<compile_context>
chip_gen: v7x
topology: tpu7x:2x2x1
jax: 0.10.0
libtpu: 0.0.40
codegen_flags: <defaults>
</compile_context>

<pallas_src>
import functools

import jax
import jax.numpy as jnp
from jax.experimental import pallas as pl
from jax.experimental.pallas import tpu as pltpu


def _pad_to(x, m):
    return (x + m - 1) // m * m


def _pick_tm(m, cap=512):
    """Row-tile for the matmul: aim for >=2 grid blocks (v7x megacore), 16-row alignment."""
    half = _pad_to((m + 1) // 2, 16)
    return int(min(cap, max(16, half)))


_VMEM_LIMIT = 32 * 1024 * 1024   # safe on v5e/v6e (128 MiB) and v7x (64 MiB)


# ----------------------------- Pallas kernels ------------------------------

def _matmul_bias_act_kernel(x_ref, w_ref, b_ref, o_ref, *, relu):
    # Whole-K single pass: MXU matmul in f32, fused bias (+ReLU), bf16 writeback.
    r = jnp.dot(x_ref[...], w_ref[...], preferred_element_type=jnp.float32)
    r = r + b_ref[...]                      # (1, Np) broadcasts over rows
    if relu:
        r = jnp.maximum(r, 0.0)
    o_ref[...] = r.astype(o_ref.dtype)


def matmul_bias_act(x, w, b, *, relu=True, out_dtype=jnp.bfloat16):
    """x:(M,K) bf16; w:(K,Np) bf16; b:(1,Np) f32. Returns act(x @ w + b):(M,Np) out_dtype.
    Single whole-K block per grid step (weights VMEM-resident), M tiled 'parallel'."""
    M, K = x.shape
    K2, Np = w.shape
    assert K == K2
    tm = _pick_tm(M)
    Mp = _pad_to(M, tm)
    if Mp != M:
        x = jnp.pad(x, ((0, Mp - M), (0, 0)))
    out = pl.pallas_call(
        functools.partial(_matmul_bias_act_kernel, relu=relu),
        out_shape=jax.ShapeDtypeStruct((Mp, Np), out_dtype),
        grid=(Mp // tm,),
        in_specs=[pl.BlockSpec((tm, K), lambda i: (i, 0)),
                  pl.BlockSpec((K, Np), lambda i: (0, 0)),   # constant -> DMA'd once
                  pl.BlockSpec((1, Np), lambda i: (0, 0))],
        out_specs=pl.BlockSpec((tm, Np), lambda i: (i, 0)),
        compiler_params=pltpu.CompilerParams(
            dimension_semantics=("parallel",),
            vmem_limit_bytes=_VMEM_LIMIT),
    )(x, w, b)
    return out[:M]


def _maxpool_kernel(pa_ref, pb_ref, pc_ref, pd_ref, o_ref):
    # 3x3/stride-2 max from 4 even/odd de-interleaved planes; 9 taps are contiguous static
    # slices; pairwise-tree jnp.maximum keeps the VPU dependency chain short.
    _, OH, OW, _ = o_ref.shape
    pa = pa_ref[0]          # even rows, even cols: (OH+1, OW+1, C)
    pb = pb_ref[0]          # even rows, odd  cols: (OH+1, OW,   C)
    pc = pc_ref[0]          # odd  rows, even cols: (OH,   OW+1, C)
    pd = pd_ref[0]          # odd  rows, odd  cols: (OH,   OW,   C)
    taps = [pa[:OH, :OW], pa[:OH, 1:], pa[1:, :OW], pa[1:, 1:],
            pb[:OH], pb[1:],
            pc[:, :OW], pc[:, 1:],
            pd]
    while len(taps) > 1:
        nxt = [jnp.maximum(taps[i], taps[i + 1]) for i in range(0, len(taps) - 1, 2)]
        if len(taps) % 2:
            nxt.append(taps[-1])
        taps = nxt
    o_ref[0] = taps[0]


def maxpool_3x3_s2(x):
    """x:(N,H,W,C) NHWC -> (N,OH,OW,C); kernel 3, stride 2, no padding (torch MaxPool2d(3,2))."""
    NB, H, W, C = x.shape
    OH = (H - 3) // 2 + 1
    OW = (W - 3) // 2 + 1
    # Even/odd de-interleave in XLA glue (single pass over x); taps become contiguous slices.
    pa = x[:, 0:2 * OH + 1:2, 0:2 * OW + 1:2, :]
    pb = x[:, 0:2 * OH + 1:2, 1:2 * OW:2, :]
    pc = x[:, 1:2 * OH:2, 0:2 * OW + 1:2, :]
    pd = x[:, 1:2 * OH:2, 1:2 * OW:2, :]
    return pl.pallas_call(
        _maxpool_kernel,
        out_shape=jax.ShapeDtypeStruct((NB, OH, OW, C), x.dtype),
        grid=(NB,),
        in_specs=[pl.BlockSpec((1, OH + 1, OW + 1, C), lambda n: (n, 0, 0, 0)),
                  pl.BlockSpec((1, OH + 1, OW, C), lambda n: (n, 0, 0, 0)),
                  pl.BlockSpec((1, OH, OW + 1, C), lambda n: (n, 0, 0, 0)),
                  pl.BlockSpec((1, OH, OW, C), lambda n: (n, 0, 0, 0))],
        out_specs=pl.BlockSpec((1, OH, OW, C), lambda n: (n, 0, 0, 0)),
        compiler_params=pltpu.CompilerParams(
            dimension_semantics=("parallel",),
            vmem_limit_bytes=_VMEM_LIMIT),
    )(pa, pb, pc, pd)


def _lpips_head_kernel(f0_ref, f1_ref, w_ref, o_ref):
    # normalize_tensor: x * rsqrt(sum_c x^2); weighted squared diff summed over channels and
    # the full spatial extent (single tile); spatial mean finished in the wrapper.
    f0 = f0_ref[0].astype(jnp.float32)                       # (P, C)
    f1 = f1_ref[0].astype(jnp.float32)
    inv0 = jax.lax.rsqrt(jnp.sum(f0 * f0, axis=-1, keepdims=True) + 1e-20)
    inv1 = jax.lax.rsqrt(jnp.sum(f1 * f1, axis=-1, keepdims=True) + 1e-20)
    d = (f0 * inv0 - f1 * inv1) ** 2
    s = jnp.sum(d * w_ref[...])                              # scalar
    o_ref[...] = jnp.zeros(o_ref.shape, o_ref.dtype) + s


def lpips_head(f, w, nb):
    """f:(2*nb,H,W,C) bf16 features of the batched trunk (first nb = target, last nb = pred);
    w:(1,C) f32 'lin' weights. Returns (nb,) spatially-averaged layer score."""
    b2, H, W, C = f.shape
    P = H * W
    f = f.reshape(b2, P, C)
    out = pl.pallas_call(
        _lpips_head_kernel,
        out_shape=jax.ShapeDtypeStruct((nb, 8, 128), jnp.float32),
        grid=(nb,),
        in_specs=[pl.BlockSpec((1, P, C), lambda n: (n, 0, 0)),
                  pl.BlockSpec((1, P, C), lambda n: (n + nb, 0, 0)),
                  pl.BlockSpec((1, C), lambda n: (0, 0))],
        out_specs=pl.BlockSpec((1, 8, 128), lambda n: (n, 0, 0)),
        compiler_params=pltpu.CompilerParams(
            dimension_semantics=("parallel",),
            vmem_limit_bytes=_VMEM_LIMIT),
    )(f, f, w)
    return out[:, 0, 0] / float(P)


# ----------------------------- network glue --------------------------------

def conv2d_relu(x, wmat, b, *, ksize, stride, pad, pad_value=None, relu=True):
    """x:(N,H,W,Cin) NHWC; wmat:(KH*KW*Cin, Cout) bf16 in (kh,kw,cin) row order; b:(1,Cout) f32.
    pad_value: optional (Cin,) border constant (folded ScalingLayer for conv1)."""
    N, H, W, C = x.shape
    KH = KW = ksize
    Hp, Wp = H + 2 * pad, W + 2 * pad
    OH = (Hp - KH) // stride + 1
    OW = (Wp - KW) // stride + 1
    if pad > 0:
        if pad_value is None:
            xpad = jnp.pad(x, ((0, 0), (pad, pad), (pad, pad), (0, 0)))
        else:
            xpad = jnp.broadcast_to(pad_value.astype(x.dtype), (N, Hp, Wp, C))
            xpad = xpad.at[:, pad:pad + H, pad:pad + W, :].set(x)
    else:
        xpad = x
    # glue: im2col patch extraction; row order (kh, kw, cin) matches wmat layout
    cols = []
    for i in range(KH):
        for j in range(KW):
            cols.append(jax.lax.slice(
                xpad, (0, i, j, 0),
                (N, i + stride * (OH - 1) + 1, j + stride * (OW - 1) + 1, C),
                (1, stride, stride, 1)))
    patches = jnp.stack(cols, axis=3).reshape(N * OH * OW, KH * KW * C)
    patches = patches.astype(jnp.bfloat16)
    out = matmul_bias_act(patches, wmat, b, relu=relu)
    return out.reshape(N, OH, OW, wmat.shape[1])


def alexnet_feats(x, params):
    """AlexNet .features trunk (relu1..relu5 taps). x:(N,H,W,3) NHWC raw input in [-1,1];
    the LPIPS ScalingLayer is folded into conv1 (see init_params)."""
    h1 = conv2d_relu(x, params['conv1_w'], params['conv1_b'],
                     ksize=11, stride=4, pad=2, pad_value=params['scale_shift'])
    p1 = maxpool_3x3_s2(h1)
    h2 = conv2d_relu(p1, params['conv2_w'], params['conv2_b'], ksize=5, stride=1, pad=2)
    p2 = maxpool_3x3_s2(h2)
    h3 = conv2d_relu(p2, params['conv3_w'], params['conv3_b'], ksize=3, stride=1, pad=1)
    h4 = conv2d_relu(h3, params['conv4_w'], params['conv4_b'], ksize=3, stride=1, pad=1)
    h5 = conv2d_relu(h4, params['conv5_w'], params['conv5_b'], ksize=3, stride=1, pad=1)
    return [h1, h2, h3, h4, h5]


def perceptual_loss(pred, target, params):
    """PerceptualLoss.forward(pred, target): inputs (N,3,H,W) NCHW in [-1,1].
    Returns (N,) LPIPS distances (DistModel.forward(target, pred); symmetric in its args)."""
    nb = pred.shape[0]
    in0 = jnp.transpose(target, (0, 2, 3, 1)).astype(jnp.float32)   # NCHW -> NHWC
    in1 = jnp.transpose(pred, (0, 2, 3, 1)).astype(jnp.float32)
    x = jnp.concatenate([in0, in1], axis=0)                         # one batched trunk pass
    feats = alexnet_feats(x, params)
    total = 0.0
    for k in range(5):
        total = total + lpips_head(feats[k], params['lin'][k], nb)
    return total


def init_params(key):
    """Deterministic synthetic weights (shapes match torchvision AlexNet + LPIPS lin layers).
    Weights are pre-reshaped to (KH*KW*Cin, Cout) matmul layout at TRUE channel widths, cast
    to bf16, and the ScalingLayer (x-shift)/scale is folded into conv1 — once, at init."""
    chns_in = [3, 64, 192, 384, 256]
    chns_out = [64, 192, 384, 256, 256]
    ksz = [11, 5, 3, 3, 3]
    shift = jnp.array([-0.030, -0.088, -0.188], jnp.float32)
    scale = jnp.array([0.458, 0.448, 0.450], jnp.float32)
    params = {'scale_shift': shift}                      # conv1 border value (exact fold)
    keys = jax.random.split(key, 11)
    for i in range(5):
        k, cin, cout = ksz[i], chns_in[i], chns_out[i]
        fan_in = cin * k * k
        # PyTorch layout (Cout,Cin,KH,KW) -> (KH,KW,Cin,Cout) for the im2col ordering
        w = jax.random.normal(keys[2 * i], (cout, cin, k, k),
                              jnp.float32) / jnp.sqrt(float(fan_in))
        b = 0.01 * jax.random.normal(keys[2 * i + 1], (cout,), jnp.float32)
        w = jnp.transpose(w, (2, 3, 1, 0))
        if i == 0:
            # Fold ScalingLayer: conv((x-shift)/scale, w)+b == conv(x, w/scale)+b-sum(w'*shift)
            # provided the conv border is padded with `shift` (handled in conv2d_relu).
            w = w / scale[None, None, :, None]
            b = b - jnp.sum(w * shift[None, None, :, None], axis=(0, 1, 2))
        params[f'conv{i + 1}_w'] = w.reshape(k * k * cin, cout).astype(jnp.bfloat16)
        params[f'conv{i + 1}_b'] = b.reshape(1, cout).astype(jnp.float32)
    lk = jax.random.split(keys[10], 5)
    # NetLinLayer weights: non-negative 1x1 conv weights (Dropout is identity at eval)
    params['lin'] = [
        (0.1 * jnp.abs(jax.random.normal(lk[i], (chns_out[i],), jnp.float32))).reshape(1, -1)
        for i in range(5)]
    return params


if __name__ == "__main__":
    key = jax.random.PRNGKey(0)
    kp, k1, k2 = jax.random.split(key, 3)
    params = init_params(kp)

    N, C, H, W = 2, 3, 64, 64          # Nx3xHxW, values in [-1, 1]
    pred = jax.random.uniform(k1, (N, C, H, W), jnp.float32, -1.0, 1.0)
    target = jax.random.uniform(k2, (N, C, H, W), jnp.float32, -1.0, 1.0)

    loss_fn = jax.jit(perceptual_loss)
    out = loss_fn(pred, target, params)
    out = jax.block_until_ready(out)
    assert out.shape == (N,) and out.dtype == jnp.float32
    assert bool(jnp.all(jnp.isfinite(out)))
    print("KERNEL_OK")
</pallas_src>

<mosaic_0001>
module attributes {stable_mosaic.version = 11 : i64} {
  func.func @_matmul_bias_act_kernel(%arg0: i32, %arg1: memref<464x363xbf16, #tpu.memory_space<vmem>>, %arg2: memref<363x64xbf16, #tpu.memory_space<vmem>>, %arg3: memref<1x64xf32, #tpu.memory_space<vmem>>, %arg4: memref<464x64xbf16, #tpu.memory_space<vmem>>) attributes {dimension_semantics = [#tpu.dimension_semantics<parallel>], iteration_bounds = array<i64: 2>, scalar_prefetch = 0 : i64, scratch_operands = 0 : i64, tpu.core_type = #tpu.core_type<tc>, window_params = [{transform_indices = @transform_0, window_bounds = array<i64: 464, 363>}, {pipeline_mode = #tpu.pipeline_mode<synchronous>, transform_indices = @transform_1, window_bounds = array<i64: 363, 64>}, {pipeline_mode = #tpu.pipeline_mode<synchronous>, transform_indices = @transform_2, window_bounds = array<i64: 1, 64>}, {transform_indices = @transform_3, window_bounds = array<i64: 464, 64>}]} {
    %c0 = arith.constant 0 : index
    %c0_0 = arith.constant 0 : index
    %0 = vector.load %arg1[%c0, %c0_0] : memref<464x363xbf16, #tpu.memory_space<vmem>>, vector<464x363xbf16>
    %c0_1 = arith.constant 0 : index
    %c0_2 = arith.constant 0 : index
    %1 = vector.load %arg2[%c0_1, %c0_2] : memref<363x64xbf16, #tpu.memory_space<vmem>>, vector<363x64xbf16>
    %cst = arith.constant dense<0.000000e+00> : vector<464x64xf32>
    %2 = tpu.matmul %0, %1, %cst {dimension_numbers = #tpu.dot_dimension_numbers<[1], [0], [0], [1], [0, 0, 1, 1], [], []>} : vector<464x363xbf16>, vector<363x64xbf16>, vector<464x64xf32> -> vector<464x64xf32>
    %c0_3 = arith.constant 0 : index
    %c0_4 = arith.constant 0 : index
    %3 = vector.load %arg3[%c0_3, %c0_4] : memref<1x64xf32, #tpu.memory_space<vmem>>, vector<1x64xf32>
    %4 = vector.broadcast %3 : vector<1x64xf32> to vector<464x64xf32>
    %5 = arith.addf %2, %4 : vector<464x64xf32>
    %cst_5 = arith.constant 0.000000e+00 : f32
    %6 = vector.broadcast %cst_5 : f32 to vector<464x64xf32>
    %7 = arith.maximumf %5, %6 : vector<464x64xf32>
    %8 = arith.truncf %7 : vector<464x64xf32> to vector<464x64xbf16>
    %c0_6 = arith.constant 0 : index
    %c0_7 = arith.constant 0 : index
    %9 = vector.load %arg4[%c0_6, %c0_7] : memref<464x64xbf16, #tpu.memory_space<vmem>>, vector<464x64xbf16>
    tpu.vector_store %arg4[%c0_6, %c0_7], %8 {strides = array<i32>} : memref<464x64xbf16, #tpu.memory_space<vmem>>, vector<464x64xbf16>,
    return
  }
  func.func @transform_0(%arg0: i32) -> (i32, i32) {
    %c0_i32 = arith.constant 0 : i32
    %c0_i32_0 = arith.constant 0 : i32
    return %arg0, %c0_i32 : i32, i32
  }
  func.func @transform_1(%arg0: i32) -> (i32, i32) {
    %c0_i32 = arith.constant 0 : i32
    %c0_i32_0 = arith.constant 0 : i32
    %c0_i32_1 = arith.constant 0 : i32
    return %c0_i32, %c0_i32_0 : i32, i32
  }
  func.func @transform_2(%arg0: i32) -> (i32, i32) {
    %c0_i32 = arith.constant 0 : i32
    %c0_i32_0 = arith.constant 0 : i32
    %c0_i32_1 = arith.constant 0 : i32
    return %c0_i32, %c0_i32_0 : i32, i32
  }
  func.func @transform_3(%arg0: i32) -> (i32, i32) {
    %c0_i32 = arith.constant 0 : i32
    %c0_i32_0 = arith.constant 0 : i32
    return %arg0, %c0_i32 : i32, i32
  }
}

module attributes {stable_mosaic.version = 11 : i64} {
  func.func @_maxpool_kernel(%arg0: i32, %arg1: memref<1x8x8x64xbf16, #tpu.memory_space<vmem>>, %arg2: memref<1x8x7x64xbf16, #tpu.memory_space<vmem>>, %arg3: memref<1x7x8x64xbf16, #tpu.memory_space<vmem>>, %arg4: memref<1x7x7x64xbf16, #tpu.memory_space<vmem>>, %arg5: memref<1x7x7x64xbf16, #tpu.memory_space<vmem>>) attributes {dimension_semantics = [#tpu.dimension_semantics<parallel>], iteration_bounds = array<i64: 4>, scalar_prefetch = 0 : i64, scratch_operands = 0 : i64, tpu.core_type = #tpu.core_type<tc>, window_params = [{transform_indices = @transform_0, window_bounds = array<i64: 1, 8, 8, 64>}, {transform_indices = @transform_1, window_bounds = array<i64: 1, 8, 7, 64>}, {transform_indices = @transform_2, window_bounds = array<i64: 1, 7, 8, 64>}, {transform_indices = @transform_3, window_bounds = array<i64: 1, 7, 7, 64>}, {transform_indices = @transform_4, window_bounds = array<i64: 1, 7, 7, 64>}]} {
    %c0 = arith.constant 0 : index
    %c0_0 = arith.constant 0 : index
    %c0_1 = arith.constant 0 : index
    %c0_2 = arith.constant 0 : index
    %0 = vector.load %arg1[%c0, %c0_0, %c0_1, %c0_2] : memref<1x8x8x64xbf16, #tpu.memory_space<vmem>>, vector<1x8x8x64xbf16>
    %1 = vector.shape_cast %0 : vector<1x8x8x64xbf16> to vector<8x8x64xbf16>
    %c0_3 = arith.constant 0 : index
    %c0_4 = arith.constant 0 : index
    %c0_5 = arith.constant 0 : index
    %c0_6 = arith.constant 0 : index
    %2 = vector.load %arg2[%c0_3, %c0_4, %c0_5, %c0_6] : memref<1x8x7x64xbf16, #tpu.memory_space<vmem>>, vector<1x8x7x64xbf16>
    %3 = vector.shape_cast %2 : vector<1x8x7x64xbf16> to vector<8x7x64xbf16>
    %c0_7 = arith.constant 0 : index
    %c0_8 = arith.constant 0 : index
    %c0_9 = arith.constant 0 : index
    %c0_10 = arith.constant 0 : index
    %4 = vector.load %arg3[%c0_7, %c0_8, %c0_9, %c0_10] : memref<1x7x8x64xbf16, #tpu.memory_space<vmem>>, vector<1x7x8x64xbf16>
    %5 = vector.shape_cast %4 : vector<1x7x8x64xbf16> to vector<7x8x64xbf16>
    %c0_11 = arith.constant 0 : index
    %c0_12 = arith.constant 0 : index
    %c0_13 = arith.constant 0 : index
    %c0_14 = arith.constant 0 : index
    %6 = vector.load %arg4[%c0_11, %c0_12, %c0_13, %c0_14] : memref<1x7x7x64xbf16, #tpu.memory_space<vmem>>, vector<1x7x7x64xbf16>
    %7 = vector.shape_cast %6 : vector<1x7x7x64xbf16> to vector<7x7x64xbf16>
    %8 = vector.extract_strided_slice %1 {offsets = [0, 0, 0], sizes = [7, 7, 64], strides = [1, 1, 1]} : vector<8x8x64xbf16> to vector<7x7x64xbf16>
    %9 = vector.extract_strided_slice %1 {offsets = [0, 1, 0], sizes = [7, 7, 64], strides = [1, 1, 1]} : vector<8x8x64xbf16> to vector<7x7x64xbf16>
    %10 = vector.extract_strided_slice %1 {offsets = [1, 0, 0], sizes = [7, 7, 64], strides = [1, 1, 1]} : vector<8x8x64xbf16> to vector<7x7x64xbf16>
    %11 = vector.extract_strided_slice %1 {offsets = [1, 1, 0], sizes = [7, 7, 64], strides = [1, 1, 1]} : vector<8x8x64xbf16> to vector<7x7x64xbf16>
    %12 = vector.extract_strided_slice %3 {offsets = [0, 0, 0], sizes = [7, 7, 64], strides = [1, 1, 1]} : vector<8x7x64xbf16> to vector<7x7x64xbf16>
    %13 = vector.extract_strided_slice %3 {offsets = [1, 0, 0], sizes = [7, 7, 64], strides = [1, 1, 1]} : vector<8x7x64xbf16> to vector<7x7x64xbf16>
    %14 = vector.extract_strided_slice %5 {offsets = [0, 0, 0], sizes = [7, 7, 64], strides = [1, 1, 1]} : vector<7x8x64xbf16> to vector<7x7x64xbf16>
    %15 = vector.extract_strided_slice %5 {offsets = [0, 1, 0], sizes = [7, 7, 64], strides = [1, 1, 1]} : vector<7x8x64xbf16> to vector<7x7x64xbf16>
    %16 = arith.maximumf %8, %9 : vector<7x7x64xbf16>
    %17 = arith.maximumf %10, %11 : vector<7x7x64xbf16>
    %18 = arith.maximumf %12, %13 : vector<7x7x64xbf16>
    %19 = arith.maximumf %14, %15 : vector<7x7x64xbf16>
    %20 = arith.maximumf %16, %17 : vector<7x7x64xbf16>
    %21 = arith.maximumf %18, %19 : vector<7x7x64xbf16>
    %22 = arith.maximumf %20, %21 : vector<7x7x64xbf16>
    %23 = arith.maximumf %22, %7 : vector<7x7x64xbf16>
    %c0_15 = arith.constant 0 : index
    %c0_16 = arith.constant 0 : index
    %c0_17 = arith.constant 0 : index
    %c0_18 = arith.constant 0 : index
    %24 = vector.load %arg5[%c0_15, %c0_16, %c0_17, %c0_18] : memref<1x7x7x64xbf16, #tpu.memory_space<vmem>>, vector<1x7x7x64xbf16>
    %25 = vector.shape_cast %24 : vector<1x7x7x64xbf16> to vector<7x7x64xbf16>
    %26 = vector.shape_cast %23 : vector<7x7x64xbf16> to vector<1x7x7x64xbf16>
    tpu.vector_store %arg5[%c0_15, %c0_16, %c0_17, %c0_18], %26 {strides = array<i32>} : memref<1x7x7x64xbf16, #tpu.memory_space<vmem>>, vector<1x7x7x64xbf16>,
    return
  }
  func.func @transform_0(%arg0: i32) -> (i32, i32, i32, i32) {
    %c0_i32 = arith.constant 0 : i32
    %c0_i32_0 = arith.constant 0 : i32
    %c0_i32_1 = arith.constant 0 : i32
    %c0_i32_2 = arith.constant 0 : i32
    return %arg0, %c0_i32, %c0_i32_0, %c0_i32_1 : i32, i32, i32, i32
  }
  func.func @transform_1(%arg0: i32) -> (i32, i32, i32, i32) {
    %c0_i32 = arith.constant 0 : i32
    %c0_i32_0 = arith.constant 0 : i32
    %c0_i32_1 = arith.constant 0 : i32
    %c0_i32_2 = arith.constant 0 : i32
    return %arg0, %c0_i32, %c0_i32_0, %c0_i32_1 : i32, i32, i32, i32
  }
  func.func @transform_2(%arg0: i32) -> (i32, i32, i32, i32) {
    %c0_i32 = arith.constant 0 : i32
    %c0_i32_0 = arith.constant 0 : i32
    %c0_i32_1 = arith.constant 0 : i32
    %c0_i32_2 = arith.constant 0 : i32
    return %arg0, %c0_i32, %c0_i32_0, %c0_i32_1 : i32, i32, i32, i32
  }
  func.func @transform_3(%arg0: i32) -> (i32, i32, i32, i32) {
    %c0_i32 = arith.constant 0 : i32
    %c0_i32_0 = arith.constant 0 : i32
    %c0_i32_1 = arith.constant 0 : i32
    %c0_i32_2 = arith.constant 0 : i32
    return %arg0, %c0_i32, %c0_i32_0, %c0_i32_1 : i32, i32, i32, i32
  }
  func.func @transform_4(%arg0: i32) -> (i32, i32, i32, i32) {
    %c0_i32 = arith.constant 0 : i32
    %c0_i32_0 = arith.constant 0 : i32
    %c0_i32_1 = arith.constant 0 : i32
    %c0_i32_2 = arith.constant 0 : i32
    return %arg0, %c0_i32, %c0_i32_0, %c0_i32_1 : i32, i32, i32, i32
  }
}

module attributes {stable_mosaic.version = 11 : i64} {
  func.func @_matmul_bias_act_kernel(%arg0: i32, %arg1: memref<112x1600xbf16, #tpu.memory_space<vmem>>, %arg2: memref<1600x192xbf16, #tpu.memory_space<vmem>>, %arg3: memref<1x192xf32, #tpu.memory_space<vmem>>, %arg4: memref<112x192xbf16, #tpu.memory_space<vmem>>) attributes {dimension_semantics = [#tpu.dimension_semantics<parallel>], iteration_bounds = array<i64: 2>, scalar_prefetch = 0 : i64, scratch_operands = 0 : i64, tpu.core_type = #tpu.core_type<tc>, window_params = [{transform_indices = @transform_0, window_bounds = array<i64: 112, 1600>}, {pipeline_mode = #tpu.pipeline_mode<synchronous>, transform_indices = @transform_1, window_bounds = array<i64: 1600, 192>}, {pipeline_mode = #tpu.pipeline_mode<synchronous>, transform_indices = @transform_2, window_bounds = array<i64: 1, 192>}, {transform_indices = @transform_3, window_bounds = array<i64: 112, 192>}]} {
    %c0 = arith.constant 0 : index
    %c0_0 = arith.constant 0 : index
    %0 = vector.load %arg1[%c0, %c0_0] : memref<112x1600xbf16, #tpu.memory_space<vmem>>, vector<112x1600xbf16>
    %c0_1 = arith.constant 0 : index
    %c0_2 = arith.constant 0 : index
    %1 = vector.load %arg2[%c0_1, %c0_2] : memref<1600x192xbf16, #tpu.memory_space<vmem>>, vector<1600x192xbf16>
    %cst = arith.constant dense<0.000000e+00> : vector<112x192xf32>
    %2 = tpu.matmul %0, %1, %cst {dimension_numbers = #tpu.dot_dimension_numbers<[1], [0], [0], [1], [0, 0, 1, 1], [], []>} : vector<112x1600xbf16>, vector<1600x192xbf16>, vector<112x192xf32> -> vector<112x192xf32>
    %c0_3 = arith.constant 0 : index
    %c0_4 = arith.constant 0 : index
    %3 = vector.load %arg3[%c0_3, %c0_4] : memref<1x192xf32, #tpu.memory_space<vmem>>, vector<1x192xf32>
    %4 = vector.broadcast %3 : vector<1x192xf32> to vector<112x192xf32>
    %5 = arith.addf %2, %4 : vector<112x192xf32>
    %cst_5 = arith.constant 0.000000e+00 : f32
    %6 = vector.broadcast %cst_5 : f32 to vector<112x192xf32>
    %7 = arith.maximumf %5, %6 : vector<112x192xf32>
    %8 = arith.truncf %7 : vector<112x192xf32> to vector<112x192xbf16>
    %c0_6 = arith.constant 0 : index
    %c0_7 = arith.constant 0 : index
    %9 = vector.load %arg4[%c0_6, %c0_7] : memref<112x192xbf16, #tpu.memory_space<vmem>>, vector<112x192xbf16>
    tpu.vector_store %arg4[%c0_6, %c0_7], %8 {strides = array<i32>} : memref<112x192xbf16, #tpu.memory_space<vmem>>, vector<112x192xbf16>,
    return
  }
  func.func @transform_0(%arg0: i32) -> (i32, i32) {
    %c0_i32 = arith.constant 0 : i32
    %c0_i32_0 = arith.constant 0 : i32
    return %arg0, %c0_i32 : i32, i32
  }
  func.func @transform_1(%arg0: i32) -> (i32, i32) {
    %c0_i32 = arith.constant 0 : i32
    %c0_i32_0 = arith.constant 0 : i32
    %c0_i32_1 = arith.constant 0 : i32
    return %c0_i32, %c0_i32_0 : i32, i32
  }
  func.func @transform_2(%arg0: i32) -> (i32, i32) {
    %c0_i32 = arith.constant 0 : i32
    %c0_i32_0 = arith.constant 0 : i32
    %c0_i32_1 = arith.constant 0 : i32
    return %c0_i32, %c0_i32_0 : i32, i32
  }
  func.func @transform_3(%arg0: i32) -> (i32, i32) {
    %c0_i32 = arith.constant 0 : i32
    %c0_i32_0 = arith.constant 0 : i32
    return %arg0, %c0_i32 : i32, i32
  }
}

module attributes {stable_mosaic.version = 11 : i64} {
  func.func @_maxpool_kernel(%arg0: i32, %arg1: memref<1x4x4x192xbf16, #tpu.memory_space<vmem>>, %arg2: memref<1x4x3x192xbf16, #tpu.memory_space<vmem>>, %arg3: memref<1x3x4x192xbf16, #tpu.memory_space<vmem>>, %arg4: memref<1x3x3x192xbf16, #tpu.memory_space<vmem>>, %arg5: memref<1x3x3x192xbf16, #tpu.memory_space<vmem>>) attributes {dimension_semantics = [#tpu.dimension_semantics<parallel>], iteration_bounds = array<i64: 4>, scalar_prefetch = 0 : i64, scratch_operands = 0 : i64, tpu.core_type = #tpu.core_type<tc>, window_params = [{transform_indices = @transform_0, window_bounds = array<i64: 1, 4, 4, 192>}, {transform_indices = @transform_1, window_bounds = array<i64: 1, 4, 3, 192>}, {transform_indices = @transform_2, window_bounds = array<i64: 1, 3, 4, 192>}, {transform_indices = @transform_3, window_bounds = array<i64: 1, 3, 3, 192>}, {transform_indices = @transform_4, window_bounds = array<i64: 1, 3, 3, 192>}]} {
    %c0 = arith.constant 0 : index
    %c0_0 = arith.constant 0 : index
    %c0_1 = arith.constant 0 : index
    %c0_2 = arith.constant 0 : index
    %0 = vector.load %arg1[%c0, %c0_0, %c0_1, %c0_2] : memref<1x4x4x192xbf16, #tpu.memory_space<vmem>>, vector<1x4x4x192xbf16>
    %1 = vector.shape_cast %0 : vector<1x4x4x192xbf16> to vector<4x4x192xbf16>
    %c0_3 = arith.constant 0 : index
    %c0_4 = arith.constant 0 : index
    %c0_5 = arith.constant 0 : index
    %c0_6 = arith.constant 0 : index
    %2 = vector.load %arg2[%c0_3, %c0_4, %c0_5, %c0_6] : memref<1x4x3x192xbf16, #tpu.memory_space<vmem>>, vector<1x4x3x192xbf16>
    %3 = vector.shape_cast %2 : vector<1x4x3x192xbf16> to vector<4x3x192xbf16>
    %c0_7 = arith.constant 0 : index
    %c0_8 = arith.constant 0 : index
    %c0_9 = arith.constant 0 : index
    %c0_10 = arith.constant 0 : index
    %4 = vector.load %arg3[%c0_7, %c0_8, %c0_9, %c0_10] : memref<1x3x4x192xbf16, #tpu.memory_space<vmem>>, vector<1x3x4x192xbf16>
    %5 = vector.shape_cast %4 : vector<1x3x4x192xbf16> to vector<3x4x192xbf16>
    %c0_11 = arith.constant 0 : index
    %c0_12 = arith.constant 0 : index
    %c0_13 = arith.constant 0 : index
    %c0_14 = arith.constant 0 : index
    %6 = vector.load %arg4[%c0_11, %c0_12, %c0_13, %c0_14] : memref<1x3x3x192xbf16, #tpu.memory_space<vmem>>, vector<1x3x3x192xbf16>
    %7 = vector.shape_cast %6 : vector<1x3x3x192xbf16> to vector<3x3x192xbf16>
    %8 = vector.extract_strided_slice %1 {offsets = [0, 0, 0], sizes = [3, 3, 192], strides = [1, 1, 1]} : vector<4x4x192xbf16> to vector<3x3x192xbf16>
    %9 = vector.extract_strided_slice %1 {offsets = [0, 1, 0], sizes = [3, 3, 192], strides = [1, 1, 1]} : vector<4x4x192xbf16> to vector<3x3x192xbf16>
    %10 = vector.extract_strided_slice %1 {offsets = [1, 0, 0], sizes = [3, 3, 192], strides = [1, 1, 1]} : vector<4x4x192xbf16> to vector<3x3x192xbf16>
    %11 = vector.extract_strided_slice %1 {offsets = [1, 1, 0], sizes = [3, 3, 192], strides = [1, 1, 1]} : vector<4x4x192xbf16> to vector<3x3x192xbf16>
    %12 = vector.extract_strided_slice %3 {offsets = [0, 0, 0], sizes = [3, 3, 192], strides = [1, 1, 1]} : vector<4x3x192xbf16> to vector<3x3x192xbf16>
    %13 = vector.extract_strided_slice %3 {offsets = [1, 0, 0], sizes = [3, 3, 192], strides = [1, 1, 1]} : vector<4x3x192xbf16> to vector<3x3x192xbf16>
    %14 = vector.extract_strided_slice %5 {offsets = [0, 0, 0], sizes = [3, 3, 192], strides = [1, 1, 1]} : vector<3x4x192xbf16> to vector<3x3x192xbf16>
    %15 = vector.extract_strided_slice %5 {offsets = [0, 1, 0], sizes = [3, 3, 192], strides = [1, 1, 1]} : vector<3x4x192xbf16> to vector<3x3x192xbf16>
    %16 = arith.maximumf %8, %9 : vector<3x3x192xbf16>
    %17 = arith.maximumf %10, %11 : vector<3x3x192xbf16>
    %18 = arith.maximumf %12, %13 : vector<3x3x192xbf16>
    %19 = arith.maximumf %14, %15 : vector<3x3x192xbf16>
    %20 = arith.maximumf %16, %17 : vector<3x3x192xbf16>
    %21 = arith.maximumf %18, %19 : vector<3x3x192xbf16>
    %22 = arith.maximumf %20, %21 : vector<3x3x192xbf16>
    %23 = arith.maximumf %22, %7 : vector<3x3x192xbf16>
    %c0_15 = arith.constant 0 : index
    %c0_16 = arith.constant 0 : index
    %c0_17 = arith.constant 0 : index
    %c0_18 = arith.constant 0 : index
    %24 = vector.load %arg5[%c0_15, %c0_16, %c0_17, %c0_18] : memref<1x3x3x192xbf16, #tpu.memory_space<vmem>>, vector<1x3x3x192xbf16>
    %25 = vector.shape_cast %24 : vector<1x3x3x192xbf16> to vector<3x3x192xbf16>
    %26 = vector.shape_cast %23 : vector<3x3x192xbf16> to vector<1x3x3x192xbf16>
    tpu.vector_store %arg5[%c0_15, %c0_16, %c0_17, %c0_18], %26 {strides = array<i32>} : memref<1x3x3x192xbf16, #tpu.memory_space<vmem>>, vector<1x3x3x192xbf16>,
    return
  }
  func.func @transform_0(%arg0: i32) -> (i32, i32, i32, i32) {
    %c0_i32 = arith.constant 0 : i32
    %c0_i32_0 = arith.constant 0 : i32
    %c0_i32_1 = arith.constant 0 : i32
    %c0_i32_2 = arith.constant 0 : i32
    return %arg0, %c0_i32, %c0_i32_0, %c0_i32_1 : i32, i32, i32, i32
  }
  func.func @transform_1(%arg0: i32) -> (i32, i32, i32, i32) {
    %c0_i32 = arith.constant 0 : i32
    %c0_i32_0 = arith.constant 0 : i32
    %c0_i32_1 = arith.constant 0 : i32
    %c0_i32_2 = arith.constant 0 : i32
    return %arg0, %c0_i32, %c0_i32_0, %c0_i32_1 : i32, i32, i32, i32
  }
  func.func @transform_2(%arg0: i32) -> (i32, i32, i32, i32) {
    %c0_i32 = arith.constant 0 : i32
    %c0_i32_0 = arith.constant 0 : i32
    %c0_i32_1 = arith.constant 0 : i32
    %c0_i32_2 = arith.constant 0 : i32
    return %arg0, %c0_i32, %c0_i32_0, %c0_i32_1 : i32, i32, i32, i32
  }
  func.func @transform_3(%arg0: i32) -> (i32, i32, i32, i32) {
    %c0_i32 = arith.constant 0 : i32
    %c0_i32_0 = arith.constant 0 : i32
    %c0_i32_1 = arith.constant 0 : i32
    %c0_i32_2 = arith.constant 0 : i32
    return %arg0, %c0_i32, %c0_i32_0, %c0_i32_1 : i32, i32, i32, i32
  }
  func.func @transform_4(%arg0: i32) -> (i32, i32, i32, i32) {
    %c0_i32 = arith.constant 0 : i32
    %c0_i32_0 = arith.constant 0 : i32
    %c0_i32_1 = arith.constant 0 : i32
    %c0_i32_2 = arith.constant 0 : i32
    return %arg0, %c0_i32, %c0_i32_0, %c0_i32_1 : i32, i32, i32, i32
  }
}

module attributes {stable_mosaic.version = 11 : i64} {
  func.func @_matmul_bias_act_kernel(%arg0: i32, %arg1: memref<32x1728xbf16, #tpu.memory_space<vmem>>, %arg2: memref<1728x384xbf16, #tpu.memory_space<vmem>>, %arg3: memref<1x384xf32, #tpu.memory_space<vmem>>, %arg4: memref<32x384xbf16, #tpu.memory_space<vmem>>) attributes {dimension_semantics = [#tpu.dimension_semantics<parallel>], iteration_bounds = array<i64: 2>, scalar_prefetch = 0 : i64, scratch_operands = 0 : i64, tpu.core_type = #tpu.core_type<tc>, window_params = [{transform_indices = @transform_0, window_bounds = array<i64: 32, 1728>}, {pipeline_mode = #tpu.pipeline_mode<synchronous>, transform_indices = @transform_1, window_bounds = array<i64: 1728, 384>}, {pipeline_mode = #tpu.pipeline_mode<synchronous>, transform_indices = @transform_2, window_bounds = array<i64: 1, 384>}, {transform_indices = @transform_3, window_bounds = array<i64: 32, 384>}]} {
    %c0 = arith.constant 0 : index
    %c0_0 = arith.constant 0 : index
    %0 = vector.load %arg1[%c0, %c0_0] : memref<32x1728xbf16, #tpu.memory_space<vmem>>, vector<32x1728xbf16>
    %c0_1 = arith.constant 0 : index
    %c0_2 = arith.constant 0 : index
    %1 = vector.load %arg2[%c0_1, %c0_2] : memref<1728x384xbf16, #tpu.memory_space<vmem>>, vector<1728x384xbf16>
    %cst = arith.constant dense<0.000000e+00> : vector<32x384xf32>
    %2 = tpu.matmul %0, %1, %cst {dimension_numbers = #tpu.dot_dimension_numbers<[1], [0], [0], [1], [0, 0, 1, 1], [], []>} : vector<32x1728xbf16>, vector<1728x384xbf16>, vector<32x384xf32> -> vector<32x384xf32>
    %c0_3 = arith.constant 0 : index
    %c0_4 = arith.constant 0 : index
    %3 = vector.load %arg3[%c0_3, %c0_4] : memref<1x384xf32, #tpu.memory_space<vmem>>, vector<1x384xf32>
    %4 = vector.broadcast %3 : vector<1x384xf32> to vector<32x384xf32>
    %5 = arith.addf %2, %4 : vector<32x384xf32>
    %cst_5 = arith.constant 0.000000e+00 : f32
    %6 = vector.broadcast %cst_5 : f32 to vector<32x384xf32>
    %7 = arith.maximumf %5, %6 : vector<32x384xf32>
    %8 = arith.truncf %7 : vector<32x384xf32> to vector<32x384xbf16>
    %c0_6 = arith.constant 0 : index
    %c0_7 = arith.constant 0 : index
    %9 = vector.load %arg4[%c0_6, %c0_7] : memref<32x384xbf16, #tpu.memory_space<vmem>>, vector<32x384xbf16>
    tpu.vector_store %arg4[%c0_6, %c0_7], %8 {strides = array<i32>} : memref<32x384xbf16, #tpu.memory_space<vmem>>, vector<32x384xbf16>,
    return
  }
  func.func @transform_0(%arg0: i32) -> (i32, i32) {
    %c0_i32 = arith.constant 0 : i32
    %c0_i32_0 = arith.constant 0 : i32
    return %arg0, %c0_i32 : i32, i32
  }
  func.func @transform_1(%arg0: i32) -> (i32, i32) {
    %c0_i32 = arith.constant 0 : i32
    %c0_i32_0 = arith.constant 0 : i32
    %c0_i32_1 = arith.constant 0 : i32
    return %c0_i32, %c0_i32_0 : i32, i32
  }
  func.func @transform_2(%arg0: i32) -> (i32, i32) {
    %c0_i32 = arith.constant 0 : i32
    %c0_i32_0 = arith.constant 0 : i32
    %c0_i32_1 = arith.constant 0 : i32
    return %c0_i32, %c0_i32_0 : i32, i32
  }
  func.func @transform_3(%arg0: i32) -> (i32, i32) {
    %c0_i32 = arith.constant 0 : i32
    %c0_i32_0 = arith.constant 0 : i32
    return %arg0, %c0_i32 : i32, i32
  }
}

module attributes {stable_mosaic.version = 11 : i64} {
  func.func @_matmul_bias_act_kernel(%arg0: i32, %arg1: memref<32x3456xbf16, #tpu.memory_space<vmem>>, %arg2: memref<3456x256xbf16, #tpu.memory_space<vmem>>, %arg3: memref<1x256xf32, #tpu.memory_space<vmem>>, %arg4: memref<32x256xbf16, #tpu.memory_space<vmem>>) attributes {dimension_semantics = [#tpu.dimension_semantics<parallel>], iteration_bounds = array<i64: 2>, scalar_prefetch = 0 : i64, scratch_operands = 0 : i64, tpu.core_type = #tpu.core_type<tc>, window_params = [{transform_indices = @transform_0, window_bounds = array<i64: 32, 3456>}, {pipeline_mode = #tpu.pipeline_mode<synchronous>, transform_indices = @transform_1, window_bounds = array<i64: 3456, 256>}, {pipeline_mode = #tpu.pipeline_mode<synchronous>, transform_indices = @transform_2, window_bounds = array<i64: 1, 256>}, {transform_indices = @transform_3, window_bounds = array<i64: 32, 256>}]} {
    %c0 = arith.constant 0 : index
    %c0_0 = arith.constant 0 : index
    %0 = vector.load %arg1[%c0, %c0_0] : memref<32x3456xbf16, #tpu.memory_space<vmem>>, vector<32x3456xbf16>
    %c0_1 = arith.constant 0 : index
    %c0_2 = arith.constant 0 : index
    %1 = vector.load %arg2[%c0_1, %c0_2] : memref<3456x256xbf16, #tpu.memory_space<vmem>>, vector<3456x256xbf16>
    %cst = arith.constant dense<0.000000e+00> : vector<32x256xf32>
    %2 = tpu.matmul %0, %1, %cst {dimension_numbers = #tpu.dot_dimension_numbers<[1], [0], [0], [1], [0, 0, 1, 1], [], []>} : vector<32x3456xbf16>, vector<3456x256xbf16>, vector<32x256xf32> -> vector<32x256xf32>
    %c0_3 = arith.constant 0 : index
    %c0_4 = arith.constant 0 : index
    %3 = vector.load %arg3[%c0_3, %c0_4] : memref<1x256xf32, #tpu.memory_space<vmem>>, vector<1x256xf32>
    %4 = vector.broadcast %3 : vector<1x256xf32> to vector<32x256xf32>
    %5 = arith.addf %2, %4 : vector<32x256xf32>
    %cst_5 = arith.constant 0.000000e+00 : f32
    %6 = vector.broadcast %cst_5 : f32 to vector<32x256xf32>
    %7 = arith.maximumf %5, %6 : vector<32x256xf32>
    %8 = arith.truncf %7 : vector<32x256xf32> to vector<32x256xbf16>
    %c0_6 = arith.constant 0 : index
    %c0_7 = arith.constant 0 : index
    %9 = vector.load %arg4[%c0_6, %c0_7] : memref<32x256xbf16, #tpu.memory_space<vmem>>, vector<32x256xbf16>
    tpu.vector_store %arg4[%c0_6, %c0_7], %8 {strides = array<i32>} : memref<32x256xbf16, #tpu.memory_space<vmem>>, vector<32x256xbf16>,
    return
  }
  func.func @transform_0(%arg0: i32) -> (i32, i32) {
    %c0_i32 = arith.constant 0 : i32
    %c0_i32_0 = arith.constant 0 : i32
    return %arg0, %c0_i32 : i32, i32
  }
  func.func @transform_1(%arg0: i32) -> (i32, i32) {
    %c0_i32 = arith.constant 0 : i32
    %c0_i32_0 = arith.constant 0 : i32
    %c0_i32_1 = arith.constant 0 : i32
    return %c0_i32, %c0_i32_0 : i32, i32
  }
  func.func @transform_2(%arg0: i32) -> (i32, i32) {
    %c0_i32 = arith.constant 0 : i32
    %c0_i32_0 = arith.constant 0 : i32
    %c0_i32_1 = arith.constant 0 : i32
    return %c0_i32, %c0_i32_0 : i32, i32
  }
  func.func @transform_3(%arg0: i32) -> (i32, i32) {
    %c0_i32 = arith.constant 0 : i32
    %c0_i32_0 = arith.constant 0 : i32
    return %arg0, %c0_i32 : i32, i32
  }
}

module attributes {stable_mosaic.version = 11 : i64} {
  func.func @_matmul_bias_act_kernel(%arg0: i32, %arg1: memref<32x2304xbf16, #tpu.memory_space<vmem>>, %arg2: memref<2304x256xbf16, #tpu.memory_space<vmem>>, %arg3: memref<1x256xf32, #tpu.memory_space<vmem>>, %arg4: memref<32x256xbf16, #tpu.memory_space<vmem>>) attributes {dimension_semantics = [#tpu.dimension_semantics<parallel>], iteration_bounds = array<i64: 2>, scalar_prefetch = 0 : i64, scratch_operands = 0 : i64, tpu.core_type = #tpu.core_type<tc>, window_params = [{transform_indices = @transform_0, window_bounds = array<i64: 32, 2304>}, {pipeline_mode = #tpu.pipeline_mode<synchronous>, transform_indices = @transform_1, window_bounds = array<i64: 2304, 256>}, {pipeline_mode = #tpu.pipeline_mode<synchronous>, transform_indices = @transform_2, window_bounds = array<i64: 1, 256>}, {transform_indices = @transform_3, window_bounds = array<i64: 32, 256>}]} {
    %c0 = arith.constant 0 : index
    %c0_0 = arith.constant 0 : index
    %0 = vector.load %arg1[%c0, %c0_0] : memref<32x2304xbf16, #tpu.memory_space<vmem>>, vector<32x2304xbf16>
    %c0_1 = arith.constant 0 : index
    %c0_2 = arith.constant 0 : index
    %1 = vector.load %arg2[%c0_1, %c0_2] : memref<2304x256xbf16, #tpu.memory_space<vmem>>, vector<2304x256xbf16>
    %cst = arith.constant dense<0.000000e+00> : vector<32x256xf32>
    %2 = tpu.matmul %0, %1, %cst {dimension_numbers = #tpu.dot_dimension_numbers<[1], [0], [0], [1], [0, 0, 1, 1], [], []>} : vector<32x2304xbf16>, vector<2304x256xbf16>, vector<32x256xf32> -> vector<32x256xf32>
    %c0_3 = arith.constant 0 : index
    %c0_4 = arith.constant 0 : index
    %3 = vector.load %arg3[%c0_3, %c0_4] : memref<1x256xf32, #tpu.memory_space<vmem>>, vector<1x256xf32>
    %4 = vector.broadcast %3 : vector<1x256xf32> to vector<32x256xf32>
    %5 = arith.addf %2, %4 : vector<32x256xf32>
    %cst_5 = arith.constant 0.000000e+00 : f32
    %6 = vector.broadcast %cst_5 : f32 to vector<32x256xf32>
    %7 = arith.maximumf %5, %6 : vector<32x256xf32>
    %8 = arith.truncf %7 : vector<32x256xf32> to vector<32x256xbf16>
    %c0_6 = arith.constant 0 : index
    %c0_7 = arith.constant 0 : index
    %9 = vector.load %arg4[%c0_6, %c0_7] : memref<32x256xbf16, #tpu.memory_space<vmem>>, vector<32x256xbf16>
    tpu.vector_store %arg4[%c0_6, %c0_7], %8 {strides = array<i32>} : memref<32x256xbf16, #tpu.memory_space<vmem>>, vector<32x256xbf16>,
    return
  }
  func.func @transform_0(%arg0: i32) -> (i32, i32) {
    %c0_i32 = arith.constant 0 : i32
    %c0_i32_0 = arith.constant 0 : i32
    return %arg0, %c0_i32 : i32, i32
  }
  func.func @transform_1(%arg0: i32) -> (i32, i32) {
    %c0_i32 = arith.constant 0 : i32
    %c0_i32_0 = arith.constant 0 : i32
    %c0_i32_1 = arith.constant 0 : i32
    return %c0_i32, %c0_i32_0 : i32, i32
  }
  func.func @transform_2(%arg0: i32) -> (i32, i32) {
    %c0_i32 = arith.constant 0 : i32
    %c0_i32_0 = arith.constant 0 : i32
    %c0_i32_1 = arith.constant 0 : i32
    return %c0_i32, %c0_i32_0 : i32, i32
  }
  func.func @transform_3(%arg0: i32) -> (i32, i32) {
    %c0_i32 = arith.constant 0 : i32
    %c0_i32_0 = arith.constant 0 : i32
    return %arg0, %c0_i32 : i32, i32
  }
}

module attributes {stable_mosaic.version = 11 : i64} {
  func.func @_lpips_head_kernel(%arg0: i32, %arg1: memref<1x9x256xbf16, #tpu.memory_space<vmem>>, %arg2: memref<1x9x256xbf16, #tpu.memory_space<vmem>>, %arg3: memref<1x256xf32, #tpu.memory_space<vmem>>, %arg4: memref<1x8x128xf32, #tpu.memory_space<vmem>>) attributes {dimension_semantics = [#tpu.dimension_semantics<parallel>], iteration_bounds = array<i64: 2>, scalar_prefetch = 0 : i64, scratch_operands = 0 : i64, tpu.core_type = #tpu.core_type<tc>, window_params = [{transform_indices = @transform_0, window_bounds = array<i64: 1, 9, 256>}, {transform_indices = @transform_1, window_bounds = array<i64: 1, 9, 256>}, {pipeline_mode = #tpu.pipeline_mode<synchronous>, transform_indices = @transform_2, window_bounds = array<i64: 1, 256>}, {transform_indices = @transform_3, window_bounds = array<i64: 1, 8, 128>}]} {
    %c0 = arith.constant 0 : index
    %c0_0 = arith.constant 0 : index
    %c0_1 = arith.constant 0 : index
    %0 = vector.load %arg1[%c0, %c0_0, %c0_1] : memref<1x9x256xbf16, #tpu.memory_space<vmem>>, vector<1x9x256xbf16>
    %1 = vector.shape_cast %0 : vector<1x9x256xbf16> to vector<9x256xbf16>
    %2 = arith.extf %1 : vector<9x256xbf16> to vector<9x256xf32>
    %c0_2 = arith.constant 0 : index
    %c0_3 = arith.constant 0 : index
    %c0_4 = arith.constant 0 : index
    %3 = vector.load %arg2[%c0_2, %c0_3, %c0_4] : memref<1x9x256xbf16, #tpu.memory_space<vmem>>, vector<1x9x256xbf16>
    %4 = vector.shape_cast %3 : vector<1x9x256xbf16> to vector<9x256xbf16>
    %5 = arith.extf %4 : vector<9x256xbf16> to vector<9x256xf32>
    %6 = arith.mulf %2, %2 : vector<9x256xf32>
    %cst = arith.constant dense<0.000000e+00> : vector<9xf32>
    %7 = vector.multi_reduction <add>, %6, %cst [1] : vector<9x256xf32> to vector<9xf32>
    %8 = vector.shape_cast %7 : vector<9xf32> to vector<9x1xf32>
    %cst_5 = arith.constant 9.99999968E-21 : f32
    %9 = vector.broadcast %cst_5 : f32 to vector<9x1xf32>
    %10 = arith.addf %8, %9 : vector<9x1xf32>
    %11 = math.rsqrt %10 : vector<9x1xf32>
    %12 = arith.mulf %5, %5 : vector<9x256xf32>
    %cst_6 = arith.constant dense<0.000000e+00> : vector<9xf32>
    %13 = vector.multi_reduction <add>, %12, %cst_6 [1] : vector<9x256xf32> to vector<9xf32>
    %14 = vector.shape_cast %13 : vector<9xf32> to vector<9x1xf32>
    %cst_7 = arith.constant 9.99999968E-21 : f32
    %15 = vector.broadcast %cst_7 : f32 to vector<9x1xf32>
    %16 = arith.addf %14, %15 : vector<9x1xf32>
    %17 = math.rsqrt %16 : vector<9x1xf32>
    %18 = vector.broadcast %11 : vector<9x1xf32> to vector<9x256xf32>
    %19 = arith.mulf %2, %18 : vector<9x256xf32>
    %20 = vector.broadcast %17 : vector<9x1xf32> to vector<9x256xf32>
    %21 = arith.mulf %5, %20 : vector<9x256xf32>
    %22 = arith.subf %19, %21 : vector<9x256xf32>
    %23 = arith.mulf %22, %22 : vector<9x256xf32>
    %c0_8 = arith.constant 0 : index
    %c0_9 = arith.constant 0 : index
    %24 = vector.load %arg3[%c0_8, %c0_9] : memref<1x256xf32, #tpu.memory_space<vmem>>, vector<1x256xf32>
    %25 = vector.broadcast %24 : vector<1x256xf32> to vector<9x256xf32>
    %26 = arith.mulf %23, %25 : vector<9x256xf32>
    %27 = vector.shape_cast %26 : vector<9x256xf32> to vector<1x9x256xf32>
    %cst_10 = arith.constant dense<0.000000e+00> : vector<1xf32>
    %28 = vector.multi_reduction <add>, %27, %cst_10 [1, 2] : vector<1x9x256xf32> to vector<1xf32>
    %29 = vector.shape_cast %28 : vector<1xf32> to vector<1x1x1xf32>
    %30 = vector.extract %29[0, 0, 0] : f32 from vector<1x1x1xf32>
    %cst_11 = arith.constant 0.000000e+00 : f32
    %31 = vector.broadcast %cst_11 : f32 to vector<1x8x128xf32>
    %32 = vector.broadcast %30 : f32 to vector<1x8x128xf32>
    %33 = arith.addf %31, %32 : vector<1x8x128xf32>
    %c0_12 = arith.constant 0 : index
    %c0_13 = arith.constant 0 : index
    %c0_14 = arith.constant 0 : index
    %34 = vector.load %arg4[%c0_12, %c0_13, %c0_14] : memref<1x8x128xf32, #tpu.memory_space<vmem>>, vector<1x8x128xf32>
    tpu.vector_store %arg4[%c0_12, %c0_13, %c0_14], %33 {strides = array<i32>} : memref<1x8x128xf32, #tpu.memory_space<vmem>>, vector<1x8x128xf32>,
    return
  }
  func.func @transform_0(%arg0: i32) -> (i32, i32, i32) {
    %c0_i32 = arith.constant 0 : i32
    %c0_i32_0 = arith.constant 0 : i32
    %c0_i32_1 = arith.constant 0 : i32
    return %arg0, %c0_i32, %c0_i32_0 : i32, i32, i32
  }
  func.func @transform_1(%arg0: i32) -> (i32, i32, i32) {
    %c2_i32 = arith.constant 2 : i32
    %0 = arith.addi %arg0, %c2_i32 : i32
    %c0_i32 = arith.constant 0 : i32
    %c0_i32_0 = arith.constant 0 : i32
    %c0_i32_1 = arith.constant 0 : i32
    return %0, %c0_i32, %c0_i32_0 : i32, i32, i32
  }
  func.func @transform_2(%arg0: i32) -> (i32, i32) {
    %c0_i32 = arith.constant 0 : i32
    %c0_i32_0 = arith.constant 0 : i32
    %c0_i32_1 = arith.constant 0 : i32
    return %c0_i32, %c0_i32_0 : i32, i32
  }
  func.func @transform_3(%arg0: i32) -> (i32, i32, i32) {
    %c0_i32 = arith.constant 0 : i32
    %c0_i32_0 = arith.constant 0 : i32
    %c0_i32_1 = arith.constant 0 : i32
    return %arg0, %c0_i32, %c0_i32_0 : i32, i32, i32
  }
}

module attributes {stable_mosaic.version = 11 : i64} {
  func.func @_lpips_head_kernel(%arg0: i32, %arg1: memref<1x9x384xbf16, #tpu.memory_space<vmem>>, %arg2: memref<1x9x384xbf16, #tpu.memory_space<vmem>>, %arg3: memref<1x384xf32, #tpu.memory_space<vmem>>, %arg4: memref<1x8x128xf32, #tpu.memory_space<vmem>>) attributes {dimension_semantics = [#tpu.dimension_semantics<parallel>], iteration_bounds = array<i64: 2>, scalar_prefetch = 0 : i64, scratch_operands = 0 : i64, tpu.core_type = #tpu.core_type<tc>, window_params = [{transform_indices = @transform_0, window_bounds = array<i64: 1, 9, 384>}, {transform_indices = @transform_1, window_bounds = array<i64: 1, 9, 384>}, {pipeline_mode = #tpu.pipeline_mode<synchronous>, transform_indices = @transform_2, window_bounds = array<i64: 1, 384>}, {transform_indices = @transform_3, window_bounds = array<i64: 1, 8, 128>}]} {
    %c0 = arith.constant 0 : index
    %c0_0 = arith.constant 0 : index
    %c0_1 = arith.constant 0 : index
    %0 = vector.load %arg1[%c0, %c0_0, %c0_1] : memref<1x9x384xbf16, #tpu.memory_space<vmem>>, vector<1x9x384xbf16>
    %1 = vector.shape_cast %0 : vector<1x9x384xbf16> to vector<9x384xbf16>
    %2 = arith.extf %1 : vector<9x384xbf16> to vector<9x384xf32>
    %c0_2 = arith.constant 0 : index
    %c0_3 = arith.constant 0 : index
    %c0_4 = arith.constant 0 : index
    %3 = vector.load %arg2[%c0_2, %c0_3, %c0_4] : memref<1x9x384xbf16, #tpu.memory_space<vmem>>, vector<1x9x384xbf16>
    %4 = vector.shape_cast %3 : vector<1x9x384xbf16> to vector<9x384xbf16>
    %5 = arith.extf %4 : vector<9x384xbf16> to vector<9x384xf32>
    %6 = arith.mulf %2, %2 : vector<9x384xf32>
    %cst = arith.constant dense<0.000000e+00> : vector<9xf32>
    %7 = vector.multi_reduction <add>, %6, %cst [1] : vector<9x384xf32> to vector<9xf32>
    %8 = vector.shape_cast %7 : vector<9xf32> to vector<9x1xf32>
    %cst_5 = arith.constant 9.99999968E-21 : f32
    %9 = vector.broadcast %cst_5 : f32 to vector<9x1xf32>
    %10 = arith.addf %8, %9 : vector<9x1xf32>
    %11 = math.rsqrt %10 : vector<9x1xf32>
    %12 = arith.mulf %5, %5 : vector<9x384xf32>
    %cst_6 = arith.constant dense<0.000000e+00> : vector<9xf32>
    %13 = vector.multi_reduction <add>, %12, %cst_6 [1] : vector<9x384xf32> to vector<9xf32>
    %14 = vector.shape_cast %13 : vector<9xf32> to vector<9x1xf32>
    %cst_7 = arith.constant 9.99999968E-21 : f32
    %15 = vector.broadcast %cst_7 : f32 to vector<9x1xf32>
    %16 = arith.addf %14, %15 : vector<9x1xf32>
    %17 = math.rsqrt %16 : vector<9x1xf32>
    %18 = vector.broadcast %11 : vector<9x1xf32> to vector<9x384xf32>
    %19 = arith.mulf %2, %18 : vector<9x384xf32>
    %20 = vector.broadcast %17 : vector<9x1xf32> to vector<9x384xf32>
    %21 = arith.mulf %5, %20 : vector<9x384xf32>
    %22 = arith.subf %19, %21 : vector<9x384xf32>
    %23 = arith.mulf %22, %22 : vector<9x384xf32>
    %c0_8 = arith.constant 0 : index
    %c0_9 = arith.constant 0 : index
    %24 = vector.load %arg3[%c0_8, %c0_9] : memref<1x384xf32, #tpu.memory_space<vmem>>, vector<1x384xf32>
    %25 = vector.broadcast %24 : vector<1x384xf32> to vector<9x384xf32>
    %26 = arith.mulf %23, %25 : vector<9x384xf32>
    %27 = vector.shape_cast %26 : vector<9x384xf32> to vector<1x9x384xf32>
    %cst_10 = arith.constant dense<0.000000e+00> : vector<1xf32>
    %28 = vector.multi_reduction <add>, %27, %cst_10 [1, 2] : vector<1x9x384xf32> to vector<1xf32>
    %29 = vector.shape_cast %28 : vector<1xf32> to vector<1x1x1xf32>
    %30 = vector.extract %29[0, 0, 0] : f32 from vector<1x1x1xf32>
    %cst_11 = arith.constant 0.000000e+00 : f32
    %31 = vector.broadcast %cst_11 : f32 to vector<1x8x128xf32>
    %32 = vector.broadcast %30 : f32 to vector<1x8x128xf32>
    %33 = arith.addf %31, %32 : vector<1x8x128xf32>
    %c0_12 = arith.constant 0 : index
    %c0_13 = arith.constant 0 : index
    %c0_14 = arith.constant 0 : index
    %34 = vector.load %arg4[%c0_12, %c0_13, %c0_14] : memref<1x8x128xf32, #tpu.memory_space<vmem>>, vector<1x8x128xf32>
    tpu.vector_store %arg4[%c0_12, %c0_13, %c0_14], %33 {strides = array<i32>} : memref<1x8x128xf32, #tpu.memory_space<vmem>>, vector<1x8x128xf32>,
    return
  }
  func.func @transform_0(%arg0: i32) -> (i32, i32, i32) {
    %c0_i32 = arith.constant 0 : i32
    %c0_i32_0 = arith.constant 0 : i32
    %c0_i32_1 = arith.constant 0 : i32
    return %arg0, %c0_i32, %c0_i32_0 : i32, i32, i32
  }
  func.func @transform_1(%arg0: i32) -> (i32, i32, i32) {
    %c2_i32 = arith.constant 2 : i32
    %0 = arith.addi %arg0, %c2_i32 : i32
    %c0_i32 = arith.constant 0 : i32
    %c0_i32_0 = arith.constant 0 : i32
    %c0_i32_1 = arith.constant 0 : i32
    return %0, %c0_i32, %c0_i32_0 : i32, i32, i32
  }
  func.func @transform_2(%arg0: i32) -> (i32, i32) {
    %c0_i32 = arith.constant 0 : i32
    %c0_i32_0 = arith.constant 0 : i32
    %c0_i32_1 = arith.constant 0 : i32
    return %c0_i32, %c0_i32_0 : i32, i32
  }
  func.func @transform_3(%arg0: i32) -> (i32, i32, i32) {
    %c0_i32 = arith.constant 0 : i32
    %c0_i32_0 = arith.constant 0 : i32
    %c0_i32_1 = arith.constant 0 : i32
    return %arg0, %c0_i32, %c0_i32_0 : i32, i32, i32
  }
}

module attributes {stable_mosaic.version = 11 : i64} {
  func.func @_lpips_head_kernel(%arg0: i32, %arg1: memref<1x49x192xbf16, #tpu.memory_space<vmem>>, %arg2: memref<1x49x192xbf16, #tpu.memory_space<vmem>>, %arg3: memref<1x192xf32, #tpu.memory_space<vmem>>, %arg4: memref<1x8x128xf32, #tpu.memory_space<vmem>>) attributes {dimension_semantics = [#tpu.dimension_semantics<parallel>], iteration_bounds = array<i64: 2>, scalar_prefetch = 0 : i64, scratch_operands = 0 : i64, tpu.core_type = #tpu.core_type<tc>, window_params = [{transform_indices = @transform_0, window_bounds = array<i64: 1, 49, 192>}, {transform_indices = @transform_1, window_bounds = array<i64: 1, 49, 192>}, {pipeline_mode = #tpu.pipeline_mode<synchronous>, transform_indices = @transform_2, window_bounds = array<i64: 1, 192>}, {transform_indices = @transform_3, window_bounds = array<i64: 1, 8, 128>}]} {
    %c0 = arith.constant 0 : index
    %c0_0 = arith.constant 0 : index
    %c0_1 = arith.constant 0 : index
    %0 = vector.load %arg1[%c0, %c0_0, %c0_1] : memref<1x49x192xbf16, #tpu.memory_space<vmem>>, vector<1x49x192xbf16>
    %1 = vector.shape_cast %0 : vector<1x49x192xbf16> to vector<49x192xbf16>
    %2 = arith.extf %1 : vector<49x192xbf16> to vector<49x192xf32>
    %c0_2 = arith.constant 0 : index
    %c0_3 = arith.constant 0 : index
    %c0_4 = arith.constant 0 : index
    %3 = vector.load %arg2[%c0_2, %c0_3, %c0_4] : memref<1x49x192xbf16, #tpu.memory_space<vmem>>, vector<1x49x192xbf16>
    %4 = vector.shape_cast %3 : vector<1x49x192xbf16> to vector<49x192xbf16>
    %5 = arith.extf %4 : vector<49x192xbf16> to vector<49x192xf32>
    %6 = arith.mulf %2, %2 : vector<49x192xf32>
    %cst = arith.constant dense<0.000000e+00> : vector<49xf32>
    %7 = vector.multi_reduction <add>, %6, %cst [1] : vector<49x192xf32> to vector<49xf32>
    %8 = vector.shape_cast %7 : vector<49xf32> to vector<49x1xf32>
    %cst_5 = arith.constant 9.99999968E-21 : f32
    %9 = vector.broadcast %cst_5 : f32 to vector<49x1xf32>
    %10 = arith.addf %8, %9 : vector<49x1xf32>
    %11 = math.rsqrt %10 : vector<49x1xf32>
    %12 = arith.mulf %5, %5 : vector<49x192xf32>
    %cst_6 = arith.constant dense<0.000000e+00> : vector<49xf32>
    %13 = vector.multi_reduction <add>, %12, %cst_6 [1] : vector<49x192xf32> to vector<49xf32>
    %14 = vector.shape_cast %13 : vector<49xf32> to vector<49x1xf32>
    %cst_7 = arith.constant 9.99999968E-21 : f32
    %15 = vector.broadcast %cst_7 : f32 to vector<49x1xf32>
    %16 = arith.addf %14, %15 : vector<49x1xf32>
    %17 = math.rsqrt %16 : vector<49x1xf32>
    %18 = vector.broadcast %11 : vector<49x1xf32> to vector<49x192xf32>
    %19 = arith.mulf %2, %18 : vector<49x192xf32>
    %20 = vector.broadcast %17 : vector<49x1xf32> to vector<49x192xf32>
    %21 = arith.mulf %5, %20 : vector<49x192xf32>
    %22 = arith.subf %19, %21 : vector<49x192xf32>
    %23 = arith.mulf %22, %22 : vector<49x192xf32>
    %c0_8 = arith.constant 0 : index
    %c0_9 = arith.constant 0 : index
    %24 = vector.load %arg3[%c0_8, %c0_9] : memref<1x192xf32, #tpu.memory_space<vmem>>, vector<1x192xf32>
    %25 = vector.broadcast %24 : vector<1x192xf32> to vector<49x192xf32>
    %26 = arith.mulf %23, %25 : vector<49x192xf32>
    %27 = vector.shape_cast %26 : vector<49x192xf32> to vector<1x49x192xf32>
    %cst_10 = arith.constant dense<0.000000e+00> : vector<1xf32>
    %28 = vector.multi_reduction <add>, %27, %cst_10 [1, 2] : vector<1x49x192xf32> to vector<1xf32>
    %29 = vector.shape_cast %28 : vector<1xf32> to vector<1x1x1xf32>
    %30 = vector.extract %29[0, 0, 0] : f32 from vector<1x1x1xf32>
    %cst_11 = arith.constant 0.000000e+00 : f32
    %31 = vector.broadcast %cst_11 : f32 to vector<1x8x128xf32>
    %32 = vector.broadcast %30 : f32 to vector<1x8x128xf32>
    %33 = arith.addf %31, %32 : vector<1x8x128xf32>
    %c0_12 = arith.constant 0 : index
    %c0_13 = arith.constant 0 : index
    %c0_14 = arith.constant 0 : index
    %34 = vector.load %arg4[%c0_12, %c0_13, %c0_14] : memref<1x8x128xf32, #tpu.memory_space<vmem>>, vector<1x8x128xf32>
    tpu.vector_store %arg4[%c0_12, %c0_13, %c0_14], %33 {strides = array<i32>} : memref<1x8x128xf32, #tpu.memory_space<vmem>>, vector<1x8x128xf32>,
    return
  }
  func.func @transform_0(%arg0: i32) -> (i32, i32, i32) {
    %c0_i32 = arith.constant 0 : i32
    %c0_i32_0 = arith.constant 0 : i32
    %c0_i32_1 = arith.constant 0 : i32
    return %arg0, %c0_i32, %c0_i32_0 : i32, i32, i32
  }
  func.func @transform_1(%arg0: i32) -> (i32, i32, i32) {
    %c2_i32 = arith.constant 2 : i32
    %0 = arith.addi %arg0, %c2_i32 : i32
    %c0_i32 = arith.constant 0 : i32
    %c0_i32_0 = arith.constant 0 : i32
    %c0_i32_1 = arith.constant 0 : i32
    return %0, %c0_i32, %c0_i32_0 : i32, i32, i32
  }
  func.func @transform_2(%arg0: i32) -> (i32, i32) {
    %c0_i32 = arith.constant 0 : i32
    %c0_i32_0 = arith.constant 0 : i32
    %c0_i32_1 = arith.constant 0 : i32
    return %c0_i32, %c0_i32_0 : i32, i32
  }
  func.func @transform_3(%arg0: i32) -> (i32, i32, i32) {
    %c0_i32 = arith.constant 0 : i32
    %c0_i32_0 = arith.constant 0 : i32
    %c0_i32_1 = arith.constant 0 : i32
    return %arg0, %c0_i32, %c0_i32_0 : i32, i32, i32
  }
}

module attributes {stable_mosaic.version = 11 : i64} {
  func.func @_lpips_head_kernel(%arg0: i32, %arg1: memref<1x225x64xbf16, #tpu.memory_space<vmem>>, %arg2: memref<1x225x64xbf16, #tpu.memory_space<vmem>>, %arg3: memref<1x64xf32, #tpu.memory_space<vmem>>, %arg4: memref<1x8x128xf32, #tpu.memory_space<vmem>>) attributes {dimension_semantics = [#tpu.dimension_semantics<parallel>], iteration_bounds = array<i64: 2>, scalar_prefetch = 0 : i64, scratch_operands = 0 : i64, tpu.core_type = #tpu.core_type<tc>, window_params = [{transform_indices = @transform_0, window_bounds = array<i64: 1, 225, 64>}, {transform_indices = @transform_1, window_bounds = array<i64: 1, 225, 64>}, {pipeline_mode = #tpu.pipeline_mode<synchronous>, transform_indices = @transform_2, window_bounds = array<i64: 1, 64>}, {transform_indices = @transform_3, window_bounds = array<i64: 1, 8, 128>}]} {
    %c0 = arith.constant 0 : index
    %c0_0 = arith.constant 0 : index
    %c0_1 = arith.constant 0 : index
    %0 = vector.load %arg1[%c0, %c0_0, %c0_1] : memref<1x225x64xbf16, #tpu.memory_space<vmem>>, vector<1x225x64xbf16>
    %1 = vector.shape_cast %0 : vector<1x225x64xbf16> to vector<225x64xbf16>
    %2 = arith.extf %1 : vector<225x64xbf16> to vector<225x64xf32>
    %c0_2 = arith.constant 0 : index
    %c0_3 = arith.constant 0 : index
    %c0_4 = arith.constant 0 : index
    %3 = vector.load %arg2[%c0_2, %c0_3, %c0_4] : memref<1x225x64xbf16, #tpu.memory_space<vmem>>, vector<1x225x64xbf16>
    %4 = vector.shape_cast %3 : vector<1x225x64xbf16> to vector<225x64xbf16>
    %5 = arith.extf %4 : vector<225x64xbf16> to vector<225x64xf32>
    %6 = arith.mulf %2, %2 : vector<225x64xf32>
    %cst = arith.constant dense<0.000000e+00> : vector<225xf32>
    %7 = vector.multi_reduction <add>, %6, %cst [1] : vector<225x64xf32> to vector<225xf32>
    %8 = vector.shape_cast %7 : vector<225xf32> to vector<225x1xf32>
    %cst_5 = arith.constant 9.99999968E-21 : f32
    %9 = vector.broadcast %cst_5 : f32 to vector<225x1xf32>
    %10 = arith.addf %8, %9 : vector<225x1xf32>
    %11 = math.rsqrt %10 : vector<225x1xf32>
    %12 = arith.mulf %5, %5 : vector<225x64xf32>
    %cst_6 = arith.constant dense<0.000000e+00> : vector<225xf32>
    %13 = vector.multi_reduction <add>, %12, %cst_6 [1] : vector<225x64xf32> to vector<225xf32>
    %14 = vector.shape_cast %13 : vector<225xf32> to vector<225x1xf32>
    %cst_7 = arith.constant 9.99999968E-21 : f32
    %15 = vector.broadcast %cst_7 : f32 to vector<225x1xf32>
    %16 = arith.addf %14, %15 : vector<225x1xf32>
    %17 = math.rsqrt %16 : vector<225x1xf32>
    %18 = vector.broadcast %11 : vector<225x1xf32> to vector<225x64xf32>
    %19 = arith.mulf %2, %18 : vector<225x64xf32>
    %20 = vector.broadcast %17 : vector<225x1xf32> to vector<225x64xf32>
    %21 = arith.mulf %5, %20 : vector<225x64xf32>
    %22 = arith.subf %19, %21 : vector<225x64xf32>
    %23 = arith.mulf %22, %22 : vector<225x64xf32>
    %c0_8 = arith.constant 0 : index
    %c0_9 = arith.constant 0 : index
    %24 = vector.load %arg3[%c0_8, %c0_9] : memref<1x64xf32, #tpu.memory_space<vmem>>, vector<1x64xf32>
    %25 = vector.broadcast %24 : vector<1x64xf32> to vector<225x64xf32>
    %26 = arith.mulf %23, %25 : vector<225x64xf32>
    %27 = vector.shape_cast %26 : vector<225x64xf32> to vector<1x225x64xf32>
    %cst_10 = arith.constant dense<0.000000e+00> : vector<1xf32>
    %28 = vector.multi_reduction <add>, %27, %cst_10 [1, 2] : vector<1x225x64xf32> to vector<1xf32>
    %29 = vector.shape_cast %28 : vector<1xf32> to vector<1x1x1xf32>
    %30 = vector.extract %29[0, 0, 0] : f32 from vector<1x1x1xf32>
    %cst_11 = arith.constant 0.000000e+00 : f32
    %31 = vector.broadcast %cst_11 : f32 to vector<1x8x128xf32>
    %32 = vector.broadcast %30 : f32 to vector<1x8x128xf32>
    %33 = arith.addf %31, %32 : vector<1x8x128xf32>
    %c0_12 = arith.constant 0 : index
    %c0_13 = arith.constant 0 : index
    %c0_14 = arith.constant 0 : index
    %34 = vector.load %arg4[%c0_12, %c0_13, %c0_14] : memref<1x8x128xf32, #tpu.memory_space<vmem>>, vector<1x8x128xf32>
    tpu.vector_store %arg4[%c0_12, %c0_13, %c0_14], %33 {strides = array<i32>} : memref<1x8x128xf32, #tpu.memory_space<vmem>>, vector<1x8x128xf32>,
    return
  }
  func.func @transform_0(%arg0: i32) -> (i32, i32, i32) {
    %c0_i32 = arith.constant 0 : i32
    %c0_i32_0 = arith.constant 0 : i32
    %c0_i32_1 = arith.constant 0 : i32
    return %arg0, %c0_i32, %c0_i32_0 : i32, i32, i32
  }
  func.func @transform_1(%arg0: i32) -> (i32, i32, i32) {
    %c2_i32 = arith.constant 2 : i32
    %0 = arith.addi %arg0, %c2_i32 : i32
    %c0_i32 = arith.constant 0 : i32
    %c0_i32_0 = arith.constant 0 : i32
    %c0_i32_1 = arith.constant 0 : i32
    return %0, %c0_i32, %c0_i32_0 : i32, i32, i32
  }
  func.func @transform_2(%arg0: i32) -> (i32, i32) {
    %c0_i32 = arith.constant 0 : i32
    %c0_i32_0 = arith.constant 0 : i32
    %c0_i32_1 = arith.constant 0 : i32
    return %c0_i32, %c0_i32_0 : i32, i32
  }
  func.func @transform_3(%arg0: i32) -> (i32, i32, i32) {
    %c0_i32 = arith.constant 0 : i32
    %c0_i32_0 = arith.constant 0 : i32
    %c0_i32_1 = arith.constant 0 : i32
    return %arg0, %c0_i32, %c0_i32_0 : i32, i32, i32
  }
}

</mosaic_0001>

<bundles_post_ra>
// kernel: perceptual_loss.12
= control target key start
LH: loop header
LB: loop body
LE: loop exit
PB: predicated region body
PF: predicated region fallthrough
CT: control target
= control target key end

     0   :  { %s2680_s12 = smov 0   ;;  %s3300_s0 = inlined_call_operand.vmem [shape: bf16[928,363], index: 0, kind: input, shape index: {}]   ;;  %s3301_s1 = inlined_call_operand.vmem [shape: bf16[363,64], index: 1, kind: input, shape index: {}]   ;;  %s3302_s2 = inlined_call_operand.vmem [shape: f32[1,64], index: 2, kind: input, shape index: {}]   ;;  %s3303_s3 = inlined_call_operand.vmem [shape: bf16[928,64], index: 3, kind: output, shape index: {}]  }
   0x1 LB: > { %s1949_s13 = sadd.s32 4294967295, %s2654_s12   ;;  %p1953_p0 = scmp.ge.s32.totalorder %s2654_s12, 1  ;;  %s2654_s12 = sphi %s2680_s12, %s13_s12  }
   0x2   : > { %p139_p1 = scmp.lt.s32.totalorder %s2654_s12, 3 }
   0x4   : > { %p140_p2 = pnand %p1953_p0, %p139_p1 }
   0x5   : > { %v2509_v0 = vld [vmem:[%s3301_s1] sm:$0xff] (!%p140_p2)   ;;  %v2656_v1 = vmov (!%p140_p2), 0   ;;  %v2510_v2 = vld [vmem:[%s3301_s1 + $0x8] sm:$0xff] (!%p140_p2)   ;;  %v2657_v3 = vmov (!%p140_p2), 0.0   ;;  %v2511_v4 = vld [vmem:[%s3301_s1 + $0x10] sm:$0xff] (!%p140_p2)   ;;  %vm2658_vm0 = vmmov (!%p140_p2), 0  }
   0x6   : > { %143 = sbr.rel (%p140_p2) target bundleno = 517 (0x205), region = 32  ;;  %1014 = vmatprep.subr.bf16.mxu1 (!%p140_p2), %v2656_v1  ;;  %2250 = vmatprep.subr.bf16.mxu0 (!%p140_p2), %v2657_v3  ;;  %v2518_v5 = vld [vmem:[%s3301_s1 + $0x80] sm:$0xff] (!%p140_p2)   ;;  %v2512_v6 = vld [vmem:[%s3301_s1 + $0x18] sm:$0xff] (!%p140_p2)   ;;  %v2520_v7 = vld [vmem:[%s3301_s1 + $0x88] sm:$0xff] (!%p140_p2)   ;;  %vm1007_vm1 = vcmask (!%p140_p2), 1044480   ;;  %vm1008_vm2 = vcmask (!%p140_p2), 1045504  }
   0x7   : > { %1015 = vmatpush1.bf16.msra.mxu1 (!%p140_p2), %v2509_v0  ;;  %2264 = vmatprep.mubr.msk.bf16.mxu0 (!%p140_p2), %vm2658_vm0, %v2657_v3  ;;  %s164_s20 = smul.u32 (!%p140_p2), 58, %s1949_s13  ;;  %v2513_v8 = vld [vmem:[%s3301_s1 + $0x20] sm:$0xff] (!%p140_p2)   ;;  %v2522_v9 = vld [vmem:[%s3301_s1 + $0x90] sm:$0xff] (!%p140_p2)   ;;  %v2514_v10 = vld [vmem:[%s3301_s1 + $0x28] sm:$0xff] (!%p140_p2)   ;;  %v2659_v15 = vmov (!%p140_p2), 65535   ;;  %vm919_vm3 = vcmask (!%p140_p2), 875520  }
   0x8   : > { %1016 = vmatprep.subr.bf16.mxu1 (!%p140_p2), %v2656_v1  ;;  %2251 = vmatpush3.bf16.msra.mxu0 (!%p140_p2), %v2518_v5  ;;  %v2524_v11 = vld [vmem:[%s3301_s1 + $0x98] sm:$0xff] (!%p140_p2)   ;;  %v2515_v12 = vld [vmem:[%s3301_s1 + $0x30] sm:$0xff] (!%p140_p2)   ;;  %v2526_v13 = vld [vmem:[%s3301_s1 + $0xa0] sm:$0xff] (!%p140_p2)   ;;  %v1009_v16 = vsel (!%p140_p2), %vm1007_vm1, 4294967295, %v2659_v15  ;;  %vm1834_vm4 = vcmask (!%p140_p2), 519168  }
   0x9   : > { %p165_p3 = scmp.lt.s32.totalorder (!%p140_p2), %s164_s20, 115  ;;  %2252 = vmatprep.subr.bf16.mxu0 (!%p140_p2), %v2657_v3  ;;  %v2516_v17 = vld [vmem:[%s3301_s1 + $0x38] sm:$0xff] (!%p140_p2)   ;;  %v2528_v18 = vld [vmem:[%s3301_s1 + $0xa8] sm:$0xff] (!%p140_p2)   ;;  %v2530_v19 = vld [vmem:[%s3301_s1 + $0xb0] sm:$0x3f] (!%p140_p2)   ;;  %v1010_v20 = vsel (!%p140_p2), %vm1008_vm2, %v1009_v16, 0 }
   0xa   : > { %v2517_v21 = vld [vmem:[%s3301_s1 + $0x40] sm:$0xff] (!%p140_p2)   ;;  %v1012_v22 = vand.u32 (!%p140_p2), %v2530_v19, %v1010_v20  ;;  %v2519_v23 = vld [vmem:[%s3301_s1 + $0x48] sm:$0xff] (!%p140_p2)   ;;  %v2521_v25 = vld [vmem:[%s3301_s1 + $0x50] sm:$0xff] (!%p140_p2)  }
   0xb   : > { %1017 = vmatpush1.bf16.msra.mxu1 (!%p140_p2), %v2510_v2  ;;  %v2523_v26 = vld [vmem:[%s3301_s1 + $0x58] sm:$0xff] (!%p140_p2)   ;;  %v2525_v28 = vld [vmem:[%s3301_s1 + $0x60] sm:$0xff] (!%p140_p2)   ;;  %v2527_v29 = vld [vmem:[%s3301_s1 + $0x68] sm:$0xff] (!%p140_p2)  }
   0xc   : > { %1018 = vmatprep.subr.bf16.mxu1 (!%p140_p2), %v2656_v1  ;;  %2253 = vmatpush3.bf16.msra.mxu0 (!%p140_p2), %v2520_v7  ;;  %v2529_v31 = vld [vmem:[%s3301_s1 + $0x70] sm:$0xff] (!%p140_p2)   ;;  %v2531_v32 = vld [vmem:[%s3301_s1 + $0x78] sm:$0xff] (!%p140_p2)  }
   0xd   : > { %s3305_s20 = smov (!%p165_p3, %s164_s20), 115  ;;  %2254 = vmatprep.subr.bf16.mxu0 %v2657_v3 }
   0xe   : > { %s2496_s4 = smul.u32 12, %s3305_s20  ;;  %s1955_s17 = sshll.u32 %s3305_s20, 2 }
   0xf   : > { %1019 = vmatpush1.bf16.msra.mxu1 %v2511_v4  ;;  %s2982_s21 = scalar_lea.vmem %s3303_s3, %s1955_s17 }
  0x10   : > { %1020 = vmatprep.subr.bf16.mxu1 %v2656_v1  ;;  %2255 = vmatpush3.bf16.msra.mxu0 %v2522_v9  ;;  %s2736_s11 = scalar_lea.vmem %s3300_s0, %s2496_s4 }
  0x11   : > { %2256 = vmatprep.subr.bf16.mxu0 %v2657_v3  ;;  %v2534_v14 = vld [vmem:[%s2736_s11 + $0x4] ss:$12 sps:$4 sm:$0xff]   ;;  %v2535_v24 = vld [vmem:[%s2736_s11 + $0x8] ss:$12 sps:$4 sm:$0xff]   ;;  %v2538_v27 = vld [vmem:[%s2736_s11 + $0x20] ss:$12 sps:$4 sm:$0xff]  }
  0x12   : > { %1046 = vmatprep.mubr.bf16.mxu1 %v2534_v14  ;;  %v2542_v30 = vld [vmem:[%s2736_s11 + $0x38] ss:$12 sps:$4 sm:$0xff]   ;;  %v2546_v33 = vld [vmem:[%s2736_s11 + $0x50] ss:$12 sps:$4 sm:$0xff]   ;;  %v2532_v34 = vld [vmem:[%s2736_s11] ss:$12 sps:$4 sm:$0xff]  }
  0x13   : > { %1021 = vmatpush1.bf16.msra.mxu1 %v2512_v6  ;;  %v2536_v35 = vld [vmem:[%s2736_s11 + $0x1c] ss:$12 sps:$4 sm:$0xff]   ;;  %v2539_v37 = vld [vmem:[%s2736_s11 + $0x18] ss:$12 sps:$4 sm:$0xff]   ;;  %v2540_v38 = vld [vmem:[%s2736_s11 + $0x34] ss:$12 sps:$4 sm:$0xff]  }
  0x14   : > { %1022 = vmatprep.subr.bf16.mxu1 %v2656_v1  ;;  %2257 = vmatpush3.bf16.msra.mxu0 %v2524_v11  ;;  %v2550_v36 = vld [vmem:[%s2736_s11 + $0x68] ss:$12 sps:$4 sm:$0xff]   ;;  %v2554_v39 = vld [vmem:[%s2736_s11 + $0x80] ss:$12 sps:$4 sm:$0xff]   ;;  %v2543_v40 = vld [vmem:[%s2736_s11 + $0x30] ss:$12 sps:$4 sm:$0xff]  }
  0x15   : > { %2258 = vmatprep.subr.bf16.mxu0 %v2657_v3  ;;  %v2544_v41 = vld [vmem:[%s2736_s11 + $0x4c] ss:$12 sps:$4 sm:$0xff]   ;;  %v2547_v43 = vld [vmem:[%s2736_s11 + $0x48] ss:$12 sps:$4 sm:$0xff]   ;;  %v2548_v44 = vld [vmem:[%s2736_s11 + $0x64] ss:$12 sps:$4 sm:$0xff]  }
  0x16   : > { %v2558_v42 = vld [vmem:[%s2736_s11 + $0x98] ss:$12 sps:$4 sm:$0xff]   ;;  %v2562_v45 = vld [vmem:[%s2736_s11 + $0xb0] ss:$12 sps:$4 sm:$0xff]   ;;  %v2551_v46 = vld [vmem:[%s2736_s11 + $0x60] ss:$12 sps:$4 sm:$0xff]  }
  0x17   : > { %1023 = vmatpush1.bf16.msra.mxu1 %v2513_v8  ;;  %v2552_v47 = vld [vmem:[%s2736_s11 + $0x7c] ss:$12 sps:$4 sm:$0xff]   ;;  %v2555_v49 = vld [vmem:[%s2736_s11 + $0x78] ss:$12 sps:$4 sm:$0xff]   ;;  %v2556_v50 = vld [vmem:[%s2736_s11 + $0x94] ss:$12 sps:$4 sm:$0xff]  }
  0x18   : > { %1024 = vmatprep.subr.bf16.mxu1 %v2656_v1  ;;  %2259 = vmatpush3.bf16.msra.mxu0 %v2526_v13  ;;  %v2566_v48 = vld [vmem:[%s2736_s11 + $0xc8] ss:$12 sps:$4 sm:$0xff]   ;;  %v2570_v51 = vld [vmem:[%s2736_s11 + $0xe0] ss:$12 sps:$4 sm:$0xff]   ;;  %v2559_v52 = vld [vmem:[%s2736_s11 + $0x90] ss:$12 sps:$4 sm:$0xff]  }
  0x19   : > { %2260 = vmatprep.subr.bf16.mxu0 %v2657_v3  ;;  %v2560_v53 = vld [vmem:[%s2736_s11 + $0xac] ss:$12 sps:$4 sm:$0xff]   ;;  %v2563_v55 = vld [vmem:[%s2736_s11 + $0xa8] ss:$12 sps:$4 sm:$0xff]   ;;  %v2564_v56 = vld [vmem:[%s2736_s11 + $0xc4] ss:$12 sps:$4 sm:$0xff]  }
  0x1a   : > { %v2574_v54 = vld [vmem:[%s2736_s11 + $0xf8] ss:$12 sps:$4 sm:$0xff]   ;;  %v2578_v57 = vld [vmem:[%s2736_s11 + $0x110] ss:$12 sps:$4 sm:$0xff]   ;;  %v2567_v58 = vld [vmem:[%s2736_s11 + $0xc0] ss:$12 sps:$4 sm:$0xff]  }
  0x1b   : > { %1025 = vmatpush1.bf16.msra.mxu1 %v2514_v10  ;;  %v2568_v59 = vld [vmem:[%s2736_s11 + $0xdc] ss:$12 sps:$4 sm:$0xff]   ;;  %v2571_v61 = vld [vmem:[%s2736_s11 + $0xd8] ss:$12 sps:$4 sm:$0xff]   ;;  %v2572_v62 = vld [vmem:[%s2736_s11 + $0xf4] ss:$12 sps:$4 sm:$0xff]  }
  0x1c   : > { %1026 = vmatprep.subr.bf16.mxu1 %v2656_v1  ;;  %2261 = vmatpush3.bf16.msra.mxu0 %v2528_v18  ;;  %v2582_v60 = vld [vmem:[%s2736_s11 + $0x128] ss:$12 sps:$4 sm:$0xff]   ;;  %v2586_v63 = vld [vmem:[%s2736_s11 + $0x140] ss:$12 sps:$4 sm:$0xff]   ;;  %v2575_v0 = vld [vmem:[%s2736_s11 + $0xf0] ss:$12 sps:$4 sm:$0xff]  }
  0x1d   : > { %2262 = vmatprep.subr.bf16.mxu0 %v2657_v3  ;;  %v2590_v2 = vld [vmem:[%s2736_s11 + $0x158] ss:$12 sps:$4 sm:$0xff]   ;;  %v2579_v4 = vld [vmem:[%s2736_s11 + $0x108] ss:$12 sps:$4 sm:$0xff]   ;;  %v2594_v6 = vld [vmem:[%s2736_s11 + $0x170] ss:$12 sps:$4 sm:$0xff]  }
  0x1e   : > { %v2580_v5 = vld [vmem:[%s2736_s11 + $0x124] ss:$12 sps:$4 sm:$0xff]   ;;  %v2583_v7 = vld [vmem:[%s2736_s11 + $0x120] ss:$12 sps:$4 sm:$0xff]   ;;  %v2584_v8 = vld [vmem:[%s2736_s11 + $0x13c] ss:$12 sps:$4 sm:$0xff]  }
  0x1f   : > { %1027 = vmatpush1.bf16.msra.mxu1 %v2515_v12  ;;  %v2598_v9 = vld [vmem:[%s2736_s11 + $0x188] ss:$12 sps:$4 sm:$0xff]   ;;  %v2587_v10 = vld [vmem:[%s2736_s11 + $0x138] ss:$12 sps:$4 sm:$0xff]   ;;  %v2602_v12 = vld [vmem:[%s2736_s11 + $0x1a0] ss:$12 sps:$4 sm:$0xff]  }
  0x20   : > { %1028 = vmatprep.subr.bf16.mxu1 %v2656_v1  ;;  %2263 = vmatpush3.bf16.msra.mxu0 %v1012_v22  ;;  %v2588_v11 = vld [vmem:[%s2736_s11 + $0x154] ss:$12 sps:$4 sm:$0xff]   ;;  %v2591_v13 = vld [vmem:[%s2736_s11 + $0x150] ss:$12 sps:$4 sm:$0xff]   ;;  %v2592_v14 = vld [vmem:[%s2736_s11 + $0x16c] ss:$12 sps:$4 sm:$0xff]  }
  0x21   : > { %v2606_v15 = vld [vmem:[%s2736_s11 + $0x1b8] ss:$12 sps:$4 sm:$0xff]   ;;  %v2595_v16 = vld [vmem:[%s2736_s11 + $0x168] ss:$12 sps:$4 sm:$0xff]   ;;  %v2610_v18 = vld [vmem:[%s2736_s11 + $0x1d0] ss:$12 sps:$4 sm:$0xff]  }
  0x22   : > { %v2599_v19 = vld [vmem:[%s2736_s11 + $0x180] ss:$12 sps:$4 sm:$0xff]   ;;  %v2600_v20 = vld [vmem:[%s2736_s11 + $0x19c] ss:$12 sps:$4 sm:$0xff]   ;;  %v2603_v22 = vld [vmem:[%s2736_s11 + $0x198] ss:$12 sps:$4 sm:$0xff]  }
  0x23   : > { %1029 = vmatpush1.bf16.msra.mxu1 %v2516_v17  ;;  %2265 = vmatmul.mubr.msk.bf16.vlgmr.msra.gmra.mrb[0].mxu0 %vm919_vm3, %v2535_v24  ;;  %v2596_v17 = vld [vmem:[%s2736_s11 + $0x184] ss:$12 sps:$4 sm:$0xff]   ;;  %v2618_v24 = vld [vmem:[%s2736_s11 + $0x200] ss:$12 sps:$4 sm:$0xff]  }
  0x24   : > { %1030 = vmatprep.subr.bf16.mxu1 %v2656_v1  ;;  %2268 = vmatprep.mubr.msk.bf16.mxu0 %vm2658_vm0, %v2657_v3 }
  0x27   : > { %1031 = vmatpush1.bf16.msra.mxu1 %v2517_v21  ;;  %v2614_v21 = vld [vmem:[%s2736_s11 + $0x1e8] ss:$12 sps:$4 sm:$0xff]  }
  0x28   : > { %1032 = vmatprep.subr.bf16.mxu1 %v2656_v1 }
  0x2b   : > { %1033 = vmatpush1.bf16.msra.mxu1 %v2519_v23  ;;  %2269 = vmatmul.mubr.msk.bf16.gmra.mrb[4].mxu0 %vm919_vm3, %v2538_v27  ;;  %v2604_v23 = vld [vmem:[%s2736_s11 + $0x1b4] ss:$12 sps:$4 sm:$0xff]   ;;  %v2622_v27 = vld [vmem:[%s2736_s11 + $0x218] ss:$12 sps:$4 sm:$0xff]  }
  0x2c   : > { %1034 = vmatprep.subr.bf16.mxu1 %v2656_v1  ;;  %2272 = vmatprep.mubr.msk.bf16.mxu0 %vm2658_vm0, %v2657_v3 }
  0x2f   : > { %1035 = vmatpush1.bf16.msra.mxu1 %v2521_v25  ;;  %v2607_v25 = vld [vmem:[%s2736_s11 + $0x1b0] ss:$12 sps:$4 sm:$0xff]  }
  0x30   : > { %1036 = vmatprep.subr.bf16.mxu1 %v2656_v1 }
  0x33   : > { %1037 = vmatpush1.bf16.msra.mxu1 %v2523_v26  ;;  %2273 = vmatmul.mubr.msk.bf16.gmra.mrb[8].mxu0 %vm919_vm3, %v2542_v30  ;;  %v2608_v26 = vld [vmem:[%s2736_s11 + $0x1cc] ss:$12 sps:$4 sm:$0xff]   ;;  %v2626_v30 = vld [vmem:[%s2736_s11 + $0x230] ss:$12 sps:$4 sm:$0xff]  }
  0x34   : > { %1038 = vmatprep.subr.bf16.mxu1 %v2656_v1  ;;  %2276 = vmatprep.mubr.msk.bf16.mxu0 %vm2658_vm0, %v2657_v3 }
  0x37   : > { %1039 = vmatpush1.bf16.msra.mxu1 %v2525_v28  ;;  %v2611_v28 = vld [vmem:[%s2736_s11 + $0x1c8] ss:$12 sps:$4 sm:$0xff]  }
  0x38   : > { %1040 = vmatprep.subr.bf16.mxu1 %v2656_v1 }
  0x3b   : > { %1041 = vmatpush1.bf16.msra.mxu1 %v2527_v29  ;;  %2277 = vmatmul.mubr.msk.bf16.gmra.mrb[12].mxu0 %vm919_vm3, %v2546_v33  ;;  %v2612_v29 = vld [vmem:[%s2736_s11 + $0x1e4] ss:$12 sps:$4 sm:$0xff]   ;;  %v2630_v33 = vld [vmem:[%s2736_s11 + $0x248] ss:$12 sps:$4 sm:$0xff]  }
  0x3c   : > { %1042 = vmatprep.subr.bf16.mxu1 %v2656_v1  ;;  %2280 = vmatprep.mubr.msk.bf16.mxu0 %vm2658_vm0, %v2657_v3 }
  0x3f   : > { %1043 = vmatpush1.bf16.msra.mxu1 %v2529_v31  ;;  %v2615_v31 = vld [vmem:[%s2736_s11 + $0x1e0] ss:$12 sps:$4 sm:$0xff]  }
  0x40   : > { %1044 = vmatprep.subr.bf16.mxu1 %v2656_v1  ;;  %v2576_v1 = vld [vmem:[%s2736_s11 + $0x10c] ss:$12 sps:$4 sm:$0xff]  }
  0x43   : > { %1045 = vmatpush1.bf16.msra.mxu1 %v2531_v32  ;;  %2281 = vmatmul.mubr.msk.bf16.gmra.mrb[16].mxu0 %vm919_vm3, %v2550_v36  ;;  %v2616_v32 = vld [vmem:[%s2736_s11 + $0x1fc] ss:$12 sps:$4 sm:$0xff]   ;;  %v2634_v36 = vld [vmem:[%s2736_s11 + $0x260] ss:$12 sps:$4 sm:$0xff]  }
  0x44   : > { %2284 = vmatprep.mubr.msk.bf16.mxu0 %vm2658_vm0, %v2657_v3 }
  0x46   : > { %1047 = vmatmul.mubr.bf16.vlgmr.msra.gmra.mrb[0].mxu1 %v2532_v34  ;;  %v2619_v34 = vld [vmem:[%s2736_s11 + $0x1f8] ss:$12 sps:$4 sm:$0xff]  }
  0x47   : > { %1054 = vmatprep.mubr.bf16.mxu1 %v2536_v35  ;;  %v2620_v35 = vld [vmem:[%s2736_s11 + $0x214] ss:$12 sps:$4 sm:$0xff]  }
  0x4b   : > { %2285 = vmatmul.mubr.msk.bf16.gmra.mrb[20].mxu0 %vm919_vm3, %v2554_v39  ;;  %v2638_v39 = vld [vmem:[%s2736_s11 + $0x278] ss:$12 sps:$4 sm:$0xff]  }
  0x4c   : > { %2288 = vmatprep.mubr.msk.bf16.mxu0 %vm2658_vm0, %v2657_v3 }
  0x4e   : > { %1055 = vmatmul.mubr.bf16.gmra.mrb[4].mxu1 %v2539_v37  ;;  %v2623_v37 = vld [vmem:[%s2736_s11 + $0x210] ss:$12 sps:$4 sm:$0xff]  }
  0x4f   : > { %1062 = vmatprep.mubr.bf16.mxu1 %v2540_v38  ;;  %v2624_v38 = vld [vmem:[%s2736_s11 + $0x22c] ss:$12 sps:$4 sm:$0xff]  }
  0x53   : > { %2289 = vmatmul.mubr.msk.bf16.gmra.mrb[24].mxu0 %vm919_vm3, %v2558_v42 }
  0x54   : > { %2292 = vmatprep.mubr.msk.bf16.mxu0 %vm2658_vm0, %v2657_v3 }
  0x56   : > { %1063 = vmatmul.mubr.bf16.gmra.mrb[8].mxu1 %v2543_v40  ;;  %v2627_v40 = vld [vmem:[%s2736_s11 + $0x228] ss:$12 sps:$4 sm:$0xff]  }
  0x57   : > { %1070 = vmatprep.mubr.bf16.mxu1 %v2544_v41  ;;  %v2628_v41 = vld [vmem:[%s2736_s11 + $0x244] ss:$12 sps:$4 sm:$0xff]  }
  0x5b   : > { %2293 = vmatmul.mubr.msk.bf16.gmra.mrb[28].mxu0 %vm919_vm3, %v2562_v45 }
  0x5c   : > { %2296 = vmatprep.mubr.msk.bf16.mxu0 %vm2658_vm0, %v2657_v3 }
  0x5e   : > { %1071 = vmatmul.mubr.bf16.gmra.mrb[12].mxu1 %v2547_v43 }
  0x5f   : > { %1078 = vmatprep.mubr.bf16.mxu1 %v2548_v44  ;;  %v2642_v44 = vld [vmem:[%s2736_s11 + $0x290] ss:$12 sps:$4 sm:$0xff]  }
  0x63   : > { %2297 = vmatmul.mubr.msk.bf16.gmra.mrb[32].mxu0 %vm919_vm3, %v2566_v48  ;;  %v2632_v48 = vld [vmem:[%s2736_s11 + $0x25c] ss:$12 sps:$4 sm:$0xff]  }
  0x64   : > { %2300 = vmatprep.mubr.msk.bf16.mxu0 %vm2658_vm0, %v2657_v3 }
  0x66   : > { %1079 = vmatmul.mubr.bf16.gmra.mrb[16].mxu1 %v2551_v46 }
  0x67   : > { %1086 = vmatprep.mubr.bf16.mxu1 %v2552_v47  ;;  %v2631_v47 = vld [vmem:[%s2736_s11 + $0x240] ss:$12 sps:$4 sm:$0xff]  }
  0x6b   : > { %2301 = vmatmul.mubr.msk.bf16.gmra.mrb[36].mxu0 %vm919_vm3, %v2570_v51  ;;  %v2646_v51 = vld [vmem:[%s2736_s11 + $0x2a8] ss:$12 sps:$4 sm:$0xff]  }
  0x6c   : > { %2304 = vmatprep.mubr.msk.bf16.mxu0 %vm2658_vm0, %v2657_v3 }
  0x6e   : > { %1087 = vmatmul.mubr.bf16.gmra.mrb[20].mxu1 %v2555_v49 }
  0x6f   : > { %1094 = vmatprep.mubr.bf16.mxu1 %v2556_v50 }
  0x73   : > { %2305 = vmatmul.mubr.msk.bf16.gmra.mrb[40].mxu0 %vm919_vm3, %v2574_v54  ;;  %v2635_v54 = vld [vmem:[%s2736_s11 + $0x258] ss:$12 sps:$4 sm:$0xff]  }
  0x74   : > { %2308 = vmatprep.mubr.msk.bf16.mxu0 %vm2658_vm0, %v2657_v3 }
  0x76   : > { %1095 = vmatmul.mubr.bf16.gmra.mrb[24].mxu1 %v2559_v52 }
  0x77   : > { %1102 = vmatprep.mubr.bf16.mxu1 %v2560_v53 }
  0x7b   : > { %2309 = vmatmul.mubr.msk.bf16.gmra.mrb[44].mxu0 %vm919_vm3, %v2578_v57 }
  0x7c   : > { %2312 = vmatprep.mubr.msk.bf16.mxu0 %vm2658_vm0, %v2657_v3 }
  0x7e   : > { %1103 = vmatmul.mubr.bf16.gmra.mrb[28].mxu1 %v2563_v55  ;;  %v2636_v55 = vld [vmem:[%s2736_s11 + $0x274] ss:$12 sps:$4 sm:$0xff]  }
  0x7f   : > { %1110 = vmatprep.mubr.bf16.mxu1 %v2564_v56 }
  0x83   : > { %2313 = vmatmul.mubr.msk.bf16.gmra.mrb[48].mxu0 %vm919_vm3, %v2582_v60  ;;  %v2640_v60 = vld [vmem:[%s2736_s11 + $0x28c] ss:$12 sps:$4 sm:$0xff]  }
  0x84   : > { %2316 = vmatprep.mubr.msk.bf16.mxu0 %vm2658_vm0, %v2657_v3 }
  0x86   : > { %1111 = vmatmul.mubr.bf16.gmra.mrb[32].mxu1 %v2567_v58 }
  0x87   : > { %1118 = vmatprep.mubr.bf16.mxu1 %v2568_v59  ;;  %v2639_v59 = vld [vmem:[%s2736_s11 + $0x270] ss:$12 sps:$4 sm:$0xff]  }
  0x8b   : > { %2317 = vmatmul.mubr.msk.bf16.gmra.mrb[52].mxu0 %vm919_vm3, %v2586_v63 }
  0x8c   : > { %2320 = vmatprep.mubr.msk.bf16.mxu0 %vm2658_vm0, %v2657_v3 }
  0x8e   : > { %1119 = vmatmul.mubr.bf16.gmra.mrb[36].mxu1 %v2571_v61 }
  0x8f   : > { %1126 = vmatprep.mubr.bf16.mxu1 %v2572_v62  ;;  %v2968_v62 = vld [vmem:[%s3302_s2] ss:$0 sm:$0xff] }
  0x93   : > { %2321 = vmatmul.mubr.msk.bf16.gmra.mrb[56].mxu0 %vm919_vm3, %v2590_v2 }
  0x94   : > { %2324 = vmatprep.mubr.msk.bf16.mxu0 %vm2658_vm0, %v2657_v3 }
  0x96   : > { %1127 = vmatmul.mubr.bf16.gmra.mrb[40].mxu1 %v2575_v0 }
  0x97   : > { %1134 = vmatprep.mubr.bf16.mxu1 %v2576_v1 }
  0x9b   : > { %2325 = vmatmul.mubr.msk.bf16.gmra.mrb[60].mxu0 %vm919_vm3, %v2594_v6  ;;  %v2643_v6 = vld [vmem:[%s2736_s11 + $0x288] ss:$12 sps:$4 sm:$0xff]  }
  0x9c   : > { %2328 = vmatprep.mubr.msk.bf16.mxu0 %vm2658_vm0, %v2657_v3 }
  0x9e   : > { %1135 = vmatmul.mubr.bf16.gmra.mrb[44].mxu1 %v2579_v4 }
  0x9f   : > { %1142 = vmatprep.mubr.bf16.mxu1 %v2580_v5 }
  0xa3   : > { %2329 = vmatmul.mubr.msk.bf16.gmra.mrb[64].mxu0 %vm919_vm3, %v2598_v9 }
  0xa4   : > { %2332 = vmatprep.mubr.msk.bf16.mxu0 %vm2658_vm0, %v2657_v3 }
  0xa6   : > { %1143 = vmatmul.mubr.bf16.gmra.mrb[48].mxu1 %v2583_v7 }
  0xa7   : > { %1150 = vmatprep.mubr.bf16.mxu1 %v2584_v8  ;;  %v2644_v8 = vld [vmem:[%s2736_s11 + $0x2a4] ss:$12 sps:$4 sm:$0xff]  }
  0xab   : > { %2333 = vmatmul.mubr.msk.bf16.gmra.mrb[68].mxu0 %vm919_vm3, %v2602_v12 }
  0xac   : > { %2336 = vmatprep.mubr.msk.bf16.mxu0 %vm2658_vm0, %v2657_v3 }
  0xae   : > { %1151 = vmatmul.mubr.bf16.gmra.mrb[52].mxu1 %v2587_v10 }
  0xaf   : > { %1158 = vmatprep.mubr.bf16.mxu1 %v2588_v11 }
  0xb3   : > { %2337 = vmatmul.mubr.msk.bf16.gmra.mrb[72].mxu0 %vm919_vm3, %v2606_v15 }
  0xb4   : > { %2340 = vmatprep.mubr.msk.bf16.mxu0 %vm2658_vm0, %v2657_v3 }
  0xb6   : > { %1159 = vmatmul.mubr.bf16.gmra.mrb[56].mxu1 %v2591_v13 }
  0xb7   : > { %1166 = vmatprep.mubr.bf16.mxu1 %v2592_v14 }
  0xbb   : > { %2341 = vmatmul.mubr.msk.bf16.gmra.mrb[76].mxu0 %vm919_vm3, %v2610_v18 }
  0xbc   : > { %2344 = vmatprep.mubr.msk.bf16.mxu0 %vm2658_vm0, %v2657_v3 }
  0xbe   : > { %1167 = vmatmul.mubr.bf16.gmra.mrb[60].mxu1 %v2595_v16 }
  0xbf   : > { %1174 = vmatprep.mubr.bf16.mxu1 %v2596_v17 }
  0xc3   : > { %2345 = vmatmul.mubr.msk.bf16.gmra.mrb[80].mxu0 %vm919_vm3, %v2614_v21 }
  0xc4   : > { %2348 = vmatprep.mubr.msk.bf16.mxu0 %vm2658_vm0, %v2657_v3 }
  0xc6   : > { %1175 = vmatmul.mubr.bf16.gmra.mrb[64].mxu1 %v2599_v19 }
  0xc7   : > { %1182 = vmatprep.mubr.bf16.mxu1 %v2600_v20 }
  0xcb   : > { %2349 = vmatmul.mubr.msk.bf16.gmra.mrb[84].mxu0 %vm919_vm3, %v2618_v24  ;;  %v2647_v24 = vld [vmem:[%s2736_s11 + $0x2a0] ss:$12 sps:$4 sm:$0xff]  }
  0xcc   : > { %2352 = vmatprep.mubr.msk.bf16.mxu0 %vm2658_vm0, %v2657_v3 }
  0xce   : > { %1183 = vmatmul.mubr.bf16.gmra.mrb[68].mxu1 %v2603_v22 }
  0xcf   : > { %1190 = vmatprep.mubr.bf16.mxu1 %v2604_v23 }
  0xd3   : > { %2353 = vmatmul.mubr.msk.bf16.gmra.mrb[88].mxu0 %vm919_vm3, %v2622_v27 }
  0xd4   : > { %2356 = vmatprep.mubr.msk.bf16.mxu0 %vm2658_vm0, %v2657_v3 }
  0xd6   : > { %1191 = vmatmul.mubr.bf16.gmra.mrb[72].mxu1 %v2607_v25 }
  0xd7   : > { %1198 = vmatprep.mubr.bf16.mxu1 %v2608_v26 }
  0xdb   : > { %2357 = vmatmul.mubr.msk.bf16.gmra.mrb[92].mxu0 %vm919_vm3, %v2626_v30 }
  0xdc   : > { %2360 = vmatprep.mubr.msk.bf16.mxu0 %vm2658_vm0, %v2657_v3 }
  0xde   : > { %1199 = vmatmul.mubr.bf16.gmra.mrb[76].mxu1 %v2611_v28 }
  0xdf   : > { %1206 = vmatprep.mubr.bf16.mxu1 %v2612_v29 }
  0xe3   : > { %2361 = vmatmul.mubr.msk.bf16.gmra.mrb[96].mxu0 %vm919_vm3, %v2630_v33 }
  0xe4   : > { %2364 = vmatprep.mubr.msk.bf16.mxu0 %vm2658_vm0, %v2657_v3 }
  0xe6   : > { %1207 = vmatmul.mubr.bf16.gmra.mrb[80].mxu1 %v2615_v31 }
  0xe7   : > { %1214 = vmatprep.mubr.bf16.mxu1 %v2616_v32 }
  0xeb   : > { %2365 = vmatmul.mubr.msk.bf16.gmra.mrb[100].mxu0 %vm919_vm3, %v2634_v36 }
  0xec   : > { %2368 = vmatprep.mubr.msk.bf16.mxu0 %vm2658_vm0, %v2657_v3 }
  0xee   : > { %1215 = vmatmul.mubr.bf16.gmra.mrb[84].mxu1 %v2619_v34 }
  0xef   : > { %1222 = vmatprep.mubr.bf16.mxu1 %v2620_v35 }
  0xf3   : > { %2369 = vmatmul.mubr.msk.bf16.gmra.mrb[104].mxu0 %vm919_vm3, %v2638_v39 }
  0xf4   : > { %2372 = vmatprep.mubr.msk.bf16.mxu0 %vm2658_vm0, %v2657_v3 }
  0xf6   : > { %1223 = vmatmul.mubr.bf16.gmra.mrb[88].mxu1 %v2623_v37  ;;  %v1313_v42 = vpop.f32.mrb[0].mxu0 }
  0xf7   : > { %1230 = vmatprep.mubr.bf16.mxu1 %v2624_v38  ;;  %v2266_v43 = vpop.f32.mrb[1].mxu0 }
  0xf8   : > { %v1316_v45 = vpop.f32.mrb[2].mxu0 }
  0xf9   : > { %v2267_v46 = vpop.f32.mrb[3].mxu0 }
  0xfb   : > { %2373 = vmatmul.mubr.msk.bf16.gmra.mrb[108].mxu0 %vm919_vm3, %v2642_v44 }
  0xfc   : > { %2376 = vmatprep.mubr.msk.bf16.mxu0 %vm2658_vm0, %v2657_v3 }
  0xfe   : > { %1231 = vmatmul.mubr.bf16.gmra.mrb[92].mxu1 %v2627_v40  ;;  %v1321_v49 = vpop.f32.mrb[4].mxu0 }
  0xff   : > { %1238 = vmatprep.mubr.bf16.mxu1 %v2628_v41  ;;  %v2270_v50 = vpop.f32.mrb[5].mxu0 }
 0x100   : > { %v1324_v52 = vpop.f32.mrb[6].mxu0 }
 0x101   : > { %v2271_v53 = vpop.f32.mrb[7].mxu0 }
 0x103   : > { %2377 = vmatmul.mubr.msk.bf16.gmra.mrb[112].mxu0 %vm919_vm3, %v2646_v51 }
 0x106   : > { %1239 = vmatmul.mubr.bf16.gmra.mrb[96].mxu1 %v2631_v47  ;;  %v2957_v56 = vpop.f32.mrb[8].mxu0 }
 0x107   : > { %1246 = vmatprep.mubr.bf16.mxu1 %v2632_v48  ;;  %v2274_v57 = vpop.f32.mrb[9].mxu0 }
 0x108   : > { %v2959_v3 = vpop.f32.mrb[10].mxu0 }
 0x109   : > { %v2275_v58 = vpop.f32.mrb[11].mxu0 }
 0x10e   : > { %1247 = vmatmul.mubr.bf16.gmra.mrb[100].mxu1 %v2635_v54  ;;  %v2963_v61 = vpop.f32.mrb[12].mxu0 }
 0x10f   : > { %1254 = vmatprep.mubr.bf16.mxu1 %v2636_v55  ;;  %v2278_v63 = vpop.f32.mrb[13].mxu0 }
 0x110   : > { %v2970_v0 = vpop.f32.mrb[14].mxu0 }
 0x111   : > { %v2279_v2 = vpop.f32.mrb[15].mxu0 }
 0x116   : > { %1255 = vmatmul.mubr.bf16.gmra.mrb[104].mxu1 %v2639_v59  ;;  %v2977_v14 = vpop.f32.mrb[16].mxu0 }
 0x117   : > { %1262 = vmatprep.mubr.bf16.mxu1 %v2640_v60  ;;  %v2282_v15 = vpop.f32.mrb[17].mxu0 }
 0x118   : > { %v2984_v18 = vpop.f32.mrb[18].mxu0 }
 0x119   : > { %v1048_v1 = vpop.f32.mrb[0].mxu1  ;;  %v2283_v20 = vpop.f32.mrb[19].mxu0 }
 0x11a   : > { %v1049_v4 = vadd.f32 %v2968_v62, %v1048_v1  ;;  %v1050_v5 = vpop.f32.mrb[1].mxu1 }
 0x11b   : > { %v1051_v7 = vpop.f32.mrb[2].mxu1 }
 0x11c   : > { %v1314_v9 = vadd.f32 %v1313_v42, %v1049_v4  ;;  %v1052_v10 = vadd.f32 %v2968_v62, %v1051_v7  ;;  %v1053_v11 = vpop.f32.mrb[3].mxu1 }
 0x11e   : > { %v1544_v12 = vmax.f32 %v1314_v9, 0.0  ;;  %v1317_v13 = vadd.f32 %v1316_v45, %v1052_v10  ;;  %1263 = vmatmul.mubr.bf16.gmra.mrb[108].mxu1 %v2643_v6  ;;  %v2993_v31 = vpop.f32.mrb[20].mxu0 }
 0x11f   : > { %1270 = vmatprep.mubr.bf16.mxu1 %v2644_v8  ;;  %v2286_v32 = vpop.f32.mrb[21].mxu0 }
 0x120   : > { %v2156_v16 = vpack.c.bf16 %v1544_v12, %v1544_v12  ;;  %v1545_v17 = vmax.f32 %v1317_v13, 0.0  ;;  %v2995_v35 = vpop.f32.mrb[22].mxu0 }
 0x121   : > { %v1056_v19 = vpop.f32.mrb[4].mxu1  ;;  %v2287_v37 = vpop.f32.mrb[23].mxu0 }
 0x122   : > { %1835 = vst.msk [vmem:[%s2982_s21] sm:$0xf] %vm1834_vm4, %v2156_v16  ;;  %v2157_v21 = vpack.c.bf16 %v1545_v17, %v1545_v17  ;;  %v1057_v22 = vadd.f32 %v2968_v62, %v1056_v19  ;;  %v1058_v23 = vpop.f32.mrb[5].mxu1 }
 0x123   : > { %v1059_v25 = vpop.f32.mrb[6].mxu1 }
 0x124   : > { %1836 = vst.msk [vmem:[%s2982_s21 + $0x4] sm:$0xf] %vm1834_vm4, %v2157_v21  ;;  %v1322_v26 = vadd.f32 %v1321_v49, %v1057_v22  ;;  %v1060_v27 = vadd.f32 %v2968_v62, %v1059_v25  ;;  %v1061_v28 = vpop.f32.mrb[7].mxu1 }
 0x126   : > { %v1546_v29 = vmax.f32 %v1322_v26, 0.0  ;;  %v1325_v30 = vadd.f32 %v1324_v52, %v1060_v27  ;;  %1271 = vmatmul.mubr.bf16.gmra.mrb[112].mxu1 %v2647_v24  ;;  %v3005_v47 = vpop.f32.mrb[24].mxu0 }
 0x127   : > { %v2290_v48 = vpop.f32.mrb[25].mxu0 }
 0x128   : > { %v2158_v33 = vpack.c.bf16 %v1546_v29, %v1546_v29  ;;  %v1547_v34 = vmax.f32 %v1325_v30, 0.0  ;;  %v3007_v51 = vpop.f32.mrb[26].mxu0 }
 0x129   : > { %v1064_v36 = vpop.f32.mrb[8].mxu1  ;;  %v2291_v53 = vpop.f32.mrb[27].mxu0 }
 0x12a   : > { %1837 = vst.msk [vmem:[%s2982_s21 + $0x8] sm:$0xf] %vm1834_vm4, %v2158_v33  ;;  %v2159_v38 = vpack.c.bf16 %v1547_v34, %v1547_v34  ;;  %v1065_v39 = vadd.f32 %v2968_v62, %v1064_v36  ;;  %v1066_v40 = vpop.f32.mrb[9].mxu1 }
 0x12b   : > { %v1067_v41 = vpop.f32.mrb[10].mxu1 }
 0x12c   : > { %1838 = vst.msk [vmem:[%s2982_s21 + $0xc] sm:$0xf] %vm1834_vm4, %v2159_v38  ;;  %v1330_v42 = vadd.f32 %v2957_v56, %v1065_v39  ;;  %v1068_v43 = vadd.f32 %v2968_v62, %v1067_v41  ;;  %v1069_v44 = vpop.f32.mrb[11].mxu1 }
 0x12e   : > { %v1548_v45 = vmax.f32 %v1330_v42, 0.0  ;;  %v1333_v46 = vadd.f32 %v2959_v3, %v1068_v43  ;;  %v3017_v1 = vpop.f32.mrb[28].mxu0 }
 0x12f   : > { %v2294_v2 = vpop.f32.mrb[29].mxu0 }
 0x130   : > { %v2160_v49 = vpack.c.bf16 %v1548_v45, %v1548_v45  ;;  %v1549_v50 = vmax.f32 %v1333_v46, 0.0  ;;  %v3019_v6 = vpop.f32.mrb[30].mxu0 }
 0x131   : > { %v1072_v52 = vpop.f32.mrb[12].mxu1  ;;  %v2295_v8 = vpop.f32.mrb[31].mxu0 }
 0x132   : > { %1839 = vst.msk [vmem:[%s2982_s21 + $0x10] sm:$0xf] %vm1834_vm4, %v2160_v49  ;;  %v2161_v54 = vpack.c.bf16 %v1549_v50, %v1549_v50  ;;  %v1073_v55 = vadd.f32 %v2968_v62, %v1072_v52  ;;  %v1074_v56 = vpop.f32.mrb[13].mxu1 }
 0x133   : > { %v1075_v57 = vpop.f32.mrb[14].mxu1 }
 0x134   : > { %1840 = vst.msk [vmem:[%s2982_s21 + $0x14] sm:$0xf] %vm1834_vm4, %v2161_v54  ;;  %v1338_v3 = vadd.f32 %v2963_v61, %v1073_v55  ;;  %v1076_v58 = vadd.f32 %v2968_v62, %v1075_v57  ;;  %v1077_v59 = vpop.f32.mrb[15].mxu1 }
 0x136   : > { %v1550_v60 = vmax.f32 %v1338_v3, 0.0  ;;  %v1341_v63 = vadd.f32 %v2970_v0, %v1076_v58  ;;  %v3029_v17 = vpop.f32.mrb[32].mxu0 }
 0x137   : > { %v2298_v19 = vpop.f32.mrb[33].mxu0 }
 0x138   : > { %v2162_v4 = vpack.c.bf16 %v1550_v60, %v1550_v60  ;;  %v1551_v5 = vmax.f32 %v1341_v63, 0.0  ;;  %v3031_v22 = vpop.f32.mrb[34].mxu0 }
 0x139   : > { %v1080_v7 = vpop.f32.mrb[16].mxu1  ;;  %v2299_v24 = vpop.f32.mrb[35].mxu0 }
 0x13a   : > { %1841 = vst.msk [vmem:[%s2982_s21 + $0x18] sm:$0xf] %vm1834_vm4, %v2162_v4  ;;  %v2163_v9 = vpack.c.bf16 %v1551_v5, %v1551_v5  ;;  %v1081_v61 = vadd.f32 %v2968_v62, %v1080_v7  ;;  %v1082_v10 = vpop.f32.mrb[17].mxu1 }
 0x13b   : > { %v1083_v11 = vpop.f32.mrb[18].mxu1 }
 0x13c   : > { %1842 = vst.msk [vmem:[%s2982_s21 + $0x1c] sm:$0xf] %vm1834_vm4, %v2163_v9  ;;  %v1346_v0 = vadd.f32 %v2977_v14, %v1081_v61  ;;  %v1084_v12 = vadd.f32 %v2968_v62, %v1083_v11  ;;  %v1085_v13 = vpop.f32.mrb[19].mxu1 }
 0x13e   : > { %v1552_v15 = vmax.f32 %v1346_v0, 0.0  ;;  %v1349_v16 = vadd.f32 %v2984_v18, %v1084_v12  ;;  %v3041_v33 = vpop.f32.mrb[36].mxu0 }
 0x13f   : > { %v2302_v34 = vpop.f32.mrb[37].mxu0 }
 0x140   : > { %v2164_v20 = vpack.c.bf16 %v1552_v15, %v1552_v15  ;;  %v1553_v21 = vmax.f32 %v1349_v16, 0.0  ;;  %v3043_v38 = vpop.f32.mrb[38].mxu0 }
 0x141   : > { %v1088_v23 = vpop.f32.mrb[20].mxu1  ;;  %v2303_v40 = vpop.f32.mrb[39].mxu0 }
 0x142   : > { %1843 = vst.msk [vmem:[%s2982_s21 + $0x20] sm:$0xf] %vm1834_vm4, %v2164_v20  ;;  %v2165_v25 = vpack.c.bf16 %v1553_v21, %v1553_v21  ;;  %v1089_v14 = vadd.f32 %v2968_v62, %v1088_v23  ;;  %v1090_v26 = vpop.f32.mrb[21].mxu1 }
 0x143   : > { %v1091_v27 = vpop.f32.mrb[22].mxu1 }
 0x144   : > { %1844 = vst.msk [vmem:[%s2982_s21 + $0x24] sm:$0xf] %vm1834_vm4, %v2165_v25  ;;  %v1354_v18 = vadd.f32 %v2993_v31, %v1089_v14  ;;  %v1092_v28 = vadd.f32 %v2968_v62, %v1091_v27  ;;  %v1093_v29 = vpop.f32.mrb[23].mxu1 }
 0x146   : > { %v1554_v30 = vmax.f32 %v1354_v18, 0.0  ;;  %v1357_v32 = vadd.f32 %v2995_v35, %v1092_v28  ;;  %v3053_v49 = vpop.f32.mrb[40].mxu0 }
 0x147   : > { %v2306_v50 = vpop.f32.mrb[41].mxu0 }
 0x148   : > { %v2166_v36 = vpack.c.bf16 %v1554_v30, %v1554_v30  ;;  %v1555_v37 = vmax.f32 %v1357_v32, 0.0  ;;  %v3055_v54 = vpop.f32.mrb[42].mxu0 }
 0x149   : > { %v1096_v39 = vpop.f32.mrb[24].mxu1  ;;  %v2307_v56 = vpop.f32.mrb[43].mxu0 }
 0x14a   : > { %1845 = vst.msk [vmem:[%s2982_s21 + $0x28] sm:$0xf] %vm1834_vm4, %v2166_v36  ;;  %v2167_v41 = vpack.c.bf16 %v1555_v37, %v1555_v37  ;;  %v1097_v31 = vadd.f32 %v2968_v62, %v1096_v39  ;;  %v1098_v42 = vpop.f32.mrb[25].mxu1 }
 0x14b   : > { %v1099_v43 = vpop.f32.mrb[26].mxu1 }
 0x14c   : > { %1846 = vst.msk [vmem:[%s2982_s21 + $0x2c] sm:$0xf] %vm1834_vm4, %v2167_v41  ;;  %v1362_v35 = vadd.f32 %v3005_v47, %v1097_v31  ;;  %v1100_v44 = vadd.f32 %v2968_v62, %v1099_v43  ;;  %v1101_v45 = vpop.f32.mrb[27].mxu1 }
 0x14e   : > { %v1556_v46 = vmax.f32 %v1362_v35, 0.0  ;;  %v1365_v48 = vadd.f32 %v3007_v51, %v1100_v44  ;;  %v3065_v4 = vpop.f32.mrb[44].mxu0 }
 0x14f   : > { %v2310_v5 = vpop.f32.mrb[45].mxu0 }
 0x150   : > { %v2168_v52 = vpack.c.bf16 %v1556_v46, %v1556_v46  ;;  %v1557_v53 = vmax.f32 %v1365_v48, 0.0  ;;  %v3067_v9 = vpop.f32.mrb[46].mxu0 }
 0x151   : > { %v1104_v55 = vpop.f32.mrb[28].mxu1  ;;  %v2311_v10 = vpop.f32.mrb[47].mxu0 }
 0x152   : > { %1847 = vst.msk [vmem:[%s2982_s21 + $0x30] sm:$0xf] %vm1834_vm4, %v2168_v52  ;;  %v2169_v57 = vpack.c.bf16 %v1557_v53, %v1557_v53  ;;  %v1105_v47 = vadd.f32 %v2968_v62, %v1104_v55  ;;  %v1106_v3 = vpop.f32.mrb[29].mxu1 }
 0x153   : > { %v1107_v58 = vpop.f32.mrb[30].mxu1 }
 0x154   : > { %1848 = vst.msk [vmem:[%s2982_s21 + $0x34] sm:$0xf] %vm1834_vm4, %v2169_v57  ;;  %v1370_v51 = vadd.f32 %v3017_v1, %v1105_v47  ;;  %v1108_v59 = vadd.f32 %v2968_v62, %v1107_v58  ;;  %v1109_v60 = vpop.f32.mrb[31].mxu1 }
 0x156   : > { %v1558_v63 = vmax.f32 %v1370_v51, 0.0  ;;  %v1373_v2 = vadd.f32 %v3019_v6, %v1108_v59  ;;  %v3077_v20 = vpop.f32.mrb[48].mxu0 }
 0x157   : > { %v2314_v21 = vpop.f32.mrb[49].mxu0 }
 0x158   : > { %v2170_v7 = vpack.c.bf16 %v1558_v63, %v1558_v63  ;;  %v1559_v8 = vmax.f32 %v1373_v2, 0.0  ;;  %v3079_v25 = vpop.f32.mrb[50].mxu0 }
 0x159   : > { %v1112_v61 = vpop.f32.mrb[32].mxu1  ;;  %v2315_v26 = vpop.f32.mrb[51].mxu0 }
 0x15a   : > { %1849 = vst.msk [vmem:[%s2982_s21 + $0x38] sm:$0xf] %vm1834_vm4, %v2170_v7  ;;  %v2171_v11 = vpack.c.bf16 %v1559_v8, %v1559_v8  ;;  %v1113_v1 = vadd.f32 %v2968_v62, %v1112_v61  ;;  %v1114_v0 = vpop.f32.mrb[33].mxu1 }
 0x15b   : > { %v1115_v12 = vpop.f32.mrb[34].mxu1 }
 0x15c   : > { %1850 = vst.msk [vmem:[%s2982_s21 + $0x3c] sm:$0xf] %vm1834_vm4, %v2171_v11  ;;  %v1378_v6 = vadd.f32 %v3029_v17, %v1113_v1  ;;  %v1116_v13 = vadd.f32 %v2968_v62, %v1115_v12  ;;  %v1117_v15 = vpop.f32.mrb[35].mxu1 }
 0x15e   : > { %v1560_v16 = vmax.f32 %v1378_v6, 0.0  ;;  %v1381_v19 = vadd.f32 %v3031_v22, %v1116_v13  ;;  %v3089_v36 = vpop.f32.mrb[52].mxu0 }
 0x15f   : > { %v2318_v37 = vpop.f32.mrb[53].mxu0 }
 0x160   : > { %v2172_v23 = vpack.c.bf16 %v1560_v16, %v1560_v16  ;;  %v1561_v24 = vmax.f32 %v1381_v19, 0.0  ;;  %v3091_v41 = vpop.f32.mrb[54].mxu0 }
 0x161   : > { %v1120_v14 = vpop.f32.mrb[36].mxu1  ;;  %v2319_v42 = vpop.f32.mrb[55].mxu0 }
 0x162   : > { %1851 = vst.msk [vmem:[%s2982_s21 + $0x40] sm:$0xf] %vm1834_vm4, %v2172_v23  ;;  %v2173_v27 = vpack.c.bf16 %v1561_v24, %v1561_v24  ;;  %v1121_v17 = vadd.f32 %v2968_v62, %v1120_v14  ;;  %v1122_v18 = vpop.f32.mrb[37].mxu1 }
 0x163   : > { %v1123_v28 = vpop.f32.mrb[38].mxu1 }
 0x164   : > { %1852 = vst.msk [vmem:[%s2982_s21 + $0x44] sm:$0xf] %vm1834_vm4, %v2173_v27  ;;  %v1386_v22 = vadd.f32 %v3041_v33, %v1121_v17  ;;  %v1124_v29 = vadd.f32 %v2968_v62, %v1123_v28  ;;  %v1125_v30 = vpop.f32.mrb[39].mxu1 }
 0x166   : > { %v1562_v32 = vmax.f32 %v1386_v22, 0.0  ;;  %v1389_v34 = vadd.f32 %v3043_v38, %v1124_v29  ;;  %v3101_v52 = vpop.f32.mrb[56].mxu0 }
 0x167   : > { %v2322_v53 = vpop.f32.mrb[57].mxu0 }
 0x168   : > { %v2174_v39 = vpack.c.bf16 %v1562_v32, %v1562_v32  ;;  %v1563_v40 = vmax.f32 %v1389_v34, 0.0  ;;  %v3103_v57 = vpop.f32.mrb[58].mxu0 }
 0x169   : > { %v1128_v31 = vpop.f32.mrb[40].mxu1  ;;  %v2323_v3 = vpop.f32.mrb[59].mxu0 }
 0x16a   : > { %1853 = vst.msk [vmem:[%s2982_s21 + $0x48] sm:$0xf] %vm1834_vm4, %v2174_v39  ;;  %v2175_v43 = vpack.c.bf16 %v1563_v40, %v1563_v40  ;;  %v1129_v33 = vadd.f32 %v2968_v62, %v1128_v31  ;;  %v1130_v35 = vpop.f32.mrb[41].mxu1 }
 0x16b   : > { %v1131_v44 = vpop.f32.mrb[42].mxu1 }
 0x16c   : > { %1854 = vst.msk [vmem:[%s2982_s21 + $0x4c] sm:$0xf] %vm1834_vm4, %v2175_v43  ;;  %v1394_v38 = vadd.f32 %v3053_v49, %v1129_v33  ;;  %v1132_v45 = vadd.f32 %v2968_v62, %v1131_v44  ;;  %v1133_v46 = vpop.f32.mrb[43].mxu1 }
 0x16e   : > { %v1564_v48 = vmax.f32 %v1394_v38, 0.0  ;;  %v1397_v50 = vadd.f32 %v3055_v54, %v1132_v45  ;;  %v3113_v7 = vpop.f32.mrb[60].mxu0 }
 0x16f   : > { %v2326_v8 = vpop.f32.mrb[61].mxu0 }
 0x170   : > { %v2176_v55 = vpack.c.bf16 %v1564_v48, %v1564_v48  ;;  %v1565_v56 = vmax.f32 %v1397_v50, 0.0  ;;  %v3115_v11 = vpop.f32.mrb[62].mxu0 }
 0x171   : > { %v1136_v47 = vpop.f32.mrb[44].mxu1  ;;  %v2327_v0 = vpop.f32.mrb[63].mxu0 }
 0x172   : > { %1855 = vst.msk [vmem:[%s2982_s21 + $0x50] sm:$0xf] %vm1834_vm4, %v2176_v55  ;;  %v2177_v58 = vpack.c.bf16 %v1565_v56, %v1565_v56  ;;  %v1137_v49 = vadd.f32 %v2968_v62, %v1136_v47  ;;  %v1138_v51 = vpop.f32.mrb[45].mxu1 }
 0x173   : > { %v1139_v59 = vpop.f32.mrb[46].mxu1 }
 0x174   : > { %1856 = vst.msk [vmem:[%s2982_s21 + $0x54] sm:$0xf] %vm1834_vm4, %v2177_v58  ;;  %v1402_v54 = vadd.f32 %v3065_v4, %v1137_v49  ;;  %v1140_v60 = vadd.f32 %v2968_v62, %v1139_v59  ;;  %v1141_v63 = vpop.f32.mrb[47].mxu1 }
 0x176   : > { %v1566_v2 = vmax.f32 %v1402_v54, 0.0  ;;  %v1405_v5 = vadd.f32 %v3067_v9, %v1140_v60  ;;  %v3125_v23 = vpop.f32.mrb[64].mxu0 }
 0x177   : > { %v2330_v24 = vpop.f32.mrb[65].mxu0 }
 0x178   : > { %v2178_v61 = vpack.c.bf16 %v1566_v2, %v1566_v2  ;;  %v1567_v10 = vmax.f32 %v1405_v5, 0.0  ;;  %v3127_v27 = vpop.f32.mrb[66].mxu0 }
 0x179   : > { %v1144_v1 = vpop.f32.mrb[48].mxu1  ;;  %v2331_v18 = vpop.f32.mrb[67].mxu0 }
 0x17a   : > { %1857 = vst.msk [vmem:[%s2982_s21 + $0x58] sm:$0xf] %vm1834_vm4, %v2178_v61  ;;  %v2179_v12 = vpack.c.bf16 %v1567_v10, %v1567_v10  ;;  %v1145_v4 = vadd.f32 %v2968_v62, %v1144_v1  ;;  %v1146_v6 = vpop.f32.mrb[49].mxu1 }
 0x17b   : > { %v1147_v13 = vpop.f32.mrb[50].mxu1 }
 0x17c   : > { %1858 = vst.msk [vmem:[%s2982_s21 + $0x5c] sm:$0xf] %vm1834_vm4, %v2179_v12  ;;  %v1410_v9 = vadd.f32 %v3077_v20, %v1145_v4  ;;  %v1148_v15 = vadd.f32 %v2968_v62, %v1147_v13  ;;  %v1149_v16 = vpop.f32.mrb[51].mxu1 }
 0x17e   : > { %v1568_v19 = vmax.f32 %v1410_v9, 0.0  ;;  %v1413_v21 = vadd.f32 %v3079_v25, %v1148_v15  ;;  %v3137_v39 = vpop.f32.mrb[68].mxu0 }
 0x17f   : > { %v2334_v40 = vpop.f32.mrb[69].mxu0 }
 0x180   : > { %v2180_v14 = vpack.c.bf16 %v1568_v19, %v1568_v19  ;;  %v1569_v26 = vmax.f32 %v1413_v21, 0.0  ;;  %v3139_v43 = vpop.f32.mrb[70].mxu0 }
 0x181   : > { %v1152_v17 = vpop.f32.mrb[52].mxu1  ;;  %v2335_v35 = vpop.f32.mrb[71].mxu0 }
 0x182   : > { %1859 = vst.msk [vmem:[%s2982_s21 + $0x60] sm:$0xf] %vm1834_vm4, %v2180_v14  ;;  %v2181_v28 = vpack.c.bf16 %v1569_v26, %v1569_v26  ;;  %v1153_v20 = vadd.f32 %v2968_v62, %v1152_v17  ;;  %v1154_v22 = vpop.f32.mrb[53].mxu1 }
 0x183   : > { %v1155_v29 = vpop.f32.mrb[54].mxu1 }
 0x184   : > { %1860 = vst.msk [vmem:[%s2982_s21 + $0x64] sm:$0xf] %vm1834_vm4, %v2181_v28  ;;  %v1418_v25 = vadd.f32 %v3089_v36, %v1153_v20  ;;  %v1156_v30 = vadd.f32 %v2968_v62, %v1155_v29  ;;  %v1157_v32 = vpop.f32.mrb[55].mxu1 }
 0x186   : > { %v1570_v34 = vmax.f32 %v1418_v25, 0.0  ;;  %v1421_v37 = vadd.f32 %v3091_v41, %v1156_v30  ;;  %v3149_v55 = vpop.f32.mrb[72].mxu0 }
 0x187   : > { %v2338_v56 = vpop.f32.mrb[73].mxu0 }
 0x188   : > { %v2182_v31 = vpack.c.bf16 %v1570_v34, %v1570_v34  ;;  %v1571_v42 = vmax.f32 %v1421_v37, 0.0  ;;  %v3151_v58 = vpop.f32.mrb[74].mxu0 }
 0x189   : > { %v1160_v33 = vpop.f32.mrb[56].mxu1  ;;  %v2339_v51 = vpop.f32.mrb[75].mxu0 }
 0x18a   : > { %1861 = vst.msk [vmem:[%s2982_s21 + $0x68] sm:$0xf] %vm1834_vm4, %v2182_v31  ;;  %v2183_v44 = vpack.c.bf16 %v1571_v42, %v1571_v42  ;;  %v1161_v36 = vadd.f32 %v2968_v62, %v1160_v33  ;;  %v1162_v38 = vpop.f32.mrb[57].mxu1 }
 0x18b   : > { %v1163_v45 = vpop.f32.mrb[58].mxu1 }
 0x18c   : > { %1862 = vst.msk [vmem:[%s2982_s21 + $0x6c] sm:$0xf] %vm1834_vm4, %v2183_v44  ;;  %v1426_v41 = vadd.f32 %v3101_v52, %v1161_v36  ;;  %v1164_v46 = vadd.f32 %v2968_v62, %v1163_v45  ;;  %v1165_v48 = vpop.f32.mrb[59].mxu1 }
 0x18e   : > { %v1572_v50 = vmax.f32 %v1426_v41, 0.0  ;;  %v1429_v53 = vadd.f32 %v3103_v57, %v1164_v46  ;;  %v3161_v61 = vpop.f32.mrb[76].mxu0 }
 0x18f   : > { %v2342_v10 = vpop.f32.mrb[77].mxu0 }
 0x190   : > { %v2184_v47 = vpack.c.bf16 %v1572_v50, %v1572_v50  ;;  %v1573_v3 = vmax.f32 %v1429_v53, 0.0  ;;  %v3163_v12 = vpop.f32.mrb[78].mxu0 }
 0x191   : > { %v1168_v49 = vpop.f32.mrb[60].mxu1  ;;  %v2343_v6 = vpop.f32.mrb[79].mxu0 }
 0x192   : > { %1863 = vst.msk [vmem:[%s2982_s21 + $0x70] sm:$0xf] %vm1834_vm4, %v2184_v47  ;;  %v2185_v59 = vpack.c.bf16 %v1573_v3, %v1573_v3  ;;  %v1169_v52 = vadd.f32 %v2968_v62, %v1168_v49  ;;  %v1170_v54 = vpop.f32.mrb[61].mxu1 }
 0x193   : > { %v1171_v60 = vpop.f32.mrb[62].mxu1 }
 0x194   : > { %1864 = vst.msk [vmem:[%s2982_s21 + $0x74] sm:$0xf] %vm1834_vm4, %v2185_v59  ;;  %v1434_v57 = vadd.f32 %v3113_v7, %v1169_v52  ;;  %v1172_v63 = vadd.f32 %v2968_v62, %v1171_v60  ;;  %v1173_v2 = vpop.f32.mrb[63].mxu1 }
 0x196   : > { %v1574_v5 = vmax.f32 %v1434_v57, 0.0  ;;  %v1437_v8 = vadd.f32 %v3115_v11, %v1172_v63  ;;  %v3173_v14 = vpop.f32.mrb[80].mxu0 }
 0x197   : > { %v2346_v26 = vpop.f32.mrb[81].mxu0 }
 0x198   : > { %v2186_v1 = vpack.c.bf16 %v1574_v5, %v1574_v5  ;;  %v1575_v0 = vmax.f32 %v1437_v8, 0.0  ;;  %v3175_v28 = vpop.f32.mrb[82].mxu0 }
 0x199   : > { %v1176_v4 = vpop.f32.mrb[64].mxu1  ;;  %v2347_v22 = vpop.f32.mrb[83].mxu0 }
 0x19a   : > { %1865 = vst.msk [vmem:[%s2982_s21 + $0x78] sm:$0xf] %vm1834_vm4, %v2186_v1  ;;  %v2187_v13 = vpack.c.bf16 %v1575_v0, %v1575_v0  ;;  %v1177_v7 = vadd.f32 %v2968_v62, %v1176_v4  ;;  %v1178_v9 = vpop.f32.mrb[65].mxu1 }
 0x19b   : > { %v1179_v15 = vpop.f32.mrb[66].mxu1 }
 0x19c   : > { %1866 = vst.msk [vmem:[%s2982_s21 + $0x7c] sm:$0xf] %vm1834_vm4, %v2187_v13  ;;  %v1442_v11 = vadd.f32 %v3125_v23, %v1177_v7  ;;  %v1180_v16 = vadd.f32 %v2968_v62, %v1179_v15  ;;  %v1181_v19 = vpop.f32.mrb[67].mxu1 }
 0x19e   : > { %v1576_v21 = vmax.f32 %v1442_v11, 0.0  ;;  %v1445_v24 = vadd.f32 %v3127_v27, %v1180_v16  ;;  %v3185_v31 = vpop.f32.mrb[84].mxu0 }
 0x19f   : > { %v2350_v42 = vpop.f32.mrb[85].mxu0 }
 0x1a0   : > { %v2188_v17 = vpack.c.bf16 %v1576_v21, %v1576_v21  ;;  %v1577_v18 = vmax.f32 %v1445_v24, 0.0  ;;  %v3187_v44 = vpop.f32.mrb[86].mxu0 }
 0x1a1   : > { %v1184_v20 = vpop.f32.mrb[68].mxu1  ;;  %v2351_v38 = vpop.f32.mrb[87].mxu0 }
 0x1a2   : > { %1867 = vst.msk [vmem:[%s2982_s21 + $0x80] sm:$0xf] %vm1834_vm4, %v2188_v17  ;;  %v2189_v29 = vpack.c.bf16 %v1577_v18, %v1577_v18  ;;  %v1185_v23 = vadd.f32 %v2968_v62, %v1184_v20  ;;  %v1186_v25 = vpop.f32.mrb[69].mxu1 }
 0x1a3   : > { %v1187_v30 = vpop.f32.mrb[70].mxu1 }
 0x1a4   : > { %1868 = vst.msk [vmem:[%s2982_s21 + $0x84] sm:$0xf] %vm1834_vm4, %v2189_v29  ;;  %v1450_v27 = vadd.f32 %v3137_v39, %v1185_v23  ;;  %v1188_v32 = vadd.f32 %v2968_v62, %v1187_v30  ;;  %v1189_v34 = vpop.f32.mrb[71].mxu1 }
 0x1a6   : > { %v1578_v37 = vmax.f32 %v1450_v27, 0.0  ;;  %v1453_v40 = vadd.f32 %v3139_v43, %v1188_v32  ;;  %v3197_v47 = vpop.f32.mrb[88].mxu0 }
 0x1a7   : > { %v2354_v3 = vpop.f32.mrb[89].mxu0 }
 0x1a8   : > { %v2190_v33 = vpack.c.bf16 %v1578_v37, %v1578_v37  ;;  %v1579_v35 = vmax.f32 %v1453_v40, 0.0  ;;  %v3199_v59 = vpop.f32.mrb[90].mxu0 }
 0x1a9   : > { %v1192_v36 = vpop.f32.mrb[72].mxu1  ;;  %v2355_v54 = vpop.f32.mrb[91].mxu0 }
 0x1aa   : > { %1869 = vst.msk [vmem:[%s2982_s21 + $0x88] sm:$0xf] %vm1834_vm4, %v2190_v33  ;;  %v2191_v45 = vpack.c.bf16 %v1579_v35, %v1579_v35  ;;  %v1193_v39 = vadd.f32 %v2968_v62, %v1192_v36  ;;  %v1194_v41 = vpop.f32.mrb[73].mxu1 }
 0x1ab   : > { %v1195_v46 = vpop.f32.mrb[74].mxu1 }
 0x1ac   : > { %1870 = vst.msk [vmem:[%s2982_s21 + $0x8c] sm:$0xf] %vm1834_vm4, %v2191_v45  ;;  %v1458_v43 = vadd.f32 %v3149_v55, %v1193_v39  ;;  %v1196_v48 = vadd.f32 %v2968_v62, %v1195_v46  ;;  %v1197_v50 = vpop.f32.mrb[75].mxu1 }
 0x1ae   : > { %v1580_v53 = vmax.f32 %v1458_v43, 0.0  ;;  %v1461_v56 = vadd.f32 %v3151_v58, %v1196_v48  ;;  %v3209_v1 = vpop.f32.mrb[92].mxu0 }
 0x1af   : > { %v2358_v0 = vpop.f32.mrb[93].mxu0 }
 0x1b0   : > { %v2192_v49 = vpack.c.bf16 %v1580_v53, %v1580_v53  ;;  %v1581_v51 = vmax.f32 %v1461_v56, 0.0  ;;  %v3211_v13 = vpop.f32.mrb[94].mxu0 }
 0x1b1   : > { %v1200_v52 = vpop.f32.mrb[76].mxu1  ;;  %v2359_v9 = vpop.f32.mrb[95].mxu0 }
 0x1b2   : > { %1871 = vst.msk [vmem:[%s2982_s21 + $0x90] sm:$0xf] %vm1834_vm4, %v2192_v49  ;;  %v2193_v60 = vpack.c.bf16 %v1581_v51, %v1581_v51  ;;  %v1201_v55 = vadd.f32 %v2968_v62, %v1200_v52  ;;  %v1202_v57 = vpop.f32.mrb[77].mxu1 }
 0x1b3   : > { %v1203_v63 = vpop.f32.mrb[78].mxu1 }
 0x1b4   : > { %1872 = vst.msk [vmem:[%s2982_s21 + $0x94] sm:$0xf] %vm1834_vm4, %v2193_v60  ;;  %v1466_v58 = vadd.f32 %v3161_v61, %v1201_v55  ;;  %v1204_v2 = vadd.f32 %v2968_v62, %v1203_v63  ;;  %v1205_v5 = vpop.f32.mrb[79].mxu1 }
 0x1b6   : > { %v1582_v8 = vmax.f32 %v1466_v58, 0.0  ;;  %v1469_v10 = vadd.f32 %v3163_v12, %v1204_v2  ;;  %v3221_v17 = vpop.f32.mrb[96].mxu0 }
 0x1b7   : > { %v2362_v18 = vpop.f32.mrb[97].mxu0 }
 0x1b8   : > { %v2194_v4 = vpack.c.bf16 %v1582_v8, %v1582_v8  ;;  %v1583_v6 = vmax.f32 %v1469_v10, 0.0  ;;  %v3223_v29 = vpop.f32.mrb[98].mxu0 }
 0x1b9   : > { %v1208_v7 = vpop.f32.mrb[80].mxu1  ;;  %v2363_v25 = vpop.f32.mrb[99].mxu0 }
 0x1ba   : > { %1873 = vst.msk [vmem:[%s2982_s21 + $0x98] sm:$0xf] %vm1834_vm4, %v2194_v4  ;;  %v2195_v15 = vpack.c.bf16 %v1583_v6, %v1583_v6  ;;  %v1209_v61 = vadd.f32 %v2968_v62, %v1208_v7  ;;  %v1210_v11 = vpop.f32.mrb[81].mxu1 }
 0x1bb   : > { %v1211_v16 = vpop.f32.mrb[82].mxu1 }
 0x1bc   : > { %1874 = vst.msk [vmem:[%s2982_s21 + $0x9c] sm:$0xf] %vm1834_vm4, %v2195_v15  ;;  %v1474_v12 = vadd.f32 %v3173_v14, %v1209_v61  ;;  %v1212_v19 = vadd.f32 %v2968_v62, %v1211_v16  ;;  %v1213_v21 = vpop.f32.mrb[83].mxu1 }
 0x1be   : > { %v1584_v24 = vmax.f32 %v1474_v12, 0.0  ;;  %v1477_v26 = vadd.f32 %v3175_v28, %v1212_v19  ;;  %v3233_v33 = vpop.f32.mrb[100].mxu0 }
 0x1bf   : > { %v2366_v35 = vpop.f32.mrb[101].mxu0 }
 0x1c0   : > { %v2196_v20 = vpack.c.bf16 %v1584_v24, %v1584_v24  ;;  %v1585_v22 = vmax.f32 %v1477_v26, 0.0  ;;  %v3235_v45 = vpop.f32.mrb[102].mxu0 }
 0x1c1   : > { %v1216_v23 = vpop.f32.mrb[84].mxu1  ;;  %v2367_v41 = vpop.f32.mrb[103].mxu0 }
 0x1c2   : > { %1875 = vst.msk [vmem:[%s2982_s21 + $0xa0] sm:$0xf] %vm1834_vm4, %v2196_v20  ;;  %v2197_v30 = vpack.c.bf16 %v1585_v22, %v1585_v22  ;;  %v1217_v14 = vadd.f32 %v2968_v62, %v1216_v23  ;;  %v1218_v27 = vpop.f32.mrb[85].mxu1 }
 0x1c3   : > { %v1219_v32 = vpop.f32.mrb[86].mxu1 }
 0x1c4   : > { %1876 = vst.msk [vmem:[%s2982_s21 + $0xa4] sm:$0xf] %vm1834_vm4, %v2197_v30  ;;  %v1482_v28 = vadd.f32 %v3185_v31, %v1217_v14  ;;  %v1220_v34 = vadd.f32 %v2968_v62, %v1219_v32  ;;  %v1221_v37 = vpop.f32.mrb[87].mxu1 }
 0x1c6   : > { %v1586_v40 = vmax.f32 %v1482_v28, 0.0  ;;  %v1485_v42 = vadd.f32 %v3187_v44, %v1220_v34  ;;  %v3245_v49 = vpop.f32.mrb[104].mxu0 }
 0x1c7   : > { %v2370_v51 = vpop.f32.mrb[105].mxu0 }
 0x1c8   : > { %v2198_v36 = vpack.c.bf16 %v1586_v40, %v1586_v40  ;;  %v1587_v38 = vmax.f32 %v1485_v42, 0.0  ;;  %v3247_v60 = vpop.f32.mrb[106].mxu0 }
 0x1c9   : > { %v1224_v39 = vpop.f32.mrb[88].mxu1  ;;  %v2371_v57 = vpop.f32.mrb[107].mxu0 }
 0x1ca   : > { %1877 = vst.msk [vmem:[%s2982_s21 + $0xa8] sm:$0xf] %vm1834_vm4, %v2198_v36  ;;  %v2199_v46 = vpack.c.bf16 %v1587_v38, %v1587_v38  ;;  %v1225_v31 = vadd.f32 %v2968_v62, %v1224_v39  ;;  %v1226_v43 = vpop.f32.mrb[89].mxu1 }
 0x1cb   : > { %v1227_v48 = vpop.f32.mrb[90].mxu1 }
 0x1cc   : > { %1878 = vst.msk [vmem:[%s2982_s21 + $0xac] sm:$0xf] %vm1834_vm4, %v2199_v46  ;;  %v1490_v44 = vadd.f32 %v3197_v47, %v1225_v31  ;;  %v1228_v50 = vadd.f32 %v2968_v62, %v1227_v48  ;;  %v1229_v53 = vpop.f32.mrb[91].mxu1 }
 0x1ce   : > { %v1588_v56 = vmax.f32 %v1490_v44, 0.0  ;;  %v1493_v3 = vadd.f32 %v3199_v59, %v1228_v50  ;;  %v1529_v4 = vpop.f32.mrb[108].mxu0 }
 0x1cf   : > { %v2374_v6 = vpop.f32.mrb[109].mxu0 }
 0x1d0   : > { %v2200_v52 = vpack.c.bf16 %v1588_v56, %v1588_v56  ;;  %v1589_v54 = vmax.f32 %v1493_v3, 0.0  ;;  %v1532_v15 = vpop.f32.mrb[110].mxu0 }
 0x1d1   : > { %v1232_v55 = vpop.f32.mrb[92].mxu1  ;;  %v2375_v11 = vpop.f32.mrb[111].mxu0 }
 0x1d2   : > { %1879 = vst.msk [vmem:[%s2982_s21 + $0xb0] sm:$0xf] %vm1834_vm4, %v2200_v52  ;;  %v2201_v63 = vpack.c.bf16 %v1589_v54, %v1589_v54  ;;  %v1233_v47 = vadd.f32 %v2968_v62, %v1232_v55  ;;  %v1234_v58 = vpop.f32.mrb[93].mxu1 }
 0x1d3   : > { %v1235_v2 = vpop.f32.mrb[94].mxu1 }
 0x1d4   : > { %1880 = vst.msk [vmem:[%s2982_s21 + $0xb4] sm:$0xf] %vm1834_vm4, %v2201_v63  ;;  %v1498_v59 = vadd.f32 %v3209_v1, %v1233_v47  ;;  %v1236_v5 = vadd.f32 %v2968_v62, %v1235_v2  ;;  %v1237_v8 = vpop.f32.mrb[95].mxu1 }
 0x1d6   : > { %v1590_v10 = vmax.f32 %v1498_v59, 0.0  ;;  %v1501_v0 = vadd.f32 %v3211_v13, %v1236_v5  ;;  %v1537_v20 = vpop.f32.mrb[112].mxu0 }
 0x1d7   : > { %v2378_v22 = vpop.f32.mrb[113].mxu0 }
 0x1d8   : > { %v2202_v7 = vpack.c.bf16 %v1590_v10, %v1590_v10  ;;  %v1591_v9 = vmax.f32 %v1501_v0, 0.0  ;;  %v1540_v30 = vpop.f32.mrb[114].mxu0 }
 0x1d9   : > { %v1240_v61 = vpop.f32.mrb[96].mxu1  ;;  %v2379_v27 = vpop.f32.mrb[115].mxu0 }
 0x1da   : > { %1881 = vst.msk [vmem:[%s2982_s21 + $0xb8] sm:$0xf] %vm1834_vm4, %v2202_v7  ;;  %v2203_v16 = vpack.c.bf16 %v1591_v9, %v1591_v9  ;;  %v1241_v12 = vadd.f32 %v2968_v62, %v1240_v61  ;;  %v1242_v1 = vpop.f32.mrb[97].mxu1 }
 0x1db   : > { %v1243_v19 = vpop.f32.mrb[98].mxu1 }
 0x1dc   : > { %1882 = vst.msk [vmem:[%s2982_s21 + $0xbc] sm:$0xf] %vm1834_vm4, %v2203_v16  ;;  %v1506_v21 = vadd.f32 %v3221_v17, %v1241_v12  ;;  %v1244_v13 = vadd.f32 %v2968_v62, %v1243_v19  ;;  %v1245_v24 = vpop.f32.mrb[99].mxu1 }
 0x1de   : > { %v1592_v26 = vmax.f32 %v1506_v21, 0.0  ;;  %v1509_v18 = vadd.f32 %v3223_v29, %v1244_v13 }
 0x1e0   : > { %v2204_v23 = vpack.c.bf16 %v1592_v26, %v1592_v26  ;;  %v1593_v25 = vmax.f32 %v1509_v18, 0.0 }
 0x1e1   : > { %v1248_v14 = vpop.f32.mrb[100].mxu1 }
 0x1e2   : > { %1883 = vst.msk [vmem:[%s2982_s21 + $0xc0] sm:$0xf] %vm1834_vm4, %v2204_v23  ;;  %v2205_v32 = vpack.c.bf16 %v1593_v25, %v1593_v25  ;;  %v1249_v17 = vadd.f32 %v2968_v62, %v1248_v14  ;;  %v1250_v28 = vpop.f32.mrb[101].mxu1 }
 0x1e3   : > { %v1251_v34 = vpop.f32.mrb[102].mxu1 }
 0x1e4   : > { %1884 = vst.msk [vmem:[%s2982_s21 + $0xc4] sm:$0xf] %vm1834_vm4, %v2205_v32  ;;  %v1514_v29 = vadd.f32 %v3233_v33, %v1249_v17  ;;  %v1252_v37 = vadd.f32 %v2968_v62, %v1251_v34  ;;  %v1253_v40 = vpop.f32.mrb[103].mxu1 }
 0x1e6   : > { %v1594_v42 = vmax.f32 %v1514_v29, 0.0  ;;  %v1517_v35 = vadd.f32 %v3235_v45, %v1252_v37 }
 0x1e8   : > { %v2206_v36 = vpack.c.bf16 %v1594_v42, %v1594_v42  ;;  %v1595_v38 = vmax.f32 %v1517_v35, 0.0 }
 0x1e9   : > { %v1256_v39 = vpop.f32.mrb[104].mxu1 }
 0x1ea   : > { %1885 = vst.msk [vmem:[%s2982_s21 + $0xc8] sm:$0xf] %vm1834_vm4, %v2206_v36  ;;  %v2207_v41 = vpack.c.bf16 %v1595_v38, %v1595_v38  ;;  %v1257_v46 = vadd.f32 %v2968_v62, %v1256_v39  ;;  %v1258_v31 = vpop.f32.mrb[105].mxu1 }
 0x1eb   : > { %v1259_v43 = vpop.f32.mrb[106].mxu1 }
 0x1ec   : > { %1886 = vst.msk [vmem:[%s2982_s21 + $0xcc] sm:$0xf] %vm1834_vm4, %v2207_v41  ;;  %v1522_v33 = vadd.f32 %v3245_v49, %v1257_v46  ;;  %v1260_v48 = vadd.f32 %v2968_v62, %v1259_v43  ;;  %v1261_v44 = vpop.f32.mrb[107].mxu1 }
 0x1ee   : > { %v1596_v45 = vmax.f32 %v1522_v33, 0.0  ;;  %v1525_v50 = vadd.f32 %v3247_v60, %v1260_v48 }
 0x1f0   : > { %v2208_v53 = vpack.c.bf16 %v1596_v45, %v1596_v45  ;;  %v1597_v56 = vmax.f32 %v1525_v50, 0.0 }
 0x1f1   : > { %v1264_v3 = vpop.f32.mrb[108].mxu1 }
 0x1f2   : > { %1887 = vst.msk [vmem:[%s2982_s21 + $0xd0] sm:$0xf] %vm1834_vm4, %v2208_v53  ;;  %v2209_v51 = vpack.c.bf16 %v1597_v56, %v1597_v56  ;;  %v1265_v52 = vadd.f32 %v2968_v62, %v1264_v3  ;;  %v1266_v54 = vpop.f32.mrb[109].mxu1 }
 0x1f3   : > { %v1267_v55 = vpop.f32.mrb[110].mxu1 }
 0x1f4   : > { %1888 = vst.msk [vmem:[%s2982_s21 + $0xd4] sm:$0xf] %vm1834_vm4, %v2209_v51  ;;  %v1530_v49 = vadd.f32 %v1529_v4, %v1265_v52  ;;  %v1268_v57 = vadd.f32 %v2968_v62, %v1267_v55  ;;  %v1269_v63 = vpop.f32.mrb[111].mxu1 }
 0x1f6   : > { %v1598_v47 = vmax.f32 %v1530_v49, 0.0  ;;  %v1533_v60 = vadd.f32 %v1532_v15, %v1268_v57 }
 0x1f8   : > { %v2210_v58 = vpack.c.bf16 %v1598_v47, %v1598_v47  ;;  %v1599_v2 = vmax.f32 %v1533_v60, 0.0 }
 0x1f9   : > { %v1272_v59 = vpop.f32.mrb[112].mxu1 }
 0x1fa   : > { %1889 = vst.msk [vmem:[%s2982_s21 + $0xd8] sm:$0xf] %vm1834_vm4, %v2210_v58  ;;  %v2211_v5 = vpack.c.bf16 %v1599_v2, %v1599_v2  ;;  %v1273_v8 = vadd.f32 %v2968_v62, %v1272_v59  ;;  %v1274_v10 = vpop.f32.mrb[113].mxu1 }
 0x1fb   : > { %v1275_v0 = vpop.f32.mrb[114].mxu1 }
 0x1fc   : > { %1890 = vst.msk [vmem:[%s2982_s21 + $0xdc] sm:$0xf] %vm1834_vm4, %v2211_v5  ;;  %v1538_v4 = vadd.f32 %v1537_v20, %v1273_v8  ;;  %v1276_v6 = vadd.f32 %v2968_v62, %v1275_v0  ;;  %v1277_v7 = vpop.f32.mrb[115].mxu1 }
 0x1fe   : > { %v1600_v9 = vmax.f32 %v1538_v4, 0.0  ;;  %v1541_v15 = vadd.f32 %v1540_v30, %v1276_v6 }
 0x200   : > { %v2212_v61 = vpack.c.bf16 %v1600_v9, %v1600_v9  ;;  %v1601_v11 = vmax.f32 %v1541_v15, 0.0 }
 0x202   : > { %1891 = vst.msk [vmem:[%s2982_s21 + $0xe0] sm:$0xf] %vm1834_vm4, %v2212_v61  ;;  %v2213_v16 = vpack.c.bf16 %v1601_v11, %v1601_v11 }
 0x204   : > { %1892 = vst.msk [vmem:[%s2982_s21 + $0xe4] sm:$0xf] %vm1834_vm4, %v2213_v16 }
 0x205 PF: > { %s13_s12 = sadd.s32 1, %s2654_s12  }
 0x206   : > { %p10_p4 = scmp.ge.s32.totalorder %s13_s12, 4  }
 0x208   :  { %12 = sbr.rel (!%p10_p4) target bundleno = 1 (0x1), region = 62 }

// kernel: perceptual_loss.13
= control target key start
LH: loop header
LB: loop body
LE: loop exit
PB: predicated region body
PF: predicated region fallthrough
CT: control target
= control target key end

     0   :  { %s661_s15 = smov 0   ;;  %s816_s0 = inlined_call_operand.vmem [shape: bf16[4,8,8,64], index: 0, kind: input, shape index: {}]   ;;  %s817_s1 = inlined_call_operand.vmem [shape: bf16[4,8,7,64], index: 1, kind: input, shape index: {}]   ;;  %s818_s2 = inlined_call_operand.vmem [shape: bf16[4,7,8,64], index: 2, kind: input, shape index: {}]   ;;  %s819_s3 = inlined_call_operand.vmem [shape: bf16[4,7,7,64], index: 3, kind: input, shape index: {}]   ;;  %s820_s4 = inlined_call_operand.vmem [shape: bf16[4,7,7,64], index: 4, kind: output, shape index: {}]  }
   0x1 LB: > { %s603_s16 = sadd.s32 4294967295, %s634_s15   ;;  %p607_p0 = scmp.ge.s32.totalorder %s634_s15, 1  ;;  %s634_s15 = sphi %s661_s15, %s14_s15  }
   0x2   : > { %p192_p1 = scmp.lt.s32.totalorder %s634_s15, 5 }
   0x4   : > { %p193_p2 = pnand %p607_p0, %p192_p1 }
   0x5   : > { %p233_p3 = scmp.lt.s32.totalorder (!%p193_p2), %s603_s16, 3  ;;  %vm488_vm0 = vcmask (!%p193_p2), 519168   ;;  %vm489_vm1 = vsmask.f32 (!%p193_p2), 3328 }
   0x6   : > { %196 = sbr.rel (%p193_p2) target bundleno = 65 (0x41), region = 36  ;;  %vm738_vm2 = vmand (!%p193_p2), %vm488_vm0, %vm489_vm1 }
   0xd   : > { %s824_s16 = smov (!%p233_p3, %s603_s16), 3 }
   0xe   : > { %s617_s17 = sshll.u32 %s824_s16, 5  ;;  %s669_s18 = smul.u32 28, %s824_s16 }
   0xf   : > { %s674_s21 = scalar_lea.vmem %s816_s0, %s617_s17  ;;  %s679_s24 = scalar_lea.vmem %s817_s1, %s617_s17 }
  0x10   : > { %s685_s27 = scalar_lea.vmem %s818_s2, %s669_s18  ;;  %v258_v0 = vld [vmem:[%s674_s21] sm:$0xf]  ;;  %v259_v1 = vld [vmem:[%s674_s21 + $0x4] sm:$0xf]  ;;  %v260_v11 = vld [vmem:[%s674_s21 + $0x8] sm:$0xf]  ;;  %s715_s30 = scalar_lea.vmem %s819_s3, %s669_s18 }
  0x11   : > { %v274_v2 = vld [vmem:[%s685_s27] sm:$0xf]  ;;  %v289_v4 = vshrl.u32 %v258_v0, 16  ;;  %v292_v5 = vshll.u32 %v258_v0, 16  ;;  %v298_v6 = vshrl.u32 %v259_v1, 16  ;;  %v301_v7 = vshll.u32 %v259_v1, 16  ;;  %s723_s7 = scalar_lea.vmem %s820_s4, %s669_s18 }
  0x12   : > { %v266_v3 = vld [vmem:[%s679_s24] sm:$0xf]  ;;  %v692_v8 = vld [vmem:[%s679_s24 + $0x4] sm:$0xf]  ;;  %v384_v9 = vshrl.u32 %v274_v2, 16  ;;  %v387_v10 = vshll.u32 %v274_v2, 16 }
  0x13   : > { %v291_v12 = vrot.slane %v289_v4, 4  ;;  %v294_v13 = vrot.slane %v292_v5, 5  ;;  %v300_v14 = vrot.slane %v298_v6, 4  ;;  %v303_v15 = vrot.slane %v301_v7, 5  ;;  %v696_v16 = vld [vmem:[%s685_s27 + $0x4] sm:$0xf] }
  0x14   : > { %v386_v17 = vrot.slane %v384_v9, 4  ;;  %v389_v18 = vrot.slane %v387_v10, 5  ;;  %v307_v19 = vshrl.u32 %v260_v11, 16  ;;  %v310_v20 = vshll.u32 %v260_v11, 16  ;;  %v261_v25 = vld [vmem:[%s674_s21 + $0xc] sm:$0xf] }
  0x15   : > { %v295_v21 = vor.u32 %v294_v13, %v291_v12  ;;  %v304_v22 = vor.u32 %v303_v15, %v300_v14  ;;  %v376_v23 = vmax.bf16 %v692_v8, %v266_v3  ;;  %v393_v24 = vshrl.u32 %v696_v16, 16  ;;  %v702_v27 = vld [vmem:[%s679_s24 + $0x8] sm:$0xf]  ;;  %v262_v44 = vld [vmem:[%s674_s21 + $0x10] sm:$0xf] }
  0x16   : > { %v390_v26 = vor.u32 %v389_v18, %v386_v17  ;;  %v309_v28 = vrot.slane %v307_v19, 4  ;;  %v312_v29 = vrot.slane %v310_v20, 5  ;;  %v396_v30 = vshll.u32 %v696_v16, 16  ;;  %v706_v38 = vld [vmem:[%s685_s27 + $0x8] sm:$0xf] }
  0x17   : > { %v296_v31 = vrot.slane %v295_v21, 4  ;;  %v305_v32 = vrot.slane %v304_v22, 4  ;;  %v395_v33 = vrot.slane %v393_v24, 4  ;;  %v316_v34 = vshrl.u32 %v261_v25, 16  ;;  %v726_v56 = vld [vmem:[%s679_s24 + $0xc] sm:$0xf] }
  0x18   : > { %v391_v35 = vrot.slane %v390_v26, 4  ;;  %v313_v36 = vor.u32 %v312_v29, %v309_v28  ;;  %v398_v37 = vrot.slane %v396_v30, 5  ;;  %v319_v39 = vshll.u32 %v261_v25, 16  ;;  %v729_v58 = vld [vmem:[%s685_s27 + $0xc] sm:$0xf] }
  0x19   : > { %v358_v40 = vmax.bf16 %v296_v31, %v258_v0  ;;  %v359_v41 = vmax.bf16 %v305_v32, %v259_v1  ;;  %v377_v42 = vmax.bf16 %v702_v27, %v692_v8  ;;  %v318_v43 = vrot.slane %v316_v34, 4  ;;  %v281_v59 = vld [vmem:[%s715_s30] sm:$0xf]  ;;  %v734_v4 = vld [vmem:[%s674_s21 + $0x14] sm:$0xf] }
  0x1a   : > { %v453_v45 = vmax.bf16 %v391_v35, %v274_v2  ;;  %v314_v46 = vrot.slane %v313_v36, 4  ;;  %v399_v47 = vor.u32 %v398_v37, %v395_v33  ;;  %v321_v48 = vrot.slane %v319_v39, 5  ;;  %v491_v6 = vld [vmem:[%s723_s7] sm:$0xf]  ;;  %v282_v12 = vld [vmem:[%s715_s30 + $0x4] sm:$0xf] }
  0x1b   : > { %v460_v49 = vmax.bf16 %v359_v41, %v358_v40  ;;  %v402_v50 = vshrl.u32 %v706_v38, 16  ;;  %v405_v51 = vshll.u32 %v706_v38, 16  ;;  %v325_v52 = vshrl.u32 %v262_v44, 16  ;;  %v748_v15 = vld [vmem:[%s679_s24 + $0x10] sm:$0xf] }
  0x1c   : > { %v467_v53 = vmax.bf16 %v453_v45, %v376_v23  ;;  %v360_v54 = vmax.bf16 %v314_v46, %v260_v11  ;;  %v400_v55 = vrot.slane %v399_v47, 4  ;;  %v322_v57 = vor.u32 %v321_v48, %v318_v43  ;;  %v752_v20 = vld [vmem:[%s685_s27 + $0x10] sm:$0xf]  ;;  %v494_v24 = vld [vmem:[%s723_s7 + $0x4] sm:$0xf] }
  0x1d   : > { %v404_v60 = vrot.slane %v402_v50, 4  ;;  %v407_v61 = vrot.slane %v405_v51, 5  ;;  %v327_v62 = vrot.slane %v325_v52, 4  ;;  %v328_v63 = vshll.u32 %v262_v44, 16  ;;  %v264_v31 = vld [vmem:[%s674_s21 + $0x18] sm:$0xf] }
  0x1e   : > { %v474_v0 = vmax.bf16 %v467_v53, %v460_v49  ;;  %v454_v1 = vmax.bf16 %v400_v55, %v696_v16  ;;  %v461_v2 = vmax.bf16 %v360_v54, %v359_v41  ;;  %v323_v3 = vrot.slane %v322_v57, 4  ;;  %v765_v35 = vld [vmem:[%s679_s24 + $0x14] sm:$0xf]  ;;  %v283_v37 = vld [vmem:[%s715_s30 + $0x8] sm:$0xf] }
  0x1f   : > { %v378_v7 = vmax.bf16 %v726_v56, %v702_v27  ;;  %v408_v8 = vor.u32 %v407_v61, %v404_v60  ;;  %v330_v9 = vrot.slane %v328_v63, 5  ;;  %v411_v10 = vshrl.u32 %v729_v58, 16  ;;  %v279_v46 = vld [vmem:[%s685_s27 + $0x14] sm:$0xf]  ;;  %v777_v52 = vld [vmem:[%s674_s21 + $0x1c] sm:$0xf] }
  0x20   : > { %v481_v11 = vmax.bf16 %v474_v0, %v281_v59  ;;  %v468_v13 = vmax.bf16 %v454_v1, %v377_v42  ;;  %v361_v14 = vmax.bf16 %v323_v3, %v261_v25  ;;  %v414_v16 = vshll.u32 %v729_v58, 16 }
  0x21   : > { %v409_v17 = vrot.slane %v408_v8, 4  ;;  %v331_v18 = vor.u32 %v330_v9, %v327_v62  ;;  %v413_v19 = vrot.slane %v411_v10, 4  ;;  %v334_v21 = vshrl.u32 %v734_v4, 16  ;;  %v280_v8 = vld [vmem:[%s685_s27 + $0x18] sm:$0xf] }
  0x22   : > { %v492_v22 = vsel %vm738_vm2, %v481_v11, %v491_v6  ;;  %v475_v23 = vmax.bf16 %v468_v13, %v461_v2  ;;  %v462_v25 = vmax.bf16 %v361_v14, %v360_v54  ;;  %v416_v26 = vrot.slane %v414_v16, 5  ;;  %v272_v10 = vld [vmem:[%s679_s24 + $0x18] sm:$0xf]  ;;  %v500_v13 = vld [vmem:[%s723_s7 + $0xc] sm:$0xf] }
  0x23   : > { %493 = vst [vmem:[%s723_s7] sm:$0xf] %v492_v22  ;;  %v455_v27 = vmax.bf16 %v409_v17, %v706_v38  ;;  %v332_v28 = vrot.slane %v331_v18, 4  ;;  %v336_v29 = vrot.slane %v334_v21, 4  ;;  %v337_v30 = vshll.u32 %v734_v4, 16 }
  0x24   : > { %v482_v32 = vmax.bf16 %v475_v23, %v282_v12  ;;  %v379_v33 = vmax.bf16 %v748_v15, %v726_v56  ;;  %v417_v34 = vor.u32 %v416_v26, %v413_v19  ;;  %v420_v36 = vshrl.u32 %v752_v20, 16 }
  0x25   : > { %v469_v38 = vmax.bf16 %v455_v27, %v378_v7  ;;  %v362_v39 = vmax.bf16 %v332_v28, %v262_v44  ;;  %v339_v40 = vrot.slane %v337_v30, 5  ;;  %v423_v41 = vshll.u32 %v752_v20, 16  ;;  %v497_v44 = vld [vmem:[%s723_s7 + $0x8] sm:$0xf] }
  0x26   : > { %v495_v42 = vsel %vm738_vm2, %v482_v32, %v494_v24  ;;  %v418_v43 = vrot.slane %v417_v34, 4  ;;  %v422_v45 = vrot.slane %v420_v36, 4  ;;  %v343_v47 = vshrl.u32 %v264_v31, 16  ;;  %v503_v34 = vld [vmem:[%s723_s7 + $0x10] sm:$0xf] }
  0x27   : > { %496 = vst [vmem:[%s723_s7 + $0x4] sm:$0xf] %v495_v42  ;;  %v476_v48 = vmax.bf16 %v469_v38, %v462_v25  ;;  %v340_v49 = vor.u32 %v339_v40, %v336_v29  ;;  %v380_v50 = vmax.bf16 %v765_v35, %v748_v15  ;;  %v425_v51 = vrot.slane %v423_v41, 5  ;;  %v286_v42 = vld [vmem:[%s715_s30 + $0x14] sm:$0xf] }
  0x28   : > { %v456_v53 = vmax.bf16 %v418_v43, %v729_v58  ;;  %v463_v54 = vmax.bf16 %v362_v39, %v361_v14  ;;  %v345_v55 = vrot.slane %v343_v47, 4  ;;  %v346_v56 = vshll.u32 %v264_v31, 16  ;;  %v284_v58 = vld [vmem:[%s715_s30 + $0xc] sm:$0xf] }
  0x29   : > { %v483_v57 = vmax.bf16 %v476_v48, %v283_v37  ;;  %v341_v59 = vrot.slane %v340_v49, 4  ;;  %v426_v60 = vor.u32 %v425_v51, %v422_v45  ;;  %v429_v61 = vshrl.u32 %v279_v46, 16  ;;  %v506_v48 = vld [vmem:[%s723_s7 + $0x14] sm:$0xf] }
  0x2a   : > { %v470_v62 = vmax.bf16 %v456_v53, %v379_v33  ;;  %v348_v63 = vrot.slane %v346_v56, 5  ;;  %v432_v0 = vshll.u32 %v279_v46, 16  ;;  %v366_v1 = vshrl.u32 %v777_v52, 16  ;;  %v509_v56 = vld [vmem:[%s723_s7 + $0x18] sm:$0xf] }
  0x2b   : > { %v498_v2 = vsel %vm738_vm2, %v483_v57, %v497_v44  ;;  %v363_v3 = vmax.bf16 %v341_v59, %v734_v4  ;;  %v427_v6 = vrot.slane %v426_v60, 4  ;;  %v431_v7 = vrot.slane %v429_v61, 4 }
  0x2c   : > { %499 = vst [vmem:[%s723_s7 + $0x8] sm:$0xf] %v498_v2  ;;  %v477_v9 = vmax.bf16 %v470_v62, %v463_v54  ;;  %v349_v11 = vor.u32 %v348_v63, %v345_v55  ;;  %v434_v12 = vrot.slane %v432_v0, 5  ;;  %v368_v16 = vrot.slane %v366_v1, 4  ;;  %v287_v54 = vld [vmem:[%s715_s30 + $0x18] sm:$0xf] }
  0x2d   : > { %v457_v14 = vmax.bf16 %v427_v6, %v752_v20  ;;  %v464_v15 = vmax.bf16 %v363_v3, %v362_v39  ;;  %v369_v17 = vshll.u32 %v777_v52, 16  ;;  %v438_v21 = vshrl.u32 %v280_v8, 16  ;;  %v285_v20 = vld [vmem:[%s715_s30 + $0x10] sm:$0xf] }
  0x2e   : > { %v484_v18 = vmax.bf16 %v477_v9, %v284_v58  ;;  %v350_v19 = vrot.slane %v349_v11, 4  ;;  %v435_v4 = vor.u32 %v434_v12, %v431_v7  ;;  %v381_v23 = vmax.bf16 %v272_v10, %v765_v35  ;;  %v273_v35 = vld [vmem:[%s679_s24 + $0x1c] sm:$0xf] }
  0x2f   : > { %v471_v22 = vmax.bf16 %v457_v14, %v380_v50  ;;  %v371_v24 = vrot.slane %v369_v17, 5  ;;  %v441_v25 = vshll.u32 %v280_v8, 16  ;;  %v440_v29 = vrot.slane %v438_v21, 4 }
  0x30   : > { %v501_v26 = vsel %vm738_vm2, %v484_v18, %v500_v13  ;;  %v364_v27 = vmax.bf16 %v350_v19, %v264_v31  ;;  %v436_v28 = vrot.slane %v435_v4, 4  ;;  %v382_v45 = vmax.bf16 %v273_v35, %v272_v10 }
  0x31   : > { %502 = vst [vmem:[%s723_s7 + $0xc] sm:$0xf] %v501_v26  ;;  %v478_v30 = vmax.bf16 %v471_v22, %v464_v15  ;;  %v372_v32 = vor.u32 %v371_v24, %v368_v16  ;;  %v443_v33 = vrot.slane %v441_v25, 5 }
  0x32   : > { %v458_v36 = vmax.bf16 %v436_v28, %v279_v46  ;;  %v465_v37 = vmax.bf16 %v364_v27, %v363_v3 }
  0x33   : > { %v485_v38 = vmax.bf16 %v478_v30, %v285_v20  ;;  %v373_v39 = vrot.slane %v372_v32, 4  ;;  %v444_v40 = vor.u32 %v443_v33, %v440_v29 }
  0x34   : > { %v472_v41 = vmax.bf16 %v458_v36, %v381_v23 }
  0x35   : > { %v504_v31 = vsel %vm738_vm2, %v485_v38, %v503_v34  ;;  %v375_v43 = vmax.bf16 %v373_v39, %v777_v52  ;;  %v445_v47 = vrot.slane %v444_v40, 4 }
  0x36   : > { %505 = vst [vmem:[%s723_s7 + $0x10] sm:$0xf] %v504_v31  ;;  %v479_v46 = vmax.bf16 %v472_v41, %v465_v37 }
  0x37   : > { %v459_v49 = vmax.bf16 %v445_v47, %v280_v8  ;;  %v466_v50 = vmax.bf16 %v375_v43, %v364_v27 }
  0x38   : > { %v486_v51 = vmax.bf16 %v479_v46, %v286_v42 }
  0x39   : > { %v473_v44 = vmax.bf16 %v459_v49, %v382_v45 }
  0x3a   : > { %v507_v53 = vsel %vm738_vm2, %v486_v51, %v506_v48 }
  0x3b   : > { %508 = vst [vmem:[%s723_s7 + $0x14] sm:$0xf] %v507_v53  ;;  %v480_v55 = vmax.bf16 %v473_v44, %v466_v50 }
  0x3d   : > { %v487_v57 = vmax.bf16 %v480_v55, %v287_v54 }
  0x3f   : > { %v510_v52 = vsel %vm738_vm2, %v487_v57, %v509_v56 }
  0x40   : > { %511 = vst [vmem:[%s723_s7 + $0x18] sm:$0xf] %v510_v52 }
  0x41 PF: > { %s14_s15 = sadd.s32 1, %s634_s15  }
  0x42   : > { %p11_p4 = scmp.ge.s32.totalorder %s14_s15, 6  }
  0x44   :  { %13 = sbr.rel (!%p11_p4) target bundleno = 1 (0x1), region = 75 }

// kernel: perceptual_loss.15
= control target key start
LH: loop header
LB: loop body
LE: loop exit
PB: predicated region body
PF: predicated region fallthrough
CT: control target
= control target key end

     0   :  { %s529_s15 = smov 0   ;;  %s613_s0 = inlined_call_operand.vmem [shape: bf16[4,4,4,192], index: 0, kind: input, shape index: {}]   ;;  %s614_s1 = inlined_call_operand.vmem [shape: bf16[4,4,3,192], index: 1, kind: input, shape index: {}]   ;;  %s615_s2 = inlined_call_operand.vmem [shape: bf16[4,3,4,192], index: 2, kind: input, shape index: {}]   ;;  %s616_s3 = inlined_call_operand.vmem [shape: bf16[4,3,3,192], index: 3, kind: input, shape index: {}]   ;;  %s617_s4 = inlined_call_operand.vmem [shape: bf16[4,3,3,192], index: 4, kind: output, shape index: {}]  }
   0x1 LB: > { %s471_s16 = sadd.s32 4294967295, %s502_s15   ;;  %p475_p0 = scmp.ge.s32.totalorder %s502_s15, 1  ;;  %s502_s15 = sphi %s529_s15, %s14_s15  }
   0x2   : > { %p192_p1 = scmp.lt.s32.totalorder %s502_s15, 5 }
   0x4   : > { %p193_p2 = pnand %p475_p0, %p192_p1 }
   0x5   : > { %p233_p3 = scmp.lt.s32.totalorder (!%p193_p2), %s471_s16, 3  ;;  %vm364_vm0 = vcmask (!%p193_p2), 1041408   ;;  %vm365_vm1 = vsmask.f32 (!%p193_p2), 1280  ;;  %vm367_vm2 = vcmask (!%p193_p2), 519170  }
   0x6   : > { %196 = sbr.rel (%p193_p2) target bundleno = 45 (0x2d), region = 36  ;;  %vm368_vm3 = vsmask.f32 (!%p193_p2), 3328  ;;  %vm576_vm4 = vmand (!%p193_p2), %vm364_vm0, %vm365_vm1 }
   0x7   : > { %vm369_vm5 = vmand (!%p193_p2), %vm367_vm2, %vm368_vm3 }
   0x8   : > { %vm592_vm6 = vmor (!%p193_p2), %vm369_vm5, %vm576_vm4 }
   0xd   : > { %s623_s16 = smov (!%p233_p3, %s471_s16), 3 }
   0xe   : > { %s485_s17 = sshll.u32 %s623_s16, 4  ;;  %s537_s18 = smul.u32 12, %s623_s16 }
   0xf   : > { %s542_s21 = scalar_lea.vmem %s613_s0, %s485_s17  ;;  %s547_s24 = scalar_lea.vmem %s614_s1, %s485_s17 }
  0x10   : > { %s553_s27 = scalar_lea.vmem %s615_s2, %s537_s18  ;;  %v258_v0 = vld [vmem:[%s542_s21] sm:$0xf]  ;;  %v259_v1 = vld [vmem:[%s542_s21 + $0x4] sm:$0xf]  ;;  %v260_v11 = vld [vmem:[%s542_s21 + $0x8] sm:$0xf]  ;;  %s572_s30 = scalar_lea.vmem %s616_s3, %s537_s18 }
  0x11   : > { %v266_v2 = vld [vmem:[%s553_s27] sm:$0xf]  ;;  %v273_v4 = vshrl.u32 %v258_v0, 16  ;;  %v276_v5 = vshll.u32 %v258_v0, 16  ;;  %v282_v6 = vshrl.u32 %v259_v1, 16  ;;  %v285_v7 = vshll.u32 %v259_v1, 16  ;;  %s585_s7 = scalar_lea.vmem %s617_s4, %s537_s18 }
  0x12   : > { %v262_v3 = vld [vmem:[%s547_s24] sm:$0xf]  ;;  %v560_v8 = vld [vmem:[%s547_s24 + $0x4] sm:$0xf]  ;;  %v320_v9 = vshrl.u32 %v266_v2, 16  ;;  %v323_v10 = vshll.u32 %v266_v2, 16 }
  0x13   : > { %v275_v12 = vrot.slane %v273_v4, 6  ;;  %v278_v13 = vrot.slane %v276_v5, 7  ;;  %v284_v14 = vrot.slane %v282_v6, 6  ;;  %v287_v15 = vrot.slane %v285_v7, 7  ;;  %v267_v16 = vld [vmem:[%s553_s27 + $0x4] sm:$0xf] }
  0x14   : > { %v322_v17 = vrot.slane %v320_v9, 6  ;;  %v325_v18 = vrot.slane %v323_v10, 7  ;;  %v291_v19 = vshrl.u32 %v260_v11, 16  ;;  %v294_v20 = vshll.u32 %v260_v11, 16  ;;  %v261_v25 = vld [vmem:[%s542_s21 + $0xc] sm:$0xf] }
  0x15   : > { %v279_v21 = vor.u32 %v278_v13, %v275_v12  ;;  %v288_v22 = vor.u32 %v287_v15, %v284_v14  ;;  %v316_v23 = vmax.bf16 %v560_v8, %v262_v3  ;;  %v329_v24 = vshrl.u32 %v267_v16, 16  ;;  %v264_v32 = vld [vmem:[%s547_s24 + $0x8] sm:$0xf]  ;;  %v269_v56 = vld [vmem:[%s572_s30] sm:$0xf] }
  0x16   : > { %v326_v26 = vor.u32 %v325_v18, %v322_v17  ;;  %v293_v27 = vrot.slane %v291_v19, 6  ;;  %v296_v28 = vrot.slane %v294_v20, 7  ;;  %v332_v29 = vshll.u32 %v267_v16, 16  ;;  %v268_v38 = vld [vmem:[%s553_s27 + $0x8] sm:$0xf] }
  0x17   : > { %v280_v30 = vrot.slane %v279_v21, 2  ;;  %v289_v31 = vrot.slane %v288_v22, 2  ;;  %v331_v33 = vrot.slane %v329_v24, 6  ;;  %v306_v34 = vshrl.u32 %v261_v25, 16  ;;  %v265_v62 = vld [vmem:[%s547_s24 + $0xc] sm:$0xf] }
  0x18   : > { %v327_v35 = vrot.slane %v326_v26, 2  ;;  %v297_v36 = vor.u32 %v296_v28, %v293_v27  ;;  %v334_v37 = vrot.slane %v332_v29, 7  ;;  %v309_v39 = vshll.u32 %v261_v25, 16  ;;  %v270_v6 = vld [vmem:[%s572_s30 + $0x4] sm:$0xf] }
  0x19   : > { %v302_v40 = vmax.bf16 %v280_v30, %v258_v0  ;;  %v303_v41 = vmax.bf16 %v289_v31, %v259_v1  ;;  %v308_v42 = vrot.slane %v306_v34, 6  ;;  %v317_v49 = vmax.bf16 %v264_v32, %v560_v8  ;;  %v371_v1 = vld [vmem:[%s585_s7] sm:$0xf]  ;;  %v271_v17 = vld [vmem:[%s572_s30 + $0x8] sm:$0xf] }
  0x1a   : > { %v349_v43 = vmax.bf16 %v327_v35, %v266_v2  ;;  %v298_v44 = vrot.slane %v297_v36, 2  ;;  %v335_v45 = vor.u32 %v334_v37, %v331_v33  ;;  %v311_v46 = vrot.slane %v309_v39, 7  ;;  %v377_v19 = vld [vmem:[%s585_s7 + $0x8] sm:$0xf] }
  0x1b   : > { %v352_v47 = vmax.bf16 %v303_v41, %v302_v40  ;;  %v338_v50 = vshrl.u32 %v268_v38, 16  ;;  %v341_v51 = vshll.u32 %v268_v38, 16  ;;  %v318_v7 = vmax.bf16 %v265_v62, %v264_v32 }
  0x1c   : > { %v355_v52 = vmax.bf16 %v349_v43, %v316_v23  ;;  %v304_v53 = vmax.bf16 %v298_v44, %v260_v11  ;;  %v336_v54 = vrot.slane %v335_v45, 2  ;;  %v312_v55 = vor.u32 %v311_v46, %v308_v42  ;;  %v374_v11 = vld [vmem:[%s585_s7 + $0x4] sm:$0xf] }
  0x1d   : > { %v340_v57 = vrot.slane %v338_v50, 6  ;;  %v343_v58 = vrot.slane %v341_v51, 7 }
  0x1e   : > { %v358_v59 = vmax.bf16 %v355_v52, %v352_v47  ;;  %v350_v60 = vmax.bf16 %v336_v54, %v267_v16  ;;  %v353_v61 = vmax.bf16 %v304_v53, %v303_v41  ;;  %v313_v63 = vrot.slane %v312_v55, 2 }
  0x1f   : > { %v344_v2 = vor.u32 %v343_v58, %v340_v57 }
  0x20   : > { %v361_v3 = vmax.bf16 %v358_v59, %v269_v56  ;;  %v356_v4 = vmax.bf16 %v350_v60, %v317_v49  ;;  %v315_v5 = vmax.bf16 %v313_v63, %v261_v25 }
  0x21   : > { %v345_v8 = vrot.slane %v344_v2, 2 }
  0x22   : > { %v372_v9 = vsel %vm592_vm6, %v361_v3, %v371_v1  ;;  %v359_v10 = vmax.bf16 %v356_v4, %v353_v61  ;;  %v354_v13 = vmax.bf16 %v315_v5, %v304_v53 }
  0x23   : > { %373 = vst [vmem:[%s585_s7] sm:$0xf] %v372_v9  ;;  %v351_v12 = vmax.bf16 %v345_v8, %v268_v38 }
  0x24   : > { %v362_v14 = vmax.bf16 %v359_v10, %v270_v6 }
  0x25   : > { %v357_v15 = vmax.bf16 %v351_v12, %v318_v7 }
  0x26   : > { %v375_v16 = vsel %vm592_vm6, %v362_v14, %v374_v11 }
  0x27   : > { %376 = vst [vmem:[%s585_s7 + $0x4] sm:$0xf] %v375_v16  ;;  %v360_v18 = vmax.bf16 %v357_v15, %v354_v13 }
  0x29   : > { %v363_v20 = vmax.bf16 %v360_v18, %v271_v17 }
  0x2b   : > { %v378_v21 = vsel %vm592_vm6, %v363_v20, %v377_v19 }
  0x2c   : > { %379 = vst [vmem:[%s585_s7 + $0x8] sm:$0xf] %v378_v21 }
  0x2d PF: > { %s14_s15 = sadd.s32 1, %s502_s15  }
  0x2e   : > { %p11_p4 = scmp.ge.s32.totalorder %s14_s15, 6  }
  0x30   :  { %13 = sbr.rel (!%p11_p4) target bundleno = 1 (0x1), region = 75 }

// kernel: perceptual_loss.14
= control target key start
LH: loop header
LB: loop body
LE: loop exit
PB: predicated region body
PF: predicated region fallthrough
CT: control target
= control target key end

     0   :  { %s3912_s12 = smov 0   ;;  %s4937_s0 = inlined_call_operand.vmem [shape: bf16[224,1600], index: 0, kind: input, shape index: {}]   ;;  %s4938_s1 = inlined_call_operand.vmem [shape: bf16[1600,192], index: 1, kind: input, shape index: {}]   ;;  %s4939_s2 = inlined_call_operand.vmem [shape: f32[1,192], index: 2, kind: input, shape index: {}]   ;;  %s4940_s3 = inlined_call_operand.vmem [shape: bf16[224,192], index: 3, kind: output, shape index: {}]  }
   0x1 LB: > { %s2875_s13 = sadd.s32 4294967295, %s3889_s12   ;;  %p2879_p0 = scmp.ge.s32.totalorder %s3889_s12, 1  ;;  %s3889_s12 = sphi %s3912_s12, %s13_s12  }
   0x2   : > { %p139_p1 = scmp.lt.s32.totalorder %s3889_s12, 3 }
   0x4   : > { %p140_p2 = pnand %p2879_p0, %p139_p1 }
   0x5   : > { %v3450_v0 = vld [vmem:[%s4938_s1 + $0x4] ss:$8 sps:$4 sm:$0xff] (!%p140_p2)   ;;  %v3454_v2 = vld [vmem:[%s4938_s1] ss:$8 sps:$4 sm:$0xff] (!%p140_p2)   ;;  %v3456_v4 = vld [vmem:[%s4938_s1 + $0x14] ss:$8 sps:$4 sm:$0xff] (!%p140_p2)  }
   0x6   : > { %143 = sbr.rel (%p140_p2) target bundleno = 502 (0x1f6), region = 32  ;;  %v3452_v1 = vld [vmem:[%s4938_s1 + $0x304] ss:$8 sps:$4 sm:$0xff] (!%p140_p2)   ;;  %1967 = vmatprep.subr.bf16.mxu1 (!%p140_p2), %v3450_v0  ;;  %v3455_v3 = vld [vmem:[%s4938_s1 + $0x300] ss:$8 sps:$4 sm:$0xff] (!%p140_p2)   ;;  %vm1945_vm0 = vcmask (!%p140_p2), 523264  }
   0x7   : > { %2276 = vmatprep.subr.bf16.mxu0 (!%p140_p2), %v3452_v1  ;;  %1968 = vmatpush1.bf16.msra.mxu1 (!%p140_p2), %v3454_v2  ;;  %v3458_v5 = vld [vmem:[%s4938_s1 + $0x314] ss:$8 sps:$4 sm:$0xff] (!%p140_p2)   ;;  %v3460_v6 = vld [vmem:[%s4938_s1 + $0x10] ss:$8 sps:$4 sm:$0xff] (!%p140_p2)   ;;  %v3462_v8 = vld [vmem:[%s4938_s1 + $0x24] ss:$8 sps:$4 sm:$0xff] (!%p140_p2)  }
   0x8   : > { %2277 = vmatpush1.bf16.msra.mxu0 (!%p140_p2), %v3455_v3  ;;  %1969 = vmatprep.subr.bf16.mxu1 (!%p140_p2), %v3456_v4  ;;  %v3461_v7 = vld [vmem:[%s4938_s1 + $0x310] ss:$8 sps:$4 sm:$0xff] (!%p140_p2)   ;;  %v3464_v9 = vld [vmem:[%s4938_s1 + $0x324] ss:$8 sps:$4 sm:$0xff] (!%p140_p2)   ;;  %v3466_v10 = vld [vmem:[%s4938_s1 + $0x20] ss:$8 sps:$4 sm:$0xff] (!%p140_p2)  }
   0x9   : > { %2278 = vmatprep.subr.bf16.mxu0 (!%p140_p2), %v3458_v5  ;;  %v3467_v11 = vld [vmem:[%s4938_s1 + $0x320] ss:$8 sps:$4 sm:$0xff] (!%p140_p2)   ;;  %v3468_v12 = vld [vmem:[%s4938_s1 + $0x34] ss:$8 sps:$4 sm:$0xff] (!%p140_p2)   ;;  %v3472_v14 = vld [vmem:[%s4938_s1 + $0x30] ss:$8 sps:$4 sm:$0xff] (!%p140_p2)  }
   0xa   : > { %v3470_v13 = vld [vmem:[%s4938_s1 + $0x334] ss:$8 sps:$4 sm:$0xff] (!%p140_p2)   ;;  %v3473_v15 = vld [vmem:[%s4938_s1 + $0x330] ss:$8 sps:$4 sm:$0xff] (!%p140_p2)   ;;  %v3474_v16 = vld [vmem:[%s4938_s1 + $0x44] ss:$8 sps:$4 sm:$0xff] (!%p140_p2)  }
   0xb   : > { %1970 = vmatpush1.bf16.msra.mxu1 (!%p140_p2), %v3460_v6  ;;  %v3476_v17 = vld [vmem:[%s4938_s1 + $0x344] ss:$8 sps:$4 sm:$0xff] (!%p140_p2)   ;;  %v3478_v18 = vld [vmem:[%s4938_s1 + $0x40] ss:$8 sps:$4 sm:$0xff] (!%p140_p2)   ;;  %v3480_v20 = vld [vmem:[%s4938_s1 + $0x54] ss:$8 sps:$4 sm:$0xff] (!%p140_p2)  }
   0xc   : > { %2279 = vmatpush1.bf16.msra.mxu0 (!%p140_p2), %v3461_v7  ;;  %1971 = vmatprep.subr.bf16.mxu1 (!%p140_p2), %v3462_v8  ;;  %v3479_v19 = vld [vmem:[%s4938_s1 + $0x340] ss:$8 sps:$4 sm:$0xff] (!%p140_p2)   ;;  %v3482_v21 = vld [vmem:[%s4938_s1 + $0x354] ss:$8 sps:$4 sm:$0xff] (!%p140_p2)   ;;  %v3484_v22 = vld [vmem:[%s4938_s1 + $0x50] ss:$8 sps:$4 sm:$0xff] (!%p140_p2)  }
   0xd   : > { %2280 = vmatprep.subr.bf16.mxu0 %v3464_v9  ;;  %v3485_v23 = vld [vmem:[%s4938_s1 + $0x350] ss:$8 sps:$4 sm:$0xff]   ;;  %v3486_v24 = vld [vmem:[%s4938_s1 + $0x64] ss:$8 sps:$4 sm:$0xff]   ;;  %v3490_v26 = vld [vmem:[%s4938_s1 + $0x60] ss:$8 sps:$4 sm:$0xff]  }
   0xe   : > { %v3488_v25 = vld [vmem:[%s4938_s1 + $0x364] ss:$8 sps:$4 sm:$0xff]   ;;  %v3491_v27 = vld [vmem:[%s4938_s1 + $0x360] ss:$8 sps:$4 sm:$0xff]   ;;  %v3492_v28 = vld [vmem:[%s4938_s1 + $0x74] ss:$8 sps:$4 sm:$0xff]  }
   0xf   : > { %1972 = vmatpush1.bf16.msra.mxu1 %v3466_v10  ;;  %s165_s22 = smul.u32 14, %s2875_s13  ;;  %v3494_v29 = vld [vmem:[%s4938_s1 + $0x374] ss:$8 sps:$4 sm:$0xff]   ;;  %v3496_v30 = vld [vmem:[%s4938_s1 + $0x70] ss:$8 sps:$4 sm:$0xff]   ;;  %vm2800_vm1 = vcmask 1043456  }
  0x10   : > { %2281 = vmatpush1.bf16.msra.mxu0 %v3467_v11  ;;  %1973 = vmatprep.subr.bf16.mxu1 %v3468_v12  ;;  %v3497_v31 = vld [vmem:[%s4938_s1 + $0x370] ss:$8 sps:$4 sm:$0xff]   ;;  %v3498_v32 = vld [vmem:[%s4938_s1 + $0x84] ss:$8 sps:$4 sm:$0xff]   ;;  %v3502_v34 = vld [vmem:[%s4938_s1 + $0x80] ss:$8 sps:$4 sm:$0xff]  }
  0x11   : > { %2282 = vmatprep.subr.bf16.mxu0 %v3470_v13  ;;  %p166_p3 = scmp.lt.s32.totalorder %s165_s22, 27  ;;  %v3500_v33 = vld [vmem:[%s4938_s1 + $0x384] ss:$8 sps:$4 sm:$0xff]   ;;  %v3503_v35 = vld [vmem:[%s4938_s1 + $0x380] ss:$8 sps:$4 sm:$0xff]   ;;  %vm2801_vm2 = vcmask 523268  }
  0x12   : > { %v3504_v36 = vld [vmem:[%s4938_s1 + $0x94] ss:$8 sps:$4 sm:$0xff]   ;;  %v3508_v38 = vld [vmem:[%s4938_s1 + $0x90] ss:$8 sps:$4 sm:$0xff]   ;;  %v3510_v40 = vld [vmem:[%s4938_s1 + $0xa4] ss:$8 sps:$4 sm:$0xff]  }
  0x13   : > { %1974 = vmatpush1.bf16.msra.mxu1 %v3472_v14  ;;  %s4944_s22 = smov (!%p166_p3, %s165_s22), 27  ;;  %v3506_v37 = vld [vmem:[%s4938_s1 + $0x394] ss:$8 sps:$4 sm:$0xff]   ;;  %v3509_v39 = vld [vmem:[%s4938_s1 + $0x390] ss:$8 sps:$4 sm:$0xff]   ;;  %vm4818_vm3 = vmor %vm2801_vm2, %vm2800_vm1 }
  0x14   : > { %2283 = vmatpush1.bf16.msra.mxu0 %v3473_v15  ;;  %1975 = vmatprep.subr.bf16.mxu1 %v3474_v16  ;;  %s3440_s21 = smul.u32 52, %s4944_s22  ;;  %v3512_v41 = vld [vmem:[%s4938_s1 + $0x3a4] ss:$8 sps:$4 sm:$0xff]   ;;  %v3514_v42 = vld [vmem:[%s4938_s1 + $0xa0] ss:$8 sps:$4 sm:$0xff]   ;;  %s3197_s4 = sshll.u32 %s4944_s22, 3 }
  0x15   : > { %2284 = vmatprep.subr.bf16.mxu0 %v3476_v17  ;;  %v3515_v43 = vld [vmem:[%s4938_s1 + $0x3a0] ss:$8 sps:$4 sm:$0xff]   ;;  %v3516_v44 = vld [vmem:[%s4938_s1 + $0xb4] ss:$8 sps:$4 sm:$0xff]   ;;  %v3520_v46 = vld [vmem:[%s4938_s1 + $0xb0] ss:$8 sps:$4 sm:$0xff]   ;;  %s4815_s7 = scalar_lea.vmem %s4940_s3, %s3197_s4 }
  0x16   : > { %s4063_s5 = scalar_lea.vmem %s4937_s0, %s3440_s21  ;;  %v3518_v45 = vld [vmem:[%s4938_s1 + $0x3b4] ss:$8 sps:$4 sm:$0xff]   ;;  %v3521_v47 = vld [vmem:[%s4938_s1 + $0x3b0] ss:$8 sps:$4 sm:$0xff]   ;;  %v3522_v49 = vld [vmem:[%s4938_s1 + $0xc4] ss:$8 sps:$4 sm:$0xff]  }
  0x17   : > { %1976 = vmatpush1.bf16.msra.mxu1 %v3478_v18  ;;  %v3548_v48 = vld [vmem:[%s4063_s5 + $0x4] ss:$52 sps:$4 sm:$0xff]   ;;  %v3554_v51 = vld [vmem:[%s4063_s5 + $0x1c] ss:$52 sps:$4 sm:$0xff]   ;;  %v3526_v52 = vld [vmem:[%s4938_s1 + $0xc0] ss:$8 sps:$4 sm:$0xff]  }
  0x18   : > { %2285 = vmatpush1.bf16.msra.mxu0 %v3479_v19  ;;  %1977 = vmatprep.subr.bf16.mxu1 %v3480_v20  ;;  %v3524_v50 = vld [vmem:[%s4938_s1 + $0x3c4] ss:$8 sps:$4 sm:$0xff]   ;;  %v3527_v53 = vld [vmem:[%s4938_s1 + $0x3c0] ss:$8 sps:$4 sm:$0xff]   ;;  %v3528_v54 = vld [vmem:[%s4938_s1 + $0xd4] ss:$8 sps:$4 sm:$0xff]  }
  0x19   : > { %2286 = vmatprep.subr.bf16.mxu0 %v3482_v21  ;;  %1999 = vmatprep.mubr.bf16.mxu1 %v3548_v48  ;;  %v3530_v55 = vld [vmem:[%s4938_s1 + $0x3d4] ss:$8 sps:$4 sm:$0xff]   ;;  %v3532_v56 = vld [vmem:[%s4938_s1 + $0xd0] ss:$8 sps:$4 sm:$0xff]   ;;  %v3534_v58 = vld [vmem:[%s4938_s1 + $0xe4] ss:$8 sps:$4 sm:$0xff]  }
  0x1a   : > { %2308 = vmatprep.mubr.bf16.mxu0 %v3554_v51  ;;  %v3533_v57 = vld [vmem:[%s4938_s1 + $0x3d0] ss:$8 sps:$4 sm:$0xff]   ;;  %v3536_v59 = vld [vmem:[%s4938_s1 + $0x3e4] ss:$8 sps:$4 sm:$0xff]   ;;  %v3538_v60 = vld [vmem:[%s4938_s1 + $0xe0] ss:$8 sps:$4 sm:$0xff]  }
  0x1b   : > { %1978 = vmatpush1.bf16.msra.mxu1 %v3484_v22  ;;  %v3539_v61 = vld [vmem:[%s4938_s1 + $0x3e0] ss:$8 sps:$4 sm:$0xff]   ;;  %v3540_v62 = vld [vmem:[%s4938_s1 + $0xf4] ss:$8 sps:$4 sm:$0xff]   ;;  %v3544_v0 = vld [vmem:[%s4938_s1 + $0xf0] ss:$8 sps:$4 sm:$0xff]  }
  0x1c   : > { %2287 = vmatpush1.bf16.msra.mxu0 %v3485_v23  ;;  %1979 = vmatprep.subr.bf16.mxu1 %v3486_v24  ;;  %v3542_v63 = vld [vmem:[%s4938_s1 + $0x3f4] ss:$8 sps:$4 sm:$0xff]   ;;  %v3545_v1 = vld [vmem:[%s4938_s1 + $0x3f0] ss:$8 sps:$4 sm:$0xff]   ;;  %v3551_v2 = vld [vmem:[%s4938_s1 + $0x104] ss:$8 sps:$4 sm:$0xff]  }
  0x1d   : > { %2288 = vmatprep.subr.bf16.mxu0 %v3488_v25  ;;  %v3546_v3 = vld [vmem:[%s4063_s5] ss:$52 sps:$4 sm:$0xff]   ;;  %v3557_v4 = vld [vmem:[%s4938_s1 + $0x404] ss:$8 sps:$4 sm:$0xff]   ;;  %v3558_v12 = vld [vmem:[%s4938_s1 + $0x110] ss:$8 sps:$4 sm:$0xff]  }
  0x1e   : > { %v3549_v5 = vld [vmem:[%s4938_s1 + $0x100] ss:$8 sps:$4 sm:$0xff]   ;;  %v3552_v6 = vld [vmem:[%s4063_s5 + $0x18] ss:$52 sps:$4 sm:$0xff]   ;;  %v3560_v8 = vld [vmem:[%s4938_s1 + $0x114] ss:$8 sps:$4 sm:$0xff]  }
  0x1f   : > { %1980 = vmatpush1.bf16.msra.mxu1 %v3490_v26  ;;  %v3555_v7 = vld [vmem:[%s4938_s1 + $0x400] ss:$8 sps:$4 sm:$0xff]   ;;  %v3563_v9 = vld [vmem:[%s4938_s1 + $0x414] ss:$8 sps:$4 sm:$0xff]   ;;  %v3576_v10 = vld [vmem:[%s4063_s5 + $0x84] ss:$52 sps:$4 sm:$0xff]  }
  0x20   : > { %2289 = vmatpush1.bf16.msra.mxu0 %v3491_v27  ;;  %1981 = vmatprep.subr.bf16.mxu1 %v3492_v28  ;;  %v3578_v11 = vld [vmem:[%s4063_s5 + $0x6c] ss:$52 sps:$4 sm:$0xff]   ;;  %v3561_v13 = vld [vmem:[%s4938_s1 + $0x410] ss:$8 sps:$4 sm:$0xff]   ;;  %v3572_v18 = vld [vmem:[%s4938_s1 + $0x134] ss:$8 sps:$4 sm:$0xff]  }
  0x21   : > { %2290 = vmatprep.subr.bf16.mxu0 %v3494_v29  ;;  %v3566_v14 = vld [vmem:[%s4938_s1 + $0x124] ss:$8 sps:$4 sm:$0xff]   ;;  %v3564_v16 = vld [vmem:[%s4938_s1 + $0x120] ss:$8 sps:$4 sm:$0xff]   ;;  %v3575_v21 = vld [vmem:[%s4938_s1 + $0x434] ss:$8 sps:$4 sm:$0xff]  }
  0x22   : > { %v3569_v15 = vld [vmem:[%s4938_s1 + $0x424] ss:$8 sps:$4 sm:$0xff]   ;;  %v3567_v17 = vld [vmem:[%s4938_s1 + $0x420] ss:$8 sps:$4 sm:$0xff]   ;;  %v3570_v24 = vld [vmem:[%s4938_s1 + $0x130] ss:$8 sps:$4 sm:$0xff]  }
  0x23   : > { %1982 = vmatpush1.bf16.msra.mxu1 %v3496_v30  ;;  %v3583_v19 = vld [vmem:[%s4063_s5 + $0x80] ss:$52 sps:$4 sm:$0xff]   ;;  %v3587_v20 = vld [vmem:[%s4063_s5 + $0x68] ss:$52 sps:$4 sm:$0xff]   ;;  %v3573_v25 = vld [vmem:[%s4938_s1 + $0x430] ss:$8 sps:$4 sm:$0xff]  }
  0x24   : > { %2291 = vmatpush1.bf16.msra.mxu0 %v3497_v31  ;;  %1983 = vmatprep.subr.bf16.mxu1 %v3498_v32  ;;  %v3594_v22 = vld [vmem:[%s4063_s5 + $0xec] ss:$52 sps:$4 sm:$0xff]   ;;  %v3596_v23 = vld [vmem:[%s4063_s5 + $0xd4] ss:$52 sps:$4 sm:$0xff]   ;;  %v3605_v32 = vld [vmem:[%s4063_s5 + $0xd0] ss:$52 sps:$4 sm:$0xff]  }
  0x25   : > { %2292 = vmatprep.subr.bf16.mxu0 %v3500_v33  ;;  %v3582_v26 = vld [vmem:[%s4938_s1 + $0x144] ss:$8 sps:$4 sm:$0xff]   ;;  %v3580_v28 = vld [vmem:[%s4938_s1 + $0x140] ss:$8 sps:$4 sm:$0xff]   ;;  %v3590_v30 = vld [vmem:[%s4938_s1 + $0x154] ss:$8 sps:$4 sm:$0xff]  }
  0x26   : > { %v3586_v27 = vld [vmem:[%s4938_s1 + $0x444] ss:$8 sps:$4 sm:$0xff]   ;;  %v3584_v29 = vld [vmem:[%s4938_s1 + $0x440] ss:$8 sps:$4 sm:$0xff]   ;;  %v3593_v33 = vld [vmem:[%s4938_s1 + $0x454] ss:$8 sps:$4 sm:$0xff]  }
  0x27   : > { %1984 = vmatpush1.bf16.msra.mxu1 %v3502_v34  ;;  %v3601_v31 = vld [vmem:[%s4063_s5 + $0xe8] ss:$52 sps:$4 sm:$0xff]   ;;  %v3606_v48 = vld [vmem:[%s4938_s1 + $0x170] ss:$8 sps:$4 sm:$0xff]   ;;  %v3622_v51 = vld [vmem:[%s4938_s1 + $0x484] ss:$8 sps:$4 sm:$0xff]  }
  0x28   : > { %2293 = vmatpush1.bf16.msra.mxu0 %v3503_v35  ;;  %1985 = vmatprep.subr.bf16.mxu1 %v3504_v36  ;;  %v3612_v34 = vld [vmem:[%s4063_s5 + $0x154] ss:$52 sps:$4 sm:$0xff]   ;;  %v3614_v35 = vld [vmem:[%s4063_s5 + $0x13c] ss:$52 sps:$4 sm:$0xff]  }
  0x29   : > { %2294 = vmatprep.subr.bf16.mxu0 %v3506_v37  ;;  %v3588_v36 = vld [vmem:[%s4938_s1 + $0x150] ss:$8 sps:$4 sm:$0xff]  }
  0x2a   : > { %v3591_v37 = vld [vmem:[%s4938_s1 + $0x450] ss:$8 sps:$4 sm:$0xff]  }
  0x2b   : > { %1986 = vmatpush1.bf16.msra.mxu1 %v3508_v38  ;;  %v3600_v38 = vld [vmem:[%s4938_s1 + $0x164] ss:$8 sps:$4 sm:$0xff]  }
  0x2c   : > { %2295 = vmatpush1.bf16.msra.mxu0 %v3509_v39  ;;  %1987 = vmatprep.subr.bf16.mxu1 %v3510_v40  ;;  %v3604_v39 = vld [vmem:[%s4938_s1 + $0x464] ss:$8 sps:$4 sm:$0xff]   ;;  %v3598_v40 = vld [vmem:[%s4938_s1 + $0x160] ss:$8 sps:$4 sm:$0xff]  }
  0x2d   : > { %2296 = vmatprep.subr.bf16.mxu0 %v3512_v41  ;;  %v3602_v41 = vld [vmem:[%s4938_s1 + $0x460] ss:$8 sps:$4 sm:$0xff]  }
  0x2f   : > { %1988 = vmatpush1.bf16.msra.mxu1 %v3514_v42  ;;  %v3608_v42 = vld [vmem:[%s4938_s1 + $0x174] ss:$8 sps:$4 sm:$0xff]  }
  0x30   : > { %2297 = vmatpush1.bf16.msra.mxu0 %v3515_v43  ;;  %1989 = vmatprep.subr.bf16.mxu1 %v3516_v44  ;;  %v3619_v43 = vld [vmem:[%s4063_s5 + $0x150] ss:$52 sps:$4 sm:$0xff]   ;;  %v3623_v44 = vld [vmem:[%s4063_s5 + $0x138] ss:$52 sps:$4 sm:$0xff]  }
  0x31   : > { %2298 = vmatprep.subr.bf16.mxu0 %v3518_v45  ;;  %v3611_v45 = vld [vmem:[%s4938_s1 + $0x474] ss:$8 sps:$4 sm:$0xff]  }
  0x33   : > { %1990 = vmatpush1.bf16.msra.mxu1 %v3520_v46  ;;  %v3630_v46 = vld [vmem:[%s4063_s5 + $0x1bc] ss:$52 sps:$4 sm:$0xff]  }
  0x34   : > { %2299 = vmatpush1.bf16.msra.mxu0 %v3521_v47  ;;  %1991 = vmatprep.subr.bf16.mxu1 %v3522_v49  ;;  %v3632_v47 = vld [vmem:[%s4063_s5 + $0x1a4] ss:$52 sps:$4 sm:$0xff]  }
  0x35   : > { %2300 = vmatprep.subr.bf16.mxu0 %v3524_v50  ;;  %v3609_v49 = vld [vmem:[%s4938_s1 + $0x470] ss:$8 sps:$4 sm:$0xff]   ;;  %v3618_v50 = vld [vmem:[%s4938_s1 + $0x184] ss:$8 sps:$4 sm:$0xff]  }
  0x37   : > { %1992 = vmatpush1.bf16.msra.mxu1 %v3526_v52  ;;  %v3616_v52 = vld [vmem:[%s4938_s1 + $0x180] ss:$8 sps:$4 sm:$0xff]  }
  0x38   : > { %2301 = vmatpush1.bf16.msra.mxu0 %v3527_v53  ;;  %1993 = vmatprep.subr.bf16.mxu1 %v3528_v54  ;;  %v3620_v53 = vld [vmem:[%s4938_s1 + $0x480] ss:$8 sps:$4 sm:$0xff]   ;;  %v3626_v54 = vld [vmem:[%s4938_s1 + $0x194] ss:$8 sps:$4 sm:$0xff]  }
  0x39   : > { %2302 = vmatprep.subr.bf16.mxu0 %v3530_v55  ;;  %v3637_v55 = vld [vmem:[%s4063_s5 + $0x1b8] ss:$52 sps:$4 sm:$0xff]  }
  0x3b   : > { %1994 = vmatpush1.bf16.msra.mxu1 %v3532_v56  ;;  %v3641_v56 = vld [vmem:[%s4063_s5 + $0x1a0] ss:$52 sps:$4 sm:$0xff]  }
  0x3c   : > { %2303 = vmatpush1.bf16.msra.mxu0 %v3533_v57  ;;  %1995 = vmatprep.subr.bf16.mxu1 %v3534_v58  ;;  %v3629_v57 = vld [vmem:[%s4938_s1 + $0x494] ss:$8 sps:$4 sm:$0xff]   ;;  %v3648_v58 = vld [vmem:[%s4063_s5 + $0x224] ss:$52 sps:$4 sm:$0xff]  }
  0x3d   : > { %2304 = vmatprep.subr.bf16.mxu0 %v3536_v59  ;;  %v3650_v59 = vld [vmem:[%s4063_s5 + $0x20c] ss:$52 sps:$4 sm:$0xff]  }
  0x3f   : > { %1996 = vmatpush1.bf16.msra.mxu1 %v3538_v60  ;;  %v3624_v60 = vld [vmem:[%s4938_s1 + $0x190] ss:$8 sps:$4 sm:$0xff]  }
  0x40   : > { %2305 = vmatpush1.bf16.msra.mxu0 %v3539_v61  ;;  %1997 = vmatprep.subr.bf16.mxu1 %v3540_v62  ;;  %v3627_v61 = vld [vmem:[%s4938_s1 + $0x490] ss:$8 sps:$4 sm:$0xff]   ;;  %v3636_v62 = vld [vmem:[%s4938_s1 + $0x1a4] ss:$8 sps:$4 sm:$0xff]  }
  0x41   : > { %2306 = vmatprep.subr.bf16.mxu0 %v3542_v63  ;;  %v3640_v63 = vld [vmem:[%s4938_s1 + $0x4a4] ss:$8 sps:$4 sm:$0xff]  }
  0x43   : > { %1998 = vmatpush1.bf16.msra.mxu1 %v3544_v0  ;;  %v3634_v0 = vld [vmem:[%s4938_s1 + $0x1a0] ss:$8 sps:$4 sm:$0xff]  }
  0x44   : > { %2307 = vmatpush1.bf16.msra.mxu0 %v3545_v1  ;;  %2070 = vmatprep.subr.bf16.mxu1 %v3551_v2  ;;  %v3638_v1 = vld [vmem:[%s4938_s1 + $0x4a0] ss:$8 sps:$4 sm:$0xff]  }
  0x45   : > { %2379 = vmatprep.subr.bf16.mxu0 %v3557_v4  ;;  %v3655_v2 = vld [vmem:[%s4063_s5 + $0x220] ss:$52 sps:$4 sm:$0xff]  }
  0x46   : > { %2000 = vmatmul.mubr.bf16.vlgmr.msra.gmra.mrb[0].mxu1 %v3546_v3  ;;  %v3659_v3 = vld [vmem:[%s4063_s5 + $0x208] ss:$52 sps:$4 sm:$0xff]  }
  0x47   : > { %2309 = vmatmul.mubr.bf16.vlgmr.msra.gmra.mrb[0].mxu0 %v3552_v6  ;;  %2071 = vmatpush1.bf16.msra.mxu1 %v3549_v5  ;;  %v3644_v4 = vld [vmem:[%s4938_s1 + $0x1b4] ss:$8 sps:$4 sm:$0xff]   ;;  %v3666_v6 = vld [vmem:[%s4063_s5 + $0x28c] ss:$52 sps:$4 sm:$0xff]  }
  0x48   : > { %2380 = vmatpush1.bf16.msra.mxu0 %v3555_v7  ;;  %2072 = vmatprep.subr.bf16.mxu1 %v3560_v8  ;;  %v3647_v5 = vld [vmem:[%s4938_s1 + $0x4b4] ss:$8 sps:$4 sm:$0xff]   ;;  %v3642_v8 = vld [vmem:[%s4938_s1 + $0x1b0] ss:$8 sps:$4 sm:$0xff]  }
  0x49   : > { %2381 = vmatprep.subr.bf16.mxu0 %v3563_v9  ;;  %2318 = vmatprep.mubr.bf16.mxu0 %v3576_v10  ;;  %v3668_v7 = vld [vmem:[%s4063_s5 + $0x274] ss:$52 sps:$4 sm:$0xff]   ;;  %v3645_v9 = vld [vmem:[%s4938_s1 + $0x4b0] ss:$8 sps:$4 sm:$0xff]   ;;  %v3654_v10 = vld [vmem:[%s4938_s1 + $0x1c4] ss:$8 sps:$4 sm:$0xff]  }
  0x4a   : > { %2009 = vmatprep.mubr.bf16.mxu1 %v3578_v11  ;;  %v3658_v11 = vld [vmem:[%s4938_s1 + $0x4c4] ss:$8 sps:$4 sm:$0xff]  }
  0x4b   : > { %2073 = vmatpush1.bf16.msra.mxu1 %v3558_v12  ;;  %v3652_v12 = vld [vmem:[%s4938_s1 + $0x1c0] ss:$8 sps:$4 sm:$0xff]  }
  0x4c   : > { %2382 = vmatpush1.bf16.msra.mxu0 %v3561_v13  ;;  %2074 = vmatprep.subr.bf16.mxu1 %v3566_v14  ;;  %v3656_v13 = vld [vmem:[%s4938_s1 + $0x4c0] ss:$8 sps:$4 sm:$0xff]  }
  0x4d   : > { %2383 = vmatprep.subr.bf16.mxu0 %v3569_v15  ;;  %v3673_v14 = vld [vmem:[%s4063_s5 + $0x288] ss:$52 sps:$4 sm:$0xff]   ;;  %v3677_v15 = vld [vmem:[%s4063_s5 + $0x270] ss:$52 sps:$4 sm:$0xff]  }
  0x4e   : > { %2010 = vmatmul.mubr.bf16.gmra.mrb[4].mxu1 %v3587_v20  ;;  %v3660_v20 = vld [vmem:[%s4938_s1 + $0x1d0] ss:$8 sps:$4 sm:$0xff]  }
  0x4f   : > { %2319 = vmatmul.mubr.bf16.gmra.mrb[4].mxu0 %v3583_v19  ;;  %2075 = vmatpush1.bf16.msra.mxu1 %v3564_v16  ;;  %v3662_v16 = vld [vmem:[%s4938_s1 + $0x1d4] ss:$8 sps:$4 sm:$0xff]   ;;  %v3689_v19 = vld [vmem:[%s4063_s5 + $0xc] ss:$52 sps:$4 sm:$0xff]  }
  0x50   : > { %2384 = vmatpush1.bf16.msra.mxu0 %v3567_v17  ;;  %2076 = vmatprep.subr.bf16.mxu1 %v3572_v18  ;;  %v3665_v17 = vld [vmem:[%s4938_s1 + $0x4d4] ss:$8 sps:$4 sm:$0xff]   ;;  %v3686_v18 = vld [vmem:[%s4063_s5 + $0x24] ss:$52 sps:$4 sm:$0xff]  }
  0x51   : > { %2385 = vmatprep.subr.bf16.mxu0 %v3575_v21  ;;  %2328 = vmatprep.mubr.bf16.mxu0 %v3594_v22  ;;  %v3663_v21 = vld [vmem:[%s4938_s1 + $0x4d0] ss:$8 sps:$4 sm:$0xff]   ;;  %v3672_v22 = vld [vmem:[%s4938_s1 + $0x1e4] ss:$8 sps:$4 sm:$0xff]  }
  0x52   : > { %2019 = vmatprep.mubr.bf16.mxu1 %v3596_v23  ;;  %v3676_v23 = vld [vmem:[%s4938_s1 + $0x4e4] ss:$8 sps:$4 sm:$0xff]  }
  0x53   : > { %2077 = vmatpush1.bf16.msra.mxu1 %v3570_v24  ;;  %v3670_v24 = vld [vmem:[%s4938_s1 + $0x1e0] ss:$8 sps:$4 sm:$0xff]  }
  0x54   : > { %2386 = vmatpush1.bf16.msra.mxu0 %v3573_v25  ;;  %2078 = vmatprep.subr.bf16.mxu1 %v3582_v26  ;;  %v3674_v25 = vld [vmem:[%s4938_s1 + $0x4e0] ss:$8 sps:$4 sm:$0xff]   ;;  %v3680_v26 = vld [vmem:[%s4938_s1 + $0x1f4] ss:$8 sps:$4 sm:$0xff]  }
  0x55   : > { %2387 = vmatprep.subr.bf16.mxu0 %v3586_v27  ;;  %v3683_v27 = vld [vmem:[%s4938_s1 + $0x4f4] ss:$8 sps:$4 sm:$0xff]  }
  0x56   : > { %2020 = vmatmul.mubr.bf16.gmra.mrb[8].mxu1 %v3605_v32  ;;  %v3684_v32 = vld [vmem:[%s4063_s5 + $0x20] ss:$52 sps:$4 sm:$0xff]  }
  0x57   : > { %2329 = vmatmul.mubr.bf16.gmra.mrb[8].mxu0 %v3601_v31  ;;  %2079 = vmatpush1.bf16.msra.mxu1 %v3580_v28  ;;  %v3678_v28 = vld [vmem:[%s4938_s1 + $0x1f0] ss:$8 sps:$4 sm:$0xff]   ;;  %v4350_v31 = vld [vmem:[%s4938_s1 + $0x504] ss:$8 sps:$4 sm:$0xff]  }
  0x58   : > { %2388 = vmatpush1.bf16.msra.mxu0 %v3584_v29  ;;  %2080 = vmatprep.subr.bf16.mxu1 %v3590_v30  ;;  %v3681_v29 = vld [vmem:[%s4938_s1 + $0x4f0] ss:$8 sps:$4 sm:$0xff]   ;;  %v3692_v30 = vld [vmem:[%s4938_s1 + $0x204] ss:$8 sps:$4 sm:$0xff]  }
  0x59   : > { %2389 = vmatprep.subr.bf16.mxu0 %v3593_v33  ;;  %2338 = vmatprep.mubr.bf16.mxu0 %v3612_v34  ;;  %v3687_v33 = vld [vmem:[%s4063_s5 + $0x8] ss:$52 sps:$4 sm:$0xff]  }
  0x5a   : > { %2029 = vmatprep.mubr.bf16.mxu1 %v3614_v35  ;;  %v3690_v34 = vld [vmem:[%s4938_s1 + $0x200] ss:$8 sps:$4 sm:$0xff]  }
  0x5b   : > { %2081 = vmatpush1.bf16.msra.mxu1 %v3588_v36  ;;  %v4360_v35 = vld [vmem:[%s4938_s1 + $0x500] ss:$8 sps:$4 sm:$0xff]   ;;  %v3698_v36 = vld [vmem:[%s4938_s1 + $0x214] ss:$8 sps:$4 sm:$0xff]  }
  0x5c   : > { %2390 = vmatpush1.bf16.msra.mxu0 %v3591_v37  ;;  %2082 = vmatprep.subr.bf16.mxu1 %v3600_v38  ;;  %v4369_v37 = vld [vmem:[%s4938_s1 + $0x514] ss:$8 sps:$4 sm:$0xff]   ;;  %v3702_v38 = vld [vmem:[%s4063_s5 + $0x8c] ss:$52 sps:$4 sm:$0xff]  }
  0x5d   : > { %2391 = vmatprep.subr.bf16.mxu0 %v3604_v39  ;;  %v3717_v39 = vld [vmem:[%s4063_s5 + $0x74] ss:$52 sps:$4 sm:$0xff]  }
  0x5e   : > { %2030 = vmatmul.mubr.bf16.gmra.mrb[12].mxu1 %v3623_v44  ;;  %v3704_v44 = vld [vmem:[%s4938_s1 + $0x220] ss:$8 sps:$4 sm:$0xff]  }
  0x5f   : > { %2339 = vmatmul.mubr.bf16.gmra.mrb[12].mxu0 %v3619_v43  ;;  %2083 = vmatpush1.bf16.msra.mxu1 %v3598_v40  ;;  %v3696_v40 = vld [vmem:[%s4938_s1 + $0x210] ss:$8 sps:$4 sm:$0xff]   ;;  %v4389_v43 = vld [vmem:[%s4938_s1 + $0x524] ss:$8 sps:$4 sm:$0xff]  }
  0x60   : > { %2392 = vmatpush1.bf16.msra.mxu0 %v3602_v41  ;;  %2084 = vmatprep.subr.bf16.mxu1 %v3608_v42  ;;  %v4379_v41 = vld [vmem:[%s4938_s1 + $0x510] ss:$8 sps:$4 sm:$0xff]   ;;  %v3706_v42 = vld [vmem:[%s4938_s1 + $0x224] ss:$8 sps:$4 sm:$0xff]  }
  0x61   : > { %2393 = vmatprep.subr.bf16.mxu0 %v3611_v45  ;;  %2348 = vmatprep.mubr.bf16.mxu0 %v3630_v46  ;;  %v3707_v45 = vld [vmem:[%s4063_s5 + $0x88] ss:$52 sps:$4 sm:$0xff]   ;;  %v3721_v46 = vld [vmem:[%s4063_s5 + $0x70] ss:$52 sps:$4 sm:$0xff]  }
  0x62   : > { %2039 = vmatprep.mubr.bf16.mxu1 %v3632_v47  ;;  %v4400_v47 = vld [vmem:[%s4938_s1 + $0x520] ss:$8 sps:$4 sm:$0xff]  }
  0x63   : > { %2085 = vmatpush1.bf16.msra.mxu1 %v3606_v48  ;;  %v3713_v48 = vld [vmem:[%s4938_s1 + $0x234] ss:$8 sps:$4 sm:$0xff]  }
  0x64   : > { %2394 = vmatpush1.bf16.msra.mxu0 %v3609_v49  ;;  %2086 = vmatprep.subr.bf16.mxu1 %v3618_v50  ;;  %v4409_v49 = vld [vmem:[%s4938_s1 + $0x534] ss:$8 sps:$4 sm:$0xff]  }
  0x65   : > { %2395 = vmatprep.subr.bf16.mxu0 %v3622_v51  ;;  %v3719_v50 = vld [vmem:[%s4063_s5 + $0xf4] ss:$52 sps:$4 sm:$0xff]   ;;  %v3735_v51 = vld [vmem:[%s4063_s5 + $0xdc] ss:$52 sps:$4 sm:$0xff]  }
  0x66   : > { %2040 = vmatmul.mubr.bf16.gmra.mrb[16].mxu1 %v3641_v56  ;;  %v3722_v56 = vld [vmem:[%s4938_s1 + $0x240] ss:$8 sps:$4 sm:$0xff]  }
  0x67   : > { %2349 = vmatmul.mubr.bf16.gmra.mrb[16].mxu0 %v3637_v55  ;;  %2087 = vmatpush1.bf16.msra.mxu1 %v3616_v52  ;;  %v3711_v52 = vld [vmem:[%s4938_s1 + $0x230] ss:$8 sps:$4 sm:$0xff]   ;;  %v4429_v55 = vld [vmem:[%s4938_s1 + $0x544] ss:$8 sps:$4 sm:$0xff]  }
  0x68   : > { %2396 = vmatpush1.bf16.msra.mxu0 %v3620_v53  ;;  %2088 = vmatprep.subr.bf16.mxu1 %v3626_v54  ;;  %v4419_v53 = vld [vmem:[%s4938_s1 + $0x530] ss:$8 sps:$4 sm:$0xff]   ;;  %v3724_v54 = vld [vmem:[%s4938_s1 + $0x244] ss:$8 sps:$4 sm:$0xff]  }
  0x69   : > { %2397 = vmatprep.subr.bf16.mxu0 %v3629_v57  ;;  %2358 = vmatprep.mubr.bf16.mxu0 %v3648_v58  ;;  %v3725_v57 = vld [vmem:[%s4063_s5 + $0xf0] ss:$52 sps:$4 sm:$0xff]   ;;  %v3739_v58 = vld [vmem:[%s4063_s5 + $0xd8] ss:$52 sps:$4 sm:$0xff]  }
  0x6a   : > { %2049 = vmatprep.mubr.bf16.mxu1 %v3650_v59  ;;  %v4440_v59 = vld [vmem:[%s4938_s1 + $0x540] ss:$8 sps:$4 sm:$0xff]  }
  0x6b   : > { %2089 = vmatpush1.bf16.msra.mxu1 %v3624_v60  ;;  %v3731_v60 = vld [vmem:[%s4938_s1 + $0x254] ss:$8 sps:$4 sm:$0xff]  }
  0x6c   : > { %2398 = vmatpush1.bf16.msra.mxu0 %v3627_v61  ;;  %2090 = vmatprep.subr.bf16.mxu1 %v3636_v62  ;;  %v4449_v61 = vld [vmem:[%s4938_s1 + $0x554] ss:$8 sps:$4 sm:$0xff]  }
  0x6d   : > { %2399 = vmatprep.subr.bf16.mxu0 %v3640_v63  ;;  %v3737_v62 = vld [vmem:[%s4063_s5 + $0x15c] ss:$52 sps:$4 sm:$0xff]   ;;  %v3753_v63 = vld [vmem:[%s4063_s5 + $0x144] ss:$52 sps:$4 sm:$0xff]  }
  0x6e   : > { %2050 = vmatmul.mubr.bf16.gmra.mrb[20].mxu1 %v3659_v3  ;;  %v4469_v3 = vld [vmem:[%s4938_s1 + $0x564] ss:$8 sps:$4 sm:$0xff]  }
  0x6f   : > { %2359 = vmatmul.mubr.bf16.gmra.mrb[20].mxu0 %v3655_v2  ;;  %2091 = vmatpush1.bf16.msra.mxu1 %v3634_v0  ;;  %v3729_v0 = vld [vmem:[%s4938_s1 + $0x250] ss:$8 sps:$4 sm:$0xff]   ;;  %v3742_v2 = vld [vmem:[%s4938_s1 + $0x264] ss:$8 sps:$4 sm:$0xff]  }
  0x70   : > { %2400 = vmatpush1.bf16.msra.mxu0 %v3638_v1  ;;  %2092 = vmatprep.subr.bf16.mxu1 %v3644_v4  ;;  %v4459_v1 = vld [vmem:[%s4938_s1 + $0x550] ss:$8 sps:$4 sm:$0xff]   ;;  %v3740_v4 = vld [vmem:[%s4938_s1 + $0x260] ss:$8 sps:$4 sm:$0xff]  }
  0x71   : > { %2401 = vmatprep.subr.bf16.mxu0 %v3647_v5  ;;  %2368 = vmatprep.mubr.bf16.mxu0 %v3666_v6  ;;  %v3743_v5 = vld [vmem:[%s4063_s5 + $0x158] ss:$52 sps:$4 sm:$0xff]   ;;  %v3757_v6 = vld [vmem:[%s4063_s5 + $0x140] ss:$52 sps:$4 sm:$0xff]  }
  0x72   : > { %2059 = vmatprep.mubr.bf16.mxu1 %v3668_v7  ;;  %v4480_v7 = vld [vmem:[%s4938_s1 + $0x560] ss:$8 sps:$4 sm:$0xff]  }
  0x73   : > { %2093 = vmatpush1.bf16.msra.mxu1 %v3642_v8  ;;  %v3749_v8 = vld [vmem:[%s4938_s1 + $0x274] ss:$8 sps:$4 sm:$0xff]  }
  0x74   : > { %2402 = vmatpush1.bf16.msra.mxu0 %v3645_v9  ;;  %2094 = vmatprep.subr.bf16.mxu1 %v3654_v10  ;;  %v4489_v9 = vld [vmem:[%s4938_s1 + $0x574] ss:$8 sps:$4 sm:$0xff]   ;;  %v3755_v10 = vld [vmem:[%s4063_s5 + $0x1c4] ss:$52 sps:$4 sm:$0xff]  }
  0x75   : > { %2403 = vmatprep.subr.bf16.mxu0 %v3658_v11  ;;  %v3771_v11 = vld [vmem:[%s4063_s5 + $0x1ac] ss:$52 sps:$4 sm:$0xff]  }
  0x76   : > { %2060 = vmatmul.mubr.bf16.gmra.mrb[24].mxu1 %v3677_v15  ;;  %v4509_v15 = vld [vmem:[%s4938_s1 + $0x584] ss:$8 sps:$4 sm:$0xff]  }
  0x77   : > { %2369 = vmatmul.mubr.bf16.gmra.mrb[24].mxu0 %v3673_v14  ;;  %2095 = vmatpush1.bf16.msra.mxu1 %v3652_v12  ;;  %v3747_v12 = vld [vmem:[%s4938_s1 + $0x270] ss:$8 sps:$4 sm:$0xff]   ;;  %v3760_v14 = vld [vmem:[%s4938_s1 + $0x284] ss:$8 sps:$4 sm:$0xff]  }
  0x78   : > { %2404 = vmatpush1.bf16.msra.mxu0 %v3656_v13  ;;  %2096 = vmatprep.subr.bf16.mxu1 %v3662_v16  ;;  %v4499_v13 = vld [vmem:[%s4938_s1 + $0x570] ss:$8 sps:$4 sm:$0xff]   ;;  %v3758_v16 = vld [vmem:[%s4938_s1 + $0x280] ss:$8 sps:$4 sm:$0xff]  }
  0x79   : > { %2405 = vmatprep.subr.bf16.mxu0 %v3665_v17  ;;  %2411 = vmatprep.mubr.bf16.mxu0 %v3686_v18  ;;  %v3761_v17 = vld [vmem:[%s4063_s5 + $0x1c0] ss:$52 sps:$4 sm:$0xff]  }
  0x7a   : > { %2102 = vmatprep.mubr.bf16.mxu1 %v3689_v19  ;;  %v4518_v18 = vld [vmem:[%s4938_s1 + $0x580] ss:$8 sps:$4 sm:$0xff]  }
  0x7b   : > { %2097 = vmatpush1.bf16.msra.mxu1 %v3660_v20  ;;  %v3775_v19 = vld [vmem:[%s4063_s5 + $0x1a8] ss:$52 sps:$4 sm:$0xff]  }
  0x7c   : > { %2406 = vmatpush1.bf16.msra.mxu0 %v3663_v21  ;;  %2098 = vmatprep.subr.bf16.mxu1 %v3672_v22  ;;  %v3767_v20 = vld [vmem:[%s4938_s1 + $0x294] ss:$8 sps:$4 sm:$0xff]   ;;  %v3773_v22 = vld [vmem:[%s4063_s5 + $0x22c] ss:$52 sps:$4 sm:$0xff]  }
  0x7d   : > { %2407 = vmatprep.subr.bf16.mxu0 %v3676_v23  ;;  %v4529_v21 = vld [vmem:[%s4938_s1 + $0x594] ss:$8 sps:$4 sm:$0xff]  }
  0x7e   : > { %v3789_v23 = vld [vmem:[%s4063_s5 + $0x214] ss:$52 sps:$4 sm:$0xff]  }
  0x7f   : > { %2099 = vmatpush1.bf16.msra.mxu1 %v3670_v24  ;;  %v3765_v24 = vld [vmem:[%s4938_s1 + $0x290] ss:$8 sps:$4 sm:$0xff]  }
  0x80   : > { %2408 = vmatpush1.bf16.msra.mxu0 %v3674_v25  ;;  %2100 = vmatprep.subr.bf16.mxu1 %v3680_v26  ;;  %v4539_v25 = vld [vmem:[%s4938_s1 + $0x590] ss:$8 sps:$4 sm:$0xff]   ;;  %v3778_v26 = vld [vmem:[%s4938_s1 + $0x2a4] ss:$8 sps:$4 sm:$0xff]  }
  0x81   : > { %2409 = vmatprep.subr.bf16.mxu0 %v3683_v27  ;;  %v4549_v27 = vld [vmem:[%s4938_s1 + $0x5a4] ss:$8 sps:$4 sm:$0xff]  }
  0x83   : > { %2101 = vmatpush1.bf16.msra.mxu1 %v3678_v28  ;;  %v3776_v28 = vld [vmem:[%s4938_s1 + $0x2a0] ss:$8 sps:$4 sm:$0xff]  }
  0x84   : > { %2410 = vmatpush1.bf16.msra.mxu0 %v3681_v29  ;;  %2173 = vmatprep.subr.bf16.mxu1 %v3692_v30  ;;  %v3779_v29 = vld [vmem:[%s4063_s5 + $0x228] ss:$52 sps:$4 sm:$0xff]  }
  0x85   : > { %2482 = vmatprep.subr.bf16.mxu0 %v4350_v31  ;;  %v4558_v30 = vld [vmem:[%s4938_s1 + $0x5a0] ss:$8 sps:$4 sm:$0xff]  }
  0x86   : > { %2103 = vmatmul.mubr.bf16.vlgmr.msra.gmra.mrb[0].mxu1 %v3687_v33  ;;  %v3793_v33 = vld [vmem:[%s4063_s5 + $0x210] ss:$52 sps:$4 sm:$0xff]  }
  0x87   : > { %2412 = vmatmul.mubr.bf16.vlgmr.msra.gmra.mrb[0].mxu0 %v3684_v32  ;;  %2174 = vmatpush1.bf16.msra.mxu1 %v3690_v34  ;;  %v3785_v32 = vld [vmem:[%s4938_s1 + $0x2b4] ss:$8 sps:$4 sm:$0xff]  }
  0x88   : > { %2483 = vmatpush1.bf16.msra.mxu0 %v4360_v35  ;;  %2175 = vmatprep.subr.bf16.mxu1 %v3698_v36  ;;  %v4568_v34 = vld [vmem:[%s4938_s1 + $0x5b4] ss:$8 sps:$4 sm:$0xff]  }
  0x89   : > { %2484 = vmatprep.subr.bf16.mxu0 %v4369_v37  ;;  %2421 = vmatprep.mubr.bf16.mxu0 %v3702_v38  ;;  %v3791_v36 = vld [vmem:[%s4063_s5 + $0x294] ss:$52 sps:$4 sm:$0xff]   ;;  %v3807_v38 = vld [vmem:[%s4063_s5 + $0x27c] ss:$52 sps:$4 sm:$0xff]  }
  0x8a   : > { %2112 = vmatprep.mubr.bf16.mxu1 %v3717_v39  ;;  %v3783_v39 = vld [vmem:[%s4938_s1 + $0x2b0] ss:$8 sps:$4 sm:$0xff]  }
  0x8b   : > { %2176 = vmatpush1.bf16.msra.mxu1 %v3696_v40  ;;  %v4579_v40 = vld [vmem:[%s4938_s1 + $0x5b0] ss:$8 sps:$4 sm:$0xff]  }
  0x8c   : > { %2485 = vmatpush1.bf16.msra.mxu0 %v4379_v41  ;;  %2177 = vmatprep.subr.bf16.mxu1 %v3706_v42  ;;  %v3796_v42 = vld [vmem:[%s4938_s1 + $0x2c4] ss:$8 sps:$4 sm:$0xff]  }
  0x8d   : > { %2486 = vmatprep.subr.bf16.mxu0 %v4389_v43 }
  0x8e   : > { %2113 = vmatmul.mubr.bf16.gmra.mrb[4].mxu1 %v3721_v46  ;;  %v3797_v46 = vld [vmem:[%s4063_s5 + $0x290] ss:$52 sps:$4 sm:$0xff]  }
  0x8f   : > { %2422 = vmatmul.mubr.bf16.gmra.mrb[4].mxu0 %v3707_v45  ;;  %2178 = vmatpush1.bf16.msra.mxu1 %v3704_v44  ;;  %v4589_v44 = vld [vmem:[%s4938_s1 + $0x5c4] ss:$8 sps:$4 sm:$0xff]   ;;  %v3794_v45 = vld [vmem:[%s4938_s1 + $0x2c0] ss:$8 sps:$4 sm:$0xff]  }
  0x90   : > { %2487 = vmatpush1.bf16.msra.mxu0 %v4400_v47  ;;  %2179 = vmatprep.subr.bf16.mxu1 %v3713_v48  ;;  %v4598_v48 = vld [vmem:[%s4938_s1 + $0x5c0] ss:$8 sps:$4 sm:$0xff]  }
  0x91   : > { %2488 = vmatprep.subr.bf16.mxu0 %v4409_v49  ;;  %2431 = vmatprep.mubr.bf16.mxu0 %v3719_v50  ;;  %v3803_v50 = vld [vmem:[%s4938_s1 + $0x2d4] ss:$8 sps:$4 sm:$0xff]  }
  0x92   : > { %2122 = vmatprep.mubr.bf16.mxu1 %v3735_v51  ;;  %v3809_v51 = vld [vmem:[%s4063_s5 + $0x278] ss:$52 sps:$4 sm:$0xff]  }
  0x93   : > { %2180 = vmatpush1.bf16.msra.mxu1 %v3711_v52  ;;  %v4608_v52 = vld [vmem:[%s4938_s1 + $0x5d4] ss:$8 sps:$4 sm:$0xff]  }
  0x94   : > { %2489 = vmatpush1.bf16.msra.mxu0 %v4419_v53  ;;  %2181 = vmatprep.subr.bf16.mxu1 %v3724_v54  ;;  %v3824_v54 = vld [vmem:[%s4063_s5 + $0x14] ss:$52 sps:$4 sm:$0xff]  }
  0x95   : > { %2490 = vmatprep.subr.bf16.mxu0 %v4429_v55 }
  0x96   : > { %2123 = vmatmul.mubr.bf16.gmra.mrb[8].mxu1 %v3739_v58  ;;  %v4619_v58 = vld [vmem:[%s4938_s1 + $0x5d0] ss:$8 sps:$4 sm:$0xff]  }
  0x97   : > { %2432 = vmatmul.mubr.bf16.gmra.mrb[8].mxu0 %v3725_v57  ;;  %2182 = vmatpush1.bf16.msra.mxu1 %v3722_v56  ;;  %v3827_v56 = vld [vmem:[%s4063_s5 + $0x2c] ss:$52 sps:$4 sm:$0xff]   ;;  %v3801_v57 = vld [vmem:[%s4938_s1 + $0x2d0] ss:$8 sps:$4 sm:$0xff]  }
  0x98   : > { %2491 = vmatpush1.bf16.msra.mxu0 %v4440_v59  ;;  %2183 = vmatprep.subr.bf16.mxu1 %v3731_v60  ;;  %v3812_v60 = vld [vmem:[%s4938_s1 + $0x2e4] ss:$8 sps:$4 sm:$0xff]  }
  0x99   : > { %2492 = vmatprep.subr.bf16.mxu0 %v4449_v61  ;;  %2441 = vmatprep.mubr.bf16.mxu0 %v3737_v62  ;;  %v4629_v62 = vld [vmem:[%s4938_s1 + $0x5e4] ss:$8 sps:$4 sm:$0xff]  }
  0x9a   : > { %2132 = vmatprep.mubr.bf16.mxu1 %v3753_v63  ;;  %v3810_v63 = vld [vmem:[%s4938_s1 + $0x2e0] ss:$8 sps:$4 sm:$0xff]  }
  0x9b   : > { %2184 = vmatpush1.bf16.msra.mxu1 %v3729_v0  ;;  %v4638_v0 = vld [vmem:[%s4938_s1 + $0x5e0] ss:$8 sps:$4 sm:$0xff]  }
  0x9c   : > { %2493 = vmatpush1.bf16.msra.mxu0 %v4459_v1  ;;  %2185 = vmatprep.subr.bf16.mxu1 %v3742_v2  ;;  %v3818_v2 = vld [vmem:[%s4938_s1 + $0x2f4] ss:$8 sps:$4 sm:$0xff]  }
  0x9d   : > { %2494 = vmatprep.subr.bf16.mxu0 %v4469_v3 }
  0x9e   : > { %2133 = vmatmul.mubr.bf16.gmra.mrb[12].mxu1 %v3757_v6  ;;  %v4656_v6 = vld [vmem:[%s4938_s1 + $0x5f0] ss:$8 sps:$4 sm:$0xff]  }
  0x9f   : > { %2442 = vmatmul.mubr.bf16.gmra.mrb[12].mxu0 %v3743_v5  ;;  %2186 = vmatpush1.bf16.msra.mxu1 %v3740_v4  ;;  %v4647_v4 = vld [vmem:[%s4938_s1 + $0x5f4] ss:$8 sps:$4 sm:$0xff]   ;;  %v3816_v5 = vld [vmem:[%s4938_s1 + $0x2f0] ss:$8 sps:$4 sm:$0xff]  }
  0xa0   : > { %2495 = vmatpush1.bf16.msra.mxu0 %v4480_v7  ;;  %2187 = vmatprep.subr.bf16.mxu1 %v3749_v8  ;;  %v3830_v8 = vld [vmem:[%s4938_s1 + $0x604] ss:$8 sps:$4 sm:$0xff]  }
  0xa1   : > { %2496 = vmatprep.subr.bf16.mxu0 %v4489_v9  ;;  %2451 = vmatprep.mubr.bf16.mxu0 %v3755_v10  ;;  %v3822_v10 = vld [vmem:[%s4063_s5 + $0x10] ss:$52 sps:$4 sm:$0xff]  }
  0xa2   : > { %2142 = vmatprep.mubr.bf16.mxu1 %v3771_v11  ;;  %v3825_v11 = vld [vmem:[%s4063_s5 + $0x28] ss:$52 sps:$4 sm:$0xff]  }
  0xa3   : > { %2188 = vmatpush1.bf16.msra.mxu1 %v3747_v12  ;;  %v3828_v12 = vld [vmem:[%s4938_s1 + $0x600] ss:$8 sps:$4 sm:$0xff]  }
  0xa4   : > { %2497 = vmatpush1.bf16.msra.mxu0 %v4499_v13  ;;  %2189 = vmatprep.subr.bf16.mxu1 %v3760_v14  ;;  %v3831_v14 = vld [vmem:[%s4063_s5 + $0x7c] ss:$52 sps:$4 sm:$0xff]  }
  0xa5   : > { %2498 = vmatprep.subr.bf16.mxu0 %v4509_v15 }
  0xa6   : > { %2143 = vmatmul.mubr.bf16.gmra.mrb[16].mxu1 %v3775_v19  ;;  %v3837_v19 = vld [vmem:[%s4938_s1 + $0x610] ss:$8 sps:$4 sm:$0xff]  }
  0xa7   : > { %2452 = vmatmul.mubr.bf16.gmra.mrb[16].mxu0 %v3761_v17  ;;  %2190 = vmatpush1.bf16.msra.mxu1 %v3758_v16  ;;  %v3833_v16 = vld [vmem:[%s4063_s5 + $0x94] ss:$52 sps:$4 sm:$0xff]  }
  0xa8   : > { %2499 = vmatpush1.bf16.msra.mxu0 %v4518_v18  ;;  %2191 = vmatprep.subr.bf16.mxu1 %v3767_v20  ;;  %v3839_v17 = vld [vmem:[%s4938_s1 + $0x614] ss:$8 sps:$4 sm:$0xff]   ;;  %v3835_v20 = vld [vmem:[%s4063_s5 + $0x78] ss:$52 sps:$4 sm:$0xff]  }
  0xa9   : > { %2500 = vmatprep.subr.bf16.mxu0 %v4529_v21  ;;  %2461 = vmatprep.mubr.bf16.mxu0 %v3773_v22  ;;  %v3836_v22 = vld [vmem:[%s4063_s5 + $0x90] ss:$52 sps:$4 sm:$0xff]  }
  0xaa   : > { %2152 = vmatprep.mubr.bf16.mxu1 %v3789_v23  ;;  %v3842_v23 = vld [vmem:[%s4063_s5 + $0xfc] ss:$52 sps:$4 sm:$0xff]  }
  0xab   : > { %2192 = vmatpush1.bf16.msra.mxu1 %v3765_v24  ;;  %v3844_v24 = vld [vmem:[%s4063_s5 + $0xe0] ss:$52 sps:$4 sm:$0xff]  }
  0xac   : > { %2501 = vmatpush1.bf16.msra.mxu0 %v4539_v25  ;;  %2193 = vmatprep.subr.bf16.mxu1 %v3778_v26  ;;  %v3845_v26 = vld [vmem:[%s4063_s5 + $0xf8] ss:$52 sps:$4 sm:$0xff]  }
  0xad   : > { %2502 = vmatprep.subr.bf16.mxu0 %v4549_v27 }
  0xae   : > { %2153 = vmatmul.mubr.bf16.gmra.mrb[20].mxu1 %v3793_v33  ;;  %v3878_v33 = vld [vmem:[%s4063_s5 + $0x238] ss:$52 sps:$4 sm:$0xff]  }
  0xaf   : > { %2462 = vmatmul.mubr.bf16.gmra.mrb[20].mxu0 %v3779_v29  ;;  %2194 = vmatpush1.bf16.msra.mxu1 %v3776_v28  ;;  %v3849_v28 = vld [vmem:[%s4063_s5 + $0x14c] ss:$52 sps:$4 sm:$0xff]  }
  0xb0   : > { %2503 = vmatpush1.bf16.msra.mxu0 %v4558_v30  ;;  %2195 = vmatprep.subr.bf16.mxu1 %v3785_v32  ;;  %v3854_v29 = vld [vmem:[%s4063_s5 + $0x160] ss:$52 sps:$4 sm:$0xff]   ;;  %v3877_v32 = vld [vmem:[%s4063_s5 + $0x230] ss:$52 sps:$4 sm:$0xff]  }
  0xb1   : > { %2504 = vmatprep.subr.bf16.mxu0 %v4568_v34  ;;  %2471 = vmatprep.mubr.bf16.mxu0 %v3791_v36  ;;  %v3881_v36 = vld [vmem:[%s4063_s5 + $0x298] ss:$52 sps:$4 sm:$0xff]  }
  0xb2   : > { %2162 = vmatprep.mubr.bf16.mxu1 %v3807_v38  ;;  %v3882_v38 = vld [vmem:[%s4063_s5 + $0x2a0] ss:$52 sps:$4 sm:$0xff]  }
  0xb3   : > { %2196 = vmatpush1.bf16.msra.mxu1 %v3783_v39 }
  0xb4   : > { %2505 = vmatpush1.bf16.msra.mxu0 %v4579_v40  ;;  %2197 = vmatprep.subr.bf16.mxu1 %v3796_v42 }
  0xb5   : > { %2506 = vmatprep.subr.bf16.mxu0 %v4589_v44 }
  0xb6   : > { %2163 = vmatmul.mubr.bf16.gmra.mrb[24].mxu1 %v3809_v51 }
  0xb7   : > { %2472 = vmatmul.mubr.bf16.gmra.mrb[24].mxu0 %v3797_v46  ;;  %2198 = vmatpush1.bf16.msra.mxu1 %v3794_v45 }
  0xb8   : > { %2507 = vmatpush1.bf16.msra.mxu0 %v4598_v48  ;;  %2199 = vmatprep.subr.bf16.mxu1 %v3803_v50 }
  0xb9   : > { %2508 = vmatprep.subr.bf16.mxu0 %v4608_v52  ;;  %2205 = vmatprep.mubr.bf16.mxu1 %v3824_v54 }
  0xba   : > { %2514 = vmatprep.mubr.bf16.mxu0 %v3827_v56 }
  0xbb   : > { %2200 = vmatpush1.bf16.msra.mxu1 %v3801_v57 }
  0xbc   : > { %2509 = vmatpush1.bf16.msra.mxu0 %v4619_v58  ;;  %2201 = vmatprep.subr.bf16.mxu1 %v3812_v60 }
  0xbd   : > { %2510 = vmatprep.subr.bf16.mxu0 %v4629_v62 }
  0xbf   : > { %2202 = vmatpush1.bf16.msra.mxu1 %v3810_v63 }
  0xc0   : > { %2511 = vmatpush1.bf16.msra.mxu0 %v4638_v0  ;;  %2203 = vmatprep.subr.bf16.mxu1 %v3818_v2 }
  0xc1   : > { %2512 = vmatprep.subr.bf16.mxu0 %v4647_v4 }
  0xc3   : > { %2204 = vmatpush1.bf16.msra.mxu1 %v3816_v5  ;;  %v480_v5 = vlaneseq }
  0xc4   : > { %2513 = vmatpush1.bf16.msra.mxu0 %v4656_v6  ;;  %3212 = vmatprep.subr.bf16.mxu1 %v4350_v31  ;;  %v3848_v31 = vld [vmem:[%s4938_s1 + $0x624] ss:$8 sps:$4 sm:$0xff]  }
  0xc5   : > { %2585 = vmatprep.subr.bf16.mxu0 %v3830_v8 }
  0xc6   : > { %2206 = vmatmul.mubr.bf16.vlgmr.msra.gmra.mrb[0].mxu1 %v3822_v10 }
  0xc7   : > { %2515 = vmatmul.mubr.bf16.vlgmr.msra.gmra.mrb[0].mxu0 %v3825_v11  ;;  %3228 = vmatpush1.bf16.msra.mxu1 %v4360_v35  ;;  %v3840_v35 = vld [vmem:[%s4063_s5 + $0xe4] ss:$52 sps:$4 sm:$0xff]   ;;  %v481_v11 = vshrl.u32 %v480_v5, 7 }
  0xc8   : > { %2586 = vmatpush1.bf16.msra.mxu0 %v3828_v12  ;;  %3213 = vmatprep.subr.bf16.mxu1 %v4369_v37  ;;  %v3846_v37 = vld [vmem:[%s4938_s1 + $0x620] ss:$8 sps:$4 sm:$0xff]  }
  0xc9   : > { %2215 = vmatprep.mubr.bf16.mxu1 %v3831_v14  ;;  %2524 = vmatprep.mubr.bf16.mxu0 %v3833_v16  ;;  %v482_v14 = vsub.s32 0, %v481_v11  ;;  %v478_v16 = vld [vmem:[%s4939_s2] sm:$0x3] }
  0xca   : > { %2587 = vmatprep.subr.bf16.mxu0 %v3839_v17  ;;  %v486_v17 = vsub.s32 1, %v481_v11 }
  0xcb   : > { %3229 = vmatpush1.bf16.msra.mxu1 %v4379_v41  ;;  %v3857_v41 = vld [vmem:[%s4938_s1 + $0x634] ss:$8 sps:$4 sm:$0xff]  }
  0xcc   : > { %2588 = vmatpush1.bf16.msra.mxu0 %v3837_v19  ;;  %3214 = vmatprep.subr.bf16.mxu1 %v4389_v43  ;;  %v3855_v43 = vld [vmem:[%s4938_s1 + $0x630] ss:$8 sps:$4 sm:$0xff]  }
  0xcd   : > { %2589 = vmatprep.subr.bf16.mxu0 %v3848_v31 }
  0xce   : > { %2216 = vmatmul.mubr.bf16.gmra.mrb[4].mxu1 %v3835_v20 }
  0xcf   : > { %2525 = vmatmul.mubr.bf16.gmra.mrb[4].mxu0 %v3836_v22  ;;  %3230 = vmatpush1.bf16.msra.mxu1 %v4400_v47  ;;  %v3851_v47 = vld [vmem:[%s4063_s5 + $0x164] ss:$52 sps:$4 sm:$0xff]   ;;  %v4793_v22 = vrot.slane %v478_v16, %v482_v14 }
  0xd0   : > { %2225 = vmatprep.mubr.bf16.mxu1 %v3840_v35  ;;  %3215 = vmatprep.subr.bf16.mxu1 %v4409_v49  ;;  %v3853_v49 = vld [vmem:[%s4063_s5 + $0x148] ss:$52 sps:$4 sm:$0xff]  }
  0xd1   : > { %2534 = vmatprep.mubr.bf16.mxu0 %v3842_v23  ;;  %2590 = vmatpush1.bf16.msra.mxu0 %v3846_v37  ;;  %v4797_v23 = vrot.slane %v478_v16, %v486_v17 }
  0xd2   : > { %2591 = vmatprep.subr.bf16.mxu0 %v3857_v41 }
  0xd3   : > { %3231 = vmatpush1.bf16.msra.mxu1 %v4419_v53  ;;  %v3858_v53 = vld [vmem:[%s4063_s5 + $0x1b4] ss:$52 sps:$4 sm:$0xff]  }
  0xd4   : > { %3216 = vmatprep.subr.bf16.mxu1 %v4429_v55  ;;  %v3891_v55 = vmov 0  }
  0xd5   : > { %2592 = vmatpush1.bf16.msra.mxu0 %v3855_v43 }
  0xd6   : > { %2226 = vmatmul.mubr.bf16.gmra.mrb[8].mxu1 %v3844_v24 }
  0xd7   : > { %2535 = vmatmul.mubr.bf16.gmra.mrb[8].mxu0 %v3845_v26  ;;  %3232 = vmatpush1.bf16.msra.mxu1 %v4440_v59  ;;  %v3860_v59 = vld [vmem:[%s4063_s5 + $0x1b0] ss:$52 sps:$4 sm:$0xff]  }
  0xd8   : > { %2235 = vmatprep.mubr.bf16.mxu1 %v3849_v28  ;;  %3217 = vmatprep.subr.bf16.mxu1 %v4449_v61  ;;  %v3861_v61 = vld [vmem:[%s4063_s5 + $0x30] ss:$52 sps:$4 sm:$0xff]  }
  0xd9   : > { %2544 = vmatprep.mubr.bf16.mxu0 %v3851_v47 }
  0xdb   : > { %3233 = vmatpush1.bf16.msra.mxu1 %v4459_v1  ;;  %v3862_v1 = vld [vmem:[%s4063_s5 + $0x21c] ss:$52 sps:$4 sm:$0xff]  }
  0xdc   : > { %3218 = vmatprep.subr.bf16.mxu1 %v4469_v3  ;;  %v3864_v3 = vld [vmem:[%s4063_s5 + $0x218] ss:$52 sps:$4 sm:$0xff]  }
  0xde   : > { %2236 = vmatmul.mubr.bf16.gmra.mrb[12].mxu1 %v3853_v49 }
  0xdf   : > { %2545 = vmatmul.mubr.bf16.gmra.mrb[12].mxu0 %v3854_v29  ;;  %3234 = vmatpush1.bf16.msra.mxu1 %v4480_v7  ;;  %v3865_v7 = vld [vmem:[%s4063_s5 + $0x98] ss:$52 sps:$4 sm:$0xff]  }
  0xe0   : > { %2245 = vmatprep.mubr.bf16.mxu1 %v3858_v53  ;;  %3219 = vmatprep.subr.bf16.mxu1 %v4489_v9  ;;  %v3866_v9 = vld [vmem:[%s4063_s5 + $0x284] ss:$52 sps:$4 sm:$0xff]  }
  0xe1   : > { %2617 = vmatprep.mubr.bf16.mxu0 %v3891_v55 }
  0xe3   : > { %3235 = vmatpush1.bf16.msra.mxu1 %v4499_v13  ;;  %v3868_v13 = vld [vmem:[%s4063_s5 + $0x280] ss:$52 sps:$4 sm:$0xff]  }
  0xe4   : > { %3220 = vmatprep.subr.bf16.mxu1 %v4509_v15  ;;  %v3869_v15 = vld [vmem:[%s4063_s5 + $0x100] ss:$52 sps:$4 sm:$0xff]  }
  0xe6   : > { %2246 = vmatmul.mubr.bf16.gmra.mrb[16].mxu1 %v3860_v59 }
  0xe7   : > { %3174 = vmatmul.mubr.msk.bf16.vlgmr.msra.gmra.mrb[0].mxu0 %vm1945_vm0, %v3861_v61  ;;  %3236 = vmatpush1.bf16.msra.mxu1 %v4518_v18  ;;  %v3873_v18 = vld [vmem:[%s4063_s5 + $0x1cc] ss:$52 sps:$4 sm:$0xff]  }
  0xe8   : > { %2255 = vmatprep.mubr.bf16.mxu1 %v3862_v1  ;;  %3221 = vmatprep.subr.bf16.mxu1 %v4529_v21  ;;  %v3870_v21 = vld [vmem:[%s4063_s5 + $0x168] ss:$52 sps:$4 sm:$0xff]  }
  0xe9   : > { %2627 = vmatprep.mubr.bf16.mxu0 %v3891_v55 }
  0xeb   : > { %3237 = vmatpush1.bf16.msra.mxu1 %v4539_v25  ;;  %v3871_v25 = vld [vmem:[%s4063_s5 + $0x1c8] ss:$52 sps:$4 sm:$0xff]  }
  0xec   : > { %3222 = vmatprep.subr.bf16.mxu1 %v4549_v27  ;;  %v3874_v27 = vld [vmem:[%s4063_s5 + $0x1d0] ss:$52 sps:$4 sm:$0xff]  }
  0xee   : > { %2256 = vmatmul.mubr.bf16.gmra.mrb[20].mxu1 %v3864_v3 }
  0xef   : > { %3175 = vmatmul.mubr.msk.bf16.gmra.mrb[4].mxu0 %vm1945_vm0, %v3865_v7  ;;  %3238 = vmatpush1.bf16.msra.mxu1 %v4558_v30  ;;  %v3875_v30 = vld [vmem:[%s4063_s5 + $0x234] ss:$52 sps:$4 sm:$0xff]  }
  0xf0   : > { %2265 = vmatprep.mubr.bf16.mxu1 %v3866_v9  ;;  %3223 = vmatprep.subr.bf16.mxu1 %v4568_v34  ;;  %v3879_v34 = vld [vmem:[%s4063_s5 + $0x29c] ss:$52 sps:$4 sm:$0xff]  }
  0xf1   : > { %2637 = vmatprep.mubr.bf16.mxu0 %v3891_v55 }
  0xf3   : > { %3239 = vmatpush1.bf16.msra.mxu1 %v4579_v40 }
  0xf4   : > { %3224 = vmatprep.subr.bf16.mxu1 %v4589_v44 }
  0xf6   : > { %2266 = vmatmul.mubr.bf16.gmra.mrb[24].mxu1 %v3868_v13 }
  0xf7   : > { %3176 = vmatmul.mubr.msk.bf16.gmra.mrb[8].mxu0 %vm1945_vm0, %v3869_v15  ;;  %3240 = vmatpush1.bf16.msra.mxu1 %v4598_v48 }
  0xf8   : > { %2647 = vmatprep.mubr.bf16.mxu0 %v3891_v55  ;;  %3225 = vmatprep.subr.bf16.mxu1 %v4608_v52 }
  0xf9   : > { %2554 = vmatprep.mubr.bf16.mxu1 %v3873_v18 }
  0xfb   : > { %3241 = vmatpush1.bf16.msra.mxu1 %v4619_v58 }
  0xfc   : > { %3226 = vmatprep.subr.bf16.mxu1 %v4629_v62 }
  0xff   : > { %3177 = vmatmul.mubr.msk.bf16.gmra.mrb[12].mxu0 %vm1945_vm0, %v3870_v21  ;;  %3242 = vmatpush1.bf16.msra.mxu1 %v4638_v0 }
 0x100   : > { %2657 = vmatprep.mubr.bf16.mxu0 %v3891_v55  ;;  %3227 = vmatprep.subr.bf16.mxu1 %v4647_v4 }
 0x103   : > { %3243 = vmatpush1.bf16.msra.mxu1 %v4656_v6 }
 0x106   : > { %2555 = vmatmul.mubr.bf16.vlgmr.msra.gmra.mrb[28].mxu1 %v3871_v25 }
 0x107   : > { %3178 = vmatmul.mubr.msk.bf16.gmra.mrb[28].mxu0 %vm1945_vm0, %v3874_v27  ;;  %2564 = vmatprep.mubr.bf16.mxu1 %v3875_v30 }
 0x108   : > { %2667 = vmatprep.mubr.bf16.mxu0 %v3891_v55 }
 0x10e   : > { %2565 = vmatmul.mubr.bf16.gmra.mrb[32].mxu1 %v3877_v32 }
 0x10f   : > { %3179 = vmatmul.mubr.msk.bf16.gmra.mrb[32].mxu0 %vm1945_vm0, %v3878_v33  ;;  %2574 = vmatprep.mubr.bf16.mxu1 %v3879_v34 }
 0x110   : > { %2677 = vmatprep.mubr.bf16.mxu0 %v3891_v55 }
 0x116   : > { %2575 = vmatmul.mubr.bf16.gmra.mrb[36].mxu1 %v3881_v36 }
 0x117   : > { %3180 = vmatmul.mubr.msk.bf16.gmra.mrb[36].mxu0 %vm1945_vm0, %v3882_v38 }
 0x17a   : > { %v2453_v39 = vpop.f32.mrb[16].mxu0 }
 0x17b   : > { %v2455_v40 = vpop.f32.mrb[17].mxu0 }
 0x17c   : > { %v4756_v42 = vpop.f32.mrb[18].mxu0 }
 0x17d   : > { %v4758_v44 = vpop.f32.mrb[19].mxu0 }
 0x182   : > { %v4760_v45 = vpop.f32.mrb[20].mxu0 }
 0x183   : > { %v4762_v46 = vpop.f32.mrb[21].mxu0 }
 0x184   : > { %v4764_v48 = vpop.f32.mrb[22].mxu0 }
 0x185   : > { %v4766_v50 = vpop.f32.mrb[23].mxu0 }
 0x18a   : > { %v4768_v51 = vpop.f32.mrb[24].mxu0 }
 0x18b   : > { %v4770_v52 = vpop.f32.mrb[25].mxu0 }
 0x18c   : > { %v4772_v54 = vpop.f32.mrb[26].mxu0 }
 0x18d   : > { %v4774_v56 = vpop.f32.mrb[27].mxu0 }
 0x199   : > { %v2207_v57 = vpop.f32.mrb[0].mxu1 }
 0x19a   : > { %v2209_v58 = vpop.f32.mrb[1].mxu1  ;;  %v3244_v37 = vadd.f32 %v2207_v57, %v4793_v22 }
 0x19b   : > { %v2211_v60 = vpop.f32.mrb[2].mxu1  ;;  %v3246_v41 = vadd.f32 %v2209_v58, %v4797_v23 }
 0x19c   : > { %v2213_v62 = vpop.f32.mrb[3].mxu1  ;;  %v3248_v26 = vadd.f32 %v2211_v60, %v4793_v22 }
 0x19d   : > { %v3250_v53 = vadd.f32 %v2213_v62, %v4797_v23 }
 0x1a1   : > { %v2217_v63 = vpop.f32.mrb[4].mxu1 }
 0x1a2   : > { %v2219_v0 = vpop.f32.mrb[5].mxu1 }
 0x1a3   : > { %v2221_v2 = vpop.f32.mrb[6].mxu1  ;;  %v3254_v57 = vadd.f32 %v2219_v0, %v4797_v23 }
 0x1a4   : > { %v2223_v4 = vpop.f32.mrb[7].mxu1  ;;  %v3256_v5 = vadd.f32 %v2221_v2, %v4793_v22 }
 0x1a9   : > { %v4776_v6 = vpop.f32.mrb[8].mxu1 }
 0x1aa   : > { %v4778_v8 = vpop.f32.mrb[9].mxu1 }
 0x1ab   : > { %v4780_v10 = vpop.f32.mrb[10].mxu1 }
 0x1ac   : > { %v4782_v12 = vpop.f32.mrb[11].mxu1 }
 0x1b1   : > { %v4787_v19 = vpop.f32.mrb[12].mxu1 }
 0x1b2   : > { %v4789_v31 = vpop.f32.mrb[13].mxu1 }
 0x1b3   : > { %v4791_v20 = vpop.f32.mrb[14].mxu1 }
 0x1b4   : > { %v4795_v35 = vpop.f32.mrb[15].mxu1 }
 0x1b9   : > { %v2247_v43 = vpop.f32.mrb[16].mxu1 }
 0x1ba   : > { %v2619_v24 = vpop.f32.mrb[0].mxu0  ;;  %v3276_v28 = vadd.f32 %v2247_v43, %v4793_v22  ;;  %v2249_v49 = vpop.f32.mrb[17].mxu1 }
 0x1bb   : > { %v3245_v47 = vadd.f32 %v3244_v37, %v2619_v24  ;;  %v2621_v29 = vpop.f32.mrb[1].mxu0  ;;  %v3280_v55 = vadd.f32 %v2249_v49, %v4797_v23  ;;  %v2251_v61 = vpop.f32.mrb[18].mxu1 }
 0x1bc   : > { %v3247_v59 = vadd.f32 %v3246_v41, %v2621_v29  ;;  %v2623_v1 = vpop.f32.mrb[2].mxu0  ;;  %v3284_v7 = vadd.f32 %v2251_v61, %v4793_v22  ;;  %v2253_v13 = vpop.f32.mrb[19].mxu1  ;;  %v4807_v18 = vadd.f32 %v3276_v28, %v2453_v39 }
 0x1bd   : > { %v2688_v3 = vmax.f32 %v3245_v47, 0.0  ;;  %v3249_v9 = vadd.f32 %v3248_v26, %v2623_v1  ;;  %v2625_v15 = vpop.f32.mrb[3].mxu0  ;;  %v3288_v25 = vadd.f32 %v2253_v13, %v4797_v23  ;;  %v4810_v30 = vadd.f32 %v3280_v55, %v2455_v40 }
 0x1be   : > { %v2689_v21 = vmax.f32 %v3247_v59, 0.0  ;;  %v3251_v27 = vadd.f32 %v3250_v53, %v2625_v15  ;;  %v4823_v34 = vadd.f32 %v3284_v7, %v4756_v42  ;;  %v3252_v40 = vadd.f32 %v2217_v63, %v4793_v22 }
 0x1bf   : > { %v2690_v33 = vmax.f32 %v3249_v9, 0.0  ;;  %v4826_v39 = vadd.f32 %v3288_v25, %v4758_v44  ;;  %v3258_v44 = vadd.f32 %v2223_v4, %v4797_v23 }
 0x1c0   : > { %v3198_v36 = vpack.c.bf16 %v2689_v21, %v2688_v3  ;;  %v2691_v38 = vmax.f32 %v3251_v27, 0.0  ;;  %v3262_v3 = vadd.f32 %v4778_v8, %v4797_v23 }
 0x1c1   : > { %v2257_v60 = vpop.f32.mrb[20].mxu1 }
 0x1c2   : > { %2803 = vst.msk [vmem:[%s4815_s7] sm:$0xff] %vm4818_vm3, %v3198_v36  ;;  %v3199_v58 = vpack.c.bf16 %v2691_v38, %v2690_v33  ;;  %v2629_v62 = vpop.f32.mrb[4].mxu0  ;;  %v3292_v42 = vadd.f32 %v2257_v60, %v4793_v22  ;;  %v2259_v14 = vpop.f32.mrb[21].mxu1 }
 0x1c3   : > { %v3253_v11 = vadd.f32 %v3252_v40, %v2629_v62  ;;  %v2631_v16 = vpop.f32.mrb[5].mxu0  ;;  %v3296_v63 = vadd.f32 %v2259_v14, %v4797_v23  ;;  %v2261_v17 = vpop.f32.mrb[22].mxu1 }
 0x1c4   : > { %2804 = vst.msk [vmem:[%s4815_s7 + $0x8] sm:$0xff] %vm4818_vm3, %v3199_v58  ;;  %v3255_v0 = vadd.f32 %v3254_v57, %v2631_v16  ;;  %v2633_v37 = vpop.f32.mrb[6].mxu0  ;;  %v3300_v43 = vadd.f32 %v2261_v17, %v4793_v22  ;;  %v2263_v24 = vpop.f32.mrb[23].mxu1  ;;  %v4842_v28 = vadd.f32 %v3292_v42, %v4760_v45  ;;  %v3260_v45 = vadd.f32 %v4776_v6, %v4793_v22 }
 0x1c5   : > { %v2692_v41 = vmax.f32 %v3253_v11, 0.0  ;;  %v3257_v2 = vadd.f32 %v3256_v5, %v2633_v37  ;;  %v2635_v26 = vpop.f32.mrb[7].mxu0  ;;  %v3304_v4 = vadd.f32 %v2263_v24, %v4797_v23  ;;  %v4846_v29 = vadd.f32 %v3296_v63, %v4762_v46 }
 0x1c6   : > { %v2693_v47 = vmax.f32 %v3255_v0, 0.0  ;;  %v3259_v49 = vadd.f32 %v3258_v44, %v2635_v26  ;;  %v4849_v55 = vadd.f32 %v3300_v43, %v4764_v48  ;;  %v3264_v48 = vadd.f32 %v4780_v10, %v4793_v22 }
 0x1c7   : > { %v2694_v53 = vmax.f32 %v3257_v2, 0.0  ;;  %v4852_v1 = vadd.f32 %v3304_v4, %v4766_v50  ;;  %v3266_v6 = vadd.f32 %v4782_v12, %v4797_v23  ;;  %v3270_v63 = vadd.f32 %v4789_v31, %v4797_v23 }
 0x1c8   : > { %v3200_v59 = vpack.c.bf16 %v2693_v47, %v2692_v41  ;;  %v2695_v61 = vmax.f32 %v3259_v49, 0.0 }
 0x1c9   : > { %v2267_v7 = vpop.f32.mrb[24].mxu1 }
 0x1ca   : > { %2805 = vst.msk [vmem:[%s4815_s7 + $0x10] sm:$0xff] %vm4818_vm3, %v3200_v59  ;;  %v3201_v46 = vpack.c.bf16 %v2695_v61, %v2694_v53  ;;  %v2639_v9 = vpop.f32.mrb[8].mxu0  ;;  %v3308_v13 = vadd.f32 %v2267_v7, %v4793_v22  ;;  %v2269_v50 = vpop.f32.mrb[25].mxu1 }
 0x1cb   : > { %v3261_v15 = vadd.f32 %v3260_v45, %v2639_v9  ;;  %v2641_v21 = vpop.f32.mrb[9].mxu0  ;;  %v3312_v8 = vadd.f32 %v2269_v50, %v4797_v23  ;;  %v2271_v27 = vpop.f32.mrb[26].mxu1 }
 0x1cc   : > { %2806 = vst.msk [vmem:[%s4815_s7 + $0x18] sm:$0xff] %vm4818_vm3, %v3201_v46  ;;  %v3263_v25 = vadd.f32 %v3262_v3, %v2641_v21  ;;  %v2643_v33 = vpop.f32.mrb[10].mxu0  ;;  %v3316_v38 = vadd.f32 %v2271_v27, %v4793_v22  ;;  %v2273_v40 = vpop.f32.mrb[27].mxu1  ;;  %v4872_v58 = vadd.f32 %v3308_v13, %v4768_v51  ;;  %v3268_v51 = vadd.f32 %v4787_v19, %v4793_v22 }
 0x1cd   : > { %v2696_v36 = vmax.f32 %v3261_v15, 0.0  ;;  %v3265_v10 = vadd.f32 %v3264_v48, %v2643_v33  ;;  %v2645_v57 = vpop.f32.mrb[11].mxu0  ;;  %v3320_v12 = vadd.f32 %v2273_v40, %v4797_v23  ;;  %v4876_v5 = vadd.f32 %v3312_v8, %v4770_v52 }
 0x1ce   : > { %v2697_v60 = vmax.f32 %v3263_v25, 0.0  ;;  %v3267_v62 = vadd.f32 %v3266_v6, %v2645_v57  ;;  %v4879_v11 = vadd.f32 %v3316_v38, %v4772_v54  ;;  %v3272_v54 = vadd.f32 %v4791_v20, %v4793_v22 }
 0x1cf   : > { %v2698_v42 = vmax.f32 %v3265_v10, 0.0  ;;  %v4882_v44 = vadd.f32 %v3320_v12, %v4774_v56  ;;  %v3274_v56 = vadd.f32 %v4795_v35, %v4797_v23 }
 0x1d0   : > { %v3202_v14 = vpack.c.bf16 %v2697_v60, %v2696_v36  ;;  %v2699_v16 = vmax.f32 %v3267_v62, 0.0 }
 0x1d2   : > { %2807 = vst.msk [vmem:[%s4815_s7 + $0x20] sm:$0xff] %vm4818_vm3, %v3202_v14  ;;  %v3203_v52 = vpack.c.bf16 %v2699_v16, %v2698_v42  ;;  %v2649_v0 = vpop.f32.mrb[12].mxu0 }
 0x1d3   : > { %v3269_v17 = vadd.f32 %v3268_v51, %v2649_v0  ;;  %v2651_v37 = vpop.f32.mrb[13].mxu0 }
 0x1d4   : > { %2808 = vst.msk [vmem:[%s4815_s7 + $0x28] sm:$0xff] %vm4818_vm3, %v3203_v52  ;;  %v3271_v19 = vadd.f32 %v3270_v63, %v2651_v37  ;;  %v2653_v41 = vpop.f32.mrb[14].mxu0 }
 0x1d5   : > { %v2700_v31 = vmax.f32 %v3269_v17, 0.0  ;;  %v3273_v43 = vadd.f32 %v3272_v54, %v2653_v41  ;;  %v2655_v2 = vpop.f32.mrb[15].mxu0 }
 0x1d6   : > { %v2701_v24 = vmax.f32 %v3271_v19, 0.0  ;;  %v3275_v26 = vadd.f32 %v3274_v56, %v2655_v2 }
 0x1d7   : > { %v2702_v47 = vmax.f32 %v3273_v43, 0.0 }
 0x1d8   : > { %v3204_v4 = vpack.c.bf16 %v2701_v24, %v2700_v31  ;;  %v2703_v49 = vmax.f32 %v3275_v26, 0.0 }
 0x1d9   : > { %v2556_v22 = vpop.f32.mrb[28].mxu1 }
 0x1da   : > { %2809 = vst.msk [vmem:[%s4815_s7 + $0x30] sm:$0xff] %vm4818_vm3, %v3204_v4  ;;  %v3205_v20 = vpack.c.bf16 %v2703_v49, %v2702_v47  ;;  %v2659_v35 = vpop.f32.mrb[28].mxu0  ;;  %v3278_v23 = vadd.f32 %v4807_v18, %v2556_v22  ;;  %v2558_v53 = vpop.f32.mrb[29].mxu1 }
 0x1db   : > { %v2661_v59 = vpop.f32.mrb[29].mxu0  ;;  %v3282_v61 = vadd.f32 %v4810_v30, %v2558_v53  ;;  %v2560_v45 = vpop.f32.mrb[30].mxu1 }
 0x1dc   : > { %2810 = vst.msk [vmem:[%s4815_s7 + $0x38] sm:$0xff] %vm4818_vm3, %v3205_v20  ;;  %v2663_v3 = vpop.f32.mrb[30].mxu0  ;;  %v3279_v46 = vadd.f32 %v3278_v23, %v2659_v35  ;;  %v3286_v7 = vadd.f32 %v4823_v34, %v2560_v45  ;;  %v2562_v9 = vpop.f32.mrb[31].mxu1 }
 0x1dd   : > { %v2665_v48 = vpop.f32.mrb[31].mxu0  ;;  %v3283_v13 = vadd.f32 %v3282_v61, %v2661_v59  ;;  %v3290_v15 = vadd.f32 %v4826_v39, %v2562_v9 }
 0x1de   : > { %v2704_v50 = vmax.f32 %v3279_v46, 0.0  ;;  %v3287_v18 = vadd.f32 %v3286_v7, %v2663_v3 }
 0x1df   : > { %v2705_v21 = vmax.f32 %v3283_v13, 0.0  ;;  %v3291_v6 = vadd.f32 %v3290_v15, %v2665_v48 }
 0x1e0   : > { %v2706_v8 = vmax.f32 %v3287_v18, 0.0 }
 0x1e1   : > { %v3206_v25 = vpack.c.bf16 %v2705_v21, %v2704_v50  ;;  %v2707_v27 = vmax.f32 %v3291_v6, 0.0  ;;  %v2566_v30 = vpop.f32.mrb[32].mxu1 }
 0x1e2   : > { %v2669_v33 = vpop.f32.mrb[32].mxu0  ;;  %v3294_v36 = vadd.f32 %v4842_v28, %v2566_v30  ;;  %v2568_v38 = vpop.f32.mrb[33].mxu1 }
 0x1e3   : > { %v2671_v34 = vpop.f32.mrb[33].mxu0  ;;  %2811 = vst.msk [vmem:[%s4815_s7 + $0x40] sm:$0xff] %vm4818_vm3, %v3206_v25  ;;  %v3207_v10 = vpack.c.bf16 %v2707_v27, %v2706_v8  ;;  %v3298_v39 = vadd.f32 %v4846_v29, %v2568_v38  ;;  %v2570_v40 = vpop.f32.mrb[34].mxu1 }
 0x1e4   : > { %v2673_v57 = vpop.f32.mrb[34].mxu0  ;;  %v3295_v60 = vadd.f32 %v3294_v36, %v2669_v33  ;;  %v3302_v12 = vadd.f32 %v4849_v55, %v2570_v40  ;;  %v2572_v62 = vpop.f32.mrb[35].mxu1 }
 0x1e5   : > { %v2675_v42 = vpop.f32.mrb[35].mxu0  ;;  %2812 = vst.msk [vmem:[%s4815_s7 + $0x48] sm:$0xff] %vm4818_vm3, %v3207_v10  ;;  %v3299_v28 = vadd.f32 %v3298_v39, %v2671_v34  ;;  %v3306_v14 = vadd.f32 %v4852_v1, %v2572_v62 }
 0x1e6   : > { %v2708_v16 = vmax.f32 %v3295_v60, 0.0  ;;  %v3303_v51 = vadd.f32 %v3302_v12, %v2673_v57 }
 0x1e7   : > { %v2709_v63 = vmax.f32 %v3299_v28, 0.0  ;;  %v3307_v52 = vadd.f32 %v3306_v14, %v2675_v42 }
 0x1e8   : > { %v2710_v0 = vmax.f32 %v3303_v51, 0.0 }
 0x1e9   : > { %v3208_v29 = vpack.c.bf16 %v2709_v63, %v2708_v16  ;;  %v2711_v54 = vmax.f32 %v3307_v52, 0.0  ;;  %v2576_v17 = vpop.f32.mrb[36].mxu1 }
 0x1ea   : > { %v2679_v37 = vpop.f32.mrb[36].mxu0  ;;  %v3310_v55 = vadd.f32 %v4872_v58, %v2576_v17  ;;  %v2578_v56 = vpop.f32.mrb[37].mxu1 }
 0x1eb   : > { %v2681_v19 = vpop.f32.mrb[37].mxu0  ;;  %2813 = vst.msk [vmem:[%s4815_s7 + $0x50] sm:$0xff] %vm4818_vm3, %v3208_v29  ;;  %v3209_v41 = vpack.c.bf16 %v2711_v54, %v2710_v0  ;;  %v3314_v1 = vadd.f32 %v4876_v5, %v2578_v56  ;;  %v2580_v31 = vpop.f32.mrb[38].mxu1 }
 0x1ec   : > { %v2683_v43 = vpop.f32.mrb[38].mxu0  ;;  %v3311_v2 = vadd.f32 %v3310_v55, %v2679_v37  ;;  %v3318_v24 = vadd.f32 %v4879_v11, %v2580_v31  ;;  %v2582_v26 = vpop.f32.mrb[39].mxu1 }
 0x1ed   : > { %v2685_v47 = vpop.f32.mrb[39].mxu0  ;;  %2814 = vst.msk [vmem:[%s4815_s7 + $0x58] sm:$0xff] %vm4818_vm3, %v3209_v41  ;;  %v3315_v58 = vadd.f32 %v3314_v1, %v2681_v19  ;;  %v3322_v4 = vadd.f32 %v4882_v44, %v2582_v26 }
 0x1ee   : > { %v2712_v49 = vmax.f32 %v3311_v2, 0.0  ;;  %v3319_v20 = vadd.f32 %v3318_v24, %v2683_v43 }
 0x1ef   : > { %v2713_v22 = vmax.f32 %v3315_v58, 0.0  ;;  %v3323_v35 = vadd.f32 %v3322_v4, %v2685_v47 }
 0x1f0   : > { %v2714_v5 = vmax.f32 %v3319_v20, 0.0 }
 0x1f1   : > { %v3210_v23 = vpack.c.bf16 %v2713_v22, %v2712_v49  ;;  %v2715_v53 = vmax.f32 %v3323_v35, 0.0 }
 0x1f3   : > { %2815 = vst.msk [vmem:[%s4815_s7 + $0x60] sm:$0xff] %vm4818_vm3, %v3210_v23  ;;  %v3211_v59 = vpack.c.bf16 %v2715_v53, %v2714_v5 }
 0x1f5   : > { %2816 = vst.msk [vmem:[%s4815_s7 + $0x68] sm:$0xff] %vm4818_vm3, %v3211_v59 }
 0x1f6 PF: > { %s13_s12 = sadd.s32 1, %s3889_s12  }
 0x1f7   : > { %p10_p4 = scmp.ge.s32.totalorder %s13_s12, 4  }
 0x1f9   :  { %12 = sbr.rel (!%p10_p4) target bundleno = 1 (0x1), region = 62 }

// kernel: perceptual_loss.16
= control target key start
LH: loop header
LB: loop body
LE: loop exit
PB: predicated region body
PF: predicated region fallthrough
CT: control target
= control target key end

     0   :  { %s4487_s12 = smov 0   ;;  %s5683_s0 = inlined_call_operand.vmem [shape: bf16[64,1728], index: 0, kind: input, shape index: {}]   ;;  %s5684_s1 = inlined_call_operand.vmem [shape: bf16[1728,384], index: 1, kind: input, shape index: {}]   ;;  %s5685_s2 = inlined_call_operand.vmem [shape: f32[1,384], index: 2, kind: input, shape index: {}]   ;;  %s5686_s3 = inlined_call_operand.vmem [shape: bf16[64,384], index: 3, kind: output, shape index: {}]  }
   0x1 LB: > { %s3362_s13 = sadd.s32 4294967295, %s4464_s12   ;;  %p3366_p0 = scmp.ge.s32.totalorder %s4464_s12, 1  ;;  %s4464_s12 = sphi %s4487_s12, %s13_s12  }
   0x2   : > { %p139_p1 = scmp.lt.s32.totalorder %s4464_s12, 3 }
   0x4   : > { %p140_p2 = pnand %p3366_p0, %p139_p1 }
   0x5   : > { %v3980_v0 = vld [vmem:[%s5684_s1 + $0x4] ss:$12 sps:$4 sm:$0xff] (!%p140_p2)   ;;  %v3984_v2 = vld [vmem:[%s5684_s1] ss:$12 sps:$4 sm:$0xff] (!%p140_p2)   ;;  %v3986_v4 = vld [vmem:[%s5684_s1 + $0x1c] ss:$12 sps:$4 sm:$0xff] (!%p140_p2)  }
   0x6   : > { %143 = sbr.rel (%p140_p2) target bundleno = 587 (0x24b), region = 32  ;;  %v3982_v1 = vld [vmem:[%s5684_s1 + $0x184] ss:$12 sps:$4 sm:$0xff] (!%p140_p2)   ;;  %2530 = vmatprep.subr.bf16.mxu1 (!%p140_p2), %v3980_v0  ;;  %v3985_v3 = vld [vmem:[%s5684_s1 + $0x180] ss:$12 sps:$4 sm:$0xff] (!%p140_p2)   ;;  %s3367_s24 = sshll.u32 (!%p140_p2), %s3362_s13, 2 }
   0x7   : > { %2583 = vmatprep.subr.bf16.mxu0 (!%p140_p2), %v3982_v1  ;;  %2531 = vmatpush1.bf16.msra.mxu1 (!%p140_p2), %v3984_v2  ;;  %v3988_v5 = vld [vmem:[%s5684_s1 + $0x19c] ss:$12 sps:$4 sm:$0xff] (!%p140_p2)   ;;  %v3990_v6 = vld [vmem:[%s5684_s1 + $0x18] ss:$12 sps:$4 sm:$0xff] (!%p140_p2)   ;;  %v3992_v8 = vld [vmem:[%s5684_s1 + $0x34] ss:$12 sps:$4 sm:$0xff] (!%p140_p2)  }
   0x8   : > { %2584 = vmatpush1.bf16.msra.mxu0 (!%p140_p2), %v3985_v3  ;;  %2532 = vmatprep.subr.bf16.mxu1 (!%p140_p2), %v3986_v4  ;;  %v3991_v7 = vld [vmem:[%s5684_s1 + $0x198] ss:$12 sps:$4 sm:$0xff] (!%p140_p2)   ;;  %v3994_v9 = vld [vmem:[%s5684_s1 + $0x1b4] ss:$12 sps:$4 sm:$0xff] (!%p140_p2)   ;;  %v3996_v10 = vld [vmem:[%s5684_s1 + $0x30] ss:$12 sps:$4 sm:$0xff] (!%p140_p2)  }
   0x9   : > { %2585 = vmatprep.subr.bf16.mxu0 (!%p140_p2), %v3988_v5  ;;  %v3997_v11 = vld [vmem:[%s5684_s1 + $0x1b0] ss:$12 sps:$4 sm:$0xff] (!%p140_p2)   ;;  %v3998_v12 = vld [vmem:[%s5684_s1 + $0x4c] ss:$12 sps:$4 sm:$0xff] (!%p140_p2)   ;;  %v4002_v14 = vld [vmem:[%s5684_s1 + $0x48] ss:$12 sps:$4 sm:$0xff] (!%p140_p2)  }
   0xa   : > { %v4000_v13 = vld [vmem:[%s5684_s1 + $0x1cc] ss:$12 sps:$4 sm:$0xff] (!%p140_p2)   ;;  %v4003_v15 = vld [vmem:[%s5684_s1 + $0x1c8] ss:$12 sps:$4 sm:$0xff] (!%p140_p2)   ;;  %v4004_v16 = vld [vmem:[%s5684_s1 + $0x64] ss:$12 sps:$4 sm:$0xff] (!%p140_p2)  }
   0xb   : > { %2533 = vmatpush1.bf16.msra.mxu1 (!%p140_p2), %v3990_v6  ;;  %v4006_v17 = vld [vmem:[%s5684_s1 + $0x1e4] ss:$12 sps:$4 sm:$0xff] (!%p140_p2)   ;;  %v4008_v18 = vld [vmem:[%s5684_s1 + $0x60] ss:$12 sps:$4 sm:$0xff] (!%p140_p2)   ;;  %v4010_v20 = vld [vmem:[%s5684_s1 + $0x7c] ss:$12 sps:$4 sm:$0xff] (!%p140_p2)  }
   0xc   : > { %2586 = vmatpush1.bf16.msra.mxu0 (!%p140_p2), %v3991_v7  ;;  %2534 = vmatprep.subr.bf16.mxu1 (!%p140_p2), %v3992_v8  ;;  %v4009_v19 = vld [vmem:[%s5684_s1 + $0x1e0] ss:$12 sps:$4 sm:$0xff] (!%p140_p2)   ;;  %v4012_v21 = vld [vmem:[%s5684_s1 + $0x1fc] ss:$12 sps:$4 sm:$0xff] (!%p140_p2)   ;;  %v4014_v22 = vld [vmem:[%s5684_s1 + $0x78] ss:$12 sps:$4 sm:$0xff] (!%p140_p2)  }
   0xd   : > { %2587 = vmatprep.subr.bf16.mxu0 %v3994_v9  ;;  %v4015_v23 = vld [vmem:[%s5684_s1 + $0x1f8] ss:$12 sps:$4 sm:$0xff]   ;;  %v4016_v24 = vld [vmem:[%s5684_s1 + $0x94] ss:$12 sps:$4 sm:$0xff]   ;;  %v4020_v26 = vld [vmem:[%s5684_s1 + $0x90] ss:$12 sps:$4 sm:$0xff]  }
   0xe   : > { %v4018_v25 = vld [vmem:[%s5684_s1 + $0x214] ss:$12 sps:$4 sm:$0xff]   ;;  %v4021_v27 = vld [vmem:[%s5684_s1 + $0x210] ss:$12 sps:$4 sm:$0xff]   ;;  %v4022_v28 = vld [vmem:[%s5684_s1 + $0xac] ss:$12 sps:$4 sm:$0xff]  }
   0xf   : > { %2535 = vmatpush1.bf16.msra.mxu1 %v3996_v10  ;;  %v4024_v29 = vld [vmem:[%s5684_s1 + $0x22c] ss:$12 sps:$4 sm:$0xff]   ;;  %v4026_v30 = vld [vmem:[%s5684_s1 + $0xa8] ss:$12 sps:$4 sm:$0xff]   ;;  %v4028_v32 = vld [vmem:[%s5684_s1 + $0xc4] ss:$12 sps:$4 sm:$0xff]  }
  0x10   : > { %2588 = vmatpush1.bf16.msra.mxu0 %v3997_v11  ;;  %2536 = vmatprep.subr.bf16.mxu1 %v3998_v12  ;;  %v4027_v31 = vld [vmem:[%s5684_s1 + $0x228] ss:$12 sps:$4 sm:$0xff]   ;;  %p166_p3 = scmp.lt.s32.totalorder %s3367_s24, 7  ;;  %v4030_v33 = vld [vmem:[%s5684_s1 + $0x244] ss:$12 sps:$4 sm:$0xff]   ;;  %vm2523_vm0 = vcmask 523264  }
  0x11   : > { %2589 = vmatprep.subr.bf16.mxu0 %v4000_v13  ;;  %v4032_v34 = vld [vmem:[%s5684_s1 + $0xc0] ss:$12 sps:$4 sm:$0xff]   ;;  %v4034_v36 = vld [vmem:[%s5684_s1 + $0xdc] ss:$12 sps:$4 sm:$0xff]   ;;  %v4038_v38 = vld [vmem:[%s5684_s1 + $0xd8] ss:$12 sps:$4 sm:$0xff]  }
  0x12   : > { %v4033_v35 = vld [vmem:[%s5684_s1 + $0x240] ss:$12 sps:$4 sm:$0xff]   ;;  %s5688_s24 = smov (!%p166_p3, %s3367_s24), 7  ;;  %v4036_v37 = vld [vmem:[%s5684_s1 + $0x25c] ss:$12 sps:$4 sm:$0xff]  }
  0x13   : > { %2537 = vmatpush1.bf16.msra.mxu1 %v4002_v14  ;;  %v4039_v39 = vld [vmem:[%s5684_s1 + $0x258] ss:$12 sps:$4 sm:$0xff]   ;;  %v4040_v40 = vld [vmem:[%s5684_s1 + $0xf4] ss:$12 sps:$4 sm:$0xff]   ;;  %s3969_s21 = smul.u32 56, %s5688_s24 }
  0x14   : > { %2590 = vmatpush1.bf16.msra.mxu0 %v4003_v15  ;;  %2538 = vmatprep.subr.bf16.mxu1 %v4004_v16  ;;  %v4042_v41 = vld [vmem:[%s5684_s1 + $0x274] ss:$12 sps:$4 sm:$0xff]   ;;  %v4044_v42 = vld [vmem:[%s5684_s1 + $0xf0] ss:$12 sps:$4 sm:$0xff]   ;;  %v4046_v44 = vld [vmem:[%s5684_s1 + $0x10c] ss:$12 sps:$4 sm:$0xff]  }
  0x15   : > { %2591 = vmatprep.subr.bf16.mxu0 %v4006_v17  ;;  %v4045_v43 = vld [vmem:[%s5684_s1 + $0x270] ss:$12 sps:$4 sm:$0xff]   ;;  %s4638_s13 = scalar_lea.vmem %s5683_s0, %s3969_s21  ;;  %v4048_v45 = vld [vmem:[%s5684_s1 + $0x28c] ss:$12 sps:$4 sm:$0xff]   ;;  %v4050_v46 = vld [vmem:[%s5684_s1 + $0x108] ss:$12 sps:$4 sm:$0xff]  }
  0x16   : > { %v4051_v47 = vld [vmem:[%s5684_s1 + $0x288] ss:$12 sps:$4 sm:$0xff]   ;;  %v4052_v48 = vld [vmem:[%s5684_s1 + $0x124] ss:$12 sps:$4 sm:$0xff]   ;;  %v4056_v52 = vld [vmem:[%s5684_s1 + $0x120] ss:$12 sps:$4 sm:$0xff]  }
  0x17   : > { %2539 = vmatpush1.bf16.msra.mxu1 %v4008_v18  ;;  %v4653_v49 = vld [vmem:[%s4638_s13 + $0x4] ss:$56 sps:$4 sm:$0xff]   ;;  %v4057_v53 = vld [vmem:[%s5684_s1 + $0x2a0] ss:$12 sps:$4 sm:$0xff]   ;;  %v4074_v0 = vld [vmem:[%s5684_s1 + $0x168] ss:$12 sps:$4 sm:$0xff]  }
  0x18   : > { %2592 = vmatpush1.bf16.msra.mxu0 %v4009_v19  ;;  %2540 = vmatprep.subr.bf16.mxu1 %v4010_v20  ;;  %v4054_v50 = vld [vmem:[%s5684_s1 + $0x2a4] ss:$12 sps:$4 sm:$0xff]   ;;  %v4058_v54 = vld [vmem:[%s5684_s1 + $0x13c] ss:$12 sps:$4 sm:$0xff]   ;;  %v4064_v58 = vld [vmem:[%s5684_s1 + $0x154] ss:$12 sps:$4 sm:$0xff]  }
  0x19   : > { %2593 = vmatprep.subr.bf16.mxu0 %v4012_v21  ;;  %v4659_v51 = vld [vmem:[%s4638_s13 + $0xc] ss:$56 sps:$4 sm:$0xff]   ;;  %2562 = vmatprep.mubr.bf16.mxu1 %v4653_v49  ;;  %v4060_v55 = vld [vmem:[%s5684_s1 + $0x2bc] ss:$12 sps:$4 sm:$0xff]   ;;  %v4066_v59 = vld [vmem:[%s5684_s1 + $0x2d4] ss:$12 sps:$4 sm:$0xff]  }
  0x1a   : > { %2615 = vmatprep.mubr.bf16.mxu0 %v4659_v51  ;;  %v4062_v56 = vld [vmem:[%s5684_s1 + $0x138] ss:$12 sps:$4 sm:$0xff]   ;;  %v4068_v60 = vld [vmem:[%s5684_s1 + $0x150] ss:$12 sps:$4 sm:$0xff]   ;;  %v4075_v1 = vld [vmem:[%s5684_s1 + $0x2e8] ss:$12 sps:$4 sm:$0xff]  }
  0x1b   : > { %2541 = vmatpush1.bf16.msra.mxu1 %v4014_v22  ;;  %v4063_v57 = vld [vmem:[%s5684_s1 + $0x2b8] ss:$12 sps:$4 sm:$0xff]   ;;  %v4069_v61 = vld [vmem:[%s5684_s1 + $0x2d0] ss:$12 sps:$4 sm:$0xff]   ;;  %v4715_v5 = vld [vmem:[%s4638_s13 + $0x8] ss:$56 sps:$4 sm:$0xff]  }
  0x1c   : > { %2594 = vmatpush1.bf16.msra.mxu0 %v4015_v23  ;;  %2542 = vmatprep.subr.bf16.mxu1 %v4016_v24  ;;  %v4070_v62 = vld [vmem:[%s5684_s1 + $0x16c] ss:$12 sps:$4 sm:$0xff]   ;;  %v4084_v2 = vld [vmem:[%s5684_s1 + $0x304] ss:$12 sps:$4 sm:$0xff]   ;;  %v4090_v8 = vld [vmem:[%s5684_s1 + $0x31c] ss:$12 sps:$4 sm:$0xff]  }
  0x1d   : > { %2595 = vmatprep.subr.bf16.mxu0 %v4018_v25  ;;  %v4072_v63 = vld [vmem:[%s5684_s1 + $0x2ec] ss:$12 sps:$4 sm:$0xff]   ;;  %v4087_v3 = vld [vmem:[%s5684_s1 + $0x904] ss:$12 sps:$4 sm:$0xff]   ;;  %v4093_v9 = vld [vmem:[%s5684_s1 + $0x91c] ss:$12 sps:$4 sm:$0xff]  }
  0x1e   : > { %v4712_v4 = vld [vmem:[%s4638_s13] ss:$56 sps:$4 sm:$0xff]   ;;  %v4094_v14 = vld [vmem:[%s5684_s1 + $0x330] ss:$12 sps:$4 sm:$0xff]   ;;  %v4756_v18 = vld [vmem:[%s4638_s13 + $0x74] ss:$56 sps:$4 sm:$0xff]  }
  0x1f   : > { %2543 = vmatpush1.bf16.msra.mxu1 %v4020_v26  ;;  %v4082_v6 = vld [vmem:[%s5684_s1 + $0x300] ss:$12 sps:$4 sm:$0xff]   ;;  %v4088_v10 = vld [vmem:[%s5684_s1 + $0x318] ss:$12 sps:$4 sm:$0xff]   ;;  %v4097_v15 = vld [vmem:[%s5684_s1 + $0x930] ss:$12 sps:$4 sm:$0xff]  }
  0x20   : > { %2596 = vmatpush1.bf16.msra.mxu0 %v4021_v27  ;;  %2544 = vmatprep.subr.bf16.mxu1 %v4022_v28  ;;  %v4085_v7 = vld [vmem:[%s5684_s1 + $0x900] ss:$12 sps:$4 sm:$0xff]   ;;  %v4091_v11 = vld [vmem:[%s5684_s1 + $0x918] ss:$12 sps:$4 sm:$0xff]   ;;  %v4759_v19 = vld [vmem:[%s4638_s13 + $0x70] ss:$56 sps:$4 sm:$0xff]  }
  0x21   : > { %2597 = vmatprep.subr.bf16.mxu0 %v4024_v29  ;;  %v4096_v12 = vld [vmem:[%s5684_s1 + $0x334] ss:$12 sps:$4 sm:$0xff]   ;;  %v4102_v16 = vld [vmem:[%s5684_s1 + $0x34c] ss:$12 sps:$4 sm:$0xff]   ;;  %v4108_v22 = vld [vmem:[%s5684_s1 + $0x364] ss:$12 sps:$4 sm:$0xff]  }
  0x22   : > { %v4099_v13 = vld [vmem:[%s5684_s1 + $0x934] ss:$12 sps:$4 sm:$0xff]   ;;  %v4105_v17 = vld [vmem:[%s5684_s1 + $0x94c] ss:$12 sps:$4 sm:$0xff]   ;;  %v4111_v23 = vld [vmem:[%s5684_s1 + $0x964] ss:$12 sps:$4 sm:$0xff]  }
  0x23   : > { %2545 = vmatpush1.bf16.msra.mxu1 %v4026_v30  ;;  %v4100_v20 = vld [vmem:[%s5684_s1 + $0x348] ss:$12 sps:$4 sm:$0xff]   ;;  %v4106_v24 = vld [vmem:[%s5684_s1 + $0x360] ss:$12 sps:$4 sm:$0xff]   ;;  %v4112_v29 = vld [vmem:[%s5684_s1 + $0x378] ss:$12 sps:$4 sm:$0xff]  }
  0x24   : > { %2598 = vmatpush1.bf16.msra.mxu0 %v4027_v31  ;;  %2546 = vmatprep.subr.bf16.mxu1 %v4028_v32  ;;  %v4103_v21 = vld [vmem:[%s5684_s1 + $0x948] ss:$12 sps:$4 sm:$0xff]   ;;  %v4109_v25 = vld [vmem:[%s5684_s1 + $0x960] ss:$12 sps:$4 sm:$0xff]   ;;  %v4115_v30 = vld [vmem:[%s5684_s1 + $0x978] ss:$12 sps:$4 sm:$0xff]  }
  0x25   : > { %2599 = vmatprep.subr.bf16.mxu0 %v4030_v33  ;;  %v4159_v26 = vld [vmem:[%s4638_s13 + $0x34] ss:$56 sps:$4 sm:$0xff]   ;;  %v4114_v27 = vld [vmem:[%s5684_s1 + $0x37c] ss:$12 sps:$4 sm:$0xff]  }
  0x26   : > { %v4117_v28 = vld [vmem:[%s5684_s1 + $0x97c] ss:$12 sps:$4 sm:$0xff]   ;;  %v4120_v31 = vld [vmem:[%s5684_s1 + $0x394] ss:$12 sps:$4 sm:$0xff]  }
  0x27   : > { %2547 = vmatpush1.bf16.msra.mxu1 %v4032_v34  ;;  %v4123_v32 = vld [vmem:[%s5684_s1 + $0x994] ss:$12 sps:$4 sm:$0xff]   ;;  %v4118_v33 = vld [vmem:[%s5684_s1 + $0x390] ss:$12 sps:$4 sm:$0xff]  }
  0x28   : > { %2600 = vmatpush1.bf16.msra.mxu0 %v4033_v35  ;;  %2548 = vmatprep.subr.bf16.mxu1 %v4034_v36  ;;  %v4805_v34 = vld [vmem:[%s4638_s13 + $0x7c] ss:$56 sps:$4 sm:$0xff]   ;;  %v4126_v36 = vld [vmem:[%s5684_s1 + $0x3ac] ss:$12 sps:$4 sm:$0xff]  }
  0x29   : > { %2601 = vmatprep.subr.bf16.mxu0 %v4036_v37  ;;  %v4121_v35 = vld [vmem:[%s5684_s1 + $0x990] ss:$12 sps:$4 sm:$0xff]   ;;  %v4129_v37 = vld [vmem:[%s5684_s1 + $0x9ac] ss:$12 sps:$4 sm:$0xff]  }
  0x2b   : > { %2549 = vmatpush1.bf16.msra.mxu1 %v4038_v38  ;;  %v4818_v38 = vld [vmem:[%s4638_s13 + $0x78] ss:$56 sps:$4 sm:$0xff]  }
  0x2c   : > { %2602 = vmatpush1.bf16.msra.mxu0 %v4039_v39  ;;  %2550 = vmatprep.subr.bf16.mxu1 %v4040_v40  ;;  %v4124_v39 = vld [vmem:[%s5684_s1 + $0x3a8] ss:$12 sps:$4 sm:$0xff]  }
  0x2d   : > { %2603 = vmatprep.subr.bf16.mxu0 %v4042_v41  ;;  %v4127_v40 = vld [vmem:[%s5684_s1 + $0x9a8] ss:$12 sps:$4 sm:$0xff]   ;;  %v4132_v41 = vld [vmem:[%s5684_s1 + $0x3c4] ss:$12 sps:$4 sm:$0xff]  }
  0x2f   : > { %2551 = vmatpush1.bf16.msra.mxu1 %v4044_v42  ;;  %v4135_v42 = vld [vmem:[%s5684_s1 + $0x9c4] ss:$12 sps:$4 sm:$0xff]  }
  0x30   : > { %2604 = vmatpush1.bf16.msra.mxu0 %v4045_v43  ;;  %2552 = vmatprep.subr.bf16.mxu1 %v4046_v44  ;;  %v4130_v43 = vld [vmem:[%s5684_s1 + $0x3c0] ss:$12 sps:$4 sm:$0xff]  }
  0x31   : > { %2605 = vmatprep.subr.bf16.mxu0 %v4048_v45  ;;  %v4133_v44 = vld [vmem:[%s5684_s1 + $0x9c0] ss:$12 sps:$4 sm:$0xff]  }
  0x32   : > { %v4840_v45 = vld [vmem:[%s4638_s13 + $0x14] ss:$56 sps:$4 sm:$0xff]  }
  0x33   : > { %2553 = vmatpush1.bf16.msra.mxu1 %v4050_v46  ;;  %v4138_v46 = vld [vmem:[%s5684_s1 + $0x3dc] ss:$12 sps:$4 sm:$0xff]  }
  0x34   : > { %2606 = vmatpush1.bf16.msra.mxu0 %v4051_v47  ;;  %2554 = vmatprep.subr.bf16.mxu1 %v4052_v48  ;;  %v4141_v47 = vld [vmem:[%s5684_s1 + $0x9dc] ss:$12 sps:$4 sm:$0xff]   ;;  %v4136_v48 = vld [vmem:[%s5684_s1 + $0x3d8] ss:$12 sps:$4 sm:$0xff]  }
  0x35   : > { %2607 = vmatprep.subr.bf16.mxu0 %v4054_v50  ;;  %v4139_v50 = vld [vmem:[%s5684_s1 + $0x9d8] ss:$12 sps:$4 sm:$0xff]  }
  0x37   : > { %2555 = vmatpush1.bf16.msra.mxu1 %v4056_v52  ;;  %v4147_v52 = vld [vmem:[%s5684_s1 + $0x3f4] ss:$12 sps:$4 sm:$0xff]  }
  0x38   : > { %2608 = vmatpush1.bf16.msra.mxu0 %v4057_v53  ;;  %2556 = vmatprep.subr.bf16.mxu1 %v4058_v54  ;;  %v4150_v53 = vld [vmem:[%s5684_s1 + $0x9f4] ss:$12 sps:$4 sm:$0xff]   ;;  %v4145_v54 = vld [vmem:[%s5684_s1 + $0x3f0] ss:$12 sps:$4 sm:$0xff]  }
  0x39   : > { %2609 = vmatprep.subr.bf16.mxu0 %v4060_v55  ;;  %v4148_v55 = vld [vmem:[%s5684_s1 + $0x9f0] ss:$12 sps:$4 sm:$0xff]  }
  0x3b   : > { %2557 = vmatpush1.bf16.msra.mxu1 %v4062_v56  ;;  %v4153_v56 = vld [vmem:[%s5684_s1 + $0x40c] ss:$12 sps:$4 sm:$0xff]  }
  0x3c   : > { %2610 = vmatpush1.bf16.msra.mxu0 %v4063_v57  ;;  %2558 = vmatprep.subr.bf16.mxu1 %v4064_v58  ;;  %v4156_v57 = vld [vmem:[%s5684_s1 + $0xa0c] ss:$12 sps:$4 sm:$0xff]   ;;  %v4151_v58 = vld [vmem:[%s5684_s1 + $0x408] ss:$12 sps:$4 sm:$0xff]  }
  0x3d   : > { %2611 = vmatprep.subr.bf16.mxu0 %v4066_v59  ;;  %v4154_v59 = vld [vmem:[%s5684_s1 + $0xa08] ss:$12 sps:$4 sm:$0xff]  }
  0x3f   : > { %2559 = vmatpush1.bf16.msra.mxu1 %v4068_v60  ;;  %v4162_v60 = vld [vmem:[%s5684_s1 + $0x424] ss:$12 sps:$4 sm:$0xff]  }
  0x40   : > { %2612 = vmatpush1.bf16.msra.mxu0 %v4069_v61  ;;  %2560 = vmatprep.subr.bf16.mxu1 %v4070_v62  ;;  %v4163_v61 = vld [vmem:[%s5684_s1 + $0xc8] ss:$12 sps:$4 sm:$0xff]  }
  0x41   : > { %2613 = vmatprep.subr.bf16.mxu0 %v4072_v63  ;;  %v4157_v62 = vld [vmem:[%s4638_s13 + $0x30] ss:$56 sps:$4 sm:$0xff]   ;;  %v4160_v63 = vld [vmem:[%s5684_s1 + $0x420] ss:$12 sps:$4 sm:$0xff]  }
  0x43   : > { %2561 = vmatpush1.bf16.msra.mxu1 %v4074_v0  ;;  %v4164_v0 = vld [vmem:[%s5684_s1 + $0x8] ss:$12 sps:$4 sm:$0xff]  }
  0x44   : > { %2614 = vmatpush1.bf16.msra.mxu0 %v4075_v1  ;;  %2848 = vmatprep.subr.bf16.mxu1 %v4087_v3  ;;  %v4167_v1 = vld [vmem:[%s5684_s1 + $0x43c] ss:$12 sps:$4 sm:$0xff]   ;;  %v4165_v3 = vld [vmem:[%s5684_s1 + $0x438] ss:$12 sps:$4 sm:$0xff]  }
  0x45   : > { %2636 = vmatprep.subr.bf16.mxu0 %v4084_v2  ;;  %v4168_v2 = vld [vmem:[%s5684_s1 + $0xe0] ss:$12 sps:$4 sm:$0xff]  }
  0x46   : > { %2563 = vmatmul.mubr.bf16.vlgmr.msra.gmra.mrb[0].mxu1 %v4712_v4 }
  0x47   : > { %2616 = vmatmul.mubr.bf16.vlgmr.msra.gmra.mrb[0].mxu0 %v4715_v5  ;;  %2849 = vmatpush1.bf16.msra.mxu1 %v4085_v7  ;;  %v4169_v7 = vld [vmem:[%s5684_s1 + $0x20] ss:$12 sps:$4 sm:$0xff]  }
  0x48   : > { %2637 = vmatpush1.bf16.msra.mxu0 %v4082_v6  ;;  %2850 = vmatprep.subr.bf16.mxu1 %v4093_v9  ;;  %v4195_v6 = vld [vmem:[%s4638_s13 + $0xa4] ss:$56 sps:$4 sm:$0xff]  }
  0x49   : > { %2638 = vmatprep.subr.bf16.mxu0 %v4090_v8  ;;  %2572 = vmatprep.mubr.bf16.mxu1 %v4756_v18  ;;  %v4174_v8 = vld [vmem:[%s5684_s1 + $0x454] ss:$12 sps:$4 sm:$0xff]   ;;  %v4175_v9 = vld [vmem:[%s5684_s1 + $0xf8] ss:$12 sps:$4 sm:$0xff]  }
  0x4a   : > { %2625 = vmatprep.mubr.bf16.mxu0 %v4805_v34 }
  0x4b   : > { %2851 = vmatpush1.bf16.msra.mxu1 %v4091_v11  ;;  %v4198_v11 = vld [vmem:[%s4638_s13 + $0xa0] ss:$56 sps:$4 sm:$0xff]  }
  0x4c   : > { %2639 = vmatpush1.bf16.msra.mxu0 %v4088_v10  ;;  %2852 = vmatprep.subr.bf16.mxu1 %v4099_v13  ;;  %v4172_v10 = vld [vmem:[%s5684_s1 + $0x450] ss:$12 sps:$4 sm:$0xff]   ;;  %v4180_v13 = vld [vmem:[%s5684_s1 + $0x46c] ss:$12 sps:$4 sm:$0xff]  }
  0x4d   : > { %2640 = vmatprep.subr.bf16.mxu0 %v4096_v12  ;;  %v4177_v12 = vld [vmem:[%s5684_s1 + $0x38] ss:$12 sps:$4 sm:$0xff]  }
  0x4e   : > { %2573 = vmatmul.mubr.bf16.gmra.mrb[4].mxu1 %v4759_v19 }
  0x4f   : > { %2853 = vmatpush1.bf16.msra.mxu1 %v4097_v15  ;;  %3723 = vmatprep.mubr.msk.bf16.mxu1 %vm2523_vm0, %v4159_v26  ;;  %v4178_v15 = vld [vmem:[%s5684_s1 + $0x468] ss:$12 sps:$4 sm:$0xff]   ;;  %v4197_v26 = vld [vmem:[%s5684_s1 + $0x80] ss:$12 sps:$4 sm:$0xff]  }
  0x50   : > { %2641 = vmatpush1.bf16.msra.mxu0 %v4094_v14  ;;  %2854 = vmatprep.subr.bf16.mxu1 %v4105_v17  ;;  %v4181_v14 = vld [vmem:[%s5684_s1 + $0x110] ss:$12 sps:$4 sm:$0xff]  }
  0x51   : > { %2642 = vmatprep.subr.bf16.mxu0 %v4102_v16  ;;  %2626 = vmatmul.mubr.bf16.gmra.mrb[4].mxu0 %v4818_v38  ;;  %v4182_v16 = vld [vmem:[%s5684_s1 + $0x50] ss:$12 sps:$4 sm:$0xff]  }
  0x52   : > { %2668 = vmatprep.mubr.bf16.mxu0 %v4840_v45  ;;  %v4188_v17 = vld [vmem:[%s5684_s1 + $0x484] ss:$12 sps:$4 sm:$0xff]  }
  0x53   : > { %2855 = vmatpush1.bf16.msra.mxu1 %v4103_v21  ;;  %v4938_v21 = vld [vmem:[%s4638_s13 + $0x10] ss:$56 sps:$4 sm:$0xff]  }
  0x54   : > { %2643 = vmatpush1.bf16.msra.mxu0 %v4100_v20  ;;  %2856 = vmatprep.subr.bf16.mxu1 %v4111_v23  ;;  %v4189_v20 = vld [vmem:[%s5684_s1 + $0x128] ss:$12 sps:$4 sm:$0xff]  }
  0x55   : > { %2644 = vmatprep.subr.bf16.mxu0 %v4108_v22  ;;  %v4186_v22 = vld [vmem:[%s5684_s1 + $0x480] ss:$12 sps:$4 sm:$0xff]   ;;  %v4190_v23 = vld [vmem:[%s5684_s1 + $0x68] ss:$12 sps:$4 sm:$0xff]  }
  0x57   : > { %2857 = vmatpush1.bf16.msra.mxu1 %v4109_v25  ;;  %v4191_v25 = vld [vmem:[%s5684_s1 + $0x498] ss:$12 sps:$4 sm:$0xff]  }
  0x58   : > { %2645 = vmatpush1.bf16.msra.mxu0 %v4106_v24  ;;  %2858 = vmatprep.subr.bf16.mxu1 %v4117_v28  ;;  %v4193_v24 = vld [vmem:[%s5684_s1 + $0x49c] ss:$12 sps:$4 sm:$0xff]   ;;  %v4202_v28 = vld [vmem:[%s5684_s1 + $0x158] ss:$12 sps:$4 sm:$0xff]  }
  0x59   : > { %2646 = vmatprep.subr.bf16.mxu0 %v4114_v27  ;;  %v4201_v27 = vld [vmem:[%s5684_s1 + $0x4b4] ss:$12 sps:$4 sm:$0xff]  }
  0x5b   : > { %2859 = vmatpush1.bf16.msra.mxu1 %v4115_v30  ;;  %v4203_v30 = vld [vmem:[%s5684_s1 + $0x98] ss:$12 sps:$4 sm:$0xff]  }
  0x5c   : > { %2647 = vmatpush1.bf16.msra.mxu0 %v4112_v29  ;;  %2860 = vmatprep.subr.bf16.mxu1 %v4123_v32  ;;  %v4199_v29 = vld [vmem:[%s5684_s1 + $0x4b0] ss:$12 sps:$4 sm:$0xff]  }
  0x5d   : > { %2648 = vmatprep.subr.bf16.mxu0 %v4120_v31  ;;  %v4206_v31 = vld [vmem:[%s5684_s1 + $0x4cc] ss:$12 sps:$4 sm:$0xff]   ;;  %v4207_v32 = vld [vmem:[%s5684_s1 + $0x170] ss:$12 sps:$4 sm:$0xff]  }
  0x5f   : > { %2861 = vmatpush1.bf16.msra.mxu1 %v4121_v35  ;;  %v4208_v35 = vld [vmem:[%s5684_s1 + $0xb0] ss:$12 sps:$4 sm:$0xff]  }
  0x60   : > { %2649 = vmatpush1.bf16.msra.mxu0 %v4118_v33  ;;  %2862 = vmatprep.subr.bf16.mxu1 %v4129_v37  ;;  %v4204_v33 = vld [vmem:[%s5684_s1 + $0x4c8] ss:$12 sps:$4 sm:$0xff]  }
  0x61   : > { %2650 = vmatprep.subr.bf16.mxu0 %v4126_v36  ;;  %v4211_v36 = vld [vmem:[%s5684_s1 + $0x4e4] ss:$12 sps:$4 sm:$0xff]   ;;  %v4212_v37 = vld [vmem:[%s5684_s1 + $0x248] ss:$12 sps:$4 sm:$0xff]  }
  0x63   : > { %2863 = vmatpush1.bf16.msra.mxu1 %v4127_v40  ;;  %v4213_v40 = vld [vmem:[%s5684_s1 + $0x188] ss:$12 sps:$4 sm:$0xff]  }
  0x64   : > { %2651 = vmatpush1.bf16.msra.mxu0 %v4124_v39  ;;  %2864 = vmatprep.subr.bf16.mxu1 %v4135_v42  ;;  %v4209_v39 = vld [vmem:[%s5684_s1 + $0x4e0] ss:$12 sps:$4 sm:$0xff]   ;;  %v5000_v42 = vld [vmem:[%s4638_s13 + $0x84] ss:$56 sps:$4 sm:$0xff]  }
  0x65   : > { %2652 = vmatprep.subr.bf16.mxu0 %v4132_v41  ;;  %v4216_v41 = vld [vmem:[%s5684_s1 + $0x4fc] ss:$12 sps:$4 sm:$0xff]  }
  0x67   : > { %2865 = vmatpush1.bf16.msra.mxu1 %v4133_v44  ;;  %v4214_v44 = vld [vmem:[%s5684_s1 + $0x4f8] ss:$12 sps:$4 sm:$0xff]  }
  0x68   : > { %2653 = vmatpush1.bf16.msra.mxu0 %v4130_v43  ;;  %2866 = vmatprep.subr.bf16.mxu1 %v4141_v47  ;;  %v4217_v43 = vld [vmem:[%s5684_s1 + $0x260] ss:$12 sps:$4 sm:$0xff]  }
  0x69   : > { %2654 = vmatprep.subr.bf16.mxu0 %v4138_v46  ;;  %v5011_v46 = vld [vmem:[%s4638_s13 + $0x80] ss:$56 sps:$4 sm:$0xff]  }
  0x6a   : > { %v4218_v47 = vld [vmem:[%s5684_s1 + $0x1a0] ss:$12 sps:$4 sm:$0xff]  }
  0x6b   : > { %2867 = vmatpush1.bf16.msra.mxu1 %v4139_v50  ;;  %v4219_v50 = vld [vmem:[%s5684_s1 + $0x510] ss:$12 sps:$4 sm:$0xff]  }
  0x6c   : > { %2655 = vmatpush1.bf16.msra.mxu0 %v4136_v48  ;;  %2868 = vmatprep.subr.bf16.mxu1 %v4150_v53  ;;  %v4221_v48 = vld [vmem:[%s5684_s1 + $0x514] ss:$12 sps:$4 sm:$0xff]   ;;  %v4226_v53 = vld [vmem:[%s5684_s1 + $0x52c] ss:$12 sps:$4 sm:$0xff]  }
  0x6d   : > { %2656 = vmatprep.subr.bf16.mxu0 %v4147_v52  ;;  %v4223_v52 = vld [vmem:[%s5684_s1 + $0x1b8] ss:$12 sps:$4 sm:$0xff]  }
  0x6f   : > { %2869 = vmatpush1.bf16.msra.mxu1 %v4148_v55  ;;  %v5037_v55 = vld [vmem:[%s4638_s13 + $0x1c] ss:$56 sps:$4 sm:$0xff]  }
  0x70   : > { %2657 = vmatpush1.bf16.msra.mxu0 %v4145_v54  ;;  %2870 = vmatprep.subr.bf16.mxu1 %v4156_v57  ;;  %v4227_v54 = vld [vmem:[%s5684_s1 + $0x290] ss:$12 sps:$4 sm:$0xff]  }
  0x71   : > { %2658 = vmatprep.subr.bf16.mxu0 %v4153_v56  ;;  %v4228_v56 = vld [vmem:[%s5684_s1 + $0x1d0] ss:$12 sps:$4 sm:$0xff]  }
  0x72   : > { %v4231_v57 = vld [vmem:[%s5684_s1 + $0x544] ss:$12 sps:$4 sm:$0xff]  }
  0x73   : > { %2871 = vmatpush1.bf16.msra.mxu1 %v4154_v59  ;;  %v4233_v59 = vld [vmem:[%s5684_s1 + $0x1e8] ss:$12 sps:$4 sm:$0xff]  }
  0x74   : > { %2659 = vmatpush1.bf16.msra.mxu0 %v4151_v58  ;;  %3745 = vmatprep.subr.bf16.mxu1 %v4163_v61  ;;  %v4232_v58 = vld [vmem:[%s5684_s1 + $0x2a8] ss:$12 sps:$4 sm:$0xff]   ;;  %v4237_v61 = vld [vmem:[%s5684_s1 + $0x2c0] ss:$12 sps:$4 sm:$0xff]  }
  0x75   : > { %2660 = vmatprep.subr.bf16.mxu0 %v4162_v60  ;;  %v4236_v60 = vld [vmem:[%s5684_s1 + $0x55c] ss:$12 sps:$4 sm:$0xff]  }
  0x76   : > { %2881 = vmatmul.mubr.bf16.vlgmr.msra.gmra.mrb[8].mxu1 %v4157_v62  ;;  %v4238_v62 = vld [vmem:[%s5684_s1 + $0x200] ss:$12 sps:$4 sm:$0xff]  }
  0x77   : > { %3746 = vmatpush3.bf16.msra.mxu1 %v4164_v0  ;;  %3724 = vmatprep.mubr.msk.bf16.mxu1 %vm2523_vm0, %v4195_v6  ;;  %v4242_v0 = vld [vmem:[%s5684_s1 + $0x2d8] ss:$12 sps:$4 sm:$0xff]   ;;  %v4247_v6 = vld [vmem:[%s5684_s1 + $0x2f0] ss:$12 sps:$4 sm:$0xff]  }
  0x78   : > { %2661 = vmatpush1.bf16.msra.mxu0 %v4160_v63  ;;  %3747 = vmatprep.subr.bf16.mxu1 %v4168_v2  ;;  %v4241_v63 = vld [vmem:[%s5684_s1 + $0x574] ss:$12 sps:$4 sm:$0xff]   ;;  %v4243_v2 = vld [vmem:[%s5684_s1 + $0x218] ss:$12 sps:$4 sm:$0xff]  }
  0x79   : > { %2662 = vmatprep.subr.bf16.mxu0 %v4167_v1  ;;  %v4239_v1 = vld [vmem:[%s5684_s1 + $0x570] ss:$12 sps:$4 sm:$0xff]  }
  0x7b   : > { %3748 = vmatpush3.bf16.msra.mxu1 %v4169_v7  ;;  %v4244_v7 = vld [vmem:[%s5684_s1 + $0x588] ss:$12 sps:$4 sm:$0xff]  }
  0x7c   : > { %2663 = vmatpush1.bf16.msra.mxu0 %v4165_v3  ;;  %3749 = vmatprep.subr.bf16.mxu1 %v4175_v9  ;;  %v4246_v3 = vld [vmem:[%s5684_s1 + $0x58c] ss:$12 sps:$4 sm:$0xff]   ;;  %v4251_v9 = vld [vmem:[%s5684_s1 + $0x5a4] ss:$12 sps:$4 sm:$0xff]  }
  0x7d   : > { %2664 = vmatprep.subr.bf16.mxu0 %v4174_v8  ;;  %v4248_v8 = vld [vmem:[%s5684_s1 + $0x230] ss:$12 sps:$4 sm:$0xff]  }
  0x7e   : > { %2891 = vmatmul.mubr.bf16.gmra.mrb[12].mxu1 %v4198_v11  ;;  %v4249_v11 = vld [vmem:[%s5684_s1 + $0x5a0] ss:$12 sps:$4 sm:$0xff]  }
  0x7f   : > { %3750 = vmatpush3.bf16.msra.mxu1 %v4177_v12  ;;  %2933 = vmatprep.mubr.bf16.mxu1 %v4653_v49  ;;  %v4194_v49 = vld [vmem:[%s5684_s1 + $0x140] ss:$12 sps:$4 sm:$0xff]   ;;  %v4253_v12 = vld [vmem:[%s5684_s1 + $0x308] ss:$12 sps:$4 sm:$0xff]  }
  0x80   : > { %2665 = vmatpush1.bf16.msra.mxu0 %v4172_v10  ;;  %3751 = vmatprep.subr.bf16.mxu1 %v4181_v14  ;;  %v4252_v10 = vld [vmem:[%s5684_s1 + $0x3c8] ss:$12 sps:$4 sm:$0xff]   ;;  %v4257_v14 = vld [vmem:[%s5684_s1 + $0x3e0] ss:$12 sps:$4 sm:$0xff]  }
  0x81   : > { %2666 = vmatprep.subr.bf16.mxu0 %v4180_v13  ;;  %v4256_v13 = vld [vmem:[%s5684_s1 + $0x5bc] ss:$12 sps:$4 sm:$0xff]  }
  0x83   : > { %3752 = vmatpush3.bf16.msra.mxu1 %v4182_v16  ;;  %v4258_v16 = vld [vmem:[%s5684_s1 + $0x320] ss:$12 sps:$4 sm:$0xff]  }
  0x84   : > { %2667 = vmatpush1.bf16.msra.mxu0 %v4178_v15  ;;  %3753 = vmatprep.subr.bf16.mxu1 %v4189_v20  ;;  %v4254_v15 = vld [vmem:[%s5684_s1 + $0x5b8] ss:$12 sps:$4 sm:$0xff]  }
  0x85   : > { %2689 = vmatprep.subr.bf16.mxu0 %v4188_v17  ;;  %v4263_v17 = vld [vmem:[%s5684_s1 + $0x5d4] ss:$12 sps:$4 sm:$0xff]   ;;  %v4264_v20 = vld [vmem:[%s5684_s1 + $0x3f8] ss:$12 sps:$4 sm:$0xff]  }
  0x87   : > { %2669 = vmatmul.mubr.bf16.vlgmr.msra.gmra.mrb[0].mxu0 %v4938_v21  ;;  %3754 = vmatpush3.bf16.msra.mxu1 %v4190_v23  ;;  %v4269_v23 = vld [vmem:[%s5684_s1 + $0x5ec] ss:$12 sps:$4 sm:$0xff]  }
  0x88   : > { %2690 = vmatpush1.bf16.msra.mxu0 %v4186_v22  ;;  %3755 = vmatprep.subr.bf16.mxu1 %v4194_v49  ;;  %v4266_v22 = vld [vmem:[%s5684_s1 + $0x338] ss:$12 sps:$4 sm:$0xff]   ;;  %v4271_v49 = vld [vmem:[%s5684_s1 + $0x350] ss:$12 sps:$4 sm:$0xff]  }
  0x89   : > { %2691 = vmatprep.subr.bf16.mxu0 %v4193_v24  ;;  %2678 = vmatprep.mubr.bf16.mxu0 %v5000_v42  ;;  %v4267_v24 = vld [vmem:[%s5684_s1 + $0x5e8] ss:$12 sps:$4 sm:$0xff]  }
  0x8b   : > { %3756 = vmatpush3.bf16.msra.mxu1 %v4197_v26  ;;  %v5151_v26 = vld [vmem:[%s4638_s13 + $0x18] ss:$56 sps:$4 sm:$0xff]  }
  0x8c   : > { %2692 = vmatpush1.bf16.msra.mxu0 %v4191_v25  ;;  %3757 = vmatprep.subr.bf16.mxu1 %v4202_v28  ;;  %v4277_v25 = vld [vmem:[%s5684_s1 + $0x604] ss:$12 sps:$4 sm:$0xff]   ;;  %v4279_v28 = vld [vmem:[%s5684_s1 + $0x368] ss:$12 sps:$4 sm:$0xff]  }
  0x8d   : > { %2693 = vmatprep.subr.bf16.mxu0 %v4201_v27  ;;  %v4275_v27 = vld [vmem:[%s5684_s1 + $0x600] ss:$12 sps:$4 sm:$0xff]  }
  0x8f   : > { %3758 = vmatpush3.bf16.msra.mxu1 %v4203_v30  ;;  %2679 = vmatmul.mubr.bf16.gmra.mrb[4].mxu0 %v5011_v46  ;;  %v4283_v30 = vld [vmem:[%s5684_s1 + $0x440] ss:$12 sps:$4 sm:$0xff]  }
  0x90   : > { %2694 = vmatpush1.bf16.msra.mxu0 %v4199_v29  ;;  %3759 = vmatprep.subr.bf16.mxu1 %v4207_v32  ;;  %v4282_v29 = vld [vmem:[%s5684_s1 + $0x61c] ss:$12 sps:$4 sm:$0xff]   ;;  %v4287_v32 = vld [vmem:[%s5684_s1 + $0x634] ss:$12 sps:$4 sm:$0xff]  }
  0x91   : > { %2695 = vmatprep.subr.bf16.mxu0 %v4206_v31  ;;  %2721 = vmatprep.mubr.bf16.mxu0 %v5037_v55  ;;  %v4284_v31 = vld [vmem:[%s5684_s1 + $0x380] ss:$12 sps:$4 sm:$0xff]  }
  0x93   : > { %3760 = vmatpush3.bf16.msra.mxu1 %v4208_v35  ;;  %v4285_v35 = vld [vmem:[%s5684_s1 + $0x630] ss:$12 sps:$4 sm:$0xff]  }
  0x94   : > { %2696 = vmatpush1.bf16.msra.mxu0 %v4204_v33  ;;  %3773 = vmatprep.subr.bf16.mxu1 %v4212_v37  ;;  %v4288_v33 = vld [vmem:[%s5684_s1 + $0x458] ss:$12 sps:$4 sm:$0xff]  }
  0x95   : > { %2697 = vmatprep.subr.bf16.mxu0 %v4211_v36  ;;  %v4289_v36 = vld [vmem:[%s5684_s1 + $0x398] ss:$12 sps:$4 sm:$0xff]  }
  0x96   : > { %2934 = vmatmul.mubr.bf16.vlgmr.msra.gmra.mrb[16].mxu1 %v4712_v4  ;;  %v4222_v4 = vld [vmem:[%s5684_s1 + $0x278] ss:$12 sps:$4 sm:$0xff]  }
  0x97   : > { %3774 = vmatpush3.bf16.msra.mxu1 %v4213_v40  ;;  %2941 = vmatprep.mubr.bf16.mxu1 %v4756_v18  ;;  %v4224_v18 = vld [vmem:[%s5684_s1 + $0x528] ss:$12 sps:$4 sm:$0xff]   ;;  %v4292_v37 = vld [vmem:[%s5684_s1 + $0x64c] ss:$12 sps:$4 sm:$0xff]   ;;  %v4293_v40 = vld [vmem:[%s5684_s1 + $0x470] ss:$12 sps:$4 sm:$0xff]  }
  0x98   : > { %2698 = vmatpush1.bf16.msra.mxu0 %v4209_v39  ;;  %3775 = vmatprep.subr.bf16.mxu1 %v4217_v43  ;;  %v5192_v39 = vld [vmem:[%s4638_s13 + $0x8c] ss:$56 sps:$4 sm:$0xff]   ;;  %v4290_v43 = vld [vmem:[%s5684_s1 + $0x648] ss:$12 sps:$4 sm:$0xff]  }
  0x99   : > { %2699 = vmatprep.subr.bf16.mxu0 %v4216_v41  ;;  %v5199_v41 = vld [vmem:[%s4638_s13 + $0x88] ss:$56 sps:$4 sm:$0xff]  }
  0x9b   : > { %3776 = vmatpush3.bf16.msra.mxu1 %v4218_v47  ;;  %v4297_v47 = vld [vmem:[%s5684_s1 + $0x664] ss:$12 sps:$4 sm:$0xff]  }
  0x9c   : > { %2700 = vmatpush1.bf16.msra.mxu0 %v4214_v44  ;;  %3777 = vmatprep.subr.bf16.mxu1 %v4222_v4  ;;  %v4294_v44 = vld [vmem:[%s5684_s1 + $0x3b0] ss:$12 sps:$4 sm:$0xff]   ;;  %v4295_v4 = vld [vmem:[%s5684_s1 + $0x660] ss:$12 sps:$4 sm:$0xff]  }
  0x9d   : > { %2701 = vmatprep.subr.bf16.mxu0 %v4221_v48  ;;  %v4298_v48 = vld [vmem:[%s5684_s1 + $0x548] ss:$12 sps:$4 sm:$0xff]  }
  0x9e   : > { %2942 = vmatmul.mubr.bf16.gmra.mrb[20].mxu1 %v4759_v19  ;;  %v4229_v19 = vld [vmem:[%s5684_s1 + $0x540] ss:$12 sps:$4 sm:$0xff]  }
  0x9f   : > { %3778 = vmatpush3.bf16.msra.mxu1 %v4223_v52  ;;  %2982 = vmatprep.mubr.bf16.mxu1 %v4659_v51  ;;  %v4234_v51 = vld [vmem:[%s5684_s1 + $0x558] ss:$12 sps:$4 sm:$0xff]   ;;  %v4302_v52 = vld [vmem:[%s5684_s1 + $0x67c] ss:$12 sps:$4 sm:$0xff]  }
  0xa0   : > { %2702 = vmatpush1.bf16.msra.mxu0 %v4219_v50  ;;  %3779 = vmatprep.subr.bf16.mxu1 %v4227_v54  ;;  %v4299_v50 = vld [vmem:[%s5684_s1 + $0x488] ss:$12 sps:$4 sm:$0xff]   ;;  %v5227_v54 = vld [vmem:[%s4638_s13 + $0x24] ss:$56 sps:$4 sm:$0xff]  }
  0xa1   : > { %2703 = vmatprep.subr.bf16.mxu0 %v4226_v53  ;;  %v4303_v53 = vld [vmem:[%s5684_s1 + $0x560] ss:$12 sps:$4 sm:$0xff]  }
  0xa3   : > { %3780 = vmatpush3.bf16.msra.mxu1 %v4228_v56  ;;  %v4304_v56 = vld [vmem:[%s5684_s1 + $0x4a0] ss:$12 sps:$4 sm:$0xff]  }
  0xa4   : > { %2704 = vmatpush1.bf16.msra.mxu0 %v4224_v18  ;;  %3781 = vmatprep.subr.bf16.mxu1 %v4232_v58  ;;  %v4300_v18 = vld [vmem:[%s5684_s1 + $0x678] ss:$12 sps:$4 sm:$0xff]   ;;  %v4305_v58 = vld [vmem:[%s5684_s1 + $0x690] ss:$12 sps:$4 sm:$0xff]  }
  0xa5   : > { %2705 = vmatprep.subr.bf16.mxu0 %v4231_v57  ;;  %v4307_v57 = vld [vmem:[%s5684_s1 + $0x694] ss:$12 sps:$4 sm:$0xff]  }
  0xa7   : > { %3782 = vmatpush3.bf16.msra.mxu1 %v4233_v59  ;;  %v4312_v59 = vld [vmem:[%s5684_s1 + $0x6ac] ss:$12 sps:$4 sm:$0xff]  }
  0xa8   : > { %2706 = vmatpush1.bf16.msra.mxu0 %v4229_v19  ;;  %3783 = vmatprep.subr.bf16.mxu1 %v4237_v61  ;;  %v4309_v19 = vld [vmem:[%s5684_s1 + $0x4b8] ss:$12 sps:$4 sm:$0xff]   ;;  %v4314_v61 = vld [vmem:[%s5684_s1 + $0x4d0] ss:$12 sps:$4 sm:$0xff]  }
  0xa9   : > { %2707 = vmatprep.subr.bf16.mxu0 %v4236_v60  ;;  %v4310_v60 = vld [vmem:[%s5684_s1 + $0x6a8] ss:$12 sps:$4 sm:$0xff]  }
  0xab   : > { %3784 = vmatpush3.bf16.msra.mxu1 %v4238_v62  ;;  %v4315_v62 = vld [vmem:[%s5684_s1 + $0x6c0] ss:$12 sps:$4 sm:$0xff]  }
  0xac   : > { %2708 = vmatpush1.bf16.msra.mxu0 %v4234_v51  ;;  %3785 = vmatprep.subr.bf16.mxu1 %v4242_v0  ;;  %v4317_v51 = vld [vmem:[%s5684_s1 + $0x6c4] ss:$12 sps:$4 sm:$0xff]   ;;  %v4322_v0 = vld [vmem:[%s5684_s1 + $0x6dc] ss:$12 sps:$4 sm:$0xff]  }
  0xad   : > { %2709 = vmatprep.subr.bf16.mxu0 %v4241_v63  ;;  %v4319_v63 = vld [vmem:[%s5684_s1 + $0x4e8] ss:$12 sps:$4 sm:$0xff]  }
  0xaf   : > { %3786 = vmatpush3.bf16.msra.mxu1 %v4243_v2  ;;  %v4324_v2 = vld [vmem:[%s5684_s1 + $0x500] ss:$12 sps:$4 sm:$0xff]  }
  0xb0   : > { %2710 = vmatpush1.bf16.msra.mxu0 %v4239_v1  ;;  %3787 = vmatprep.subr.bf16.mxu1 %v4247_v6  ;;  %v4320_v1 = vld [vmem:[%s5684_s1 + $0x6d8] ss:$12 sps:$4 sm:$0xff]  }
  0xb1   : > { %2711 = vmatprep.subr.bf16.mxu0 %v4246_v3  ;;  %v4327_v3 = vld [vmem:[%s5684_s1 + $0x6f4] ss:$12 sps:$4 sm:$0xff]   ;;  %v4328_v6 = vld [vmem:[%s5684_s1 + $0x5d8] ss:$12 sps:$4 sm:$0xff]  }
  0xb3   : > { %3788 = vmatpush3.bf16.msra.mxu1 %v4248_v8  ;;  %v4329_v8 = vld [vmem:[%s5684_s1 + $0x518] ss:$12 sps:$4 sm:$0xff]  }
  0xb4   : > { %2712 = vmatpush1.bf16.msra.mxu0 %v4244_v7  ;;  %3801 = vmatprep.subr.bf16.mxu1 %v4252_v10  ;;  %v4325_v7 = vld [vmem:[%s5684_s1 + $0x6f0] ss:$12 sps:$4 sm:$0xff]  }
  0xb5   : > { %2713 = vmatprep.subr.bf16.mxu0 %v4251_v9  ;;  %v4332_v9 = vld [vmem:[%s5684_s1 + $0x70c] ss:$12 sps:$4 sm:$0xff]   ;;  %v4333_v10 = vld [vmem:[%s5684_s1 + $0x5f0] ss:$12 sps:$4 sm:$0xff]  }
  0xb6   : > { %2983 = vmatmul.mubr.bf16.vlgmr.msra.gmra.mrb[24].mxu1 %v4715_v5  ;;  %v4261_v5 = vld [vmem:[%s5684_s1 + $0x5d0] ss:$12 sps:$4 sm:$0xff]  }
  0xb7   : > { %3802 = vmatpush3.bf16.msra.mxu1 %v4253_v12  ;;  %2990 = vmatprep.mubr.bf16.mxu1 %v4805_v34  ;;  %v4270_v34 = vld [vmem:[%s5684_s1 + $0x410] ss:$12 sps:$4 sm:$0xff]  }
  0xb8   : > { %2714 = vmatpush1.bf16.msra.mxu0 %v4249_v11  ;;  %3803 = vmatprep.subr.bf16.mxu1 %v4257_v14  ;;  %v4330_v11 = vld [vmem:[%s5684_s1 + $0x708] ss:$12 sps:$4 sm:$0xff]   ;;  %v4334_v12 = vld [vmem:[%s5684_s1 + $0x530] ss:$12 sps:$4 sm:$0xff]  }
  0xb9   : > { %2715 = vmatprep.subr.bf16.mxu0 %v4256_v13  ;;  %v4337_v13 = vld [vmem:[%s5684_s1 + $0x724] ss:$12 sps:$4 sm:$0xff]   ;;  %v4338_v14 = vld [vmem:[%s5684_s1 + $0x6c8] ss:$12 sps:$4 sm:$0xff]  }
  0xbb   : > { %3804 = vmatpush3.bf16.msra.mxu1 %v4258_v16  ;;  %v4339_v16 = vld [vmem:[%s5684_s1 + $0x608] ss:$12 sps:$4 sm:$0xff]  }
  0xbc   : > { %2716 = vmatpush1.bf16.msra.mxu0 %v4254_v15  ;;  %3805 = vmatprep.subr.bf16.mxu1 %v4264_v20  ;;  %v4335_v15 = vld [vmem:[%s5684_s1 + $0x720] ss:$12 sps:$4 sm:$0xff]  }
  0xbd   : > { %2717 = vmatprep.subr.bf16.mxu0 %v4263_v17  ;;  %v4342_v17 = vld [vmem:[%s5684_s1 + $0x73c] ss:$12 sps:$4 sm:$0xff]   ;;  %v4343_v20 = vld [vmem:[%s5684_s1 + $0x6e0] ss:$12 sps:$4 sm:$0xff]  }
  0xbe   : > { %2991 = vmatmul.mubr.bf16.gmra.mrb[28].mxu1 %v4818_v38  ;;  %v4278_v38 = vld [vmem:[%s5684_s1 + $0x428] ss:$12 sps:$4 sm:$0xff]  }
  0xbf   : > { %3806 = vmatpush3.bf16.msra.mxu1 %v4266_v22  ;;  %3031 = vmatprep.mubr.bf16.mxu1 %v4840_v45  ;;  %v4280_v45 = vld [vmem:[%s5684_s1 + $0x618] ss:$12 sps:$4 sm:$0xff]   ;;  %v4344_v22 = vld [vmem:[%s5684_s1 + $0x620] ss:$12 sps:$4 sm:$0xff]  }
  0xc0   : > { %2718 = vmatpush1.bf16.msra.mxu0 %v4261_v5  ;;  %3807 = vmatprep.subr.bf16.mxu1 %v4270_v34  ;;  %v4340_v5 = vld [vmem:[%s5684_s1 + $0x738] ss:$12 sps:$4 sm:$0xff]  }
  0xc1   : > { %2719 = vmatprep.subr.bf16.mxu0 %v4269_v23  ;;  %v4349_v23 = vld [vmem:[%s5684_s1 + $0x754] ss:$12 sps:$4 sm:$0xff]   ;;  %v4351_v34 = vld [vmem:[%s5684_s1 + $0x6f8] ss:$12 sps:$4 sm:$0xff]  }
  0xc3   : > { %3808 = vmatpush3.bf16.msra.mxu1 %v4271_v49  ;;  %v4352_v49 = vld [vmem:[%s5684_s1 + $0x638] ss:$12 sps:$4 sm:$0xff]  }
  0xc4   : > { %2720 = vmatpush1.bf16.msra.mxu0 %v4267_v24  ;;  %3809 = vmatprep.subr.bf16.mxu1 %v4278_v38  ;;  %v4347_v24 = vld [vmem:[%s5684_s1 + $0x750] ss:$12 sps:$4 sm:$0xff]   ;;  %v4353_v38 = vld [vmem:[%s5684_s1 + $0x768] ss:$12 sps:$4 sm:$0xff]  }
  0xc5   : > { %2742 = vmatprep.subr.bf16.mxu0 %v4277_v25  ;;  %v4355_v25 = vld [vmem:[%s5684_s1 + $0x76c] ss:$12 sps:$4 sm:$0xff]  }
  0xc7   : > { %2722 = vmatmul.mubr.bf16.vlgmr.msra.gmra.mrb[0].mxu0 %v5151_v26  ;;  %3810 = vmatpush3.bf16.msra.mxu1 %v4279_v28  ;;  %v4363_v28 = vld [vmem:[%s5684_s1 + $0x784] ss:$12 sps:$4 sm:$0xff]  }
  0xc8   : > { %2743 = vmatpush1.bf16.msra.mxu0 %v4275_v27  ;;  %3811 = vmatprep.subr.bf16.mxu1 %v4283_v30  ;;  %v4357_v27 = vld [vmem:[%s5684_s1 + $0x650] ss:$12 sps:$4 sm:$0xff]   ;;  %v4358_v30 = vld [vmem:[%s4638_s13 + $0x20] ss:$56 sps:$4 sm:$0xff]  }
  0xc9   : > { %2744 = vmatprep.subr.bf16.mxu0 %v4282_v29  ;;  %2731 = vmatprep.mubr.bf16.mxu0 %v5192_v39  ;;  %v4364_v29 = vld [vmem:[%s5684_s1 + $0x728] ss:$12 sps:$4 sm:$0xff]  }
  0xcb   : > { %3812 = vmatpush3.bf16.msra.mxu1 %v4284_v31  ;;  %v4365_v31 = vld [vmem:[%s5684_s1 + $0x668] ss:$12 sps:$4 sm:$0xff]  }
  0xcc   : > { %2745 = vmatpush1.bf16.msra.mxu0 %v4280_v45  ;;  %3813 = vmatprep.subr.bf16.mxu1 %v4288_v33  ;;  %v4361_v45 = vld [vmem:[%s5684_s1 + $0x780] ss:$12 sps:$4 sm:$0xff]  }
  0xcd   : > { %2746 = vmatprep.subr.bf16.mxu0 %v4287_v32  ;;  %v4368_v32 = vld [vmem:[%s5684_s1 + $0x79c] ss:$12 sps:$4 sm:$0xff]   ;;  %v4369_v33 = vld [vmem:[%s5684_s1 + $0x740] ss:$12 sps:$4 sm:$0xff]  }
  0xcf   : > { %3814 = vmatpush3.bf16.msra.mxu1 %v4289_v36  ;;  %2732 = vmatmul.mubr.bf16.gmra.mrb[4].mxu0 %v5199_v41  ;;  %v4370_v36 = vld [vmem:[%s5684_s1 + $0x680] ss:$12 sps:$4 sm:$0xff]  }
  0xd0   : > { %2747 = vmatpush1.bf16.msra.mxu0 %v4285_v35  ;;  %3815 = vmatprep.subr.bf16.mxu1 %v4293_v40  ;;  %v4366_v35 = vld [vmem:[%s5684_s1 + $0x798] ss:$12 sps:$4 sm:$0xff]  }
  0xd1   : > { %2748 = vmatprep.subr.bf16.mxu0 %v4292_v37  ;;  %2774 = vmatprep.mubr.bf16.mxu0 %v5227_v54  ;;  %v4391_v37 = vld [vmem:[%s4638_s13 + $0x94] ss:$56 sps:$4 sm:$0xff]   ;;  %v4374_v40 = vld [vmem:[%s5684_s1 + $0x758] ss:$12 sps:$4 sm:$0xff]  }
  0xd3   : > { %3816 = vmatpush3.bf16.msra.mxu1 %v4294_v44  ;;  %v4378_v44 = vld [vmem:[%s5684_s1 + $0x7cc] ss:$12 sps:$4 sm:$0xff]  }
  0xd4   : > { %2749 = vmatpush1.bf16.msra.mxu0 %v4290_v43  ;;  %3829 = vmatprep.subr.bf16.mxu1 %v4298_v48  ;;  %v4375_v43 = vld [vmem:[%s5684_s1 + $0x698] ss:$12 sps:$4 sm:$0xff]   ;;  %v4396_v48 = vld [vmem:[%s4638_s13 + $0x90] ss:$56 sps:$4 sm:$0xff]  }
  0xd5   : > { %2750 = vmatprep.subr.bf16.mxu0 %v4297_v47  ;;  %v4379_v47 = vld [vmem:[%s5684_s1 + $0x770] ss:$12 sps:$4 sm:$0xff]  }
  0xd6   : > { %3032 = vmatmul.mubr.bf16.vlgmr.msra.gmra.mrb[32].mxu1 %v4938_v21  ;;  %v4308_v21 = vld [vmem:[%s5684_s1 + $0x578] ss:$12 sps:$4 sm:$0xff]  }
  0xd7   : > { %3830 = vmatpush3.bf16.msra.mxu1 %v4299_v50  ;;  %3039 = vmatprep.mubr.bf16.mxu1 %v5000_v42  ;;  %v4313_v42 = vld [vmem:[%s5684_s1 + $0x590] ss:$12 sps:$4 sm:$0xff]  }
  0xd8   : > { %2751 = vmatpush1.bf16.msra.mxu0 %v4295_v4  ;;  %3831 = vmatprep.subr.bf16.mxu1 %v4303_v53  ;;  %v4376_v4 = vld [vmem:[%s5684_s1 + $0x7c8] ss:$12 sps:$4 sm:$0xff]   ;;  %v4380_v50 = vld [vmem:[%s5684_s1 + $0x6b0] ss:$12 sps:$4 sm:$0xff]   ;;  %v4426_v53 = vld [vmem:[%s4638_s13 + $0x2c] ss:$56 sps:$4 sm:$0xff]  }
  0xd9   : > { %2752 = vmatprep.subr.bf16.mxu0 %v4302_v52  ;;  %v4383_v52 = vld [vmem:[%s5684_s1 + $0x7e4] ss:$12 sps:$4 sm:$0xff]  }
  0xdb   : > { %3832 = vmatpush3.bf16.msra.mxu1 %v4304_v56  ;;  %v4385_v56 = vld [vmem:[%s5684_s1 + $0x788] ss:$12 sps:$4 sm:$0xff]  }
  0xdc   : > { %2753 = vmatpush1.bf16.msra.mxu0 %v4300_v18  ;;  %3833 = vmatprep.subr.bf16.mxu1 %v4308_v21  ;;  %v4381_v18 = vld [vmem:[%s5684_s1 + $0x7e0] ss:$12 sps:$4 sm:$0xff]  }
  0xdd   : > { %2754 = vmatprep.subr.bf16.mxu0 %v4307_v57  ;;  %v4388_v57 = vld [vmem:[%s5684_s1 + $0x7fc] ss:$12 sps:$4 sm:$0xff]   ;;  %v4389_v21 = vld [vmem:[%s5684_s1 + $0x860] ss:$12 sps:$4 sm:$0xff]  }
  0xde   : > { %3040 = vmatmul.mubr.bf16.gmra.mrb[36].mxu1 %v5011_v46  ;;  %v4318_v46 = vld [vmem:[%s5684_s1 + $0x5a8] ss:$12 sps:$4 sm:$0xff]  }
  0xdf   : > { %3834 = vmatpush3.bf16.msra.mxu1 %v4309_v19  ;;  %3080 = vmatprep.mubr.bf16.mxu1 %v5037_v55  ;;  %v4323_v55 = vld [vmem:[%s5684_s1 + $0x5c0] ss:$12 sps:$4 sm:$0xff]  }
  0xe0   : > { %2755 = vmatpush1.bf16.msra.mxu0 %v4305_v58  ;;  %3835 = vmatprep.subr.bf16.mxu1 %v4313_v42  ;;  %v4386_v58 = vld [vmem:[%s5684_s1 + $0x7f8] ss:$12 sps:$4 sm:$0xff]   ;;  %v4390_v19 = vld [vmem:[%s5684_s1 + $0x7a0] ss:$12 sps:$4 sm:$0xff]  }
  0xe1   : > { %2756 = vmatprep.subr.bf16.mxu0 %v4312_v59  ;;  %v4395_v59 = vld [vmem:[%s5684_s1 + $0x814] ss:$12 sps:$4 sm:$0xff]   ;;  %v4397_v42 = vld [vmem:[%s5684_s1 + $0x878] ss:$12 sps:$4 sm:$0xff]  }
  0xe3   : > { %3836 = vmatpush3.bf16.msra.mxu1 %v4314_v61 }
  0xe4   : > { %2757 = vmatpush1.bf16.msra.mxu0 %v4310_v60  ;;  %3837 = vmatprep.subr.bf16.mxu1 %v4318_v46  ;;  %v4393_v46 = vld [vmem:[%s5684_s1 + $0x810] ss:$12 sps:$4 sm:$0xff]  }
  0xe5   : > { %2758 = vmatprep.subr.bf16.mxu0 %v4317_v51 }
  0xe7   : > { %3838 = vmatpush3.bf16.msra.mxu1 %v4319_v63 }
  0xe8   : > { %2759 = vmatpush1.bf16.msra.mxu0 %v4315_v62  ;;  %3839 = vmatprep.subr.bf16.mxu1 %v4323_v55  ;;  %v4398_v62 = vld [vmem:[%s5684_s1 + $0x7b8] ss:$12 sps:$4 sm:$0xff]   ;;  %v4402_v55 = vld [vmem:[%s5684_s1 + $0x890] ss:$12 sps:$4 sm:$0xff]  }
  0xe9   : > { %2760 = vmatprep.subr.bf16.mxu0 %v4322_v0  ;;  %v4401_v0 = vld [vmem:[%s5684_s1 + $0x82c] ss:$12 sps:$4 sm:$0xff]  }
  0xeb   : > { %3840 = vmatpush3.bf16.msra.mxu1 %v4324_v2  ;;  %v4403_v2 = vld [vmem:[%s5684_s1 + $0x7d0] ss:$12 sps:$4 sm:$0xff]  }
  0xec   : > { %2761 = vmatpush1.bf16.msra.mxu0 %v4320_v1  ;;  %3841 = vmatprep.subr.bf16.mxu1 %v4328_v6  ;;  %v4399_v1 = vld [vmem:[%s5684_s1 + $0x828] ss:$12 sps:$4 sm:$0xff]  }
  0xed   : > { %2762 = vmatprep.subr.bf16.mxu0 %v4327_v3  ;;  %v4406_v3 = vld [vmem:[%s5684_s1 + $0x844] ss:$12 sps:$4 sm:$0xff]   ;;  %v4407_v6 = vld [vmem:[%s5684_s1 + $0x8a8] ss:$12 sps:$4 sm:$0xff]  }
  0xef   : > { %3842 = vmatpush3.bf16.msra.mxu1 %v4329_v8 }
  0xf0   : > { %2763 = vmatpush1.bf16.msra.mxu0 %v4325_v7  ;;  %3843 = vmatprep.subr.bf16.mxu1 %v4333_v10  ;;  %v4408_v10 = vld [vmem:[%s5684_s1 + $0x7e8] ss:$12 sps:$4 sm:$0xff]  }
  0xf1   : > { %2764 = vmatprep.subr.bf16.mxu0 %v4332_v9  ;;  %v4404_v9 = vld [vmem:[%s5684_s1 + $0x840] ss:$12 sps:$4 sm:$0xff]  }
  0xf3   : > { %3844 = vmatpush3.bf16.msra.mxu1 %v4334_v12  ;;  %v4411_v12 = vld [vmem:[%s5684_s1 + $0x85c] ss:$12 sps:$4 sm:$0xff]  }
  0xf4   : > { %2765 = vmatpush1.bf16.msra.mxu0 %v4330_v11  ;;  %3857 = vmatprep.subr.bf16.mxu1 %v4338_v14 }
  0xf5   : > { %2766 = vmatprep.subr.bf16.mxu0 %v4337_v13  ;;  %v4412_v13 = vld [vmem:[%s5684_s1 + $0x8c0] ss:$12 sps:$4 sm:$0xff]  }
  0xf6   : > { %3081 = vmatmul.mubr.bf16.vlgmr.msra.gmra.mrb[40].mxu1 %v5151_v26  ;;  %v4356_v26 = vld [vmem:[%s5684_s1 + $0x710] ss:$12 sps:$4 sm:$0xff]  }
  0xf7   : > { %3858 = vmatpush3.bf16.msra.mxu1 %v4339_v16  ;;  %3088 = vmatprep.mubr.bf16.mxu1 %v5192_v39  ;;  %v4373_v39 = vld [vmem:[%s5684_s1 + $0x7b4] ss:$12 sps:$4 sm:$0xff]  }
  0xf8   : > { %2767 = vmatpush1.bf16.msra.mxu0 %v4335_v15  ;;  %3859 = vmatprep.subr.bf16.mxu1 %v4343_v20  ;;  %v4409_v15 = vld [vmem:[%s5684_s1 + $0x858] ss:$12 sps:$4 sm:$0xff]   ;;  %v4413_v16 = vld [vmem:[%s5684_s1 + $0x800] ss:$12 sps:$4 sm:$0xff]  }
  0xf9   : > { %2768 = vmatprep.subr.bf16.mxu0 %v4342_v17  ;;  %v4416_v17 = vld [vmem:[%s5684_s1 + $0x874] ss:$12 sps:$4 sm:$0xff]   ;;  %v4417_v20 = vld [vmem:[%s5684_s1 + $0x8d8] ss:$12 sps:$4 sm:$0xff]  }
  0xfb   : > { %3860 = vmatpush3.bf16.msra.mxu1 %v4344_v22  ;;  %v4418_v22 = vld [vmem:[%s5684_s1 + $0x818] ss:$12 sps:$4 sm:$0xff]  }
  0xfc   : > { %2769 = vmatpush1.bf16.msra.mxu0 %v4340_v5  ;;  %3861 = vmatprep.subr.bf16.mxu1 %v4351_v34  ;;  %v4414_v5 = vld [vmem:[%s5684_s1 + $0x870] ss:$12 sps:$4 sm:$0xff]  }
  0xfd   : > { %2770 = vmatprep.subr.bf16.mxu0 %v4349_v23  ;;  %v4421_v23 = vld [vmem:[%s5684_s1 + $0x88c] ss:$12 sps:$4 sm:$0xff]   ;;  %v4422_v34 = vld [vmem:[%s5684_s1 + $0x8f0] ss:$12 sps:$4 sm:$0xff]  }
  0xfe   : > { %3089 = vmatmul.mubr.bf16.gmra.mrb[44].mxu1 %v5199_v41  ;;  %v4371_v41 = vld [vmem:[%s5684_s1 + $0x7b0] ss:$12 sps:$4 sm:$0xff]  }
  0xff   : > { %3862 = vmatpush3.bf16.msra.mxu1 %v4352_v49  ;;  %3129 = vmatprep.mubr.bf16.mxu1 %v5227_v54  ;;  %v4384_v54 = vld [vmem:[%s5684_s1 + $0x848] ss:$12 sps:$4 sm:$0xff]   ;;  %v4423_v49 = vld [vmem:[%s5684_s1 + $0x830] ss:$12 sps:$4 sm:$0xff]  }
 0x100   : > { %2771 = vmatpush1.bf16.msra.mxu0 %v4347_v24  ;;  %3863 = vmatprep.subr.bf16.mxu1 %v4356_v26  ;;  %v4419_v24 = vld [vmem:[%s5684_s1 + $0x888] ss:$12 sps:$4 sm:$0xff]  }
 0x101   : > { %2772 = vmatprep.subr.bf16.mxu0 %v4355_v25  ;;  %v4429_v25 = vld [vmem:[%s5684_s1 + $0x8a4] ss:$12 sps:$4 sm:$0xff]   ;;  %v4424_v26 = vld [vmem:[%s4638_s13 + $0x28] ss:$56 sps:$4 sm:$0xff]  }
 0x103   : > { %3864 = vmatpush3.bf16.msra.mxu1 %v4357_v27  ;;  %v4430_v27 = vld [vmem:[%s5684_s1 + $0x908] ss:$12 sps:$4 sm:$0xff]  }
 0x104   : > { %2773 = vmatpush1.bf16.msra.mxu0 %v4353_v38  ;;  %3865 = vmatprep.subr.bf16.mxu1 %v4364_v29  ;;  %v4427_v38 = vld [vmem:[%s5684_s1 + $0x8a0] ss:$12 sps:$4 sm:$0xff]   ;;  %v4433_v29 = vld [vmem:[%s5684_s1 + $0x8bc] ss:$12 sps:$4 sm:$0xff]  }
 0x105   : > { %2795 = vmatprep.subr.bf16.mxu0 %v4363_v28  ;;  %v4466_v28 = vmov 0  }
 0x107   : > { %2775 = vmatmul.mubr.bf16.vlgmr.msra.gmra.mrb[0].mxu0 %v4358_v30  ;;  %3866 = vmatpush3.bf16.msra.mxu1 %v4365_v31  ;;  %v4434_v31 = vld [vmem:[%s5684_s1 + $0x920] ss:$12 sps:$4 sm:$0xff]  }
 0x108   : > { %2796 = vmatpush1.bf16.msra.mxu0 %v4361_v45  ;;  %3867 = vmatprep.subr.bf16.mxu1 %v4369_v33  ;;  %v4431_v45 = vld [vmem:[%s5684_s1 + $0x8b8] ss:$12 sps:$4 sm:$0xff]  }
 0x109   : > { %2797 = vmatprep.subr.bf16.mxu0 %v4368_v32  ;;  %2784 = vmatprep.mubr.bf16.mxu0 %v4391_v37  ;;  %v4439_v32 = vld [vmem:[%s5684_s1 + $0x8d4] ss:$12 sps:$4 sm:$0xff]   ;;  %v4440_v33 = vld [vmem:[%s4638_s13 + $0x98] ss:$56 sps:$4 sm:$0xff]  }
 0x10b   : > { %3868 = vmatpush3.bf16.msra.mxu1 %v4370_v36  ;;  %v4441_v36 = vld [vmem:[%s5684_s1 + $0x938] ss:$12 sps:$4 sm:$0xff]  }
 0x10c   : > { %2798 = vmatpush1.bf16.msra.mxu0 %v4366_v35  ;;  %3869 = vmatprep.subr.bf16.mxu1 %v4374_v40  ;;  %v4437_v35 = vld [vmem:[%s5684_s1 + $0x8d0] ss:$12 sps:$4 sm:$0xff]  }
 0x10d   : > { %2799 = vmatprep.subr.bf16.mxu0 %v4373_v39  ;;  %v4442_v39 = vld [vmem:[%s5684_s1 + $0x8e8] ss:$12 sps:$4 sm:$0xff]   ;;  %v4445_v40 = vld [vmem:[%s5684_s1 + $0x950] ss:$12 sps:$4 sm:$0xff]  }
 0x10f   : > { %2785 = vmatmul.mubr.bf16.gmra.mrb[4].mxu0 %v4396_v48  ;;  %3870 = vmatpush3.bf16.msra.mxu1 %v4375_v43  ;;  %v4446_v43 = vld [vmem:[%s5684_s1 + $0x968] ss:$12 sps:$4 sm:$0xff]  }
 0x110   : > { %2800 = vmatpush1.bf16.msra.mxu0 %v4371_v41  ;;  %3871 = vmatprep.subr.bf16.mxu1 %v4379_v47  ;;  %v4454_v41 = vld [vmem:[%s4638_s13 + $0x34] ss:$56 sps:$4 sm:$0xff]  }
 0x111   : > { %2801 = vmatprep.subr.bf16.mxu0 %v4378_v44  ;;  %2827 = vmatprep.mubr.bf16.mxu0 %v4426_v53  ;;  %v4447_v44 = vld [vmem:[%s5684_s1 + $0x980] ss:$12 sps:$4 sm:$0xff]  }
 0x113   : > { %3872 = vmatpush3.bf16.msra.mxu1 %v4380_v50  ;;  %v4448_v50 = vld [vmem:[%s5684_s1 + $0x998] ss:$12 sps:$4 sm:$0xff]  }
 0x114   : > { %2802 = vmatpush1.bf16.msra.mxu0 %v4376_v4  ;;  %3885 = vmatprep.subr.bf16.mxu1 %v4384_v54 }
 0x115   : > { %2803 = vmatprep.subr.bf16.mxu0 %v4383_v52 }
 0x116   : > { %3130 = vmatmul.mubr.bf16.vlgmr.msra.gmra.mrb[48].mxu1 %v4358_v30  ;;  %v4435_v30 = vld [vmem:[%s4638_s13 + $0x9c] ss:$56 sps:$4 sm:$0xff]  }
 0x117   : > { %3886 = vmatpush3.bf16.msra.mxu1 %v4385_v56  ;;  %3137 = vmatprep.mubr.bf16.mxu1 %v4391_v37  ;;  %v4444_v37 = vld [vmem:[%s5684_s1 + $0x8ec] ss:$12 sps:$4 sm:$0xff]   ;;  %v4450_v56 = vld [vmem:[%s5684_s1 + $0x9c8] ss:$12 sps:$4 sm:$0xff]  }
 0x118   : > { %2804 = vmatpush1.bf16.msra.mxu0 %v4381_v18  ;;  %3887 = vmatprep.subr.bf16.mxu1 %v4389_v21 }
 0x119   : > { %2805 = vmatprep.subr.bf16.mxu0 %v4388_v57  ;;  %v5446_v60 = vpop.f32.mrb[0].mxu1 }
 0x11a   : > { %v5448_v61 = vpop.f32.mrb[1].mxu1 }
 0x11b   : > { %v5450_v51 = vpop.f32.mrb[2].mxu1  ;;  %3888 = vmatpush3.bf16.msra.mxu1 %v4390_v19  ;;  %v4452_v19 = vld [vmem:[%s5684_s1 + $0x9f8] ss:$12 sps:$4 sm:$0xff]  }
 0x11c   : > { %2806 = vmatpush1.bf16.msra.mxu0 %v4386_v58  ;;  %v5458_v63 = vpop.f32.mrb[3].mxu1  ;;  %3889 = vmatprep.subr.bf16.mxu1 %v4397_v42  ;;  %v4451_v58 = vld [vmem:[%s5684_s1 + $0x9e0] ss:$12 sps:$4 sm:$0xff]   ;;  %v4455_v42 = vld [vmem:[%s4638_s13 + $0x30] ss:$56 sps:$4 sm:$0xff]  }
 0x11d   : > { %2807 = vmatprep.subr.bf16.mxu0 %v4395_v59  ;;  %v4453_v59 = vld [vmem:[%s5684_s1 + $0xa10] ss:$12 sps:$4 sm:$0xff]  }
 0x11e   : > { %3138 = vmatmul.mubr.bf16.gmra.mrb[52].mxu1 %v4396_v48 }
 0x11f   : > { %3890 = vmatpush3.bf16.msra.mxu1 %v4398_v62  ;;  %3178 = vmatprep.mubr.bf16.mxu1 %v4426_v53  ;;  %v4449_v53 = vld [vmem:[%s5684_s1 + $0x9b0] ss:$12 sps:$4 sm:$0xff]  }
 0x120   : > { %2808 = vmatpush1.bf16.msra.mxu0 %v4393_v46  ;;  %3891 = vmatprep.subr.bf16.mxu1 %v4402_v55  ;;  %v4456_v46 = vld [vmem:[%s4638_s13 + $0xa4] ss:$56 sps:$4 sm:$0xff]  }
 0x121   : > { %2809 = vmatprep.subr.bf16.mxu0 %v4401_v0  ;;  %v5478_v7 = vpop.f32.mrb[4].mxu1 }
 0x122   : > { %v5480_v8 = vpop.f32.mrb[5].mxu1 }
 0x123   : > { %3892 = vmatpush3.bf16.msra.mxu1 %v4403_v2  ;;  %v5488_v11 = vpop.f32.mrb[6].mxu1 }
 0x124   : > { %2810 = vmatpush1.bf16.msra.mxu0 %v4399_v1  ;;  %3893 = vmatprep.subr.bf16.mxu1 %v4407_v6  ;;  %v5496_v14 = vpop.f32.mrb[7].mxu1  ;;  %v4457_v6 = vld [vmem:[%s4638_s13 + $0xa0] ss:$56 sps:$4 sm:$0xff]   ;;  %s3970_s13 = smul.u32 12, %s5688_s24 }
 0x125   : > { %2811 = vmatprep.subr.bf16.mxu0 %v4406_v3 }
 0x126   : > { %s5659_s18 = scalar_lea.vmem %s5686_s3, %s3970_s13 }
 0x127   : > { %3894 = vmatpush3.bf16.msra.mxu1 %v4408_v10 }
 0x128   : > { %2812 = vmatpush1.bf16.msra.mxu0 %v4404_v9  ;;  %3895 = vmatprep.subr.bf16.mxu1 %v4412_v13 }
 0x129   : > { %2813 = vmatprep.subr.bf16.mxu0 %v4411_v12 }
 0x12b   : > { %3896 = vmatpush3.bf16.msra.mxu1 %v4413_v16 }
 0x12c   : > { %2814 = vmatpush1.bf16.msra.mxu0 %v4409_v15  ;;  %3897 = vmatprep.subr.bf16.mxu1 %v4417_v20 }
 0x12d   : > { %2815 = vmatprep.subr.bf16.mxu0 %v4416_v17  ;;  %v642_v17 = vlaneseq }
 0x12f   : > { %3898 = vmatpush3.bf16.msra.mxu1 %v4418_v22  ;;  %v5625_v20 = vshrl.u32 %v642_v17, 7  ;;  %v5631_v22 = vld [vmem:[%s5685_s2] sm:$0x7] }
 0x130   : > { %2816 = vmatpush1.bf16.msra.mxu0 %v4414_v5  ;;  %3899 = vmatprep.subr.bf16.mxu1 %v4422_v34 }
 0x131   : > { %2817 = vmatprep.subr.bf16.mxu0 %v4421_v23  ;;  %v652_v5 = vsub.s32 2, %v5625_v20 }
 0x133   : > { %3900 = vmatpush3.bf16.msra.mxu1 %v4423_v49  ;;  %v653_v23 = vrot.slane %v5631_v22, %v652_v5 }
 0x134   : > { %2818 = vmatpush1.bf16.msra.mxu0 %v4419_v24  ;;  %3195 = vmatprep.subr.bf16.mxu1 %v4466_v28 }
 0x135   : > { %2819 = vmatprep.subr.bf16.mxu0 %v4429_v25 }
 0x136   : > { %3179 = vmatmul.mubr.bf16.vlgmr.msra.gmra.mrb[56].mxu1 %v4424_v26 }
 0x137   : > { %3196 = vmatpush1.bf16.msra.mxu1 %v4430_v27  ;;  %3186 = vmatprep.mubr.bf16.mxu1 %v4435_v30 }
 0x138   : > { %2820 = vmatpush1.bf16.msra.mxu0 %v4427_v38  ;;  %3197 = vmatprep.subr.bf16.mxu1 %v4466_v28 }
 0x139   : > { %2821 = vmatprep.subr.bf16.mxu0 %v4433_v29 }
 0x13b   : > { %3198 = vmatpush1.bf16.msra.mxu1 %v4434_v31 }
 0x13c   : > { %2822 = vmatpush1.bf16.msra.mxu0 %v4431_v45  ;;  %3199 = vmatprep.subr.bf16.mxu1 %v4466_v28 }
 0x13d   : > { %2823 = vmatprep.subr.bf16.mxu0 %v4439_v32 }
 0x13e   : > { %3187 = vmatmul.mubr.bf16.gmra.mrb[60].mxu1 %v4440_v33 }
 0x13f   : > { %3200 = vmatpush1.bf16.msra.mxu1 %v4441_v36  ;;  %3725 = vmatprep.mubr.msk.bf16.mxu1 %vm2523_vm0, %v4454_v41 }
 0x140   : > { %2824 = vmatpush1.bf16.msra.mxu0 %v4437_v35  ;;  %3201 = vmatprep.subr.bf16.mxu1 %v4466_v28 }
 0x141   : > { %2825 = vmatprep.subr.bf16.mxu0 %v4444_v37 }
 0x143   : > { %3202 = vmatpush1.bf16.msra.mxu1 %v4445_v40 }
 0x144   : > { %2826 = vmatpush1.bf16.msra.mxu0 %v4442_v39  ;;  %3203 = vmatprep.subr.bf16.mxu1 %v4466_v28 }
 0x147   : > { %2828 = vmatmul.mubr.bf16.vlgmr.msra.gmra.mrb[0].mxu0 %v4424_v26  ;;  %3204 = vmatpush1.bf16.msra.mxu1 %v4446_v43 }
 0x148   : > { %2837 = vmatprep.mubr.bf16.mxu0 %v4435_v30  ;;  %3205 = vmatprep.subr.bf16.mxu1 %v4466_v28 }
 0x149   : > { %v5581_v47 = vpop.f32.mrb[8].mxu1 }
 0x14a   : > { %v5583_v48 = vpop.f32.mrb[9].mxu1 }
 0x14b   : > { %v5585_v4 = vpop.f32.mrb[10].mxu1  ;;  %3206 = vmatpush1.bf16.msra.mxu1 %v4447_v44 }
 0x14c   : > { %v5590_v52 = vpop.f32.mrb[11].mxu1  ;;  %3207 = vmatprep.subr.bf16.mxu1 %v4466_v28 }
 0x14f   : > { %2838 = vmatmul.mubr.bf16.gmra.mrb[4].mxu0 %v4440_v33  ;;  %3208 = vmatpush1.bf16.msra.mxu1 %v4448_v50 }
 0x150   : > { %3209 = vmatprep.subr.bf16.mxu1 %v4466_v28 }
 0x151   : > { %v5597_v54 = vpop.f32.mrb[12].mxu1 }
 0x152   : > { %v5599_v18 = vpop.f32.mrb[13].mxu1 }
 0x153   : > { %3210 = vmatpush1.bf16.msra.mxu1 %v4449_v53  ;;  %v5604_v57 = vpop.f32.mrb[14].mxu1 }
 0x154   : > { %3211 = vmatprep.subr.bf16.mxu1 %v4466_v28  ;;  %v5607_v21 = vpop.f32.mrb[15].mxu1 }
 0x157   : > { %3212 = vmatpush1.bf16.msra.mxu1 %v4450_v56 }
 0x158   : > { %3213 = vmatprep.subr.bf16.mxu1 %v4466_v28 }
 0x15b   : > { %3214 = vmatpush1.bf16.msra.mxu1 %v4451_v58 }
 0x15c   : > { %3215 = vmatprep.subr.bf16.mxu1 %v4466_v28 }
 0x15f   : > { %3216 = vmatpush1.bf16.msra.mxu1 %v4452_v19 }
 0x160   : > { %3217 = vmatprep.subr.bf16.mxu1 %v4466_v28 }
 0x163   : > { %3218 = vmatpush1.bf16.msra.mxu1 %v4453_v59 }
 0x166   : > { %3228 = vmatmul.mubr.bf16.vlgmr.msra.gmra.mrb[64].mxu1 %v4455_v42 }
 0x167   : > { %3726 = vmatprep.mubr.msk.bf16.mxu1 %vm2523_vm0, %v4456_v46 }
 0x169   : > { %v3761_v62 = vpop.f32.mrb[16].mxu1 }
 0x16a   : > { %v3762_v0 = vpop.f32.mrb[17].mxu1 }
 0x16b   : > { %v3763_v55 = vadd.f32 %v3762_v0, %v3761_v62  ;;  %v3764_v1 = vpop.f32.mrb[18].mxu1 }
 0x16c   : > { %v3765_v2 = vpop.f32.mrb[19].mxu1 }
 0x16d   : > { %v3766_v3 = vadd.f32 %v3765_v2, %v3764_v1  ;;  %v2936_v49 = vadd.f32 %v3763_v55, %v653_v23 }
 0x16e   : > { %3236 = vmatmul.mubr.bf16.gmra.mrb[68].mxu1 %v4457_v6 }
 0x16f   : > { %v2939_v27 = vadd.f32 %v3766_v3, %v653_v23 }
 0x171   : > { %v3767_v9 = vpop.f32.mrb[20].mxu1 }
 0x172   : > { %v3768_v10 = vpop.f32.mrb[21].mxu1 }
 0x173   : > { %v3769_v12 = vadd.f32 %v3768_v10, %v3767_v9  ;;  %v3770_v13 = vpop.f32.mrb[22].mxu1 }
 0x174   : > { %v3771_v15 = vpop.f32.mrb[23].mxu1 }
 0x175   : > { %v3772_v16 = vadd.f32 %v3771_v15, %v3770_v13  ;;  %v2944_v32 = vadd.f32 %v3769_v12, %v653_v23 }
 0x177   : > { %v2947_v37 = vadd.f32 %v3772_v16, %v653_v23 }
 0x189   : > { %v3789_v34 = vpop.f32.mrb[24].mxu1 }
 0x18a   : > { %v3790_v24 = vpop.f32.mrb[25].mxu1 }
 0x18b   : > { %v3791_v25 = vadd.f32 %v3790_v24, %v3789_v34  ;;  %v3792_v26 = vpop.f32.mrb[26].mxu1 }
 0x18c   : > { %v3793_v38 = vpop.f32.mrb[27].mxu1 }
 0x18d   : > { %v2985_v28 = vadd.f32 %v3791_v25, %v2936_v49  ;;  %v3794_v29 = vadd.f32 %v3793_v38, %v3792_v26 }
 0x18f   : > { %v2988_v30 = vadd.f32 %v3794_v29, %v2939_v27 }
 0x191   : > { %v3795_v45 = vpop.f32.mrb[28].mxu1 }
 0x192   : > { %v3796_v31 = vpop.f32.mrb[29].mxu1 }
 0x193   : > { %v3797_v33 = vadd.f32 %v3796_v31, %v3795_v45  ;;  %v3798_v35 = vpop.f32.mrb[30].mxu1 }
 0x194   : > { %v3799_v36 = vpop.f32.mrb[31].mxu1 }
 0x195   : > { %v2993_v39 = vadd.f32 %v3797_v33, %v2944_v32  ;;  %v3800_v40 = vadd.f32 %v3799_v36, %v3798_v35 }
 0x197   : > { %v2996_v41 = vadd.f32 %v3800_v40, %v2947_v37 }
 0x1a9   : > { %v3817_v43 = vpop.f32.mrb[32].mxu1 }
 0x1aa   : > { %v3818_v44 = vpop.f32.mrb[33].mxu1 }
 0x1ab   : > { %v3819_v50 = vadd.f32 %v3818_v44, %v3817_v43  ;;  %v3820_v53 = vpop.f32.mrb[34].mxu1 }
 0x1ac   : > { %v3821_v56 = vpop.f32.mrb[35].mxu1 }
 0x1ad   : > { %v3034_v58 = vadd.f32 %v3819_v50, %v2985_v28  ;;  %v3822_v19 = vadd.f32 %v3821_v56, %v3820_v53 }
 0x1af   : > { %v3037_v59 = vadd.f32 %v3822_v19, %v2988_v30 }
 0x1b1   : > { %v3823_v42 = vpop.f32.mrb[36].mxu1 }
 0x1b2   : > { %v3824_v46 = vpop.f32.mrb[37].mxu1 }
 0x1b3   : > { %v3825_v62 = vadd.f32 %v3824_v46, %v3823_v42  ;;  %v3826_v0 = vpop.f32.mrb[38].mxu1 }
 0x1b4   : > { %v3827_v55 = vpop.f32.mrb[39].mxu1 }
 0x1b5   : > { %v3042_v1 = vadd.f32 %v3825_v62, %v2993_v39  ;;  %v3828_v2 = vadd.f32 %v3827_v55, %v3826_v0  ;;  %v644_v62 = vsub.s32 0, %v5625_v20  ;;  %v648_v0 = vsub.s32 1, %v5625_v20 }
 0x1b7   : > { %v3045_v3 = vadd.f32 %v3828_v2, %v2996_v41 }
 0x1c9   : > { %v3845_v6 = vpop.f32.mrb[40].mxu1 }
 0x1ca   : > { %v3846_v9 = vpop.f32.mrb[41].mxu1 }
 0x1cb   : > { %v3847_v10 = vadd.f32 %v3846_v9, %v3845_v6  ;;  %v3848_v12 = vpop.f32.mrb[42].mxu1  ;;  %v645_v6 = vrot.slane %v5631_v22, %v644_v62 }
 0x1cc   : > { %v3849_v13 = vpop.f32.mrb[43].mxu1 }
 0x1cd   : > { %v3083_v15 = vadd.f32 %v3847_v10, %v3034_v58  ;;  %v3850_v16 = vadd.f32 %v3849_v13, %v3848_v12  ;;  %v649_v10 = vrot.slane %v5631_v22, %v648_v0 }
 0x1cf   : > { %v3086_v17 = vadd.f32 %v3850_v16, %v3037_v59  ;;  %v2565_v16 = vadd.f32 %v5446_v60, %v645_v6 }
 0x1d1   : > { %v3851_v5 = vpop.f32.mrb[44].mxu1 }
 0x1d2   : > { %v3852_v23 = vpop.f32.mrb[45].mxu1 }
 0x1d3   : > { %v3853_v34 = vadd.f32 %v3852_v23, %v3851_v5  ;;  %v3854_v24 = vpop.f32.mrb[46].mxu1  ;;  %v2569_v5 = vadd.f32 %v5450_v51, %v645_v6 }
 0x1d4   : > { %v3855_v49 = vpop.f32.mrb[47].mxu1 }
 0x1d5   : > { %v3091_v25 = vadd.f32 %v3853_v34, %v3042_v1  ;;  %v3856_v26 = vadd.f32 %v3855_v49, %v3854_v24  ;;  %v2571_v24 = vadd.f32 %v5458_v63, %v649_v10 }
 0x1d7   : > { %v3094_v38 = vadd.f32 %v3856_v26, %v3045_v3 }
 0x1e9   : > { %v3873_v27 = vpop.f32.mrb[48].mxu1 }
 0x1ea   : > { %v3874_v28 = vpop.f32.mrb[49].mxu1 }
 0x1eb   : > { %v3875_v29 = vadd.f32 %v3874_v28, %v3873_v27  ;;  %v3876_v30 = vpop.f32.mrb[50].mxu1 }
 0x1ec   : > { %v3877_v45 = vpop.f32.mrb[51].mxu1 }
 0x1ed   : > { %v3132_v31 = vadd.f32 %v3875_v29, %v3083_v15  ;;  %v3878_v32 = vadd.f32 %v3877_v45, %v3876_v30  ;;  %v2575_v30 = vadd.f32 %v5478_v7, %v645_v6 }
 0x1ef   : > { %v3135_v33 = vadd.f32 %v3878_v32, %v3086_v17  ;;  %v2567_v17 = vadd.f32 %v5448_v61, %v649_v10 }
 0x1f1   : > { %v3879_v35 = vpop.f32.mrb[52].mxu1 }
 0x1f2   : > { %v3880_v36 = vpop.f32.mrb[53].mxu1 }
 0x1f3   : > { %v3881_v37 = vadd.f32 %v3880_v36, %v3879_v35  ;;  %v3882_v39 = vpop.f32.mrb[54].mxu1 }
 0x1f4   : > { %v3883_v40 = vpop.f32.mrb[55].mxu1 }
 0x1f5   : > { %v3140_v41 = vadd.f32 %v3881_v37, %v3091_v25  ;;  %v3884_v43 = vadd.f32 %v3883_v40, %v3882_v39 }
 0x1f7   : > { %v3143_v44 = vadd.f32 %v3884_v43, %v3094_v38 }
 0x209   : > { %v3901_v50 = vpop.f32.mrb[56].mxu1 }
 0x20a   : > { %v3902_v53 = vpop.f32.mrb[57].mxu1 }
 0x20b   : > { %v3903_v56 = vadd.f32 %v3902_v53, %v3901_v50  ;;  %v3904_v58 = vpop.f32.mrb[58].mxu1 }
 0x20c   : > { %v3905_v19 = vpop.f32.mrb[59].mxu1 }
 0x20d   : > { %v3906_v59 = vadd.f32 %v3905_v19, %v3904_v58  ;;  %v5634_v42 = vadd.f32 %v3903_v56, %v3132_v31 }
 0x20f   : > { %v5636_v46 = vadd.f32 %v3906_v59, %v3135_v33 }
 0x211   : > { %v3907_v55 = vpop.f32.mrb[60].mxu1 }
 0x212   : > { %v3908_v1 = vpop.f32.mrb[61].mxu1 }
 0x213   : > { %v3909_v2 = vadd.f32 %v3908_v1, %v3907_v55  ;;  %v3910_v3 = vpop.f32.mrb[62].mxu1 }
 0x214   : > { %v3911_v9 = vpop.f32.mrb[63].mxu1 }
 0x215   : > { %v3912_v12 = vadd.f32 %v3911_v9, %v3910_v3  ;;  %v5642_v13 = vadd.f32 %v3909_v2, %v3140_v41 }
 0x217   : > { %v5644_v15 = vadd.f32 %v3912_v12, %v3143_v44 }
 0x21a   : > { %v2829_v20 = vpop.f32.mrb[0].mxu0 }
 0x21b   : > { %v3914_v23 = vadd.f32 %v2829_v20, %v2565_v16  ;;  %v2831_v34 = vpop.f32.mrb[1].mxu0 }
 0x21c   : > { %v3917_v49 = vadd.f32 %v2831_v34, %v2567_v17  ;;  %v2833_v25 = vpop.f32.mrb[2].mxu0 }
 0x21d   : > { %v3915_v22 = vadd.f32 %v3914_v23, %v5581_v47  ;;  %v3920_v26 = vadd.f32 %v2833_v25, %v2569_v5  ;;  %v2835_v38 = vpop.f32.mrb[3].mxu0  ;;  %v2577_v47 = vadd.f32 %v5480_v8, %v649_v10 }
 0x21e   : > { %v3918_v27 = vadd.f32 %v3917_v49, %v5583_v48  ;;  %v3923_v28 = vadd.f32 %v2835_v38, %v2571_v24 }
 0x21f   : > { %v3244_v60 = vmax.f32 %v3915_v22, 0.0  ;;  %v3921_v61 = vadd.f32 %v3920_v26, %v5585_v4  ;;  %v2579_v4 = vadd.f32 %v5488_v11, %v645_v6 }
 0x220   : > { %v3245_v29 = vmax.f32 %v3918_v27, 0.0  ;;  %v3924_v51 = vadd.f32 %v3923_v28, %v5590_v52  ;;  %v2581_v52 = vadd.f32 %v5496_v14, %v649_v10 }
 0x221   : > { %v3247_v63 = vmax.f32 %v3921_v61, 0.0 }
 0x222   : > { %v3737_v48 = vpack.c.bf16 %v3245_v29, %v3244_v60  ;;  %v3248_v45 = vmax.f32 %v3924_v51, 0.0  ;;  %v2839_v31 = vpop.f32.mrb[4].mxu0 }
 0x223   : > { %v3926_v32 = vadd.f32 %v2839_v31, %v2575_v30  ;;  %v2841_v33 = vpop.f32.mrb[5].mxu0 }
 0x224   : > { %3296 = vst [vmem:[%s5659_s18] sm:$0xff] %v3737_v48  ;;  %v3739_v7 = vpack.c.bf16 %v3248_v45, %v3247_v63  ;;  %v3929_v35 = vadd.f32 %v2841_v33, %v2577_v47  ;;  %v2843_v36 = vpop.f32.mrb[6].mxu0 }
 0x225   : > { %v3927_v37 = vadd.f32 %v3926_v32, %v5597_v54  ;;  %v3932_v39 = vadd.f32 %v2843_v36, %v2579_v4  ;;  %v2845_v40 = vpop.f32.mrb[7].mxu0 }
 0x226   : > { %3298 = vst [vmem:[%s5659_s18 + $0xc] sm:$0xff] %v3739_v7  ;;  %v3930_v8 = vadd.f32 %v3929_v35, %v5599_v18  ;;  %v3935_v41 = vadd.f32 %v2845_v40, %v2581_v52 }
 0x227   : > { %v3250_v43 = vmax.f32 %v3927_v37, 0.0  ;;  %v3933_v11 = vadd.f32 %v3932_v39, %v5604_v57 }
 0x228   : > { %v3251_v44 = vmax.f32 %v3930_v8, 0.0  ;;  %v3936_v14 = vadd.f32 %v3935_v41, %v5607_v21 }
 0x229   : > { %v3253_v50 = vmax.f32 %v3933_v11, 0.0 }
 0x22a   : > { %v3741_v53 = vpack.c.bf16 %v3251_v44, %v3250_v43  ;;  %v3254_v56 = vmax.f32 %v3936_v14, 0.0 }
 0x22c   : > { %3300 = vst [vmem:[%s5659_s18 + $0x18] sm:$0xff] %v3741_v53  ;;  %v3743_v58 = vpack.c.bf16 %v3254_v56, %v3253_v50 }
 0x22e   : > { %3302 = vst [vmem:[%s5659_s18 + $0x24] sm:$0xff] %v3743_v58 }
 0x239   : > { %v3229_v54 = vpop.f32.mrb[64].mxu1 }
 0x23a   : > { %v3230_v19 = vadd.f32 %v3229_v54, %v5634_v42  ;;  %v3231_v59 = vpop.f32.mrb[65].mxu1 }
 0x23b   : > { %v3232_v18 = vpop.f32.mrb[66].mxu1 }
 0x23c   : > { %v3246_v62 = vmax.f32 %v3230_v19, 0.0  ;;  %v3233_v0 = vadd.f32 %v3232_v18, %v5636_v46  ;;  %v3234_v57 = vpop.f32.mrb[67].mxu1 }
 0x23e   : > { %v3738_v55 = vpack.c.bf16 %v3246_v62, %v3246_v62  ;;  %v3249_v21 = vmax.f32 %v3233_v0, 0.0 }
 0x240   : > { %3297 = vst [vmem:[%s5659_s18 + $0x8] sm:$0xf] %v3738_v55  ;;  %v3740_v1 = vpack.c.bf16 %v3249_v21, %v3249_v21 }
 0x241   : > { %v3237_v2 = vpop.f32.mrb[68].mxu1 }
 0x242   : > { %3299 = vst [vmem:[%s5659_s18 + $0x14] sm:$0xf] %v3740_v1  ;;  %v3238_v3 = vadd.f32 %v3237_v2, %v5642_v13  ;;  %v3239_v6 = vpop.f32.mrb[69].mxu1 }
 0x243   : > { %v3240_v9 = vpop.f32.mrb[70].mxu1 }
 0x244   : > { %v3252_v10 = vmax.f32 %v3238_v3, 0.0  ;;  %v3241_v42 = vadd.f32 %v3240_v9, %v5644_v15  ;;  %v3242_v12 = vpop.f32.mrb[71].mxu1 }
 0x246   : > { %v3742_v16 = vpack.c.bf16 %v3252_v10, %v3252_v10  ;;  %v3255_v17 = vmax.f32 %v3241_v42, 0.0 }
 0x248   : > { %3301 = vst [vmem:[%s5659_s18 + $0x20] sm:$0xf] %v3742_v16  ;;  %v3744_v46 = vpack.c.bf16 %v3255_v17, %v3255_v17 }
 0x24a   : > { %3303 = vst [vmem:[%s5659_s18 + $0x2c] sm:$0xf] %v3744_v46 }
 0x24b PF: > { %s13_s12 = sadd.s32 1, %s4464_s12  }
 0x24c   : > { %p10_p4 = scmp.ge.s32.totalorder %s13_s12, 4  }
 0x24e   :  { %12 = sbr.rel (!%p10_p4) target bundleno = 1 (0x1), region = 62 }

// kernel: perceptual_loss.17
= control target key start
LH: loop header
LB: loop body
LE: loop exit
PB: predicated region body
PF: predicated region fallthrough
CT: control target
= control target key end

     0   :  { %s5334_s12 = smov 0   ;;  %s6712_s0 = inlined_call_operand.vmem [shape: bf16[64,3456], index: 0, kind: input, shape index: {}]   ;;  %s6713_s1 = inlined_call_operand.vmem [shape: bf16[3456,256], index: 1, kind: input, shape index: {}]   ;;  %s6714_s2 = inlined_call_operand.vmem [shape: f32[1,256], index: 2, kind: input, shape index: {}]   ;;  %s6715_s3 = inlined_call_operand.vmem [shape: bf16[64,256], index: 3, kind: output, shape index: {}]  }
   0x1 LB: > { %s3948_s13 = sadd.s32 4294967295, %s5311_s12   ;;  %p3952_p0 = scmp.ge.s32.totalorder %s5311_s12, 1  ;;  %s5311_s12 = sphi %s5334_s12, %s13_s12  }
   0x2   : > { %p139_p1 = scmp.lt.s32.totalorder %s5311_s12, 3 }
   0x4   : > { %p140_p2 = pnand %p3952_p0, %p139_p1 }
   0x5   : > { %v4577_v0 = vld [vmem:[%s6713_s1 + $0x4] ss:$8 sps:$4 sm:$0xff] (!%p140_p2)   ;;  %v4581_v2 = vld [vmem:[%s6713_s1] ss:$8 sps:$4 sm:$0xff] (!%p140_p2)   ;;  %v4583_v4 = vld [vmem:[%s6713_s1 + $0x14] ss:$8 sps:$4 sm:$0xff] (!%p140_p2)  }
   0x6   : > { %143 = sbr.rel (%p140_p2) target bundleno = 686 (0x2ae), region = 32  ;;  %v4579_v1 = vld [vmem:[%s6713_s1 + $0x704] ss:$8 sps:$4 sm:$0xff] (!%p140_p2)   ;;  %3112 = vmatprep.subr.bf16.mxu1 (!%p140_p2), %v4577_v0  ;;  %v4582_v3 = vld [vmem:[%s6713_s1 + $0x700] ss:$8 sps:$4 sm:$0xff] (!%p140_p2)   ;;  %s3953_s24 = sshll.u32 (!%p140_p2), %s3948_s13, 2 }
   0x7   : > { %3483 = vmatprep.subr.bf16.mxu0 (!%p140_p2), %v4579_v1  ;;  %3113 = vmatpush1.bf16.msra.mxu1 (!%p140_p2), %v4581_v2  ;;  %v4585_v5 = vld [vmem:[%s6713_s1 + $0x714] ss:$8 sps:$4 sm:$0xff] (!%p140_p2)   ;;  %v4587_v6 = vld [vmem:[%s6713_s1 + $0x10] ss:$8 sps:$4 sm:$0xff] (!%p140_p2)   ;;  %v4589_v8 = vld [vmem:[%s6713_s1 + $0x24] ss:$8 sps:$4 sm:$0xff] (!%p140_p2)  }
   0x8   : > { %3484 = vmatpush1.bf16.msra.mxu0 (!%p140_p2), %v4582_v3  ;;  %3114 = vmatprep.subr.bf16.mxu1 (!%p140_p2), %v4583_v4  ;;  %v4588_v7 = vld [vmem:[%s6713_s1 + $0x710] ss:$8 sps:$4 sm:$0xff] (!%p140_p2)   ;;  %v4591_v9 = vld [vmem:[%s6713_s1 + $0x724] ss:$8 sps:$4 sm:$0xff] (!%p140_p2)   ;;  %v4593_v10 = vld [vmem:[%s6713_s1 + $0x20] ss:$8 sps:$4 sm:$0xff] (!%p140_p2)  }
   0x9   : > { %3485 = vmatprep.subr.bf16.mxu0 (!%p140_p2), %v4585_v5  ;;  %v4594_v11 = vld [vmem:[%s6713_s1 + $0x720] ss:$8 sps:$4 sm:$0xff] (!%p140_p2)   ;;  %v4595_v12 = vld [vmem:[%s6713_s1 + $0x34] ss:$8 sps:$4 sm:$0xff] (!%p140_p2)   ;;  %v4599_v14 = vld [vmem:[%s6713_s1 + $0x30] ss:$8 sps:$4 sm:$0xff] (!%p140_p2)  }
   0xa   : > { %v4597_v13 = vld [vmem:[%s6713_s1 + $0x734] ss:$8 sps:$4 sm:$0xff] (!%p140_p2)   ;;  %v4600_v15 = vld [vmem:[%s6713_s1 + $0x730] ss:$8 sps:$4 sm:$0xff] (!%p140_p2)   ;;  %v4601_v16 = vld [vmem:[%s6713_s1 + $0x44] ss:$8 sps:$4 sm:$0xff] (!%p140_p2)  }
   0xb   : > { %3115 = vmatpush1.bf16.msra.mxu1 (!%p140_p2), %v4587_v6  ;;  %v4603_v17 = vld [vmem:[%s6713_s1 + $0x744] ss:$8 sps:$4 sm:$0xff] (!%p140_p2)   ;;  %v4605_v18 = vld [vmem:[%s6713_s1 + $0x40] ss:$8 sps:$4 sm:$0xff] (!%p140_p2)   ;;  %v4607_v20 = vld [vmem:[%s6713_s1 + $0x54] ss:$8 sps:$4 sm:$0xff] (!%p140_p2)  }
   0xc   : > { %3486 = vmatpush1.bf16.msra.mxu0 (!%p140_p2), %v4588_v7  ;;  %3116 = vmatprep.subr.bf16.mxu1 (!%p140_p2), %v4589_v8  ;;  %v4606_v19 = vld [vmem:[%s6713_s1 + $0x740] ss:$8 sps:$4 sm:$0xff] (!%p140_p2)   ;;  %v4609_v21 = vld [vmem:[%s6713_s1 + $0x754] ss:$8 sps:$4 sm:$0xff] (!%p140_p2)   ;;  %v4611_v22 = vld [vmem:[%s6713_s1 + $0x50] ss:$8 sps:$4 sm:$0xff] (!%p140_p2)  }
   0xd   : > { %3487 = vmatprep.subr.bf16.mxu0 %v4591_v9  ;;  %v4612_v23 = vld [vmem:[%s6713_s1 + $0x750] ss:$8 sps:$4 sm:$0xff]   ;;  %v4613_v24 = vld [vmem:[%s6713_s1 + $0x64] ss:$8 sps:$4 sm:$0xff]   ;;  %v4617_v26 = vld [vmem:[%s6713_s1 + $0x60] ss:$8 sps:$4 sm:$0xff]  }
   0xe   : > { %v4615_v25 = vld [vmem:[%s6713_s1 + $0x764] ss:$8 sps:$4 sm:$0xff]   ;;  %v4618_v27 = vld [vmem:[%s6713_s1 + $0x760] ss:$8 sps:$4 sm:$0xff]   ;;  %v4619_v28 = vld [vmem:[%s6713_s1 + $0x74] ss:$8 sps:$4 sm:$0xff]  }
   0xf   : > { %3117 = vmatpush1.bf16.msra.mxu1 %v4593_v10  ;;  %v4621_v29 = vld [vmem:[%s6713_s1 + $0x774] ss:$8 sps:$4 sm:$0xff]   ;;  %v4623_v30 = vld [vmem:[%s6713_s1 + $0x70] ss:$8 sps:$4 sm:$0xff]   ;;  %v4625_v32 = vld [vmem:[%s6713_s1 + $0x84] ss:$8 sps:$4 sm:$0xff]  }
  0x10   : > { %3488 = vmatpush1.bf16.msra.mxu0 %v4594_v11  ;;  %3118 = vmatprep.subr.bf16.mxu1 %v4595_v12  ;;  %v4624_v31 = vld [vmem:[%s6713_s1 + $0x770] ss:$8 sps:$4 sm:$0xff]   ;;  %p166_p3 = scmp.lt.s32.totalorder %s3953_s24, 7  ;;  %v4627_v33 = vld [vmem:[%s6713_s1 + $0x784] ss:$8 sps:$4 sm:$0xff]  }
  0x11   : > { %3489 = vmatprep.subr.bf16.mxu0 %v4597_v13  ;;  %v4629_v34 = vld [vmem:[%s6713_s1 + $0x80] ss:$8 sps:$4 sm:$0xff]   ;;  %v4631_v36 = vld [vmem:[%s6713_s1 + $0x94] ss:$8 sps:$4 sm:$0xff]   ;;  %v4635_v38 = vld [vmem:[%s6713_s1 + $0x90] ss:$8 sps:$4 sm:$0xff]  }
  0x12   : > { %v4630_v35 = vld [vmem:[%s6713_s1 + $0x780] ss:$8 sps:$4 sm:$0xff]   ;;  %s6717_s24 = smov (!%p166_p3, %s3953_s24), 7  ;;  %v4633_v37 = vld [vmem:[%s6713_s1 + $0x794] ss:$8 sps:$4 sm:$0xff]  }
  0x13   : > { %3119 = vmatpush1.bf16.msra.mxu1 %v4599_v14  ;;  %v4636_v39 = vld [vmem:[%s6713_s1 + $0x790] ss:$8 sps:$4 sm:$0xff]   ;;  %v4637_v40 = vld [vmem:[%s6713_s1 + $0xa4] ss:$8 sps:$4 sm:$0xff]   ;;  %s4567_s21 = smul.u32 108, %s6717_s24 }
  0x14   : > { %3490 = vmatpush1.bf16.msra.mxu0 %v4600_v15  ;;  %3120 = vmatprep.subr.bf16.mxu1 %v4601_v16  ;;  %v4639_v41 = vld [vmem:[%s6713_s1 + $0x7a4] ss:$8 sps:$4 sm:$0xff]   ;;  %v4641_v42 = vld [vmem:[%s6713_s1 + $0xa0] ss:$8 sps:$4 sm:$0xff]   ;;  %v4643_v44 = vld [vmem:[%s6713_s1 + $0xb4] ss:$8 sps:$4 sm:$0xff]  }
  0x15   : > { %3491 = vmatprep.subr.bf16.mxu0 %v4603_v17  ;;  %v4642_v43 = vld [vmem:[%s6713_s1 + $0x7a0] ss:$8 sps:$4 sm:$0xff]   ;;  %s5485_s13 = scalar_lea.vmem %s6712_s0, %s4567_s21  ;;  %v4645_v45 = vld [vmem:[%s6713_s1 + $0x7b4] ss:$8 sps:$4 sm:$0xff]   ;;  %v4647_v46 = vld [vmem:[%s6713_s1 + $0xb0] ss:$8 sps:$4 sm:$0xff]  }
  0x16   : > { %v4648_v47 = vld [vmem:[%s6713_s1 + $0x7b0] ss:$8 sps:$4 sm:$0xff]   ;;  %v4649_v49 = vld [vmem:[%s6713_s1 + $0xc4] ss:$8 sps:$4 sm:$0xff]   ;;  %v4681_v51 = vld [vmem:[%s5485_s13 + $0x3c] ss:$108 sps:$4 sm:$0xff]  }
  0x17   : > { %3121 = vmatpush1.bf16.msra.mxu1 %v4605_v18  ;;  %v4675_v48 = vld [vmem:[%s5485_s13 + $0x4] ss:$108 sps:$4 sm:$0xff]   ;;  %v4653_v52 = vld [vmem:[%s6713_s1 + $0xc0] ss:$8 sps:$4 sm:$0xff]   ;;  %v4655_v54 = vld [vmem:[%s6713_s1 + $0xd4] ss:$8 sps:$4 sm:$0xff]   ;;  %3515 = vmatprep.mubr.bf16.mxu0 %v4681_v51 }
  0x18   : > { %3492 = vmatpush1.bf16.msra.mxu0 %v4606_v19  ;;  %3122 = vmatprep.subr.bf16.mxu1 %v4607_v20  ;;  %v4651_v50 = vld [vmem:[%s6713_s1 + $0x7c4] ss:$8 sps:$4 sm:$0xff]   ;;  %v4654_v53 = vld [vmem:[%s6713_s1 + $0x7c0] ss:$8 sps:$4 sm:$0xff]   ;;  %v4657_v55 = vld [vmem:[%s6713_s1 + $0x7d4] ss:$8 sps:$4 sm:$0xff]  }
  0x19   : > { %3493 = vmatprep.subr.bf16.mxu0 %v4609_v21  ;;  %3144 = vmatprep.mubr.bf16.mxu1 %v4675_v48  ;;  %v4659_v56 = vld [vmem:[%s6713_s1 + $0xd0] ss:$8 sps:$4 sm:$0xff]   ;;  %v4661_v58 = vld [vmem:[%s6713_s1 + $0xe4] ss:$8 sps:$4 sm:$0xff]   ;;  %v4665_v60 = vld [vmem:[%s6713_s1 + $0xe0] ss:$8 sps:$4 sm:$0xff]  }
  0x1a   : > { %v4660_v57 = vld [vmem:[%s6713_s1 + $0x7d0] ss:$8 sps:$4 sm:$0xff]   ;;  %v4663_v59 = vld [vmem:[%s6713_s1 + $0x7e4] ss:$8 sps:$4 sm:$0xff]   ;;  %v4666_v61 = vld [vmem:[%s6713_s1 + $0x7e0] ss:$8 sps:$4 sm:$0xff]  }
  0x1b   : > { %3123 = vmatpush1.bf16.msra.mxu1 %v4611_v22  ;;  %v4667_v62 = vld [vmem:[%s6713_s1 + $0xf4] ss:$8 sps:$4 sm:$0xff]   ;;  %v4671_v0 = vld [vmem:[%s6713_s1 + $0xf0] ss:$8 sps:$4 sm:$0xff]   ;;  %v4678_v2 = vld [vmem:[%s6713_s1 + $0x104] ss:$8 sps:$4 sm:$0xff]  }
  0x1c   : > { %3494 = vmatpush1.bf16.msra.mxu0 %v4612_v23  ;;  %3124 = vmatprep.subr.bf16.mxu1 %v4613_v24  ;;  %v4669_v63 = vld [vmem:[%s6713_s1 + $0x7f4] ss:$8 sps:$4 sm:$0xff]   ;;  %v4672_v1 = vld [vmem:[%s6713_s1 + $0x7f0] ss:$8 sps:$4 sm:$0xff]   ;;  %v4684_v3 = vld [vmem:[%s6713_s1 + $0x804] ss:$8 sps:$4 sm:$0xff]  }
  0x1d   : > { %3495 = vmatprep.subr.bf16.mxu0 %v4615_v25  ;;  %v4673_v4 = vld [vmem:[%s5485_s13] ss:$108 sps:$4 sm:$0xff]   ;;  %v4679_v6 = vld [vmem:[%s5485_s13 + $0x38] ss:$108 sps:$4 sm:$0xff]   ;;  %v4687_v8 = vld [vmem:[%s6713_s1 + $0x114] ss:$8 sps:$4 sm:$0xff]  }
  0x1e   : > { %v4676_v5 = vld [vmem:[%s6713_s1 + $0x100] ss:$8 sps:$4 sm:$0xff]   ;;  %v4690_v9 = vld [vmem:[%s6713_s1 + $0x814] ss:$8 sps:$4 sm:$0xff]   ;;  %v4685_v10 = vld [vmem:[%s6713_s1 + $0x110] ss:$8 sps:$4 sm:$0xff]  }
  0x1f   : > { %3125 = vmatpush1.bf16.msra.mxu1 %v4617_v26  ;;  %v4682_v7 = vld [vmem:[%s6713_s1 + $0x800] ss:$8 sps:$4 sm:$0xff]   ;;  %v4688_v11 = vld [vmem:[%s6713_s1 + $0x810] ss:$8 sps:$4 sm:$0xff]   ;;  %v4693_v12 = vld [vmem:[%s6713_s1 + $0x124] ss:$8 sps:$4 sm:$0xff]  }
  0x20   : > { %3496 = vmatpush1.bf16.msra.mxu0 %v4618_v27  ;;  %3126 = vmatprep.subr.bf16.mxu1 %v4619_v28  ;;  %v4696_v13 = vld [vmem:[%s6713_s1 + $0x824] ss:$8 sps:$4 sm:$0xff]   ;;  %v4691_v14 = vld [vmem:[%s6713_s1 + $0x120] ss:$8 sps:$4 sm:$0xff]   ;;  %v4699_v16 = vld [vmem:[%s6713_s1 + $0x134] ss:$8 sps:$4 sm:$0xff]  }
  0x21   : > { %3497 = vmatprep.subr.bf16.mxu0 %v4621_v29  ;;  %v4694_v15 = vld [vmem:[%s6713_s1 + $0x820] ss:$8 sps:$4 sm:$0xff]   ;;  %v4702_v17 = vld [vmem:[%s6713_s1 + $0x834] ss:$8 sps:$4 sm:$0xff]   ;;  %v4697_v18 = vld [vmem:[%s6713_s1 + $0x130] ss:$8 sps:$4 sm:$0xff]  }
  0x22   : > { %v4700_v19 = vld [vmem:[%s6713_s1 + $0x830] ss:$8 sps:$4 sm:$0xff]   ;;  %v4705_v20 = vld [vmem:[%s6713_s1 + $0x144] ss:$8 sps:$4 sm:$0xff]   ;;  %v4703_v22 = vld [vmem:[%s6713_s1 + $0x140] ss:$8 sps:$4 sm:$0xff]  }
  0x23   : > { %3127 = vmatpush1.bf16.msra.mxu1 %v4623_v30  ;;  %v4708_v21 = vld [vmem:[%s6713_s1 + $0x844] ss:$8 sps:$4 sm:$0xff]   ;;  %v4706_v23 = vld [vmem:[%s6713_s1 + $0x840] ss:$8 sps:$4 sm:$0xff]   ;;  %v4711_v24 = vld [vmem:[%s6713_s1 + $0x154] ss:$8 sps:$4 sm:$0xff]  }
  0x24   : > { %3498 = vmatpush1.bf16.msra.mxu0 %v4624_v31  ;;  %3128 = vmatprep.subr.bf16.mxu1 %v4625_v32  ;;  %v4714_v25 = vld [vmem:[%s6713_s1 + $0x854] ss:$8 sps:$4 sm:$0xff]   ;;  %v4709_v26 = vld [vmem:[%s6713_s1 + $0x150] ss:$8 sps:$4 sm:$0xff]   ;;  %v4717_v29 = vld [vmem:[%s6713_s1 + $0x164] ss:$8 sps:$4 sm:$0xff]  }
  0x25   : > { %3499 = vmatprep.subr.bf16.mxu0 %v4627_v33  ;;  %v4712_v27 = vld [vmem:[%s6713_s1 + $0x850] ss:$8 sps:$4 sm:$0xff]   ;;  %v4763_v28 = vld [vmem:[%s5485_s13 + $0xdc] ss:$108 sps:$4 sm:$0xff]   ;;  %v4720_v30 = vld [vmem:[%s6713_s1 + $0x864] ss:$8 sps:$4 sm:$0xff]  }
  0x26   : > { %v4768_v31 = vld [vmem:[%s5485_s13 + $0x114] ss:$108 sps:$4 sm:$0xff]   ;;  %v4733_v48 = vld [vmem:[%s6713_s1 + $0x190] ss:$8 sps:$4 sm:$0xff]   ;;  %v4744_v51 = vld [vmem:[%s6713_s1 + $0x8a4] ss:$8 sps:$4 sm:$0xff]  }
  0x27   : > { %3129 = vmatpush1.bf16.msra.mxu1 %v4629_v34  ;;  %v4715_v32 = vld [vmem:[%s6713_s1 + $0x160] ss:$8 sps:$4 sm:$0xff]   ;;  %v4773_v34 = vld [vmem:[%s5485_s13 + $0xd8] ss:$108 sps:$4 sm:$0xff]  }
  0x28   : > { %3500 = vmatpush1.bf16.msra.mxu0 %v4630_v35  ;;  %3130 = vmatprep.subr.bf16.mxu1 %v4631_v36  ;;  %v4718_v33 = vld [vmem:[%s6713_s1 + $0x860] ss:$8 sps:$4 sm:$0xff]   ;;  %v4774_v35 = vld [vmem:[%s5485_s13 + $0x110] ss:$108 sps:$4 sm:$0xff]  }
  0x29   : > { %3501 = vmatprep.subr.bf16.mxu0 %v4633_v37  ;;  %v4723_v36 = vld [vmem:[%s6713_s1 + $0x174] ss:$8 sps:$4 sm:$0xff]  }
  0x2a   : > { %v4726_v37 = vld [vmem:[%s6713_s1 + $0x874] ss:$8 sps:$4 sm:$0xff]  }
  0x2b   : > { %3131 = vmatpush1.bf16.msra.mxu1 %v4635_v38  ;;  %v4721_v38 = vld [vmem:[%s6713_s1 + $0x170] ss:$8 sps:$4 sm:$0xff]  }
  0x2c   : > { %3502 = vmatpush1.bf16.msra.mxu0 %v4636_v39  ;;  %3132 = vmatprep.subr.bf16.mxu1 %v4637_v40  ;;  %v4724_v39 = vld [vmem:[%s6713_s1 + $0x870] ss:$8 sps:$4 sm:$0xff]  }
  0x2d   : > { %3503 = vmatprep.subr.bf16.mxu0 %v4639_v41  ;;  %v4783_v40 = vld [vmem:[%s5485_s13 + $0xc] ss:$108 sps:$4 sm:$0xff]  }
  0x2e   : > { %v4729_v41 = vld [vmem:[%s6713_s1 + $0x184] ss:$8 sps:$4 sm:$0xff]  }
  0x2f   : > { %3133 = vmatpush1.bf16.msra.mxu1 %v4641_v42  ;;  %v4732_v42 = vld [vmem:[%s6713_s1 + $0x884] ss:$8 sps:$4 sm:$0xff]  }
  0x30   : > { %3504 = vmatpush1.bf16.msra.mxu0 %v4642_v43  ;;  %3134 = vmatprep.subr.bf16.mxu1 %v4643_v44  ;;  %v4789_v43 = vld [vmem:[%s5485_s13 + $0x44] ss:$108 sps:$4 sm:$0xff]   ;;  %v4727_v44 = vld [vmem:[%s6713_s1 + $0x180] ss:$8 sps:$4 sm:$0xff]  }
  0x31   : > { %3505 = vmatprep.subr.bf16.mxu0 %v4645_v45  ;;  %v4730_v45 = vld [vmem:[%s6713_s1 + $0x880] ss:$8 sps:$4 sm:$0xff]  }
  0x33   : > { %3135 = vmatpush1.bf16.msra.mxu1 %v4647_v46  ;;  %v4735_v46 = vld [vmem:[%s6713_s1 + $0x194] ss:$8 sps:$4 sm:$0xff]  }
  0x34   : > { %3506 = vmatpush1.bf16.msra.mxu0 %v4648_v47  ;;  %3136 = vmatprep.subr.bf16.mxu1 %v4649_v49  ;;  %v4738_v47 = vld [vmem:[%s6713_s1 + $0x894] ss:$8 sps:$4 sm:$0xff]   ;;  %v4736_v49 = vld [vmem:[%s6713_s1 + $0x890] ss:$8 sps:$4 sm:$0xff]  }
  0x35   : > { %3507 = vmatprep.subr.bf16.mxu0 %v4651_v50  ;;  %v4741_v50 = vld [vmem:[%s6713_s1 + $0x1a4] ss:$8 sps:$4 sm:$0xff]  }
  0x37   : > { %3137 = vmatpush1.bf16.msra.mxu1 %v4653_v52  ;;  %v4739_v52 = vld [vmem:[%s6713_s1 + $0x1a0] ss:$8 sps:$4 sm:$0xff]  }
  0x38   : > { %3508 = vmatpush1.bf16.msra.mxu0 %v4654_v53  ;;  %3138 = vmatprep.subr.bf16.mxu1 %v4655_v54  ;;  %v4742_v53 = vld [vmem:[%s6713_s1 + $0x8a0] ss:$8 sps:$4 sm:$0xff]   ;;  %v4747_v54 = vld [vmem:[%s6713_s1 + $0x1b4] ss:$8 sps:$4 sm:$0xff]  }
  0x39   : > { %3509 = vmatprep.subr.bf16.mxu0 %v4657_v55  ;;  %v4750_v55 = vld [vmem:[%s6713_s1 + $0x8b4] ss:$8 sps:$4 sm:$0xff]  }
  0x3b   : > { %3139 = vmatpush1.bf16.msra.mxu1 %v4659_v56  ;;  %v4745_v56 = vld [vmem:[%s6713_s1 + $0x1b0] ss:$8 sps:$4 sm:$0xff]  }
  0x3c   : > { %3510 = vmatpush1.bf16.msra.mxu0 %v4660_v57  ;;  %3140 = vmatprep.subr.bf16.mxu1 %v4661_v58  ;;  %v4748_v57 = vld [vmem:[%s6713_s1 + $0x8b0] ss:$8 sps:$4 sm:$0xff]   ;;  %v4753_v58 = vld [vmem:[%s6713_s1 + $0x1c4] ss:$8 sps:$4 sm:$0xff]  }
  0x3d   : > { %3511 = vmatprep.subr.bf16.mxu0 %v4663_v59  ;;  %v4756_v59 = vld [vmem:[%s6713_s1 + $0x8c4] ss:$8 sps:$4 sm:$0xff]  }
  0x3f   : > { %3141 = vmatpush1.bf16.msra.mxu1 %v4665_v60  ;;  %v4751_v60 = vld [vmem:[%s6713_s1 + $0x1c0] ss:$8 sps:$4 sm:$0xff]  }
  0x40   : > { %3512 = vmatpush1.bf16.msra.mxu0 %v4666_v61  ;;  %3142 = vmatprep.subr.bf16.mxu1 %v4667_v62  ;;  %v4754_v61 = vld [vmem:[%s6713_s1 + $0x8c0] ss:$8 sps:$4 sm:$0xff]   ;;  %v4759_v62 = vld [vmem:[%s6713_s1 + $0x1d4] ss:$8 sps:$4 sm:$0xff]  }
  0x41   : > { %3513 = vmatprep.subr.bf16.mxu0 %v4669_v63  ;;  %v4762_v63 = vld [vmem:[%s6713_s1 + $0x8d4] ss:$8 sps:$4 sm:$0xff]  }
  0x43   : > { %3143 = vmatpush1.bf16.msra.mxu1 %v4671_v0  ;;  %v4757_v0 = vld [vmem:[%s6713_s1 + $0x1d0] ss:$8 sps:$4 sm:$0xff]  }
  0x44   : > { %3514 = vmatpush1.bf16.msra.mxu0 %v4672_v1  ;;  %3165 = vmatprep.subr.bf16.mxu1 %v4678_v2  ;;  %v4760_v1 = vld [vmem:[%s6713_s1 + $0x8d0] ss:$8 sps:$4 sm:$0xff]   ;;  %v4767_v2 = vld [vmem:[%s6713_s1 + $0x1e4] ss:$8 sps:$4 sm:$0xff]  }
  0x45   : > { %3536 = vmatprep.subr.bf16.mxu0 %v4684_v3  ;;  %v4772_v3 = vld [vmem:[%s6713_s1 + $0x8e4] ss:$8 sps:$4 sm:$0xff]  }
  0x46   : > { %3145 = vmatmul.mubr.bf16.vlgmr.msra.gmra.mrb[0].mxu1 %v4673_v4  ;;  %v4765_v4 = vld [vmem:[%s6713_s1 + $0x1e0] ss:$8 sps:$4 sm:$0xff]  }
  0x47   : > { %3516 = vmatmul.mubr.bf16.vlgmr.msra.gmra.mrb[0].mxu0 %v4679_v6  ;;  %3166 = vmatpush1.bf16.msra.mxu1 %v4676_v5  ;;  %v4770_v5 = vld [vmem:[%s6713_s1 + $0x8e0] ss:$8 sps:$4 sm:$0xff]   ;;  %v4777_v6 = vld [vmem:[%s6713_s1 + $0x1f4] ss:$8 sps:$4 sm:$0xff]  }
  0x48   : > { %3537 = vmatpush1.bf16.msra.mxu0 %v4682_v7  ;;  %3167 = vmatprep.subr.bf16.mxu1 %v4687_v8  ;;  %v4780_v7 = vld [vmem:[%s6713_s1 + $0x8f4] ss:$8 sps:$4 sm:$0xff]   ;;  %v4775_v8 = vld [vmem:[%s6713_s1 + $0x1f0] ss:$8 sps:$4 sm:$0xff]  }
  0x49   : > { %3538 = vmatprep.subr.bf16.mxu0 %v4690_v9  ;;  %3154 = vmatprep.mubr.bf16.mxu1 %v4763_v28  ;;  %v4778_v9 = vld [vmem:[%s6713_s1 + $0x8f0] ss:$8 sps:$4 sm:$0xff]   ;;  %v4807_v28 = vld [vmem:[%s6713_s1 + $0x234] ss:$8 sps:$4 sm:$0xff]  }
  0x4a   : > { %3525 = vmatprep.mubr.bf16.mxu0 %v4768_v31  ;;  %v4808_v31 = vld [vmem:[%s6713_s1 + $0x930] ss:$8 sps:$4 sm:$0xff]  }
  0x4b   : > { %3168 = vmatpush1.bf16.msra.mxu1 %v4685_v10  ;;  %v4786_v10 = vld [vmem:[%s6713_s1 + $0x204] ss:$8 sps:$4 sm:$0xff]  }
  0x4c   : > { %3539 = vmatpush1.bf16.msra.mxu0 %v4688_v11  ;;  %3169 = vmatprep.subr.bf16.mxu1 %v4693_v12  ;;  %v4792_v11 = vld [vmem:[%s6713_s1 + $0x904] ss:$8 sps:$4 sm:$0xff]   ;;  %v4781_v12 = vld [vmem:[%s5485_s13 + $0x8] ss:$108 sps:$4 sm:$0xff]  }
  0x4d   : > { %3540 = vmatprep.subr.bf16.mxu0 %v4696_v13  ;;  %v4784_v13 = vld [vmem:[%s6713_s1 + $0x200] ss:$8 sps:$4 sm:$0xff]  }
  0x4e   : > { %3155 = vmatmul.mubr.bf16.gmra.mrb[4].mxu1 %v4773_v34  ;;  %v4816_v34 = vld [vmem:[%s6713_s1 + $0x944] ss:$8 sps:$4 sm:$0xff]  }
  0x4f   : > { %3170 = vmatpush1.bf16.msra.mxu1 %v4691_v14  ;;  %3526 = vmatmul.mubr.bf16.gmra.mrb[4].mxu0 %v4774_v35  ;;  %v4787_v14 = vld [vmem:[%s5485_s13 + $0x40] ss:$108 sps:$4 sm:$0xff]  }
  0x50   : > { %3541 = vmatpush1.bf16.msra.mxu0 %v4694_v15  ;;  %3171 = vmatprep.subr.bf16.mxu1 %v4699_v16  ;;  %v4790_v15 = vld [vmem:[%s6713_s1 + $0x900] ss:$8 sps:$4 sm:$0xff]   ;;  %v4795_v16 = vld [vmem:[%s6713_s1 + $0x214] ss:$8 sps:$4 sm:$0xff]   ;;  %v4897_v35 = vld [vmem:[%s5485_s13 + $0x4c] ss:$108 sps:$4 sm:$0xff]  }
  0x51   : > { %3542 = vmatprep.subr.bf16.mxu0 %v4702_v17  ;;  %3197 = vmatprep.mubr.bf16.mxu1 %v4783_v40  ;;  %v4798_v17 = vld [vmem:[%s6713_s1 + $0x914] ss:$8 sps:$4 sm:$0xff]   ;;  %v4817_v40 = vld [vmem:[%s6713_s1 + $0x250] ss:$8 sps:$4 sm:$0xff]  }
  0x52   : > { %3568 = vmatprep.mubr.bf16.mxu0 %v4789_v43  ;;  %v4828_v43 = vld [vmem:[%s6713_s1 + $0x964] ss:$8 sps:$4 sm:$0xff]  }
  0x53   : > { %3172 = vmatpush1.bf16.msra.mxu1 %v4697_v18  ;;  %v4793_v18 = vld [vmem:[%s6713_s1 + $0x210] ss:$8 sps:$4 sm:$0xff]  }
  0x54   : > { %3543 = vmatpush1.bf16.msra.mxu0 %v4700_v19  ;;  %3173 = vmatprep.subr.bf16.mxu1 %v4705_v20  ;;  %v4796_v19 = vld [vmem:[%s6713_s1 + $0x910] ss:$8 sps:$4 sm:$0xff]  }
  0x55   : > { %3544 = vmatprep.subr.bf16.mxu0 %v4708_v21  ;;  %v4871_v20 = vld [vmem:[%s5485_s13 + $0xe4] ss:$108 sps:$4 sm:$0xff]  }
  0x56   : > { %v4801_v21 = vld [vmem:[%s6713_s1 + $0x224] ss:$8 sps:$4 sm:$0xff]  }
  0x57   : > { %3174 = vmatpush1.bf16.msra.mxu1 %v4703_v22  ;;  %v4804_v22 = vld [vmem:[%s6713_s1 + $0x924] ss:$8 sps:$4 sm:$0xff]  }
  0x58   : > { %3545 = vmatpush1.bf16.msra.mxu0 %v4706_v23  ;;  %3175 = vmatprep.subr.bf16.mxu1 %v4711_v24  ;;  %v4876_v23 = vld [vmem:[%s5485_s13 + $0x11c] ss:$108 sps:$4 sm:$0xff]  }
  0x59   : > { %3546 = vmatprep.subr.bf16.mxu0 %v4714_v25  ;;  %v4799_v24 = vld [vmem:[%s6713_s1 + $0x220] ss:$8 sps:$4 sm:$0xff]  }
  0x5a   : > { %v4802_v25 = vld [vmem:[%s6713_s1 + $0x920] ss:$8 sps:$4 sm:$0xff]  }
  0x5b   : > { %3176 = vmatpush1.bf16.msra.mxu1 %v4709_v26  ;;  %v4881_v26 = vld [vmem:[%s5485_s13 + $0xe0] ss:$108 sps:$4 sm:$0xff]  }
  0x5c   : > { %3547 = vmatpush1.bf16.msra.mxu0 %v4712_v27  ;;  %3177 = vmatprep.subr.bf16.mxu1 %v4717_v29  ;;  %v4882_v27 = vld [vmem:[%s5485_s13 + $0x118] ss:$108 sps:$4 sm:$0xff]   ;;  %v4810_v29 = vld [vmem:[%s6713_s1 + $0x934] ss:$8 sps:$4 sm:$0xff]  }
  0x5d   : > { %3548 = vmatprep.subr.bf16.mxu0 %v4720_v30  ;;  %v4805_v30 = vld [vmem:[%s6713_s1 + $0x230] ss:$8 sps:$4 sm:$0xff]  }
  0x5f   : > { %3178 = vmatpush1.bf16.msra.mxu1 %v4715_v32  ;;  %v4891_v32 = vld [vmem:[%s5485_s13 + $0x14] ss:$108 sps:$4 sm:$0xff]  }
  0x60   : > { %3549 = vmatpush1.bf16.msra.mxu0 %v4718_v33  ;;  %3179 = vmatprep.subr.bf16.mxu1 %v4723_v36  ;;  %v4813_v33 = vld [vmem:[%s6713_s1 + $0x244] ss:$8 sps:$4 sm:$0xff]   ;;  %v4811_v36 = vld [vmem:[%s6713_s1 + $0x240] ss:$8 sps:$4 sm:$0xff]  }
  0x61   : > { %3550 = vmatprep.subr.bf16.mxu0 %v4726_v37  ;;  %v4814_v37 = vld [vmem:[%s6713_s1 + $0x940] ss:$8 sps:$4 sm:$0xff]  }
  0x63   : > { %3180 = vmatpush1.bf16.msra.mxu1 %v4721_v38  ;;  %v4819_v38 = vld [vmem:[%s6713_s1 + $0x254] ss:$8 sps:$4 sm:$0xff]  }
  0x64   : > { %3551 = vmatpush1.bf16.msra.mxu0 %v4724_v39  ;;  %3181 = vmatprep.subr.bf16.mxu1 %v4729_v41  ;;  %v4822_v39 = vld [vmem:[%s6713_s1 + $0x954] ss:$8 sps:$4 sm:$0xff]   ;;  %v4820_v41 = vld [vmem:[%s6713_s1 + $0x950] ss:$8 sps:$4 sm:$0xff]  }
  0x65   : > { %3552 = vmatprep.subr.bf16.mxu0 %v4732_v42  ;;  %v4825_v42 = vld [vmem:[%s6713_s1 + $0x264] ss:$8 sps:$4 sm:$0xff]  }
  0x67   : > { %3182 = vmatpush1.bf16.msra.mxu1 %v4727_v44  ;;  %v4823_v44 = vld [vmem:[%s6713_s1 + $0x260] ss:$8 sps:$4 sm:$0xff]  }
  0x68   : > { %3553 = vmatpush1.bf16.msra.mxu0 %v4730_v45  ;;  %3183 = vmatprep.subr.bf16.mxu1 %v4735_v46  ;;  %v4826_v45 = vld [vmem:[%s6713_s1 + $0x960] ss:$8 sps:$4 sm:$0xff]   ;;  %v4831_v46 = vld [vmem:[%s6713_s1 + $0x274] ss:$8 sps:$4 sm:$0xff]  }
  0x69   : > { %3554 = vmatprep.subr.bf16.mxu0 %v4738_v47  ;;  %v4834_v47 = vld [vmem:[%s6713_s1 + $0x974] ss:$8 sps:$4 sm:$0xff]  }
  0x6b   : > { %3184 = vmatpush1.bf16.msra.mxu1 %v4733_v48  ;;  %v4829_v48 = vld [vmem:[%s6713_s1 + $0x270] ss:$8 sps:$4 sm:$0xff]  }
  0x6c   : > { %3555 = vmatpush1.bf16.msra.mxu0 %v4736_v49  ;;  %3185 = vmatprep.subr.bf16.mxu1 %v4741_v50  ;;  %v4832_v49 = vld [vmem:[%s6713_s1 + $0x970] ss:$8 sps:$4 sm:$0xff]   ;;  %v4837_v50 = vld [vmem:[%s6713_s1 + $0x284] ss:$8 sps:$4 sm:$0xff]  }
  0x6d   : > { %3556 = vmatprep.subr.bf16.mxu0 %v4744_v51  ;;  %v4840_v51 = vld [vmem:[%s6713_s1 + $0x984] ss:$8 sps:$4 sm:$0xff]  }
  0x6f   : > { %3186 = vmatpush1.bf16.msra.mxu1 %v4739_v52  ;;  %v4835_v52 = vld [vmem:[%s6713_s1 + $0x280] ss:$8 sps:$4 sm:$0xff]  }
  0x70   : > { %3557 = vmatpush1.bf16.msra.mxu0 %v4742_v53  ;;  %3187 = vmatprep.subr.bf16.mxu1 %v4747_v54  ;;  %v4838_v53 = vld [vmem:[%s6713_s1 + $0x980] ss:$8 sps:$4 sm:$0xff]   ;;  %v4843_v54 = vld [vmem:[%s6713_s1 + $0x294] ss:$8 sps:$4 sm:$0xff]  }
  0x71   : > { %3558 = vmatprep.subr.bf16.mxu0 %v4750_v55  ;;  %v4846_v55 = vld [vmem:[%s6713_s1 + $0x994] ss:$8 sps:$4 sm:$0xff]  }
  0x73   : > { %3188 = vmatpush1.bf16.msra.mxu1 %v4745_v56  ;;  %v4841_v56 = vld [vmem:[%s6713_s1 + $0x290] ss:$8 sps:$4 sm:$0xff]  }
  0x74   : > { %3559 = vmatpush1.bf16.msra.mxu0 %v4748_v57  ;;  %3189 = vmatprep.subr.bf16.mxu1 %v4753_v58  ;;  %v4844_v57 = vld [vmem:[%s6713_s1 + $0x990] ss:$8 sps:$4 sm:$0xff]   ;;  %v4849_v58 = vld [vmem:[%s6713_s1 + $0x2a4] ss:$8 sps:$4 sm:$0xff]  }
  0x75   : > { %3560 = vmatprep.subr.bf16.mxu0 %v4756_v59  ;;  %v4852_v59 = vld [vmem:[%s6713_s1 + $0x9a4] ss:$8 sps:$4 sm:$0xff]  }
  0x77   : > { %3190 = vmatpush1.bf16.msra.mxu1 %v4751_v60  ;;  %v4847_v60 = vld [vmem:[%s6713_s1 + $0x2a0] ss:$8 sps:$4 sm:$0xff]  }
  0x78   : > { %3561 = vmatpush1.bf16.msra.mxu0 %v4754_v61  ;;  %3191 = vmatprep.subr.bf16.mxu1 %v4759_v62  ;;  %v4850_v61 = vld [vmem:[%s6713_s1 + $0x9a0] ss:$8 sps:$4 sm:$0xff]   ;;  %v4855_v62 = vld [vmem:[%s6713_s1 + $0x2b4] ss:$8 sps:$4 sm:$0xff]  }
  0x79   : > { %3562 = vmatprep.subr.bf16.mxu0 %v4762_v63  ;;  %v4858_v63 = vld [vmem:[%s6713_s1 + $0x9b4] ss:$8 sps:$4 sm:$0xff]  }
  0x7b   : > { %3192 = vmatpush1.bf16.msra.mxu1 %v4757_v0  ;;  %v4853_v0 = vld [vmem:[%s6713_s1 + $0x2b0] ss:$8 sps:$4 sm:$0xff]  }
  0x7c   : > { %3563 = vmatpush1.bf16.msra.mxu0 %v4760_v1  ;;  %3193 = vmatprep.subr.bf16.mxu1 %v4767_v2  ;;  %v4856_v1 = vld [vmem:[%s6713_s1 + $0x9b0] ss:$8 sps:$4 sm:$0xff]   ;;  %v4861_v2 = vld [vmem:[%s6713_s1 + $0x2c4] ss:$8 sps:$4 sm:$0xff]  }
  0x7d   : > { %3564 = vmatprep.subr.bf16.mxu0 %v4772_v3  ;;  %v4864_v3 = vld [vmem:[%s6713_s1 + $0x9c4] ss:$8 sps:$4 sm:$0xff]  }
  0x7f   : > { %3194 = vmatpush1.bf16.msra.mxu1 %v4765_v4  ;;  %v4859_v4 = vld [vmem:[%s6713_s1 + $0x2c0] ss:$8 sps:$4 sm:$0xff]  }
  0x80   : > { %3565 = vmatpush1.bf16.msra.mxu0 %v4770_v5  ;;  %3195 = vmatprep.subr.bf16.mxu1 %v4777_v6  ;;  %v4862_v5 = vld [vmem:[%s6713_s1 + $0x9c0] ss:$8 sps:$4 sm:$0xff]   ;;  %v4867_v6 = vld [vmem:[%s6713_s1 + $0x2d4] ss:$8 sps:$4 sm:$0xff]  }
  0x81   : > { %3566 = vmatprep.subr.bf16.mxu0 %v4780_v7  ;;  %v4870_v7 = vld [vmem:[%s6713_s1 + $0x9d4] ss:$8 sps:$4 sm:$0xff]  }
  0x83   : > { %3196 = vmatpush1.bf16.msra.mxu1 %v4775_v8  ;;  %v4865_v8 = vld [vmem:[%s6713_s1 + $0x2d0] ss:$8 sps:$4 sm:$0xff]  }
  0x84   : > { %3567 = vmatpush1.bf16.msra.mxu0 %v4778_v9  ;;  %3218 = vmatprep.subr.bf16.mxu1 %v4786_v10  ;;  %v4868_v9 = vld [vmem:[%s6713_s1 + $0x9d0] ss:$8 sps:$4 sm:$0xff]   ;;  %v4875_v10 = vld [vmem:[%s6713_s1 + $0x2e4] ss:$8 sps:$4 sm:$0xff]  }
  0x85   : > { %3589 = vmatprep.subr.bf16.mxu0 %v4792_v11  ;;  %v4880_v11 = vld [vmem:[%s6713_s1 + $0x9e4] ss:$8 sps:$4 sm:$0xff]  }
  0x86   : > { %3198 = vmatmul.mubr.bf16.vlgmr.msra.gmra.mrb[0].mxu1 %v4781_v12  ;;  %v4873_v12 = vld [vmem:[%s6713_s1 + $0x2e0] ss:$8 sps:$4 sm:$0xff]  }
  0x87   : > { %3569 = vmatmul.mubr.bf16.vlgmr.msra.gmra.mrb[0].mxu0 %v4787_v14  ;;  %3219 = vmatpush1.bf16.msra.mxu1 %v4784_v13  ;;  %v4878_v13 = vld [vmem:[%s6713_s1 + $0x9e0] ss:$8 sps:$4 sm:$0xff]   ;;  %v4885_v14 = vld [vmem:[%s6713_s1 + $0x2f4] ss:$8 sps:$4 sm:$0xff]  }
  0x88   : > { %3590 = vmatpush1.bf16.msra.mxu0 %v4790_v15  ;;  %3220 = vmatprep.subr.bf16.mxu1 %v4795_v16  ;;  %v4888_v15 = vld [vmem:[%s6713_s1 + $0x9f4] ss:$8 sps:$4 sm:$0xff]   ;;  %v4883_v16 = vld [vmem:[%s6713_s1 + $0x2f0] ss:$8 sps:$4 sm:$0xff]  }
  0x89   : > { %3591 = vmatprep.subr.bf16.mxu0 %v4798_v17  ;;  %3207 = vmatprep.mubr.bf16.mxu1 %v4871_v20  ;;  %v4886_v17 = vld [vmem:[%s6713_s1 + $0x9f0] ss:$8 sps:$4 sm:$0xff]  }
  0x8a   : > { %3578 = vmatprep.mubr.bf16.mxu0 %v4876_v23  ;;  %v4889_v20 = vld [vmem:[%s5485_s13 + $0x10] ss:$108 sps:$4 sm:$0xff]   ;;  %v4898_v23 = vld [vmem:[%s6713_s1 + $0xa00] ss:$8 sps:$4 sm:$0xff]  }
  0x8b   : > { %3221 = vmatpush1.bf16.msra.mxu1 %v4793_v18  ;;  %v4894_v18 = vld [vmem:[%s6713_s1 + $0x304] ss:$8 sps:$4 sm:$0xff]  }
  0x8c   : > { %3592 = vmatpush1.bf16.msra.mxu0 %v4796_v19  ;;  %3222 = vmatprep.subr.bf16.mxu1 %v4801_v21  ;;  %v4900_v19 = vld [vmem:[%s6713_s1 + $0xa04] ss:$8 sps:$4 sm:$0xff]   ;;  %v4892_v21 = vld [vmem:[%s6713_s1 + $0x300] ss:$8 sps:$4 sm:$0xff]  }
  0x8d   : > { %3593 = vmatprep.subr.bf16.mxu0 %v4804_v22  ;;  %v4895_v22 = vld [vmem:[%s5485_s13 + $0x48] ss:$108 sps:$4 sm:$0xff]  }
  0x8e   : > { %3208 = vmatmul.mubr.bf16.gmra.mrb[4].mxu1 %v4881_v26  ;;  %v4979_v26 = vld [vmem:[%s5485_s13 + $0xec] ss:$108 sps:$4 sm:$0xff]  }
  0x8f   : > { %3579 = vmatmul.mubr.bf16.gmra.mrb[4].mxu0 %v4882_v27  ;;  %3223 = vmatpush1.bf16.msra.mxu1 %v4799_v24  ;;  %v4903_v24 = vld [vmem:[%s6713_s1 + $0x314] ss:$8 sps:$4 sm:$0xff]   ;;  %v4984_v27 = vld [vmem:[%s5485_s13 + $0x124] ss:$108 sps:$4 sm:$0xff]  }
  0x90   : > { %3594 = vmatpush1.bf16.msra.mxu0 %v4802_v25  ;;  %3224 = vmatprep.subr.bf16.mxu1 %v4807_v28  ;;  %v4906_v25 = vld [vmem:[%s6713_s1 + $0xa14] ss:$8 sps:$4 sm:$0xff]   ;;  %v4901_v28 = vld [vmem:[%s6713_s1 + $0x310] ss:$8 sps:$4 sm:$0xff]  }
  0x91   : > { %3595 = vmatprep.subr.bf16.mxu0 %v4810_v29  ;;  %3250 = vmatprep.mubr.bf16.mxu1 %v4891_v32  ;;  %v4904_v29 = vld [vmem:[%s6713_s1 + $0xa10] ss:$8 sps:$4 sm:$0xff]   ;;  %v4907_v32 = vld [vmem:[%s6713_s1 + $0x320] ss:$8 sps:$4 sm:$0xff]  }
  0x92   : > { %3621 = vmatprep.mubr.bf16.mxu0 %v4897_v35  ;;  %v4990_v35 = vld [vmem:[%s5485_s13 + $0x120] ss:$108 sps:$4 sm:$0xff]  }
  0x93   : > { %3225 = vmatpush1.bf16.msra.mxu1 %v4805_v30  ;;  %v4909_v30 = vld [vmem:[%s6713_s1 + $0x324] ss:$8 sps:$4 sm:$0xff]  }
  0x94   : > { %3596 = vmatpush1.bf16.msra.mxu0 %v4808_v31  ;;  %3226 = vmatprep.subr.bf16.mxu1 %v4813_v33  ;;  %v4912_v31 = vld [vmem:[%s6713_s1 + $0xa24] ss:$8 sps:$4 sm:$0xff]   ;;  %v4910_v33 = vld [vmem:[%s6713_s1 + $0xa20] ss:$8 sps:$4 sm:$0xff]  }
  0x95   : > { %3597 = vmatprep.subr.bf16.mxu0 %v4816_v34  ;;  %v4989_v34 = vld [vmem:[%s5485_s13 + $0xe8] ss:$108 sps:$4 sm:$0xff]  }
  0x97   : > { %3227 = vmatpush1.bf16.msra.mxu1 %v4811_v36  ;;  %v4915_v36 = vld [vmem:[%s6713_s1 + $0x334] ss:$8 sps:$4 sm:$0xff]  }
  0x98   : > { %3598 = vmatpush1.bf16.msra.mxu0 %v4814_v37  ;;  %3228 = vmatprep.subr.bf16.mxu1 %v4819_v38  ;;  %v4918_v37 = vld [vmem:[%s6713_s1 + $0xa34] ss:$8 sps:$4 sm:$0xff]  }
  0x99   : > { %3599 = vmatprep.subr.bf16.mxu0 %v4822_v39  ;;  %v4999_v38 = vld [vmem:[%s5485_s13 + $0x1c] ss:$108 sps:$4 sm:$0xff]   ;;  %v5005_v39 = vld [vmem:[%s5485_s13 + $0x54] ss:$108 sps:$4 sm:$0xff]  }
  0x9b   : > { %3229 = vmatpush1.bf16.msra.mxu1 %v4817_v40  ;;  %v4913_v40 = vld [vmem:[%s6713_s1 + $0x330] ss:$8 sps:$4 sm:$0xff]  }
  0x9c   : > { %3600 = vmatpush1.bf16.msra.mxu0 %v4820_v41  ;;  %3230 = vmatprep.subr.bf16.mxu1 %v4825_v42  ;;  %v4916_v41 = vld [vmem:[%s6713_s1 + $0xa30] ss:$8 sps:$4 sm:$0xff]   ;;  %v4921_v42 = vld [vmem:[%s6713_s1 + $0x344] ss:$8 sps:$4 sm:$0xff]  }
  0x9d   : > { %3601 = vmatprep.subr.bf16.mxu0 %v4828_v43  ;;  %v4924_v43 = vld [vmem:[%s6713_s1 + $0xa44] ss:$8 sps:$4 sm:$0xff]  }
  0x9f   : > { %3231 = vmatpush1.bf16.msra.mxu1 %v4823_v44  ;;  %v4919_v44 = vld [vmem:[%s6713_s1 + $0x340] ss:$8 sps:$4 sm:$0xff]  }
  0xa0   : > { %3602 = vmatpush1.bf16.msra.mxu0 %v4826_v45  ;;  %3232 = vmatprep.subr.bf16.mxu1 %v4831_v46  ;;  %v4922_v45 = vld [vmem:[%s6713_s1 + $0xa40] ss:$8 sps:$4 sm:$0xff]   ;;  %v4927_v46 = vld [vmem:[%s6713_s1 + $0x354] ss:$8 sps:$4 sm:$0xff]  }
  0xa1   : > { %3603 = vmatprep.subr.bf16.mxu0 %v4834_v47  ;;  %v4930_v47 = vld [vmem:[%s6713_s1 + $0xa54] ss:$8 sps:$4 sm:$0xff]  }
  0xa3   : > { %3233 = vmatpush1.bf16.msra.mxu1 %v4829_v48  ;;  %v4925_v48 = vld [vmem:[%s6713_s1 + $0x350] ss:$8 sps:$4 sm:$0xff]  }
  0xa4   : > { %3604 = vmatpush1.bf16.msra.mxu0 %v4832_v49  ;;  %3234 = vmatprep.subr.bf16.mxu1 %v4837_v50  ;;  %v4928_v49 = vld [vmem:[%s6713_s1 + $0xa50] ss:$8 sps:$4 sm:$0xff]   ;;  %v4933_v50 = vld [vmem:[%s6713_s1 + $0x364] ss:$8 sps:$4 sm:$0xff]  }
  0xa5   : > { %3605 = vmatprep.subr.bf16.mxu0 %v4840_v51  ;;  %v4936_v51 = vld [vmem:[%s6713_s1 + $0xa64] ss:$8 sps:$4 sm:$0xff]  }
  0xa7   : > { %3235 = vmatpush1.bf16.msra.mxu1 %v4835_v52  ;;  %v4931_v52 = vld [vmem:[%s6713_s1 + $0x360] ss:$8 sps:$4 sm:$0xff]  }
  0xa8   : > { %3606 = vmatpush1.bf16.msra.mxu0 %v4838_v53  ;;  %3236 = vmatprep.subr.bf16.mxu1 %v4843_v54  ;;  %v4934_v53 = vld [vmem:[%s6713_s1 + $0xa60] ss:$8 sps:$4 sm:$0xff]   ;;  %v4939_v54 = vld [vmem:[%s6713_s1 + $0x374] ss:$8 sps:$4 sm:$0xff]  }
  0xa9   : > { %3607 = vmatprep.subr.bf16.mxu0 %v4846_v55  ;;  %v4942_v55 = vld [vmem:[%s6713_s1 + $0xa74] ss:$8 sps:$4 sm:$0xff]  }
  0xab   : > { %3237 = vmatpush1.bf16.msra.mxu1 %v4841_v56  ;;  %v4937_v56 = vld [vmem:[%s6713_s1 + $0x370] ss:$8 sps:$4 sm:$0xff]  }
  0xac   : > { %3608 = vmatpush1.bf16.msra.mxu0 %v4844_v57  ;;  %3238 = vmatprep.subr.bf16.mxu1 %v4849_v58  ;;  %v4940_v57 = vld [vmem:[%s6713_s1 + $0xa70] ss:$8 sps:$4 sm:$0xff]   ;;  %v4945_v58 = vld [vmem:[%s6713_s1 + $0x384] ss:$8 sps:$4 sm:$0xff]  }
  0xad   : > { %3609 = vmatprep.subr.bf16.mxu0 %v4852_v59  ;;  %v4948_v59 = vld [vmem:[%s6713_s1 + $0xa84] ss:$8 sps:$4 sm:$0xff]  }
  0xaf   : > { %3239 = vmatpush1.bf16.msra.mxu1 %v4847_v60  ;;  %v4943_v60 = vld [vmem:[%s6713_s1 + $0x380] ss:$8 sps:$4 sm:$0xff]  }
  0xb0   : > { %3610 = vmatpush1.bf16.msra.mxu0 %v4850_v61  ;;  %3240 = vmatprep.subr.bf16.mxu1 %v4855_v62  ;;  %v4946_v61 = vld [vmem:[%s6713_s1 + $0xa80] ss:$8 sps:$4 sm:$0xff]   ;;  %v4951_v62 = vld [vmem:[%s6713_s1 + $0x394] ss:$8 sps:$4 sm:$0xff]  }
  0xb1   : > { %3611 = vmatprep.subr.bf16.mxu0 %v4858_v63  ;;  %v4954_v63 = vld [vmem:[%s6713_s1 + $0xa94] ss:$8 sps:$4 sm:$0xff]  }
  0xb3   : > { %3241 = vmatpush1.bf16.msra.mxu1 %v4853_v0  ;;  %v4949_v0 = vld [vmem:[%s6713_s1 + $0x390] ss:$8 sps:$4 sm:$0xff]  }
  0xb4   : > { %3612 = vmatpush1.bf16.msra.mxu0 %v4856_v1  ;;  %3242 = vmatprep.subr.bf16.mxu1 %v4861_v2  ;;  %v4952_v1 = vld [vmem:[%s6713_s1 + $0xa90] ss:$8 sps:$4 sm:$0xff]   ;;  %v4957_v2 = vld [vmem:[%s6713_s1 + $0x3a4] ss:$8 sps:$4 sm:$0xff]  }
  0xb5   : > { %3613 = vmatprep.subr.bf16.mxu0 %v4864_v3  ;;  %v4960_v3 = vld [vmem:[%s6713_s1 + $0xaa4] ss:$8 sps:$4 sm:$0xff]  }
  0xb7   : > { %3243 = vmatpush1.bf16.msra.mxu1 %v4859_v4  ;;  %v4955_v4 = vld [vmem:[%s6713_s1 + $0x3a0] ss:$8 sps:$4 sm:$0xff]  }
  0xb8   : > { %3614 = vmatpush1.bf16.msra.mxu0 %v4862_v5  ;;  %3244 = vmatprep.subr.bf16.mxu1 %v4867_v6  ;;  %v4958_v5 = vld [vmem:[%s6713_s1 + $0xaa0] ss:$8 sps:$4 sm:$0xff]   ;;  %v4963_v6 = vld [vmem:[%s6713_s1 + $0x3b4] ss:$8 sps:$4 sm:$0xff]  }
  0xb9   : > { %3615 = vmatprep.subr.bf16.mxu0 %v4870_v7  ;;  %v4966_v7 = vld [vmem:[%s6713_s1 + $0xab4] ss:$8 sps:$4 sm:$0xff]  }
  0xbb   : > { %3245 = vmatpush1.bf16.msra.mxu1 %v4865_v8  ;;  %v4961_v8 = vld [vmem:[%s6713_s1 + $0x3b0] ss:$8 sps:$4 sm:$0xff]  }
  0xbc   : > { %3616 = vmatpush1.bf16.msra.mxu0 %v4868_v9  ;;  %3246 = vmatprep.subr.bf16.mxu1 %v4875_v10  ;;  %v4964_v9 = vld [vmem:[%s6713_s1 + $0xab0] ss:$8 sps:$4 sm:$0xff]   ;;  %v4969_v10 = vld [vmem:[%s6713_s1 + $0x3c4] ss:$8 sps:$4 sm:$0xff]  }
  0xbd   : > { %3617 = vmatprep.subr.bf16.mxu0 %v4880_v11  ;;  %v4972_v11 = vld [vmem:[%s6713_s1 + $0xac4] ss:$8 sps:$4 sm:$0xff]  }
  0xbf   : > { %3247 = vmatpush1.bf16.msra.mxu1 %v4873_v12  ;;  %v4967_v12 = vld [vmem:[%s6713_s1 + $0x3c0] ss:$8 sps:$4 sm:$0xff]  }
  0xc0   : > { %3618 = vmatpush1.bf16.msra.mxu0 %v4878_v13  ;;  %3248 = vmatprep.subr.bf16.mxu1 %v4885_v14  ;;  %v4970_v13 = vld [vmem:[%s6713_s1 + $0xac0] ss:$8 sps:$4 sm:$0xff]   ;;  %v4975_v14 = vld [vmem:[%s6713_s1 + $0x3d4] ss:$8 sps:$4 sm:$0xff]  }
  0xc1   : > { %3619 = vmatprep.subr.bf16.mxu0 %v4888_v15  ;;  %v4978_v15 = vld [vmem:[%s6713_s1 + $0xad4] ss:$8 sps:$4 sm:$0xff]  }
  0xc3   : > { %3249 = vmatpush1.bf16.msra.mxu1 %v4883_v16  ;;  %v4973_v16 = vld [vmem:[%s6713_s1 + $0x3d0] ss:$8 sps:$4 sm:$0xff]  }
  0xc4   : > { %3620 = vmatpush1.bf16.msra.mxu0 %v4886_v17  ;;  %3271 = vmatprep.subr.bf16.mxu1 %v4894_v18  ;;  %v4976_v17 = vld [vmem:[%s6713_s1 + $0xad0] ss:$8 sps:$4 sm:$0xff]   ;;  %v4983_v18 = vld [vmem:[%s6713_s1 + $0x3e4] ss:$8 sps:$4 sm:$0xff]  }
  0xc5   : > { %3642 = vmatprep.subr.bf16.mxu0 %v4900_v19  ;;  %v4988_v19 = vld [vmem:[%s6713_s1 + $0xae4] ss:$8 sps:$4 sm:$0xff]  }
  0xc6   : > { %3251 = vmatmul.mubr.bf16.vlgmr.msra.gmra.mrb[0].mxu1 %v4889_v20  ;;  %v4981_v20 = vld [vmem:[%s6713_s1 + $0x3e0] ss:$8 sps:$4 sm:$0xff]  }
  0xc7   : > { %3622 = vmatmul.mubr.bf16.vlgmr.msra.gmra.mrb[0].mxu0 %v4895_v22  ;;  %3272 = vmatpush1.bf16.msra.mxu1 %v4892_v21  ;;  %v4986_v21 = vld [vmem:[%s6713_s1 + $0xae0] ss:$8 sps:$4 sm:$0xff]   ;;  %v4993_v22 = vld [vmem:[%s6713_s1 + $0x3f4] ss:$8 sps:$4 sm:$0xff]  }
  0xc8   : > { %3643 = vmatpush1.bf16.msra.mxu0 %v4898_v23  ;;  %3273 = vmatprep.subr.bf16.mxu1 %v4903_v24  ;;  %v4996_v23 = vld [vmem:[%s6713_s1 + $0xaf4] ss:$8 sps:$4 sm:$0xff]   ;;  %v4991_v24 = vld [vmem:[%s6713_s1 + $0x3f0] ss:$8 sps:$4 sm:$0xff]  }
  0xc9   : > { %3644 = vmatprep.subr.bf16.mxu0 %v4906_v25  ;;  %3260 = vmatprep.mubr.bf16.mxu1 %v4979_v26  ;;  %v4994_v25 = vld [vmem:[%s6713_s1 + $0xaf0] ss:$8 sps:$4 sm:$0xff]   ;;  %v5002_v26 = vld [vmem:[%s6713_s1 + $0x404] ss:$8 sps:$4 sm:$0xff]  }
  0xca   : > { %3631 = vmatprep.mubr.bf16.mxu0 %v4984_v27  ;;  %v5008_v27 = vld [vmem:[%s6713_s1 + $0xb04] ss:$8 sps:$4 sm:$0xff]  }
  0xcb   : > { %3274 = vmatpush1.bf16.msra.mxu1 %v4901_v28  ;;  %v4997_v28 = vld [vmem:[%s5485_s13 + $0x18] ss:$108 sps:$4 sm:$0xff]  }
  0xcc   : > { %3645 = vmatpush1.bf16.msra.mxu0 %v4904_v29  ;;  %3275 = vmatprep.subr.bf16.mxu1 %v4909_v30  ;;  %v5000_v29 = vld [vmem:[%s6713_s1 + $0x400] ss:$8 sps:$4 sm:$0xff]   ;;  %v5003_v30 = vld [vmem:[%s5485_s13 + $0x50] ss:$108 sps:$4 sm:$0xff]  }
  0xcd   : > { %3646 = vmatprep.subr.bf16.mxu0 %v4912_v31  ;;  %v5006_v31 = vld [vmem:[%s6713_s1 + $0xb00] ss:$8 sps:$4 sm:$0xff]  }
  0xce   : > { %3261 = vmatmul.mubr.bf16.gmra.mrb[4].mxu1 %v4989_v34  ;;  %v5087_v34 = vld [vmem:[%s5485_s13 + $0xf4] ss:$108 sps:$4 sm:$0xff]  }
  0xcf   : > { %3632 = vmatmul.mubr.bf16.gmra.mrb[4].mxu0 %v4990_v35  ;;  %3276 = vmatpush1.bf16.msra.mxu1 %v4907_v32  ;;  %v5011_v32 = vld [vmem:[%s6713_s1 + $0x414] ss:$8 sps:$4 sm:$0xff]   ;;  %v5092_v35 = vld [vmem:[%s5485_s13 + $0x12c] ss:$108 sps:$4 sm:$0xff]  }
  0xd0   : > { %3647 = vmatpush1.bf16.msra.mxu0 %v4910_v33  ;;  %3277 = vmatprep.subr.bf16.mxu1 %v4915_v36  ;;  %v5014_v33 = vld [vmem:[%s6713_s1 + $0xb14] ss:$8 sps:$4 sm:$0xff]   ;;  %v5009_v36 = vld [vmem:[%s6713_s1 + $0x410] ss:$8 sps:$4 sm:$0xff]  }
  0xd1   : > { %3648 = vmatprep.subr.bf16.mxu0 %v4918_v37  ;;  %3303 = vmatprep.mubr.bf16.mxu1 %v4999_v38  ;;  %v5012_v37 = vld [vmem:[%s6713_s1 + $0xb10] ss:$8 sps:$4 sm:$0xff]   ;;  %v5017_v38 = vld [vmem:[%s6713_s1 + $0x424] ss:$8 sps:$4 sm:$0xff]  }
  0xd2   : > { %3674 = vmatprep.mubr.bf16.mxu0 %v5005_v39  ;;  %v5020_v39 = vld [vmem:[%s6713_s1 + $0xb24] ss:$8 sps:$4 sm:$0xff]  }
  0xd3   : > { %3278 = vmatpush1.bf16.msra.mxu1 %v4913_v40  ;;  %v5015_v40 = vld [vmem:[%s6713_s1 + $0x420] ss:$8 sps:$4 sm:$0xff]  }
  0xd4   : > { %3649 = vmatpush1.bf16.msra.mxu0 %v4916_v41  ;;  %3279 = vmatprep.subr.bf16.mxu1 %v4921_v42  ;;  %v5018_v41 = vld [vmem:[%s6713_s1 + $0xb20] ss:$8 sps:$4 sm:$0xff]   ;;  %v5097_v42 = vld [vmem:[%s5485_s13 + $0xf0] ss:$108 sps:$4 sm:$0xff]  }
  0xd5   : > { %3650 = vmatprep.subr.bf16.mxu0 %v4924_v43  ;;  %v5098_v43 = vld [vmem:[%s5485_s13 + $0x128] ss:$108 sps:$4 sm:$0xff]  }
  0xd7   : > { %3280 = vmatpush1.bf16.msra.mxu1 %v4919_v44  ;;  %v5023_v44 = vld [vmem:[%s6713_s1 + $0x434] ss:$8 sps:$4 sm:$0xff]  }
  0xd8   : > { %3651 = vmatpush1.bf16.msra.mxu0 %v4922_v45  ;;  %3281 = vmatprep.subr.bf16.mxu1 %v4927_v46  ;;  %v5026_v45 = vld [vmem:[%s6713_s1 + $0xb34] ss:$8 sps:$4 sm:$0xff]   ;;  %v5107_v46 = vld [vmem:[%s5485_s13 + $0x24] ss:$108 sps:$4 sm:$0xff]  }
  0xd9   : > { %3652 = vmatprep.subr.bf16.mxu0 %v4930_v47  ;;  %v5113_v47 = vld [vmem:[%s5485_s13 + $0x5c] ss:$108 sps:$4 sm:$0xff]  }
  0xdb   : > { %3282 = vmatpush1.bf16.msra.mxu1 %v4925_v48  ;;  %v5021_v48 = vld [vmem:[%s6713_s1 + $0x430] ss:$8 sps:$4 sm:$0xff]  }
  0xdc   : > { %3653 = vmatpush1.bf16.msra.mxu0 %v4928_v49  ;;  %3283 = vmatprep.subr.bf16.mxu1 %v4933_v50  ;;  %v5024_v49 = vld [vmem:[%s6713_s1 + $0xb30] ss:$8 sps:$4 sm:$0xff]   ;;  %v5029_v50 = vld [vmem:[%s6713_s1 + $0x444] ss:$8 sps:$4 sm:$0xff]  }
  0xdd   : > { %3654 = vmatprep.subr.bf16.mxu0 %v4936_v51  ;;  %v5032_v51 = vld [vmem:[%s6713_s1 + $0xb44] ss:$8 sps:$4 sm:$0xff]  }
  0xdf   : > { %3284 = vmatpush1.bf16.msra.mxu1 %v4931_v52  ;;  %v5027_v52 = vld [vmem:[%s6713_s1 + $0x440] ss:$8 sps:$4 sm:$0xff]  }
  0xe0   : > { %3655 = vmatpush1.bf16.msra.mxu0 %v4934_v53  ;;  %3285 = vmatprep.subr.bf16.mxu1 %v4939_v54  ;;  %v5030_v53 = vld [vmem:[%s6713_s1 + $0xb40] ss:$8 sps:$4 sm:$0xff]   ;;  %v5035_v54 = vld [vmem:[%s6713_s1 + $0x454] ss:$8 sps:$4 sm:$0xff]  }
  0xe1   : > { %3656 = vmatprep.subr.bf16.mxu0 %v4942_v55  ;;  %v5038_v55 = vld [vmem:[%s6713_s1 + $0xb54] ss:$8 sps:$4 sm:$0xff]  }
  0xe3   : > { %3286 = vmatpush1.bf16.msra.mxu1 %v4937_v56  ;;  %v5033_v56 = vld [vmem:[%s6713_s1 + $0x450] ss:$8 sps:$4 sm:$0xff]  }
  0xe4   : > { %3657 = vmatpush1.bf16.msra.mxu0 %v4940_v57  ;;  %3287 = vmatprep.subr.bf16.mxu1 %v4945_v58  ;;  %v5036_v57 = vld [vmem:[%s6713_s1 + $0xb50] ss:$8 sps:$4 sm:$0xff]   ;;  %v5041_v58 = vld [vmem:[%s6713_s1 + $0x464] ss:$8 sps:$4 sm:$0xff]  }
  0xe5   : > { %3658 = vmatprep.subr.bf16.mxu0 %v4948_v59  ;;  %v5044_v59 = vld [vmem:[%s6713_s1 + $0xb64] ss:$8 sps:$4 sm:$0xff]  }
  0xe7   : > { %3288 = vmatpush1.bf16.msra.mxu1 %v4943_v60  ;;  %v5039_v60 = vld [vmem:[%s6713_s1 + $0x460] ss:$8 sps:$4 sm:$0xff]  }
  0xe8   : > { %3659 = vmatpush1.bf16.msra.mxu0 %v4946_v61  ;;  %3289 = vmatprep.subr.bf16.mxu1 %v4951_v62  ;;  %v5042_v61 = vld [vmem:[%s6713_s1 + $0xb60] ss:$8 sps:$4 sm:$0xff]   ;;  %v5047_v62 = vld [vmem:[%s6713_s1 + $0x474] ss:$8 sps:$4 sm:$0xff]  }
  0xe9   : > { %3660 = vmatprep.subr.bf16.mxu0 %v4954_v63  ;;  %v5050_v63 = vld [vmem:[%s6713_s1 + $0xb74] ss:$8 sps:$4 sm:$0xff]  }
  0xeb   : > { %3290 = vmatpush1.bf16.msra.mxu1 %v4949_v0  ;;  %v5045_v0 = vld [vmem:[%s6713_s1 + $0x470] ss:$8 sps:$4 sm:$0xff]  }
  0xec   : > { %3661 = vmatpush1.bf16.msra.mxu0 %v4952_v1  ;;  %3291 = vmatprep.subr.bf16.mxu1 %v4957_v2  ;;  %v5048_v1 = vld [vmem:[%s6713_s1 + $0xb70] ss:$8 sps:$4 sm:$0xff]   ;;  %v5053_v2 = vld [vmem:[%s6713_s1 + $0x484] ss:$8 sps:$4 sm:$0xff]  }
  0xed   : > { %3662 = vmatprep.subr.bf16.mxu0 %v4960_v3  ;;  %v5056_v3 = vld [vmem:[%s6713_s1 + $0xb84] ss:$8 sps:$4 sm:$0xff]  }
  0xef   : > { %3292 = vmatpush1.bf16.msra.mxu1 %v4955_v4  ;;  %v5051_v4 = vld [vmem:[%s6713_s1 + $0x480] ss:$8 sps:$4 sm:$0xff]  }
  0xf0   : > { %3663 = vmatpush1.bf16.msra.mxu0 %v4958_v5  ;;  %3293 = vmatprep.subr.bf16.mxu1 %v4963_v6  ;;  %v5054_v5 = vld [vmem:[%s6713_s1 + $0xb80] ss:$8 sps:$4 sm:$0xff]   ;;  %v5059_v6 = vld [vmem:[%s6713_s1 + $0x494] ss:$8 sps:$4 sm:$0xff]  }
  0xf1   : > { %3664 = vmatprep.subr.bf16.mxu0 %v4966_v7  ;;  %v5062_v7 = vld [vmem:[%s6713_s1 + $0xb94] ss:$8 sps:$4 sm:$0xff]  }
  0xf3   : > { %3294 = vmatpush1.bf16.msra.mxu1 %v4961_v8  ;;  %v5057_v8 = vld [vmem:[%s6713_s1 + $0x490] ss:$8 sps:$4 sm:$0xff]  }
  0xf4   : > { %3665 = vmatpush1.bf16.msra.mxu0 %v4964_v9  ;;  %3295 = vmatprep.subr.bf16.mxu1 %v4969_v10  ;;  %v5060_v9 = vld [vmem:[%s6713_s1 + $0xb90] ss:$8 sps:$4 sm:$0xff]   ;;  %v5065_v10 = vld [vmem:[%s6713_s1 + $0x4a4] ss:$8 sps:$4 sm:$0xff]  }
  0xf5   : > { %3666 = vmatprep.subr.bf16.mxu0 %v4972_v11  ;;  %v5068_v11 = vld [vmem:[%s6713_s1 + $0xba4] ss:$8 sps:$4 sm:$0xff]  }
  0xf7   : > { %3296 = vmatpush1.bf16.msra.mxu1 %v4967_v12  ;;  %v5063_v12 = vld [vmem:[%s6713_s1 + $0x4a0] ss:$8 sps:$4 sm:$0xff]  }
  0xf8   : > { %3667 = vmatpush1.bf16.msra.mxu0 %v4970_v13  ;;  %3297 = vmatprep.subr.bf16.mxu1 %v4975_v14  ;;  %v5066_v13 = vld [vmem:[%s6713_s1 + $0xba0] ss:$8 sps:$4 sm:$0xff]   ;;  %v5071_v14 = vld [vmem:[%s6713_s1 + $0x4b4] ss:$8 sps:$4 sm:$0xff]  }
  0xf9   : > { %3668 = vmatprep.subr.bf16.mxu0 %v4978_v15  ;;  %v5074_v15 = vld [vmem:[%s6713_s1 + $0xbb4] ss:$8 sps:$4 sm:$0xff]  }
  0xfb   : > { %3298 = vmatpush1.bf16.msra.mxu1 %v4973_v16  ;;  %v5069_v16 = vld [vmem:[%s6713_s1 + $0x4b0] ss:$8 sps:$4 sm:$0xff]  }
  0xfc   : > { %3669 = vmatpush1.bf16.msra.mxu0 %v4976_v17  ;;  %3299 = vmatprep.subr.bf16.mxu1 %v4983_v18  ;;  %v5072_v17 = vld [vmem:[%s6713_s1 + $0xbb0] ss:$8 sps:$4 sm:$0xff]   ;;  %v5077_v18 = vld [vmem:[%s6713_s1 + $0x4c4] ss:$8 sps:$4 sm:$0xff]  }
  0xfd   : > { %3670 = vmatprep.subr.bf16.mxu0 %v4988_v19  ;;  %v5080_v19 = vld [vmem:[%s6713_s1 + $0xbc4] ss:$8 sps:$4 sm:$0xff]  }
  0xff   : > { %3300 = vmatpush1.bf16.msra.mxu1 %v4981_v20  ;;  %v5075_v20 = vld [vmem:[%s6713_s1 + $0x4c0] ss:$8 sps:$4 sm:$0xff]  }
 0x100   : > { %3671 = vmatpush1.bf16.msra.mxu0 %v4986_v21  ;;  %3301 = vmatprep.subr.bf16.mxu1 %v4993_v22  ;;  %v5078_v21 = vld [vmem:[%s6713_s1 + $0xbc0] ss:$8 sps:$4 sm:$0xff]   ;;  %v5083_v22 = vld [vmem:[%s6713_s1 + $0x4d4] ss:$8 sps:$4 sm:$0xff]  }
 0x101   : > { %3672 = vmatprep.subr.bf16.mxu0 %v4996_v23  ;;  %v5086_v23 = vld [vmem:[%s6713_s1 + $0xbd4] ss:$8 sps:$4 sm:$0xff]  }
 0x103   : > { %3302 = vmatpush1.bf16.msra.mxu1 %v4991_v24  ;;  %v5081_v24 = vld [vmem:[%s6713_s1 + $0x4d0] ss:$8 sps:$4 sm:$0xff]  }
 0x104   : > { %3673 = vmatpush1.bf16.msra.mxu0 %v4994_v25  ;;  %3324 = vmatprep.subr.bf16.mxu1 %v5002_v26  ;;  %v5084_v25 = vld [vmem:[%s6713_s1 + $0xbd0] ss:$8 sps:$4 sm:$0xff]   ;;  %v5091_v26 = vld [vmem:[%s6713_s1 + $0x4e4] ss:$8 sps:$4 sm:$0xff]  }
 0x105   : > { %3695 = vmatprep.subr.bf16.mxu0 %v5008_v27  ;;  %v5096_v27 = vld [vmem:[%s6713_s1 + $0xbe4] ss:$8 sps:$4 sm:$0xff]  }
 0x106   : > { %3304 = vmatmul.mubr.bf16.vlgmr.msra.gmra.mrb[0].mxu1 %v4997_v28  ;;  %v5089_v28 = vld [vmem:[%s6713_s1 + $0x4e0] ss:$8 sps:$4 sm:$0xff]  }
 0x107   : > { %3675 = vmatmul.mubr.bf16.vlgmr.msra.gmra.mrb[0].mxu0 %v5003_v30  ;;  %3325 = vmatpush1.bf16.msra.mxu1 %v5000_v29  ;;  %v5094_v29 = vld [vmem:[%s6713_s1 + $0xbe0] ss:$8 sps:$4 sm:$0xff]   ;;  %v5101_v30 = vld [vmem:[%s6713_s1 + $0x4f4] ss:$8 sps:$4 sm:$0xff]  }
 0x108   : > { %3696 = vmatpush1.bf16.msra.mxu0 %v5006_v31  ;;  %3326 = vmatprep.subr.bf16.mxu1 %v5011_v32  ;;  %v5104_v31 = vld [vmem:[%s6713_s1 + $0xbf4] ss:$8 sps:$4 sm:$0xff]   ;;  %v5099_v32 = vld [vmem:[%s6713_s1 + $0x4f0] ss:$8 sps:$4 sm:$0xff]  }
 0x109   : > { %3697 = vmatprep.subr.bf16.mxu0 %v5014_v33  ;;  %3313 = vmatprep.mubr.bf16.mxu1 %v5087_v34  ;;  %v5102_v33 = vld [vmem:[%s6713_s1 + $0xbf0] ss:$8 sps:$4 sm:$0xff]   ;;  %v5105_v34 = vld [vmem:[%s5485_s13 + $0x20] ss:$108 sps:$4 sm:$0xff]  }
 0x10a   : > { %3684 = vmatprep.mubr.bf16.mxu0 %v5092_v35  ;;  %v5110_v35 = vld [vmem:[%s6713_s1 + $0x504] ss:$8 sps:$4 sm:$0xff]  }
 0x10b   : > { %3327 = vmatpush1.bf16.msra.mxu1 %v5009_v36  ;;  %v5116_v36 = vld [vmem:[%s6713_s1 + $0xc04] ss:$8 sps:$4 sm:$0xff]  }
 0x10c   : > { %3698 = vmatpush1.bf16.msra.mxu0 %v5012_v37  ;;  %3328 = vmatprep.subr.bf16.mxu1 %v5017_v38  ;;  %v5108_v37 = vld [vmem:[%s6713_s1 + $0x500] ss:$8 sps:$4 sm:$0xff]   ;;  %v5111_v38 = vld [vmem:[%s5485_s13 + $0x58] ss:$108 sps:$4 sm:$0xff]  }
 0x10d   : > { %3699 = vmatprep.subr.bf16.mxu0 %v5020_v39  ;;  %v5114_v39 = vld [vmem:[%s6713_s1 + $0xc00] ss:$8 sps:$4 sm:$0xff]  }
 0x10e   : > { %3314 = vmatmul.mubr.bf16.gmra.mrb[4].mxu1 %v5097_v42  ;;  %v5195_v42 = vld [vmem:[%s5485_s13 + $0xfc] ss:$108 sps:$4 sm:$0xff]  }
 0x10f   : > { %3685 = vmatmul.mubr.bf16.gmra.mrb[4].mxu0 %v5098_v43  ;;  %3329 = vmatpush1.bf16.msra.mxu1 %v5015_v40  ;;  %v5119_v40 = vld [vmem:[%s6713_s1 + $0x514] ss:$8 sps:$4 sm:$0xff]  }
 0x110   : > { %3700 = vmatpush1.bf16.msra.mxu0 %v5018_v41  ;;  %3330 = vmatprep.subr.bf16.mxu1 %v5023_v44  ;;  %v5122_v41 = vld [vmem:[%s6713_s1 + $0xc14] ss:$8 sps:$4 sm:$0xff]   ;;  %v5117_v44 = vld [vmem:[%s6713_s1 + $0x510] ss:$8 sps:$4 sm:$0xff]  }
 0x111   : > { %3701 = vmatprep.subr.bf16.mxu0 %v5026_v45  ;;  %3356 = vmatprep.mubr.bf16.mxu1 %v5107_v46  ;;  %v5200_v43 = vld [vmem:[%s5485_s13 + $0x134] ss:$108 sps:$4 sm:$0xff]   ;;  %v5120_v45 = vld [vmem:[%s6713_s1 + $0xc10] ss:$8 sps:$4 sm:$0xff]   ;;  %v5125_v46 = vld [vmem:[%s6713_s1 + $0x524] ss:$8 sps:$4 sm:$0xff]  }
 0x112   : > { %3727 = vmatprep.mubr.bf16.mxu0 %v5113_v47  ;;  %v5128_v47 = vld [vmem:[%s6713_s1 + $0xc24] ss:$8 sps:$4 sm:$0xff]  }
 0x113   : > { %3331 = vmatpush1.bf16.msra.mxu1 %v5021_v48  ;;  %v5205_v48 = vld [vmem:[%s5485_s13 + $0xf8] ss:$108 sps:$4 sm:$0xff]  }
 0x114   : > { %3702 = vmatpush1.bf16.msra.mxu0 %v5024_v49  ;;  %3332 = vmatprep.subr.bf16.mxu1 %v5029_v50  ;;  %v5206_v49 = vld [vmem:[%s5485_s13 + $0x130] ss:$108 sps:$4 sm:$0xff]   ;;  %v5123_v50 = vld [vmem:[%s6713_s1 + $0x520] ss:$8 sps:$4 sm:$0xff]  }
 0x115   : > { %3703 = vmatprep.subr.bf16.mxu0 %v5032_v51  ;;  %v5126_v51 = vld [vmem:[%s6713_s1 + $0xc20] ss:$8 sps:$4 sm:$0xff]  }
 0x117   : > { %3333 = vmatpush1.bf16.msra.mxu1 %v5027_v52  ;;  %v5131_v52 = vld [vmem:[%s6713_s1 + $0x534] ss:$8 sps:$4 sm:$0xff]  }
 0x118   : > { %3704 = vmatpush1.bf16.msra.mxu0 %v5030_v53  ;;  %3334 = vmatprep.subr.bf16.mxu1 %v5035_v54  ;;  %v5134_v53 = vld [vmem:[%s6713_s1 + $0xc34] ss:$8 sps:$4 sm:$0xff]   ;;  %v5215_v54 = vld [vmem:[%s5485_s13 + $0x2c] ss:$108 sps:$4 sm:$0xff]  }
 0x119   : > { %3705 = vmatprep.subr.bf16.mxu0 %v5038_v55  ;;  %v5221_v55 = vld [vmem:[%s5485_s13 + $0x64] ss:$108 sps:$4 sm:$0xff]  }
 0x11b   : > { %3335 = vmatpush1.bf16.msra.mxu1 %v5033_v56  ;;  %v5129_v56 = vld [vmem:[%s6713_s1 + $0x530] ss:$8 sps:$4 sm:$0xff]  }
 0x11c   : > { %3706 = vmatpush1.bf16.msra.mxu0 %v5036_v57  ;;  %3336 = vmatprep.subr.bf16.mxu1 %v5041_v58  ;;  %v5132_v57 = vld [vmem:[%s6713_s1 + $0xc30] ss:$8 sps:$4 sm:$0xff]   ;;  %v5137_v58 = vld [vmem:[%s6713_s1 + $0x544] ss:$8 sps:$4 sm:$0xff]  }
 0x11d   : > { %3707 = vmatprep.subr.bf16.mxu0 %v5044_v59  ;;  %v5140_v59 = vld [vmem:[%s6713_s1 + $0xc44] ss:$8 sps:$4 sm:$0xff]  }
 0x11f   : > { %3337 = vmatpush1.bf16.msra.mxu1 %v5039_v60  ;;  %v5135_v60 = vld [vmem:[%s6713_s1 + $0x540] ss:$8 sps:$4 sm:$0xff]  }
 0x120   : > { %3708 = vmatpush1.bf16.msra.mxu0 %v5042_v61  ;;  %3338 = vmatprep.subr.bf16.mxu1 %v5047_v62  ;;  %v5138_v61 = vld [vmem:[%s6713_s1 + $0xc40] ss:$8 sps:$4 sm:$0xff]   ;;  %v5143_v62 = vld [vmem:[%s6713_s1 + $0x554] ss:$8 sps:$4 sm:$0xff]  }
 0x121   : > { %3709 = vmatprep.subr.bf16.mxu0 %v5050_v63  ;;  %v5146_v63 = vld [vmem:[%s6713_s1 + $0xc54] ss:$8 sps:$4 sm:$0xff]  }
 0x123   : > { %3339 = vmatpush1.bf16.msra.mxu1 %v5045_v0  ;;  %v5141_v0 = vld [vmem:[%s6713_s1 + $0x550] ss:$8 sps:$4 sm:$0xff]  }
 0x124   : > { %3710 = vmatpush1.bf16.msra.mxu0 %v5048_v1  ;;  %3340 = vmatprep.subr.bf16.mxu1 %v5053_v2  ;;  %v5144_v1 = vld [vmem:[%s6713_s1 + $0xc50] ss:$8 sps:$4 sm:$0xff]   ;;  %v5149_v2 = vld [vmem:[%s6713_s1 + $0x564] ss:$8 sps:$4 sm:$0xff]  }
 0x125   : > { %3711 = vmatprep.subr.bf16.mxu0 %v5056_v3  ;;  %v5152_v3 = vld [vmem:[%s6713_s1 + $0xc64] ss:$8 sps:$4 sm:$0xff]  }
 0x127   : > { %3341 = vmatpush1.bf16.msra.mxu1 %v5051_v4  ;;  %v5147_v4 = vld [vmem:[%s6713_s1 + $0x560] ss:$8 sps:$4 sm:$0xff]  }
 0x128   : > { %3712 = vmatpush1.bf16.msra.mxu0 %v5054_v5  ;;  %3342 = vmatprep.subr.bf16.mxu1 %v5059_v6  ;;  %v5150_v5 = vld [vmem:[%s6713_s1 + $0xc60] ss:$8 sps:$4 sm:$0xff]   ;;  %v5155_v6 = vld [vmem:[%s6713_s1 + $0x574] ss:$8 sps:$4 sm:$0xff]  }
 0x129   : > { %3713 = vmatprep.subr.bf16.mxu0 %v5062_v7  ;;  %v5158_v7 = vld [vmem:[%s6713_s1 + $0xc74] ss:$8 sps:$4 sm:$0xff]  }
 0x12b   : > { %3343 = vmatpush1.bf16.msra.mxu1 %v5057_v8  ;;  %v5153_v8 = vld [vmem:[%s6713_s1 + $0x570] ss:$8 sps:$4 sm:$0xff]  }
 0x12c   : > { %3714 = vmatpush1.bf16.msra.mxu0 %v5060_v9  ;;  %3344 = vmatprep.subr.bf16.mxu1 %v5065_v10  ;;  %v5156_v9 = vld [vmem:[%s6713_s1 + $0xc70] ss:$8 sps:$4 sm:$0xff]   ;;  %v5161_v10 = vld [vmem:[%s6713_s1 + $0x584] ss:$8 sps:$4 sm:$0xff]  }
 0x12d   : > { %3715 = vmatprep.subr.bf16.mxu0 %v5068_v11  ;;  %v5164_v11 = vld [vmem:[%s6713_s1 + $0xc84] ss:$8 sps:$4 sm:$0xff]  }
 0x12f   : > { %3345 = vmatpush1.bf16.msra.mxu1 %v5063_v12  ;;  %v5159_v12 = vld [vmem:[%s6713_s1 + $0x580] ss:$8 sps:$4 sm:$0xff]  }
 0x130   : > { %3716 = vmatpush1.bf16.msra.mxu0 %v5066_v13  ;;  %3346 = vmatprep.subr.bf16.mxu1 %v5071_v14  ;;  %v5162_v13 = vld [vmem:[%s6713_s1 + $0xc80] ss:$8 sps:$4 sm:$0xff]   ;;  %v5167_v14 = vld [vmem:[%s6713_s1 + $0x594] ss:$8 sps:$4 sm:$0xff]  }
 0x131   : > { %3717 = vmatprep.subr.bf16.mxu0 %v5074_v15  ;;  %v5170_v15 = vld [vmem:[%s6713_s1 + $0xc94] ss:$8 sps:$4 sm:$0xff]  }
 0x133   : > { %3347 = vmatpush1.bf16.msra.mxu1 %v5069_v16  ;;  %v5165_v16 = vld [vmem:[%s6713_s1 + $0x590] ss:$8 sps:$4 sm:$0xff]  }
 0x134   : > { %3718 = vmatpush1.bf16.msra.mxu0 %v5072_v17  ;;  %3348 = vmatprep.subr.bf16.mxu1 %v5077_v18  ;;  %v5168_v17 = vld [vmem:[%s6713_s1 + $0xc90] ss:$8 sps:$4 sm:$0xff]   ;;  %v5173_v18 = vld [vmem:[%s6713_s1 + $0x5a4] ss:$8 sps:$4 sm:$0xff]  }
 0x135   : > { %3719 = vmatprep.subr.bf16.mxu0 %v5080_v19  ;;  %v5176_v19 = vld [vmem:[%s6713_s1 + $0xca4] ss:$8 sps:$4 sm:$0xff]  }
 0x137   : > { %3349 = vmatpush1.bf16.msra.mxu1 %v5075_v20  ;;  %v5171_v20 = vld [vmem:[%s6713_s1 + $0x5a0] ss:$8 sps:$4 sm:$0xff]  }
 0x138   : > { %3720 = vmatpush1.bf16.msra.mxu0 %v5078_v21  ;;  %3350 = vmatprep.subr.bf16.mxu1 %v5083_v22  ;;  %v5174_v21 = vld [vmem:[%s6713_s1 + $0xca0] ss:$8 sps:$4 sm:$0xff]   ;;  %v5179_v22 = vld [vmem:[%s6713_s1 + $0x5b4] ss:$8 sps:$4 sm:$0xff]  }
 0x139   : > { %3721 = vmatprep.subr.bf16.mxu0 %v5086_v23  ;;  %v5182_v23 = vld [vmem:[%s6713_s1 + $0xcb4] ss:$8 sps:$4 sm:$0xff]  }
 0x13b   : > { %3351 = vmatpush1.bf16.msra.mxu1 %v5081_v24  ;;  %v5177_v24 = vld [vmem:[%s6713_s1 + $0x5b0] ss:$8 sps:$4 sm:$0xff]  }
 0x13c   : > { %3722 = vmatpush1.bf16.msra.mxu0 %v5084_v25  ;;  %3352 = vmatprep.subr.bf16.mxu1 %v5091_v26  ;;  %v5180_v25 = vld [vmem:[%s6713_s1 + $0xcb0] ss:$8 sps:$4 sm:$0xff]   ;;  %v5185_v26 = vld [vmem:[%s6713_s1 + $0x5c4] ss:$8 sps:$4 sm:$0xff]  }
 0x13d   : > { %3723 = vmatprep.subr.bf16.mxu0 %v5096_v27  ;;  %v5188_v27 = vld [vmem:[%s6713_s1 + $0xcc4] ss:$8 sps:$4 sm:$0xff]  }
 0x13f   : > { %3353 = vmatpush1.bf16.msra.mxu1 %v5089_v28  ;;  %v5183_v28 = vld [vmem:[%s6713_s1 + $0x5c0] ss:$8 sps:$4 sm:$0xff]  }
 0x140   : > { %3724 = vmatpush1.bf16.msra.mxu0 %v5094_v29  ;;  %3354 = vmatprep.subr.bf16.mxu1 %v5101_v30  ;;  %v5186_v29 = vld [vmem:[%s6713_s1 + $0xcc0] ss:$8 sps:$4 sm:$0xff]   ;;  %v5191_v30 = vld [vmem:[%s6713_s1 + $0x5d4] ss:$8 sps:$4 sm:$0xff]  }
 0x141   : > { %3725 = vmatprep.subr.bf16.mxu0 %v5104_v31  ;;  %v5194_v31 = vld [vmem:[%s6713_s1 + $0xcd4] ss:$8 sps:$4 sm:$0xff]  }
 0x143   : > { %3355 = vmatpush1.bf16.msra.mxu1 %v5099_v32  ;;  %v5189_v32 = vld [vmem:[%s6713_s1 + $0x5d0] ss:$8 sps:$4 sm:$0xff]  }
 0x144   : > { %3726 = vmatpush1.bf16.msra.mxu0 %v5102_v33  ;;  %3377 = vmatprep.subr.bf16.mxu1 %v5110_v35  ;;  %v5192_v33 = vld [vmem:[%s6713_s1 + $0xcd0] ss:$8 sps:$4 sm:$0xff]   ;;  %v5204_v35 = vld [vmem:[%s6713_s1 + $0xce4] ss:$8 sps:$4 sm:$0xff]  }
 0x145   : > { %3748 = vmatprep.subr.bf16.mxu0 %v5116_v36  ;;  %v5197_v36 = vld [vmem:[%s6713_s1 + $0x5e0] ss:$8 sps:$4 sm:$0xff]  }
 0x146   : > { %3357 = vmatmul.mubr.bf16.vlgmr.msra.gmra.mrb[0].mxu1 %v5105_v34  ;;  %v5199_v34 = vld [vmem:[%s6713_s1 + $0x5e4] ss:$8 sps:$4 sm:$0xff]  }
 0x147   : > { %3728 = vmatmul.mubr.bf16.vlgmr.msra.gmra.mrb[0].mxu0 %v5111_v38  ;;  %3378 = vmatpush1.bf16.msra.mxu1 %v5108_v37  ;;  %v5202_v37 = vld [vmem:[%s6713_s1 + $0xce0] ss:$8 sps:$4 sm:$0xff]   ;;  %v5209_v38 = vld [vmem:[%s6713_s1 + $0x5f4] ss:$8 sps:$4 sm:$0xff]  }
 0x148   : > { %3749 = vmatpush1.bf16.msra.mxu0 %v5114_v39  ;;  %3379 = vmatprep.subr.bf16.mxu1 %v5119_v40  ;;  %v5212_v39 = vld [vmem:[%s6713_s1 + $0xcf4] ss:$8 sps:$4 sm:$0xff]   ;;  %v5207_v40 = vld [vmem:[%s6713_s1 + $0x5f0] ss:$8 sps:$4 sm:$0xff]  }
 0x149   : > { %3750 = vmatprep.subr.bf16.mxu0 %v5122_v41  ;;  %3366 = vmatprep.mubr.bf16.mxu1 %v5195_v42  ;;  %v5210_v41 = vld [vmem:[%s6713_s1 + $0xcf0] ss:$8 sps:$4 sm:$0xff]   ;;  %v5218_v42 = vld [vmem:[%s6713_s1 + $0x604] ss:$8 sps:$4 sm:$0xff]  }
 0x14a   : > { %3737 = vmatprep.mubr.bf16.mxu0 %v5200_v43  ;;  %v5224_v43 = vld [vmem:[%s6713_s1 + $0xd04] ss:$8 sps:$4 sm:$0xff]  }
 0x14b   : > { %3380 = vmatpush1.bf16.msra.mxu1 %v5117_v44  ;;  %v5213_v44 = vld [vmem:[%s5485_s13 + $0x28] ss:$108 sps:$4 sm:$0xff]  }
 0x14c   : > { %3751 = vmatpush1.bf16.msra.mxu0 %v5120_v45  ;;  %3381 = vmatprep.subr.bf16.mxu1 %v5125_v46  ;;  %v5219_v45 = vld [vmem:[%s5485_s13 + $0x60] ss:$108 sps:$4 sm:$0xff]  }
 0x14d   : > { %3752 = vmatprep.subr.bf16.mxu0 %v5128_v47  ;;  %v5216_v46 = vld [vmem:[%s6713_s1 + $0x600] ss:$8 sps:$4 sm:$0xff]  }
 0x14e   : > { %3367 = vmatmul.mubr.bf16.gmra.mrb[4].mxu1 %v5205_v48  ;;  %v5222_v47 = vld [vmem:[%s6713_s1 + $0xd00] ss:$8 sps:$4 sm:$0xff]   ;;  %v5227_v48 = vld [vmem:[%s6713_s1 + $0x614] ss:$8 sps:$4 sm:$0xff]  }
 0x14f   : > { %3738 = vmatmul.mubr.bf16.gmra.mrb[4].mxu0 %v5206_v49  ;;  %3382 = vmatpush1.bf16.msra.mxu1 %v5123_v50  ;;  %v5230_v49 = vld [vmem:[%s6713_s1 + $0xd14] ss:$8 sps:$4 sm:$0xff]  }
 0x150   : > { %3753 = vmatpush1.bf16.msra.mxu0 %v5126_v51  ;;  %3383 = vmatprep.subr.bf16.mxu1 %v5131_v52  ;;  %v5255_v50 = vld [vmem:[%s5485_s13 + $0x13c] ss:$108 sps:$4 sm:$0xff]   ;;  %v5290_v51 = vld [vmem:[%s5485_s13 + $0x104] ss:$108 sps:$4 sm:$0xff]  }
 0x151   : > { %3754 = vmatprep.subr.bf16.mxu0 %v5134_v53  ;;  %3409 = vmatprep.mubr.bf16.mxu1 %v5215_v54  ;;  %v5225_v52 = vld [vmem:[%s6713_s1 + $0x610] ss:$8 sps:$4 sm:$0xff]   ;;  %v5233_v54 = vld [vmem:[%s6713_s1 + $0x624] ss:$8 sps:$4 sm:$0xff]  }
 0x152   : > { %3780 = vmatprep.mubr.bf16.mxu0 %v5221_v55  ;;  %v5228_v53 = vld [vmem:[%s6713_s1 + $0xd10] ss:$8 sps:$4 sm:$0xff]   ;;  %v5236_v55 = vld [vmem:[%s6713_s1 + $0xd24] ss:$8 sps:$4 sm:$0xff]  }
 0x153   : > { %3384 = vmatpush1.bf16.msra.mxu1 %v5129_v56  ;;  %v5260_v56 = vld [vmem:[%s5485_s13 + $0x138] ss:$108 sps:$4 sm:$0xff]  }
 0x154   : > { %3755 = vmatpush1.bf16.msra.mxu0 %v5132_v57  ;;  %3385 = vmatprep.subr.bf16.mxu1 %v5137_v58  ;;  %v5292_v57 = vld [vmem:[%s5485_s13 + $0x100] ss:$108 sps:$4 sm:$0xff]  }
 0x155   : > { %3756 = vmatprep.subr.bf16.mxu0 %v5140_v59  ;;  %v5231_v58 = vld [vmem:[%s6713_s1 + $0x620] ss:$8 sps:$4 sm:$0xff]  }
 0x156   : > { %v5234_v59 = vld [vmem:[%s6713_s1 + $0xd20] ss:$8 sps:$4 sm:$0xff]  }
 0x157   : > { %3386 = vmatpush1.bf16.msra.mxu1 %v5135_v60  ;;  %v5239_v60 = vld [vmem:[%s6713_s1 + $0x634] ss:$8 sps:$4 sm:$0xff]  }
 0x158   : > { %3757 = vmatpush1.bf16.msra.mxu0 %v5138_v61  ;;  %3387 = vmatprep.subr.bf16.mxu1 %v5143_v62  ;;  %v5242_v61 = vld [vmem:[%s6713_s1 + $0xd34] ss:$8 sps:$4 sm:$0xff]  }
 0x159   : > { %3758 = vmatprep.subr.bf16.mxu0 %v5146_v63  ;;  %v5301_v62 = vld [vmem:[%s5485_s13 + $0x34] ss:$108 sps:$4 sm:$0xff]   ;;  %v5237_v63 = vld [vmem:[%s6713_s1 + $0x630] ss:$8 sps:$4 sm:$0xff]  }
 0x15b   : > { %3388 = vmatpush1.bf16.msra.mxu1 %v5141_v0  ;;  %v5240_v0 = vld [vmem:[%s6713_s1 + $0xd30] ss:$8 sps:$4 sm:$0xff]  }
 0x15c   : > { %3759 = vmatpush1.bf16.msra.mxu0 %v5144_v1  ;;  %3389 = vmatprep.subr.bf16.mxu1 %v5149_v2  ;;  %v5245_v1 = vld [vmem:[%s6713_s1 + $0x644] ss:$8 sps:$4 sm:$0xff]  }
 0x15d   : > { %3760 = vmatprep.subr.bf16.mxu0 %v5152_v3  ;;  %v5248_v2 = vld [vmem:[%s6713_s1 + $0xd44] ss:$8 sps:$4 sm:$0xff]   ;;  %v5313_v3 = vmov 0  }
 0x15f   : > { %3390 = vmatpush1.bf16.msra.mxu1 %v5147_v4  ;;  %v5243_v4 = vld [vmem:[%s6713_s1 + $0x640] ss:$8 sps:$4 sm:$0xff]  }
 0x160   : > { %3761 = vmatpush1.bf16.msra.mxu0 %v5150_v5  ;;  %3391 = vmatprep.subr.bf16.mxu1 %v5155_v6  ;;  %v5246_v5 = vld [vmem:[%s6713_s1 + $0xd40] ss:$8 sps:$4 sm:$0xff]   ;;  %v5251_v6 = vld [vmem:[%s6713_s1 + $0x654] ss:$8 sps:$4 sm:$0xff]  }
 0x161   : > { %3762 = vmatprep.subr.bf16.mxu0 %v5158_v7  ;;  %v5254_v7 = vld [vmem:[%s6713_s1 + $0xd54] ss:$8 sps:$4 sm:$0xff]  }
 0x163   : > { %3392 = vmatpush1.bf16.msra.mxu1 %v5153_v8  ;;  %v5249_v8 = vld [vmem:[%s6713_s1 + $0x650] ss:$8 sps:$4 sm:$0xff]  }
 0x164   : > { %3763 = vmatpush1.bf16.msra.mxu0 %v5156_v9  ;;  %3393 = vmatprep.subr.bf16.mxu1 %v5161_v10  ;;  %v5252_v9 = vld [vmem:[%s6713_s1 + $0xd50] ss:$8 sps:$4 sm:$0xff]   ;;  %v5259_v10 = vld [vmem:[%s6713_s1 + $0x664] ss:$8 sps:$4 sm:$0xff]  }
 0x165   : > { %3764 = vmatprep.subr.bf16.mxu0 %v5164_v11  ;;  %v5263_v11 = vld [vmem:[%s6713_s1 + $0xd64] ss:$8 sps:$4 sm:$0xff]  }
 0x167   : > { %3394 = vmatpush1.bf16.msra.mxu1 %v5159_v12  ;;  %v5257_v12 = vld [vmem:[%s6713_s1 + $0x660] ss:$8 sps:$4 sm:$0xff]  }
 0x168   : > { %3765 = vmatpush1.bf16.msra.mxu0 %v5162_v13  ;;  %3395 = vmatprep.subr.bf16.mxu1 %v5167_v14  ;;  %v5261_v13 = vld [vmem:[%s6713_s1 + $0xd60] ss:$8 sps:$4 sm:$0xff]   ;;  %v5266_v14 = vld [vmem:[%s6713_s1 + $0x674] ss:$8 sps:$4 sm:$0xff]  }
 0x169   : > { %3766 = vmatprep.subr.bf16.mxu0 %v5170_v15  ;;  %v5269_v15 = vld [vmem:[%s6713_s1 + $0xd74] ss:$8 sps:$4 sm:$0xff]  }
 0x16b   : > { %3396 = vmatpush1.bf16.msra.mxu1 %v5165_v16  ;;  %v5264_v16 = vld [vmem:[%s6713_s1 + $0x670] ss:$8 sps:$4 sm:$0xff]  }
 0x16c   : > { %3767 = vmatpush1.bf16.msra.mxu0 %v5168_v17  ;;  %3397 = vmatprep.subr.bf16.mxu1 %v5173_v18  ;;  %v5267_v17 = vld [vmem:[%s6713_s1 + $0xd70] ss:$8 sps:$4 sm:$0xff]   ;;  %v5272_v18 = vld [vmem:[%s6713_s1 + $0x684] ss:$8 sps:$4 sm:$0xff]  }
 0x16d   : > { %3768 = vmatprep.subr.bf16.mxu0 %v5176_v19  ;;  %v5273_v19 = vld [vmem:[%s5485_s13 + $0x68] ss:$108 sps:$4 sm:$0xff]  }
 0x16f   : > { %3398 = vmatpush1.bf16.msra.mxu1 %v5171_v20  ;;  %v5270_v20 = vld [vmem:[%s6713_s1 + $0x680] ss:$8 sps:$4 sm:$0xff]  }
 0x170   : > { %3769 = vmatpush1.bf16.msra.mxu0 %v5174_v21  ;;  %3399 = vmatprep.subr.bf16.mxu1 %v5179_v22  ;;  %v5276_v21 = vld [vmem:[%s6713_s1 + $0x694] ss:$8 sps:$4 sm:$0xff]   ;;  %v5274_v22 = vld [vmem:[%s6713_s1 + $0x690] ss:$8 sps:$4 sm:$0xff]  }
 0x171   : > { %3770 = vmatprep.subr.bf16.mxu0 %v5182_v23  ;;  %v5279_v23 = vld [vmem:[%s6713_s1 + $0x6a4] ss:$8 sps:$4 sm:$0xff]  }
 0x173   : > { %3400 = vmatpush1.bf16.msra.mxu1 %v5177_v24  ;;  %v5280_v24 = vld [vmem:[%s5485_s13 + $0x140] ss:$108 sps:$4 sm:$0xff]  }
 0x174   : > { %3771 = vmatpush1.bf16.msra.mxu0 %v5180_v25  ;;  %3401 = vmatprep.subr.bf16.mxu1 %v5185_v26  ;;  %v5277_v25 = vld [vmem:[%s6713_s1 + $0x6a0] ss:$8 sps:$4 sm:$0xff]   ;;  %v5283_v26 = vld [vmem:[%s6713_s1 + $0x6b4] ss:$8 sps:$4 sm:$0xff]  }
 0x175   : > { %3772 = vmatprep.subr.bf16.mxu0 %v5188_v27  ;;  %v5281_v27 = vld [vmem:[%s6713_s1 + $0x6b0] ss:$8 sps:$4 sm:$0xff]  }
 0x177   : > { %3402 = vmatpush1.bf16.msra.mxu1 %v5183_v28  ;;  %v5286_v28 = vld [vmem:[%s6713_s1 + $0x6c4] ss:$8 sps:$4 sm:$0xff]  }
 0x178   : > { %3773 = vmatpush1.bf16.msra.mxu0 %v5186_v29  ;;  %3403 = vmatprep.subr.bf16.mxu1 %v5191_v30  ;;  %v5284_v29 = vld [vmem:[%s6713_s1 + $0x6c0] ss:$8 sps:$4 sm:$0xff]   ;;  %v5289_v30 = vld [vmem:[%s6713_s1 + $0x6d4] ss:$8 sps:$4 sm:$0xff]  }
 0x179   : > { %3774 = vmatprep.subr.bf16.mxu0 %v5194_v31  ;;  %v5287_v31 = vld [vmem:[%s6713_s1 + $0x6d0] ss:$8 sps:$4 sm:$0xff]  }
 0x17b   : > { %3404 = vmatpush1.bf16.msra.mxu1 %v5189_v32  ;;  %v5295_v32 = vld [vmem:[%s6713_s1 + $0x6e4] ss:$8 sps:$4 sm:$0xff]  }
 0x17c   : > { %3775 = vmatpush1.bf16.msra.mxu0 %v5192_v33  ;;  %3405 = vmatprep.subr.bf16.mxu1 %v5199_v34  ;;  %v5293_v33 = vld [vmem:[%s6713_s1 + $0x6e0] ss:$8 sps:$4 sm:$0xff]   ;;  %v5298_v34 = vld [vmem:[%s6713_s1 + $0x6f4] ss:$8 sps:$4 sm:$0xff]  }
 0x17d   : > { %3776 = vmatprep.subr.bf16.mxu0 %v5204_v35  ;;  %v5296_v35 = vld [vmem:[%s6713_s1 + $0x6f0] ss:$8 sps:$4 sm:$0xff]  }
 0x17f   : > { %3406 = vmatpush1.bf16.msra.mxu1 %v5197_v36  ;;  %v5299_v36 = vld [vmem:[%s5485_s13 + $0x30] ss:$108 sps:$4 sm:$0xff]  }
 0x180   : > { %3777 = vmatpush1.bf16.msra.mxu0 %v5202_v37  ;;  %3407 = vmatprep.subr.bf16.mxu1 %v5209_v38  ;;  %v5302_v37 = vld [vmem:[%s5485_s13 + $0x10c] ss:$108 sps:$4 sm:$0xff]   ;;  %v5304_v38 = vld [vmem:[%s5485_s13 + $0x108] ss:$108 sps:$4 sm:$0xff]   ;;  %s4450_s13 = sshll.u32 %s6717_s24, 3 }
 0x181   : > { %3778 = vmatprep.subr.bf16.mxu0 %v5212_v39  ;;  %s177_s18 = scalar_lea.vmem %s6715_s3, %s4450_s13 }
 0x183   : > { %3408 = vmatpush1.bf16.msra.mxu1 %v5207_v40 }
 0x184   : > { %3779 = vmatpush1.bf16.msra.mxu0 %v5210_v41  ;;  %3430 = vmatprep.subr.bf16.mxu1 %v5218_v42 }
 0x185   : > { %3801 = vmatprep.subr.bf16.mxu0 %v5224_v43 }
 0x186   : > { %3410 = vmatmul.mubr.bf16.vlgmr.msra.gmra.mrb[0].mxu1 %v5213_v44 }
 0x187   : > { %3781 = vmatmul.mubr.bf16.vlgmr.msra.gmra.mrb[0].mxu0 %v5219_v45  ;;  %3431 = vmatpush1.bf16.msra.mxu1 %v5216_v46 }
 0x188   : > { %3802 = vmatpush1.bf16.msra.mxu0 %v5222_v47  ;;  %3432 = vmatprep.subr.bf16.mxu1 %v5227_v48  ;;  %v670_v47 = vlaneseq }
 0x189   : > { %3803 = vmatprep.subr.bf16.mxu0 %v5230_v49  ;;  %3790 = vmatprep.mubr.bf16.mxu0 %v5255_v50  ;;  %v668_v50 = vld [vmem:[%s6714_s2] sm:$0x3] }
 0x18a   : > { %3419 = vmatprep.mubr.bf16.mxu1 %v5290_v51  ;;  %v671_v48 = vshrl.u32 %v670_v47, 7 }
 0x18b   : > { %3433 = vmatpush1.bf16.msra.mxu1 %v5225_v52 }
 0x18c   : > { %3804 = vmatpush1.bf16.msra.mxu0 %v5228_v53  ;;  %3434 = vmatprep.subr.bf16.mxu1 %v5233_v54  ;;  %v672_v49 = vsub.s32 0, %v671_v48  ;;  %v676_v51 = vsub.s32 1, %v671_v48 }
 0x18d   : > { %3805 = vmatprep.subr.bf16.mxu0 %v5236_v55 }
 0x18e   : > { %3420 = vmatmul.mubr.bf16.gmra.mrb[4].mxu1 %v5292_v57  ;;  %v673_v52 = vrot.slane %v668_v50, %v672_v49  ;;  %v677_v53 = vrot.slane %v668_v50, %v676_v51 }
 0x18f   : > { %3791 = vmatmul.mubr.bf16.gmra.mrb[4].mxu0 %v5260_v56  ;;  %3435 = vmatpush1.bf16.msra.mxu1 %v5231_v58 }
 0x190   : > { %3806 = vmatpush1.bf16.msra.mxu0 %v5234_v59  ;;  %3436 = vmatprep.subr.bf16.mxu1 %v5239_v60 }
 0x191   : > { %3807 = vmatprep.subr.bf16.mxu0 %v5242_v61  ;;  %3833 = vmatprep.mubr.bf16.mxu0 %v5313_v3 }
 0x192   : > { %3462 = vmatprep.mubr.bf16.mxu1 %v5301_v62 }
 0x193   : > { %3437 = vmatpush1.bf16.msra.mxu1 %v5237_v63 }
 0x194   : > { %3808 = vmatpush1.bf16.msra.mxu0 %v5240_v0  ;;  %3438 = vmatprep.subr.bf16.mxu1 %v5245_v1 }
 0x195   : > { %3809 = vmatprep.subr.bf16.mxu0 %v5248_v2 }
 0x197   : > { %3439 = vmatpush1.bf16.msra.mxu1 %v5243_v4 }
 0x198   : > { %3810 = vmatpush1.bf16.msra.mxu0 %v5246_v5  ;;  %3440 = vmatprep.subr.bf16.mxu1 %v5251_v6 }
 0x199   : > { %3811 = vmatprep.subr.bf16.mxu0 %v5254_v7 }
 0x19b   : > { %3441 = vmatpush1.bf16.msra.mxu1 %v5249_v8 }
 0x19c   : > { %3812 = vmatpush1.bf16.msra.mxu0 %v5252_v9  ;;  %3442 = vmatprep.subr.bf16.mxu1 %v5259_v10 }
 0x19d   : > { %3813 = vmatprep.subr.bf16.mxu0 %v5263_v11 }
 0x19f   : > { %3443 = vmatpush1.bf16.msra.mxu1 %v5257_v12 }
 0x1a0   : > { %3814 = vmatpush1.bf16.msra.mxu0 %v5261_v13  ;;  %3444 = vmatprep.subr.bf16.mxu1 %v5266_v14 }
 0x1a1   : > { %3815 = vmatprep.subr.bf16.mxu0 %v5269_v15 }
 0x1a3   : > { %3445 = vmatpush1.bf16.msra.mxu1 %v5264_v16 }
 0x1a4   : > { %3816 = vmatpush1.bf16.msra.mxu0 %v5267_v17  ;;  %3446 = vmatprep.subr.bf16.mxu1 %v5272_v18 }
 0x1a7   : > { %3834 = vmatmul.mubr.bf16.vlgmr.msra.gmra.mrb[0].mxu0 %v5273_v19  ;;  %3447 = vmatpush1.bf16.msra.mxu1 %v5270_v20 }
 0x1a8   : > { %3843 = vmatprep.mubr.bf16.mxu0 %v5313_v3  ;;  %3448 = vmatprep.subr.bf16.mxu1 %v5276_v21 }
 0x1ab   : > { %3449 = vmatpush1.bf16.msra.mxu1 %v5274_v22 }
 0x1ac   : > { %3450 = vmatprep.subr.bf16.mxu1 %v5279_v23 }
 0x1af   : > { %3844 = vmatmul.mubr.bf16.gmra.mrb[4].mxu0 %v5280_v24  ;;  %3451 = vmatpush1.bf16.msra.mxu1 %v5277_v25 }
 0x1b0   : > { %3452 = vmatprep.subr.bf16.mxu1 %v5283_v26 }
 0x1b3   : > { %3453 = vmatpush1.bf16.msra.mxu1 %v5281_v27 }
 0x1b4   : > { %3454 = vmatprep.subr.bf16.mxu1 %v5286_v28 }
 0x1b7   : > { %3455 = vmatpush1.bf16.msra.mxu1 %v5284_v29 }
 0x1b8   : > { %3456 = vmatprep.subr.bf16.mxu1 %v5289_v30 }
 0x1bb   : > { %3457 = vmatpush1.bf16.msra.mxu1 %v5287_v31 }
 0x1bc   : > { %3458 = vmatprep.subr.bf16.mxu1 %v5295_v32 }
 0x1bf   : > { %3459 = vmatpush1.bf16.msra.mxu1 %v5293_v33 }
 0x1c0   : > { %3460 = vmatprep.subr.bf16.mxu1 %v5298_v34 }
 0x1c3   : > { %3461 = vmatpush1.bf16.msra.mxu1 %v5296_v35 }
 0x1c6   : > { %3463 = vmatmul.mubr.bf16.vlgmr.msra.gmra.mrb[0].mxu1 %v5299_v36 }
 0x1c7   : > { %3472 = vmatprep.mubr.bf16.mxu1 %v5302_v37 }
 0x1ce   : > { %3473 = vmatmul.mubr.bf16.gmra.mrb[4].mxu1 %v5304_v38 }
 0x27a   : > { %v3835_v39 = vpop.f32.mrb[0].mxu0 }
 0x27b   : > { %v3837_v40 = vpop.f32.mrb[1].mxu0 }
 0x27c   : > { %v3839_v41 = vpop.f32.mrb[2].mxu0 }
 0x27d   : > { %v3841_v42 = vpop.f32.mrb[3].mxu0 }
 0x282   : > { %v3845_v43 = vpop.f32.mrb[4].mxu0 }
 0x283   : > { %v3847_v44 = vpop.f32.mrb[5].mxu0 }
 0x284   : > { %v3849_v45 = vpop.f32.mrb[6].mxu0 }
 0x285   : > { %v3851_v46 = vpop.f32.mrb[7].mxu0 }
 0x299   : > { %v3464_v54 = vpop.f32.mrb[0].mxu1 }
 0x29a   : > { %v4455_v55 = vadd.f32 %v3464_v54, %v673_v52  ;;  %v3466_v56 = vpop.f32.mrb[1].mxu1 }
 0x29b   : > { %v4457_v57 = vadd.f32 %v3466_v56, %v677_v53  ;;  %v3468_v58 = vpop.f32.mrb[2].mxu1 }
 0x29c   : > { %v4456_v59 = vadd.f32 %v4455_v55, %v3835_v39  ;;  %v4459_v60 = vadd.f32 %v3468_v58, %v673_v52  ;;  %v3470_v61 = vpop.f32.mrb[3].mxu1 }
 0x29d   : > { %v4458_v62 = vadd.f32 %v4457_v57, %v3837_v40  ;;  %v4461_v63 = vadd.f32 %v3470_v61, %v677_v53 }
 0x29e   : > { %v3854_v0 = vmax.f32 %v4456_v59, 0.0  ;;  %v4460_v1 = vadd.f32 %v4459_v60, %v3839_v41 }
 0x29f   : > { %v3855_v2 = vmax.f32 %v4458_v62, 0.0  ;;  %v4462_v3 = vadd.f32 %v4461_v63, %v3841_v42 }
 0x2a0   : > { %v3856_v4 = vmax.f32 %v4460_v1, 0.0 }
 0x2a1   : > { %v4451_v5 = vpack.c.bf16 %v3855_v2, %v3854_v0  ;;  %v3857_v6 = vmax.f32 %v4462_v3, 0.0  ;;  %v3474_v7 = vpop.f32.mrb[4].mxu1 }
 0x2a2   : > { %v4463_v8 = vadd.f32 %v3474_v7, %v673_v52  ;;  %v3476_v9 = vpop.f32.mrb[5].mxu1 }
 0x2a3   : > { %3886 = vst [vmem:[%s177_s18] sm:$0xff] %v4451_v5  ;;  %v4452_v10 = vpack.c.bf16 %v3857_v6, %v3856_v4  ;;  %v4465_v11 = vadd.f32 %v3476_v9, %v677_v53  ;;  %v3478_v12 = vpop.f32.mrb[6].mxu1 }
 0x2a4   : > { %v4464_v13 = vadd.f32 %v4463_v8, %v3845_v43  ;;  %v4467_v14 = vadd.f32 %v3478_v12, %v673_v52  ;;  %v3480_v15 = vpop.f32.mrb[7].mxu1 }
 0x2a5   : > { %3887 = vst [vmem:[%s177_s18 + $0x8] sm:$0xff] %v4452_v10  ;;  %v4466_v16 = vadd.f32 %v4465_v11, %v3847_v44  ;;  %v4469_v17 = vadd.f32 %v3480_v15, %v677_v53 }
 0x2a6   : > { %v3858_v18 = vmax.f32 %v4464_v13, 0.0  ;;  %v4468_v19 = vadd.f32 %v4467_v14, %v3849_v45 }
 0x2a7   : > { %v3859_v20 = vmax.f32 %v4466_v16, 0.0  ;;  %v4470_v21 = vadd.f32 %v4469_v17, %v3851_v46 }
 0x2a8   : > { %v3860_v22 = vmax.f32 %v4468_v19, 0.0 }
 0x2a9   : > { %v4453_v23 = vpack.c.bf16 %v3859_v20, %v3858_v18  ;;  %v3861_v24 = vmax.f32 %v4470_v21, 0.0 }
 0x2ab   : > { %3888 = vst [vmem:[%s177_s18 + $0x10] sm:$0xff] %v4453_v23  ;;  %v4454_v25 = vpack.c.bf16 %v3861_v24, %v3860_v22 }
 0x2ad   : > { %3889 = vst [vmem:[%s177_s18 + $0x18] sm:$0xff] %v4454_v25 }
 0x2ae PF: > { %s13_s12 = sadd.s32 1, %s5311_s12  }
 0x2af   : > { %p10_p4 = scmp.ge.s32.totalorder %s13_s12, 4  }
 0x2b1   :  { %12 = sbr.rel (!%p10_p4) target bundleno = 1 (0x1), region = 62 }

// kernel: perceptual_loss.23
= control target key start
LH: loop header
LB: loop body
LE: loop exit
PB: predicated region body
PF: predicated region fallthrough
CT: control target
= control target key end

     0   :  { %s415_s12 = smov 0   ;;  %s451_s0 = inlined_call_operand.vmem [shape: bf16[4,9,256], index: 0, kind: input, shape index: {}, may-alias: {0,1}]   ;;  %s452_s1 = inlined_call_operand.vmem [shape: bf16[4,9,256], index: 1, kind: input, shape index: {}, may-alias: {0,1}]   ;;  %s453_s2 = inlined_call_operand.vmem [shape: f32[1,256], index: 2, kind: input, shape index: {}]   ;;  %s454_s3 = inlined_call_operand.vmem [shape: f32[2,8,128], index: 3, kind: output, shape index: {}]  }
   0x1 LB: > { %s421_s13 = sadd.s32 4294967295, %s393_s12   ;;  %p359_p0 = scmp.ge.s32.totalorder %s393_s12, 1  ;;  %s393_s12 = sphi %s415_s12, %s13_s12  }
   0x2   : > { %p151_p1 = scmp.lt.s32.totalorder %s393_s12, 3 }
   0x4   : > { %p152_p2 = pnand %p359_p0, %p151_p1 }
   0x5   : > { %p180_p3 = scmp.lt.s32.totalorder (!%p152_p2), %s421_s13, 3  ;;  %s185_s14 = sadd.s32 (!%p152_p2), 2, %s421_s13  ;;  %vm215_vm0 = vcmask (!%p152_p2), 1040384   ;;  %v259_v36 = vlaneseq (!%p152_p2)  ;;  %v257_v43 = vld [vmem:[%s453_s2] sm:$0x3] (!%p152_p2) }
   0x6   : > { %155 = sbr.rel (%p152_p2) target bundleno = 403 (0x193), region = 32  ;;  %p186_p4 = scmp.lt.s32.totalorder (!%p152_p2), %s185_s14, 3 }
   0x7   : > { %v260_v37 = vshrl.u32 (!%p152_p2), %v259_v36, 7  ;;  %p192_p5 = scmp.lt.s32.totalorder (!%p152_p2), %s421_s13, 1 }
   0x9   : > { %v261_v40 = vsub.s32 (!%p152_p2), 0, %v260_v37  ;;  %v265_v41 = vsub.s32 (!%p152_p2), 1, %v260_v37 }
   0xb   : > { %v262_v55 = vrot.slane (!%p152_p2), %v257_v43, %v261_v40  ;;  %v266_v56 = vrot.slane (!%p152_p2), %v257_v43, %v265_v41 }
   0xd   : > { %s181_s15 = scalar_select %p180_p3, %s421_s13, 3 }
   0xe   : > { %s456_s14 = smov (!%p186_p4, %s185_s14), 3  ;;  %s458_s13 = smov (!%p192_p5, %s421_s13), 1 }
   0xf   : > { %s367_s16 = sshll.u32 %s181_s15, 4  ;;  %s368_s20 = sshll.u32 %s456_s14, 4 }
  0x10   : > { %s184_s19 = scalar_lea.vmem %s451_s0, %s367_s16  ;;  %s190_s23 = scalar_lea.vmem %s452_s1, %s368_s20 }
  0x11   : > { %v196_v0 = vld [vmem:[%s184_s19] sm:$0xff]  ;;  %v197_v1 = vld [vmem:[%s184_s19 + $0x8] sm:$0x11]  ;;  %s364_s26 = sshll.u32 %s458_s13, 3 }
  0x12   : > { %v198_v2 = vunpack.c.l.bf16 %v196_v0  ;;  %v199_v3 = vunpack.c.h.bf16 %v196_v0  ;;  %v200_v4 = vunpack.c.l.bf16 %v197_v1  ;;  %v201_v5 = vunpack.c.h.bf16 %v197_v1  ;;  %v202_v6 = vld [vmem:[%s190_s23] sm:$0xff]  ;;  %v203_v7 = vld [vmem:[%s190_s23 + $0x8] sm:$0x11]  ;;  %s195_s29 = scalar_lea.vmem %s454_s3, %s364_s26 }
  0x13   : > { %v204_v8 = vunpack.c.l.bf16 %v202_v6  ;;  %v205_v9 = vunpack.c.h.bf16 %v202_v6  ;;  %v206_v10 = vunpack.c.l.bf16 %v203_v7  ;;  %v207_v11 = vunpack.c.h.bf16 %v203_v7 }
  0x14   : > { %v208_v12 = vmul.f32 %v198_v2, %v198_v2  ;;  %v209_v13 = vmul.f32 %v199_v3, %v199_v3  ;;  %v210_v14 = vmul.f32 %v200_v4, %v200_v4  ;;  %v211_v15 = vmul.f32 %v201_v5, %v201_v5 }
  0x15   : > { %v225_v16 = vmul.f32 %v204_v8, %v204_v8  ;;  %v226_v17 = vmul.f32 %v205_v9, %v205_v9  ;;  %v227_v18 = vmul.f32 %v206_v10, %v206_v10  ;;  %v228_v19 = vmul.f32 %v207_v11, %v207_v11 }
  0x16   : > { %v212_v20 = vadd.f32 %v209_v13, %v208_v12  ;;  %v216_v21 = vsel %vm215_vm0, %v210_v14, 0.0  ;;  %v217_v22 = vsel %vm215_vm0, %v211_v15, 0.0 }
  0x17   : > { %v218_v23 = vadd.f32 %v217_v22, %v216_v21  ;;  %v232_v24 = vsel %vm215_vm0, %v227_v18, 0.0  ;;  %v233_v25 = vsel %vm215_vm0, %v228_v19, 0.0  ;;  %v229_v26 = vadd.f32 %v226_v17, %v225_v16 }
  0x18   : > { %213 = vadd.xlane.f32.xlu0 %v212_v20  ;;  %v234_v27 = vadd.f32 %v233_v25, %v232_v24 }
  0x19   : > { %219 = vadd.xlane.f32.xlu1 %v218_v23 }
  0x1c   : > { %230 = vadd.xlane.f32.xlu0 %v229_v26 }
  0x1d   : > { %235 = vadd.xlane.f32.xlu1 %v234_v27 }
  0xa5   : > { %v214_v28 = vpop.xlane.xlu0 %213 }
  0xa6   : > { %v221_v29 = vadd.f32 1e-20, %v214_v28  ;;  %v220_v30 = vpop.xlane.xlu1 %219 }
  0xa7   : > { %v222_v31 = vadd.f32 1e-20, %v220_v30 }
  0xa8   : > { %379 = vrsqrt.f32 %v221_v29 }
  0xa9   : > { %v231_v32 = vpop.xlane.xlu0 %230  ;;  %381 = vrsqrt.f32 %v222_v31 }
  0xaa   : > { %v237_v33 = vadd.f32 1e-20, %v231_v32  ;;  %v236_v34 = vpop.xlane.xlu1 %235 }
  0xab   : > { %v238_v35 = vadd.f32 1e-20, %v236_v34 }
  0xac   : > { %383 = vrsqrt.f32 %v237_v33 }
  0xad   : > { %385 = vrsqrt.f32 %v238_v35 }
  0xb2   : > { %v380_v38 = vpop.eup %379 }
  0xb3   : > { %v382_v39 = vpop.eup %381  ;;  %v241_v45 = vmul.f32 %v380_v38, %v198_v2  ;;  %v242_v46 = vmul.f32 %v380_v38, %v199_v3 }
  0xb4   : > { %v243_v49 = vmul.f32 %v382_v39, %v200_v4  ;;  %v244_v50 = vmul.f32 %v382_v39, %v201_v5 }
  0xb6   : > { %v384_v42 = vpop.eup %383 }
  0xb7   : > { %v386_v44 = vpop.eup %385  ;;  %v245_v47 = vmul.f32 %v384_v42, %v204_v8  ;;  %v246_v48 = vmul.f32 %v384_v42, %v205_v9 }
  0xb8   : > { %v247_v51 = vmul.f32 %v386_v44, %v206_v10  ;;  %v248_v52 = vmul.f32 %v386_v44, %v207_v11 }
  0xb9   : > { %v249_v53 = vsub.f32 %v241_v45, %v245_v47  ;;  %v250_v54 = vsub.f32 %v242_v46, %v246_v48 }
  0xba   : > { %v251_v57 = vsub.f32 %v243_v49, %v247_v51  ;;  %v252_v58 = vsub.f32 %v244_v50, %v248_v52 }
  0xbb   : > { %v253_v59 = vmul.f32 %v249_v53, %v249_v53  ;;  %v254_v60 = vmul.f32 %v250_v54, %v250_v54 }
  0xbc   : > { %v255_v61 = vmul.f32 %v251_v57, %v251_v57  ;;  %v256_v62 = vmul.f32 %v252_v58, %v252_v58 }
  0xbd   : > { %v269_v63 = vmul.f32 %v262_v55, %v253_v59  ;;  %v270_v0 = vmul.f32 %v266_v56, %v254_v60 }
  0xbe   : > { %v271_v1 = vmul.f32 %v262_v55, %v255_v61  ;;  %v272_v2 = vmul.f32 %v266_v56, %v256_v62 }
  0xbf   : > { %v273_v3 = vadd.f32 %v270_v0, %v269_v63 }
  0xc0   : > { %v274_v4 = vsel %vm215_vm0, %v271_v1, 0.0  ;;  %v276_v6 = vsel %vm215_vm0, %v272_v2, 0.0 }
  0xc1   : > { %v275_v5 = vadd.f32 %v274_v4, %v273_v3 }
  0xc3   : > { %v277_v7 = vadd.f32 %v276_v6, %v275_v5 }
  0xc5   : > { %278 = vadd.xlane.f32.xlu0 %v277_v7 }
 0x152   : > { %v279_v8 = vpop.xlane.xlu0 %278 }
 0x153   : > { %v280_v9 = vrot.slane %v279_v8, 4 }
 0x155   : > { %v281_v10 = vadd.f32 %v280_v9, %v279_v8 }
 0x157   : > { %v282_v11 = vrot.slane %v281_v10, 2 }
 0x159   : > { %v283_v12 = vadd.f32 %v282_v11, %v281_v10 }
 0x15b   : > { %v284_v13 = vrot.slane %v283_v12, 1 }
 0x15d   : > { %v285_v14 = vadd.f32 %v284_v13, %v283_v12 }
 0x15f   : > { %369 = vpush %v285_v14 }
 0x190   : > { %s370_s30 = spop %369 }
 0x191   : > { %v287_v15 = vstv %s370_s30 }
 0x192   : > { %289 = vst [vmem:[%s195_s29] sm:$0xff] %v287_v15 }
 0x193 PF: > { %s13_s12 = sadd.s32 1, %s393_s12  }
 0x194   : > { %p10_p6 = scmp.ge.s32.totalorder %s13_s12, 4  }
 0x196   :  { %12 = sbr.rel (!%p10_p6) target bundleno = 1 (0x1), region = 65 }

// kernel: perceptual_loss.18
= control target key start
LH: loop header
LB: loop body
LE: loop exit
PB: predicated region body
PF: predicated region fallthrough
CT: control target
= control target key end

     0   :  { %s3678_s12 = smov 0   ;;  %s4606_s0 = inlined_call_operand.vmem [shape: bf16[64,2304], index: 0, kind: input, shape index: {}]   ;;  %s4607_s1 = inlined_call_operand.vmem [shape: bf16[2304,256], index: 1, kind: input, shape index: {}]   ;;  %s4608_s2 = inlined_call_operand.vmem [shape: f32[1,256], index: 2, kind: input, shape index: {}]   ;;  %s4609_s3 = inlined_call_operand.vmem [shape: bf16[64,256], index: 3, kind: output, shape index: {}]  }
   0x1 LB: > { %s2706_s13 = sadd.s32 4294967295, %s3656_s12   ;;  %p2710_p0 = scmp.ge.s32.totalorder %s3656_s12, 1  ;;  %s3656_s12 = sphi %s3678_s12, %s13_s12  }
   0x2   : > { %p139_p1 = scmp.lt.s32.totalorder %s3656_s12, 3 }
   0x4   : > { %p140_p2 = pnand %p2710_p0, %p139_p1 }
   0x5   : > { %v3164_v0 = vld [vmem:[%s4607_s1 + $0x4] ss:$8 sps:$4 sm:$0xff] (!%p140_p2)   ;;  %v3168_v2 = vld [vmem:[%s4607_s1] ss:$8 sps:$4 sm:$0xff] (!%p140_p2)   ;;  %v3170_v4 = vld [vmem:[%s4607_s1 + $0x14] ss:$8 sps:$4 sm:$0xff] (!%p140_p2)  }
   0x6   : > { %143 = sbr.rel (%p140_p2) target bundleno = 549 (0x225), region = 32  ;;  %v3166_v1 = vld [vmem:[%s4607_s1 + $0x404] ss:$8 sps:$4 sm:$0xff] (!%p140_p2)   ;;  %2135 = vmatprep.subr.bf16.mxu1 (!%p140_p2), %v3164_v0  ;;  %v3169_v3 = vld [vmem:[%s4607_s1 + $0x400] ss:$8 sps:$4 sm:$0xff] (!%p140_p2)   ;;  %s2711_s24 = sshll.u32 (!%p140_p2), %s2706_s13, 2 }
   0x7   : > { %2347 = vmatprep.subr.bf16.mxu0 (!%p140_p2), %v3166_v1  ;;  %2136 = vmatpush1.bf16.msra.mxu1 (!%p140_p2), %v3168_v2  ;;  %v3172_v5 = vld [vmem:[%s4607_s1 + $0x414] ss:$8 sps:$4 sm:$0xff] (!%p140_p2)   ;;  %v3174_v6 = vld [vmem:[%s4607_s1 + $0x10] ss:$8 sps:$4 sm:$0xff] (!%p140_p2)   ;;  %v3176_v8 = vld [vmem:[%s4607_s1 + $0x24] ss:$8 sps:$4 sm:$0xff] (!%p140_p2)  }
   0x8   : > { %2348 = vmatpush1.bf16.msra.mxu0 (!%p140_p2), %v3169_v3  ;;  %2137 = vmatprep.subr.bf16.mxu1 (!%p140_p2), %v3170_v4  ;;  %v3175_v7 = vld [vmem:[%s4607_s1 + $0x410] ss:$8 sps:$4 sm:$0xff] (!%p140_p2)   ;;  %v3178_v9 = vld [vmem:[%s4607_s1 + $0x424] ss:$8 sps:$4 sm:$0xff] (!%p140_p2)   ;;  %v3180_v10 = vld [vmem:[%s4607_s1 + $0x20] ss:$8 sps:$4 sm:$0xff] (!%p140_p2)  }
   0x9   : > { %2349 = vmatprep.subr.bf16.mxu0 (!%p140_p2), %v3172_v5  ;;  %v3181_v11 = vld [vmem:[%s4607_s1 + $0x420] ss:$8 sps:$4 sm:$0xff] (!%p140_p2)   ;;  %v3182_v12 = vld [vmem:[%s4607_s1 + $0x34] ss:$8 sps:$4 sm:$0xff] (!%p140_p2)   ;;  %v3186_v14 = vld [vmem:[%s4607_s1 + $0x30] ss:$8 sps:$4 sm:$0xff] (!%p140_p2)  }
   0xa   : > { %v3184_v13 = vld [vmem:[%s4607_s1 + $0x434] ss:$8 sps:$4 sm:$0xff] (!%p140_p2)   ;;  %v3187_v15 = vld [vmem:[%s4607_s1 + $0x430] ss:$8 sps:$4 sm:$0xff] (!%p140_p2)   ;;  %v3188_v16 = vld [vmem:[%s4607_s1 + $0x44] ss:$8 sps:$4 sm:$0xff] (!%p140_p2)  }
   0xb   : > { %2138 = vmatpush1.bf16.msra.mxu1 (!%p140_p2), %v3174_v6  ;;  %v3190_v17 = vld [vmem:[%s4607_s1 + $0x444] ss:$8 sps:$4 sm:$0xff] (!%p140_p2)   ;;  %v3192_v18 = vld [vmem:[%s4607_s1 + $0x40] ss:$8 sps:$4 sm:$0xff] (!%p140_p2)   ;;  %v3194_v20 = vld [vmem:[%s4607_s1 + $0x54] ss:$8 sps:$4 sm:$0xff] (!%p140_p2)  }
   0xc   : > { %2350 = vmatpush1.bf16.msra.mxu0 (!%p140_p2), %v3175_v7  ;;  %2139 = vmatprep.subr.bf16.mxu1 (!%p140_p2), %v3176_v8  ;;  %v3193_v19 = vld [vmem:[%s4607_s1 + $0x440] ss:$8 sps:$4 sm:$0xff] (!%p140_p2)   ;;  %v3196_v21 = vld [vmem:[%s4607_s1 + $0x454] ss:$8 sps:$4 sm:$0xff] (!%p140_p2)   ;;  %v3198_v22 = vld [vmem:[%s4607_s1 + $0x50] ss:$8 sps:$4 sm:$0xff] (!%p140_p2)  }
   0xd   : > { %2351 = vmatprep.subr.bf16.mxu0 %v3178_v9  ;;  %v3199_v23 = vld [vmem:[%s4607_s1 + $0x450] ss:$8 sps:$4 sm:$0xff]   ;;  %v3200_v24 = vld [vmem:[%s4607_s1 + $0x64] ss:$8 sps:$4 sm:$0xff]   ;;  %v3204_v26 = vld [vmem:[%s4607_s1 + $0x60] ss:$8 sps:$4 sm:$0xff]  }
   0xe   : > { %v3202_v25 = vld [vmem:[%s4607_s1 + $0x464] ss:$8 sps:$4 sm:$0xff]   ;;  %v3205_v27 = vld [vmem:[%s4607_s1 + $0x460] ss:$8 sps:$4 sm:$0xff]   ;;  %v3206_v28 = vld [vmem:[%s4607_s1 + $0x74] ss:$8 sps:$4 sm:$0xff]  }
   0xf   : > { %2140 = vmatpush1.bf16.msra.mxu1 %v3180_v10  ;;  %v3208_v29 = vld [vmem:[%s4607_s1 + $0x474] ss:$8 sps:$4 sm:$0xff]   ;;  %v3210_v30 = vld [vmem:[%s4607_s1 + $0x70] ss:$8 sps:$4 sm:$0xff]   ;;  %v3212_v32 = vld [vmem:[%s4607_s1 + $0x84] ss:$8 sps:$4 sm:$0xff]  }
  0x10   : > { %2352 = vmatpush1.bf16.msra.mxu0 %v3181_v11  ;;  %2141 = vmatprep.subr.bf16.mxu1 %v3182_v12  ;;  %v3211_v31 = vld [vmem:[%s4607_s1 + $0x470] ss:$8 sps:$4 sm:$0xff]   ;;  %p166_p3 = scmp.lt.s32.totalorder %s2711_s24, 7  ;;  %v3214_v33 = vld [vmem:[%s4607_s1 + $0x484] ss:$8 sps:$4 sm:$0xff]  }
  0x11   : > { %2353 = vmatprep.subr.bf16.mxu0 %v3184_v13  ;;  %v3216_v34 = vld [vmem:[%s4607_s1 + $0x80] ss:$8 sps:$4 sm:$0xff]   ;;  %v3218_v36 = vld [vmem:[%s4607_s1 + $0x94] ss:$8 sps:$4 sm:$0xff]   ;;  %v3222_v38 = vld [vmem:[%s4607_s1 + $0x90] ss:$8 sps:$4 sm:$0xff]  }
  0x12   : > { %v3217_v35 = vld [vmem:[%s4607_s1 + $0x480] ss:$8 sps:$4 sm:$0xff]   ;;  %s4611_s24 = smov (!%p166_p3, %s2711_s24), 7  ;;  %v3220_v37 = vld [vmem:[%s4607_s1 + $0x494] ss:$8 sps:$4 sm:$0xff]  }
  0x13   : > { %2142 = vmatpush1.bf16.msra.mxu1 %v3186_v14  ;;  %v3223_v39 = vld [vmem:[%s4607_s1 + $0x490] ss:$8 sps:$4 sm:$0xff]   ;;  %v3224_v40 = vld [vmem:[%s4607_s1 + $0xa4] ss:$8 sps:$4 sm:$0xff]   ;;  %s3155_s21 = smul.u32 72, %s4611_s24 }
  0x14   : > { %2354 = vmatpush1.bf16.msra.mxu0 %v3187_v15  ;;  %2143 = vmatprep.subr.bf16.mxu1 %v3188_v16  ;;  %v3226_v41 = vld [vmem:[%s4607_s1 + $0x4a4] ss:$8 sps:$4 sm:$0xff]   ;;  %v3228_v42 = vld [vmem:[%s4607_s1 + $0xa0] ss:$8 sps:$4 sm:$0xff]   ;;  %v3230_v44 = vld [vmem:[%s4607_s1 + $0xb4] ss:$8 sps:$4 sm:$0xff]  }
  0x15   : > { %2355 = vmatprep.subr.bf16.mxu0 %v3190_v17  ;;  %v3229_v43 = vld [vmem:[%s4607_s1 + $0x4a0] ss:$8 sps:$4 sm:$0xff]   ;;  %s3829_s13 = scalar_lea.vmem %s4606_s0, %s3155_s21  ;;  %v3232_v45 = vld [vmem:[%s4607_s1 + $0x4b4] ss:$8 sps:$4 sm:$0xff]   ;;  %v3234_v46 = vld [vmem:[%s4607_s1 + $0xb0] ss:$8 sps:$4 sm:$0xff]  }
  0x16   : > { %v3235_v47 = vld [vmem:[%s4607_s1 + $0x4b0] ss:$8 sps:$4 sm:$0xff]   ;;  %v3262_v48 = vld [vmem:[%s3829_s13 + $0x4] ss:$72 sps:$4 sm:$0xff]   ;;  %v3240_v52 = vld [vmem:[%s4607_s1 + $0xc0] ss:$8 sps:$4 sm:$0xff]  }
  0x17   : > { %2144 = vmatpush1.bf16.msra.mxu1 %v3192_v18  ;;  %v3236_v49 = vld [vmem:[%s4607_s1 + $0xc4] ss:$8 sps:$4 sm:$0xff]   ;;  %2167 = vmatprep.mubr.bf16.mxu1 %v3262_v48  ;;  %v3241_v53 = vld [vmem:[%s4607_s1 + $0x4c0] ss:$8 sps:$4 sm:$0xff]   ;;  %v3242_v54 = vld [vmem:[%s4607_s1 + $0xd4] ss:$8 sps:$4 sm:$0xff]  }
  0x18   : > { %2356 = vmatpush1.bf16.msra.mxu0 %v3193_v19  ;;  %2145 = vmatprep.subr.bf16.mxu1 %v3194_v20  ;;  %v3238_v50 = vld [vmem:[%s4607_s1 + $0x4c4] ss:$8 sps:$4 sm:$0xff]   ;;  %v3244_v55 = vld [vmem:[%s4607_s1 + $0x4d4] ss:$8 sps:$4 sm:$0xff]   ;;  %v3246_v56 = vld [vmem:[%s4607_s1 + $0xd0] ss:$8 sps:$4 sm:$0xff]  }
  0x19   : > { %2357 = vmatprep.subr.bf16.mxu0 %v3196_v21  ;;  %v3268_v51 = vld [vmem:[%s3829_s13 + $0x24] ss:$72 sps:$4 sm:$0xff]   ;;  %v3247_v57 = vld [vmem:[%s4607_s1 + $0x4d0] ss:$8 sps:$4 sm:$0xff]   ;;  %v3252_v60 = vld [vmem:[%s4607_s1 + $0xe0] ss:$8 sps:$4 sm:$0xff]  }
  0x1a   : > { %2379 = vmatprep.mubr.bf16.mxu0 %v3268_v51  ;;  %v3248_v58 = vld [vmem:[%s4607_s1 + $0xe4] ss:$8 sps:$4 sm:$0xff]   ;;  %v3253_v61 = vld [vmem:[%s4607_s1 + $0x4e0] ss:$8 sps:$4 sm:$0xff]   ;;  %v3254_v62 = vld [vmem:[%s4607_s1 + $0xf4] ss:$8 sps:$4 sm:$0xff]  }
  0x1b   : > { %2146 = vmatpush1.bf16.msra.mxu1 %v3198_v22  ;;  %v3250_v59 = vld [vmem:[%s4607_s1 + $0x4e4] ss:$8 sps:$4 sm:$0xff]   ;;  %v3256_v63 = vld [vmem:[%s4607_s1 + $0x4f4] ss:$8 sps:$4 sm:$0xff]   ;;  %v3258_v0 = vld [vmem:[%s4607_s1 + $0xf0] ss:$8 sps:$4 sm:$0xff]  }
  0x1c   : > { %2358 = vmatpush1.bf16.msra.mxu0 %v3199_v23  ;;  %2147 = vmatprep.subr.bf16.mxu1 %v3200_v24  ;;  %v3259_v1 = vld [vmem:[%s4607_s1 + $0x4f0] ss:$8 sps:$4 sm:$0xff]   ;;  %v3265_v2 = vld [vmem:[%s4607_s1 + $0x104] ss:$8 sps:$4 sm:$0xff]   ;;  %v3260_v4 = vld [vmem:[%s3829_s13] ss:$72 sps:$4 sm:$0xff]  }
  0x1d   : > { %2359 = vmatprep.subr.bf16.mxu0 %v3202_v25  ;;  %v3271_v3 = vld [vmem:[%s4607_s1 + $0x504] ss:$8 sps:$4 sm:$0xff]   ;;  %v3263_v5 = vld [vmem:[%s4607_s1 + $0x100] ss:$8 sps:$4 sm:$0xff]   ;;  %v3274_v8 = vld [vmem:[%s4607_s1 + $0x114] ss:$8 sps:$4 sm:$0xff]  }
  0x1e   : > { %v3266_v6 = vld [vmem:[%s3829_s13 + $0x20] ss:$72 sps:$4 sm:$0xff]   ;;  %v3277_v9 = vld [vmem:[%s4607_s1 + $0x514] ss:$8 sps:$4 sm:$0xff]   ;;  %v3272_v10 = vld [vmem:[%s4607_s1 + $0x110] ss:$8 sps:$4 sm:$0xff]  }
  0x1f   : > { %2148 = vmatpush1.bf16.msra.mxu1 %v3204_v26  ;;  %v3269_v7 = vld [vmem:[%s4607_s1 + $0x500] ss:$8 sps:$4 sm:$0xff]   ;;  %v3275_v11 = vld [vmem:[%s4607_s1 + $0x510] ss:$8 sps:$4 sm:$0xff]   ;;  %v3280_v12 = vld [vmem:[%s4607_s1 + $0x124] ss:$8 sps:$4 sm:$0xff]  }
  0x20   : > { %2360 = vmatpush1.bf16.msra.mxu0 %v3205_v27  ;;  %2149 = vmatprep.subr.bf16.mxu1 %v3206_v28  ;;  %v3283_v13 = vld [vmem:[%s4607_s1 + $0x524] ss:$8 sps:$4 sm:$0xff]   ;;  %v3278_v14 = vld [vmem:[%s4607_s1 + $0x120] ss:$8 sps:$4 sm:$0xff]   ;;  %v3286_v16 = vld [vmem:[%s4607_s1 + $0x134] ss:$8 sps:$4 sm:$0xff]  }
  0x21   : > { %2361 = vmatprep.subr.bf16.mxu0 %v3208_v29  ;;  %v3281_v15 = vld [vmem:[%s4607_s1 + $0x520] ss:$8 sps:$4 sm:$0xff]   ;;  %v3289_v17 = vld [vmem:[%s4607_s1 + $0x534] ss:$8 sps:$4 sm:$0xff]   ;;  %v3284_v18 = vld [vmem:[%s4607_s1 + $0x130] ss:$8 sps:$4 sm:$0xff]  }
  0x22   : > { %v3287_v19 = vld [vmem:[%s4607_s1 + $0x530] ss:$8 sps:$4 sm:$0xff]   ;;  %v3292_v20 = vld [vmem:[%s4607_s1 + $0x144] ss:$8 sps:$4 sm:$0xff]   ;;  %v3290_v22 = vld [vmem:[%s4607_s1 + $0x140] ss:$8 sps:$4 sm:$0xff]  }
  0x23   : > { %2150 = vmatpush1.bf16.msra.mxu1 %v3210_v30  ;;  %v3295_v21 = vld [vmem:[%s4607_s1 + $0x544] ss:$8 sps:$4 sm:$0xff]   ;;  %v3293_v23 = vld [vmem:[%s4607_s1 + $0x540] ss:$8 sps:$4 sm:$0xff]   ;;  %v3298_v24 = vld [vmem:[%s4607_s1 + $0x154] ss:$8 sps:$4 sm:$0xff]  }
  0x24   : > { %2362 = vmatpush1.bf16.msra.mxu0 %v3211_v31  ;;  %2151 = vmatprep.subr.bf16.mxu1 %v3212_v32  ;;  %v3301_v25 = vld [vmem:[%s4607_s1 + $0x554] ss:$8 sps:$4 sm:$0xff]   ;;  %v3296_v26 = vld [vmem:[%s4607_s1 + $0x150] ss:$8 sps:$4 sm:$0xff]   ;;  %v3304_v29 = vld [vmem:[%s4607_s1 + $0x164] ss:$8 sps:$4 sm:$0xff]  }
  0x25   : > { %2363 = vmatprep.subr.bf16.mxu0 %v3214_v33  ;;  %v3299_v27 = vld [vmem:[%s4607_s1 + $0x550] ss:$8 sps:$4 sm:$0xff]   ;;  %v3350_v28 = vld [vmem:[%s3829_s13 + $0x94] ss:$72 sps:$4 sm:$0xff]   ;;  %v3307_v30 = vld [vmem:[%s4607_s1 + $0x564] ss:$8 sps:$4 sm:$0xff]  }
  0x26   : > { %v3355_v31 = vld [vmem:[%s3829_s13 + $0xb4] ss:$72 sps:$4 sm:$0xff]   ;;  %v3302_v32 = vld [vmem:[%s4607_s1 + $0x160] ss:$8 sps:$4 sm:$0xff]   ;;  %v3320_v48 = vld [vmem:[%s4607_s1 + $0x190] ss:$8 sps:$4 sm:$0xff]  }
  0x27   : > { %2152 = vmatpush1.bf16.msra.mxu1 %v3216_v34  ;;  %v3305_v33 = vld [vmem:[%s4607_s1 + $0x560] ss:$8 sps:$4 sm:$0xff]   ;;  %v3360_v34 = vld [vmem:[%s3829_s13 + $0x90] ss:$72 sps:$4 sm:$0xff]   ;;  %v3331_v51 = vld [vmem:[%s4607_s1 + $0x5a4] ss:$8 sps:$4 sm:$0xff]  }
  0x28   : > { %2364 = vmatpush1.bf16.msra.mxu0 %v3217_v35  ;;  %2153 = vmatprep.subr.bf16.mxu1 %v3218_v36  ;;  %v3361_v35 = vld [vmem:[%s3829_s13 + $0xb0] ss:$72 sps:$4 sm:$0xff]   ;;  %v3310_v36 = vld [vmem:[%s4607_s1 + $0x174] ss:$8 sps:$4 sm:$0xff]  }
  0x29   : > { %2365 = vmatprep.subr.bf16.mxu0 %v3220_v37  ;;  %v3313_v37 = vld [vmem:[%s4607_s1 + $0x574] ss:$8 sps:$4 sm:$0xff]  }
  0x2b   : > { %2154 = vmatpush1.bf16.msra.mxu1 %v3222_v38  ;;  %v3308_v38 = vld [vmem:[%s4607_s1 + $0x170] ss:$8 sps:$4 sm:$0xff]  }
  0x2c   : > { %2366 = vmatpush1.bf16.msra.mxu0 %v3223_v39  ;;  %2155 = vmatprep.subr.bf16.mxu1 %v3224_v40  ;;  %v3311_v39 = vld [vmem:[%s4607_s1 + $0x570] ss:$8 sps:$4 sm:$0xff]   ;;  %v3370_v40 = vld [vmem:[%s3829_s13 + $0xc] ss:$72 sps:$4 sm:$0xff]  }
  0x2d   : > { %2367 = vmatprep.subr.bf16.mxu0 %v3226_v41  ;;  %v3316_v41 = vld [vmem:[%s4607_s1 + $0x184] ss:$8 sps:$4 sm:$0xff]  }
  0x2f   : > { %2156 = vmatpush1.bf16.msra.mxu1 %v3228_v42  ;;  %v3319_v42 = vld [vmem:[%s4607_s1 + $0x584] ss:$8 sps:$4 sm:$0xff]  }
  0x30   : > { %2368 = vmatpush1.bf16.msra.mxu0 %v3229_v43  ;;  %2157 = vmatprep.subr.bf16.mxu1 %v3230_v44  ;;  %v3376_v43 = vld [vmem:[%s3829_s13 + $0x2c] ss:$72 sps:$4 sm:$0xff]   ;;  %v3314_v44 = vld [vmem:[%s4607_s1 + $0x180] ss:$8 sps:$4 sm:$0xff]  }
  0x31   : > { %2369 = vmatprep.subr.bf16.mxu0 %v3232_v45  ;;  %v3317_v45 = vld [vmem:[%s4607_s1 + $0x580] ss:$8 sps:$4 sm:$0xff]  }
  0x33   : > { %2158 = vmatpush1.bf16.msra.mxu1 %v3234_v46  ;;  %v3322_v46 = vld [vmem:[%s4607_s1 + $0x194] ss:$8 sps:$4 sm:$0xff]  }
  0x34   : > { %2370 = vmatpush1.bf16.msra.mxu0 %v3235_v47  ;;  %2159 = vmatprep.subr.bf16.mxu1 %v3236_v49  ;;  %v3325_v47 = vld [vmem:[%s4607_s1 + $0x594] ss:$8 sps:$4 sm:$0xff]   ;;  %v3323_v49 = vld [vmem:[%s4607_s1 + $0x590] ss:$8 sps:$4 sm:$0xff]  }
  0x35   : > { %2371 = vmatprep.subr.bf16.mxu0 %v3238_v50  ;;  %v3328_v50 = vld [vmem:[%s4607_s1 + $0x1a4] ss:$8 sps:$4 sm:$0xff]  }
  0x37   : > { %2160 = vmatpush1.bf16.msra.mxu1 %v3240_v52  ;;  %v3326_v52 = vld [vmem:[%s4607_s1 + $0x1a0] ss:$8 sps:$4 sm:$0xff]  }
  0x38   : > { %2372 = vmatpush1.bf16.msra.mxu0 %v3241_v53  ;;  %2161 = vmatprep.subr.bf16.mxu1 %v3242_v54  ;;  %v3329_v53 = vld [vmem:[%s4607_s1 + $0x5a0] ss:$8 sps:$4 sm:$0xff]   ;;  %v3334_v54 = vld [vmem:[%s4607_s1 + $0x1b4] ss:$8 sps:$4 sm:$0xff]  }
  0x39   : > { %2373 = vmatprep.subr.bf16.mxu0 %v3244_v55  ;;  %v3337_v55 = vld [vmem:[%s4607_s1 + $0x5b4] ss:$8 sps:$4 sm:$0xff]  }
  0x3b   : > { %2162 = vmatpush1.bf16.msra.mxu1 %v3246_v56  ;;  %v3332_v56 = vld [vmem:[%s4607_s1 + $0x1b0] ss:$8 sps:$4 sm:$0xff]  }
  0x3c   : > { %2374 = vmatpush1.bf16.msra.mxu0 %v3247_v57  ;;  %2163 = vmatprep.subr.bf16.mxu1 %v3248_v58  ;;  %v3335_v57 = vld [vmem:[%s4607_s1 + $0x5b0] ss:$8 sps:$4 sm:$0xff]   ;;  %v3340_v58 = vld [vmem:[%s4607_s1 + $0x1c4] ss:$8 sps:$4 sm:$0xff]  }
  0x3d   : > { %2375 = vmatprep.subr.bf16.mxu0 %v3250_v59  ;;  %v3343_v59 = vld [vmem:[%s4607_s1 + $0x5c4] ss:$8 sps:$4 sm:$0xff]  }
  0x3f   : > { %2164 = vmatpush1.bf16.msra.mxu1 %v3252_v60  ;;  %v3338_v60 = vld [vmem:[%s4607_s1 + $0x1c0] ss:$8 sps:$4 sm:$0xff]  }
  0x40   : > { %2376 = vmatpush1.bf16.msra.mxu0 %v3253_v61  ;;  %2165 = vmatprep.subr.bf16.mxu1 %v3254_v62  ;;  %v3341_v61 = vld [vmem:[%s4607_s1 + $0x5c0] ss:$8 sps:$4 sm:$0xff]   ;;  %v3346_v62 = vld [vmem:[%s4607_s1 + $0x1d4] ss:$8 sps:$4 sm:$0xff]  }
  0x41   : > { %2377 = vmatprep.subr.bf16.mxu0 %v3256_v63  ;;  %v3349_v63 = vld [vmem:[%s4607_s1 + $0x5d4] ss:$8 sps:$4 sm:$0xff]  }
  0x43   : > { %2166 = vmatpush1.bf16.msra.mxu1 %v3258_v0  ;;  %v3344_v0 = vld [vmem:[%s4607_s1 + $0x1d0] ss:$8 sps:$4 sm:$0xff]  }
  0x44   : > { %2378 = vmatpush1.bf16.msra.mxu0 %v3259_v1  ;;  %2188 = vmatprep.subr.bf16.mxu1 %v3265_v2  ;;  %v3347_v1 = vld [vmem:[%s4607_s1 + $0x5d0] ss:$8 sps:$4 sm:$0xff]   ;;  %v3354_v2 = vld [vmem:[%s4607_s1 + $0x1e4] ss:$8 sps:$4 sm:$0xff]  }
  0x45   : > { %2400 = vmatprep.subr.bf16.mxu0 %v3271_v3  ;;  %v3359_v3 = vld [vmem:[%s4607_s1 + $0x5e4] ss:$8 sps:$4 sm:$0xff]  }
  0x46   : > { %2168 = vmatmul.mubr.bf16.vlgmr.msra.gmra.mrb[0].mxu1 %v3260_v4  ;;  %v3352_v4 = vld [vmem:[%s4607_s1 + $0x1e0] ss:$8 sps:$4 sm:$0xff]  }
  0x47   : > { %2380 = vmatmul.mubr.bf16.vlgmr.msra.gmra.mrb[0].mxu0 %v3266_v6  ;;  %2189 = vmatpush1.bf16.msra.mxu1 %v3263_v5  ;;  %v3357_v5 = vld [vmem:[%s4607_s1 + $0x5e0] ss:$8 sps:$4 sm:$0xff]   ;;  %v3364_v6 = vld [vmem:[%s4607_s1 + $0x1f4] ss:$8 sps:$4 sm:$0xff]  }
  0x48   : > { %2401 = vmatpush1.bf16.msra.mxu0 %v3269_v7  ;;  %2190 = vmatprep.subr.bf16.mxu1 %v3274_v8  ;;  %v3367_v7 = vld [vmem:[%s4607_s1 + $0x5f4] ss:$8 sps:$4 sm:$0xff]   ;;  %v3362_v8 = vld [vmem:[%s4607_s1 + $0x1f0] ss:$8 sps:$4 sm:$0xff]  }
  0x49   : > { %2402 = vmatprep.subr.bf16.mxu0 %v3277_v9  ;;  %2177 = vmatprep.mubr.bf16.mxu1 %v3350_v28  ;;  %v3365_v9 = vld [vmem:[%s4607_s1 + $0x5f0] ss:$8 sps:$4 sm:$0xff]   ;;  %v3394_v28 = vld [vmem:[%s4607_s1 + $0x234] ss:$8 sps:$4 sm:$0xff]  }
  0x4a   : > { %2389 = vmatprep.mubr.bf16.mxu0 %v3355_v31  ;;  %v3395_v31 = vld [vmem:[%s4607_s1 + $0x630] ss:$8 sps:$4 sm:$0xff]  }
  0x4b   : > { %2191 = vmatpush1.bf16.msra.mxu1 %v3272_v10  ;;  %v3373_v10 = vld [vmem:[%s4607_s1 + $0x204] ss:$8 sps:$4 sm:$0xff]  }
  0x4c   : > { %2403 = vmatpush1.bf16.msra.mxu0 %v3275_v11  ;;  %2192 = vmatprep.subr.bf16.mxu1 %v3280_v12  ;;  %v3379_v11 = vld [vmem:[%s4607_s1 + $0x604] ss:$8 sps:$4 sm:$0xff]   ;;  %v3368_v12 = vld [vmem:[%s3829_s13 + $0x8] ss:$72 sps:$4 sm:$0xff]  }
  0x4d   : > { %2404 = vmatprep.subr.bf16.mxu0 %v3283_v13  ;;  %v3371_v13 = vld [vmem:[%s4607_s1 + $0x200] ss:$8 sps:$4 sm:$0xff]  }
  0x4e   : > { %2178 = vmatmul.mubr.bf16.gmra.mrb[4].mxu1 %v3360_v34  ;;  %v3403_v34 = vld [vmem:[%s4607_s1 + $0x644] ss:$8 sps:$4 sm:$0xff]  }
  0x4f   : > { %2193 = vmatpush1.bf16.msra.mxu1 %v3278_v14  ;;  %2390 = vmatmul.mubr.bf16.gmra.mrb[4].mxu0 %v3361_v35  ;;  %v3374_v14 = vld [vmem:[%s3829_s13 + $0x28] ss:$72 sps:$4 sm:$0xff]   ;;  %v3484_v35 = vld [vmem:[%s3829_s13 + $0x34] ss:$72 sps:$4 sm:$0xff]  }
  0x50   : > { %2405 = vmatpush1.bf16.msra.mxu0 %v3281_v15  ;;  %2194 = vmatprep.subr.bf16.mxu1 %v3286_v16  ;;  %v3377_v15 = vld [vmem:[%s4607_s1 + $0x600] ss:$8 sps:$4 sm:$0xff]   ;;  %v3382_v16 = vld [vmem:[%s4607_s1 + $0x214] ss:$8 sps:$4 sm:$0xff]  }
  0x51   : > { %2406 = vmatprep.subr.bf16.mxu0 %v3289_v17  ;;  %2220 = vmatprep.mubr.bf16.mxu1 %v3370_v40  ;;  %v3385_v17 = vld [vmem:[%s4607_s1 + $0x614] ss:$8 sps:$4 sm:$0xff]   ;;  %v3404_v40 = vld [vmem:[%s4607_s1 + $0x250] ss:$8 sps:$4 sm:$0xff]  }
  0x52   : > { %2432 = vmatprep.mubr.bf16.mxu0 %v3376_v43  ;;  %v3415_v43 = vld [vmem:[%s4607_s1 + $0x664] ss:$8 sps:$4 sm:$0xff]  }
  0x53   : > { %2195 = vmatpush1.bf16.msra.mxu1 %v3284_v18  ;;  %v3380_v18 = vld [vmem:[%s4607_s1 + $0x210] ss:$8 sps:$4 sm:$0xff]  }
  0x54   : > { %2407 = vmatpush1.bf16.msra.mxu0 %v3287_v19  ;;  %2196 = vmatprep.subr.bf16.mxu1 %v3292_v20  ;;  %v3383_v19 = vld [vmem:[%s4607_s1 + $0x610] ss:$8 sps:$4 sm:$0xff]   ;;  %v3458_v20 = vld [vmem:[%s3829_s13 + $0x9c] ss:$72 sps:$4 sm:$0xff]  }
  0x55   : > { %2408 = vmatprep.subr.bf16.mxu0 %v3295_v21  ;;  %v3388_v21 = vld [vmem:[%s4607_s1 + $0x224] ss:$8 sps:$4 sm:$0xff]  }
  0x57   : > { %2197 = vmatpush1.bf16.msra.mxu1 %v3290_v22  ;;  %v3391_v22 = vld [vmem:[%s4607_s1 + $0x624] ss:$8 sps:$4 sm:$0xff]  }
  0x58   : > { %2409 = vmatpush1.bf16.msra.mxu0 %v3293_v23  ;;  %2198 = vmatprep.subr.bf16.mxu1 %v3298_v24  ;;  %v3463_v23 = vld [vmem:[%s3829_s13 + $0xbc] ss:$72 sps:$4 sm:$0xff]   ;;  %v3386_v24 = vld [vmem:[%s4607_s1 + $0x220] ss:$8 sps:$4 sm:$0xff]  }
  0x59   : > { %2410 = vmatprep.subr.bf16.mxu0 %v3301_v25  ;;  %v3389_v25 = vld [vmem:[%s4607_s1 + $0x620] ss:$8 sps:$4 sm:$0xff]  }
  0x5b   : > { %2199 = vmatpush1.bf16.msra.mxu1 %v3296_v26  ;;  %v3468_v26 = vld [vmem:[%s3829_s13 + $0x98] ss:$72 sps:$4 sm:$0xff]  }
  0x5c   : > { %2411 = vmatpush1.bf16.msra.mxu0 %v3299_v27  ;;  %2200 = vmatprep.subr.bf16.mxu1 %v3304_v29  ;;  %v3469_v27 = vld [vmem:[%s3829_s13 + $0xb8] ss:$72 sps:$4 sm:$0xff]   ;;  %v3397_v29 = vld [vmem:[%s4607_s1 + $0x634] ss:$8 sps:$4 sm:$0xff]  }
  0x5d   : > { %2412 = vmatprep.subr.bf16.mxu0 %v3307_v30  ;;  %v3392_v30 = vld [vmem:[%s4607_s1 + $0x230] ss:$8 sps:$4 sm:$0xff]  }
  0x5f   : > { %2201 = vmatpush1.bf16.msra.mxu1 %v3302_v32  ;;  %v3478_v32 = vld [vmem:[%s3829_s13 + $0x14] ss:$72 sps:$4 sm:$0xff]  }
  0x60   : > { %2413 = vmatpush1.bf16.msra.mxu0 %v3305_v33  ;;  %2202 = vmatprep.subr.bf16.mxu1 %v3310_v36  ;;  %v3400_v33 = vld [vmem:[%s4607_s1 + $0x244] ss:$8 sps:$4 sm:$0xff]   ;;  %v3398_v36 = vld [vmem:[%s4607_s1 + $0x240] ss:$8 sps:$4 sm:$0xff]  }
  0x61   : > { %2414 = vmatprep.subr.bf16.mxu0 %v3313_v37  ;;  %v3401_v37 = vld [vmem:[%s4607_s1 + $0x640] ss:$8 sps:$4 sm:$0xff]  }
  0x63   : > { %2203 = vmatpush1.bf16.msra.mxu1 %v3308_v38  ;;  %v3406_v38 = vld [vmem:[%s4607_s1 + $0x254] ss:$8 sps:$4 sm:$0xff]  }
  0x64   : > { %2415 = vmatpush1.bf16.msra.mxu0 %v3311_v39  ;;  %2204 = vmatprep.subr.bf16.mxu1 %v3316_v41  ;;  %v3409_v39 = vld [vmem:[%s4607_s1 + $0x654] ss:$8 sps:$4 sm:$0xff]   ;;  %v3407_v41 = vld [vmem:[%s4607_s1 + $0x650] ss:$8 sps:$4 sm:$0xff]  }
  0x65   : > { %2416 = vmatprep.subr.bf16.mxu0 %v3319_v42  ;;  %v3412_v42 = vld [vmem:[%s4607_s1 + $0x264] ss:$8 sps:$4 sm:$0xff]  }
  0x67   : > { %2205 = vmatpush1.bf16.msra.mxu1 %v3314_v44  ;;  %v3410_v44 = vld [vmem:[%s4607_s1 + $0x260] ss:$8 sps:$4 sm:$0xff]  }
  0x68   : > { %2417 = vmatpush1.bf16.msra.mxu0 %v3317_v45  ;;  %2206 = vmatprep.subr.bf16.mxu1 %v3322_v46  ;;  %v3413_v45 = vld [vmem:[%s4607_s1 + $0x660] ss:$8 sps:$4 sm:$0xff]   ;;  %v3418_v46 = vld [vmem:[%s4607_s1 + $0x274] ss:$8 sps:$4 sm:$0xff]  }
  0x69   : > { %2418 = vmatprep.subr.bf16.mxu0 %v3325_v47  ;;  %v3421_v47 = vld [vmem:[%s4607_s1 + $0x674] ss:$8 sps:$4 sm:$0xff]  }
  0x6b   : > { %2207 = vmatpush1.bf16.msra.mxu1 %v3320_v48  ;;  %v3416_v48 = vld [vmem:[%s4607_s1 + $0x270] ss:$8 sps:$4 sm:$0xff]  }
  0x6c   : > { %2419 = vmatpush1.bf16.msra.mxu0 %v3323_v49  ;;  %2208 = vmatprep.subr.bf16.mxu1 %v3328_v50  ;;  %v3419_v49 = vld [vmem:[%s4607_s1 + $0x670] ss:$8 sps:$4 sm:$0xff]   ;;  %v3424_v50 = vld [vmem:[%s4607_s1 + $0x284] ss:$8 sps:$4 sm:$0xff]  }
  0x6d   : > { %2420 = vmatprep.subr.bf16.mxu0 %v3331_v51  ;;  %v3427_v51 = vld [vmem:[%s4607_s1 + $0x684] ss:$8 sps:$4 sm:$0xff]  }
  0x6f   : > { %2209 = vmatpush1.bf16.msra.mxu1 %v3326_v52  ;;  %v3422_v52 = vld [vmem:[%s4607_s1 + $0x280] ss:$8 sps:$4 sm:$0xff]  }
  0x70   : > { %2421 = vmatpush1.bf16.msra.mxu0 %v3329_v53  ;;  %2210 = vmatprep.subr.bf16.mxu1 %v3334_v54  ;;  %v3425_v53 = vld [vmem:[%s4607_s1 + $0x680] ss:$8 sps:$4 sm:$0xff]   ;;  %v3430_v54 = vld [vmem:[%s4607_s1 + $0x294] ss:$8 sps:$4 sm:$0xff]  }
  0x71   : > { %2422 = vmatprep.subr.bf16.mxu0 %v3337_v55  ;;  %v3433_v55 = vld [vmem:[%s4607_s1 + $0x694] ss:$8 sps:$4 sm:$0xff]  }
  0x73   : > { %2211 = vmatpush1.bf16.msra.mxu1 %v3332_v56  ;;  %v3428_v56 = vld [vmem:[%s4607_s1 + $0x290] ss:$8 sps:$4 sm:$0xff]  }
  0x74   : > { %2423 = vmatpush1.bf16.msra.mxu0 %v3335_v57  ;;  %2212 = vmatprep.subr.bf16.mxu1 %v3340_v58  ;;  %v3431_v57 = vld [vmem:[%s4607_s1 + $0x690] ss:$8 sps:$4 sm:$0xff]   ;;  %v3436_v58 = vld [vmem:[%s4607_s1 + $0x2a4] ss:$8 sps:$4 sm:$0xff]  }
  0x75   : > { %2424 = vmatprep.subr.bf16.mxu0 %v3343_v59  ;;  %v3439_v59 = vld [vmem:[%s4607_s1 + $0x6a4] ss:$8 sps:$4 sm:$0xff]  }
  0x77   : > { %2213 = vmatpush1.bf16.msra.mxu1 %v3338_v60  ;;  %v3434_v60 = vld [vmem:[%s4607_s1 + $0x2a0] ss:$8 sps:$4 sm:$0xff]  }
  0x78   : > { %2425 = vmatpush1.bf16.msra.mxu0 %v3341_v61  ;;  %2214 = vmatprep.subr.bf16.mxu1 %v3346_v62  ;;  %v3437_v61 = vld [vmem:[%s4607_s1 + $0x6a0] ss:$8 sps:$4 sm:$0xff]   ;;  %v3442_v62 = vld [vmem:[%s4607_s1 + $0x2b4] ss:$8 sps:$4 sm:$0xff]  }
  0x79   : > { %2426 = vmatprep.subr.bf16.mxu0 %v3349_v63  ;;  %v3445_v63 = vld [vmem:[%s4607_s1 + $0x6b4] ss:$8 sps:$4 sm:$0xff]  }
  0x7b   : > { %2215 = vmatpush1.bf16.msra.mxu1 %v3344_v0  ;;  %v3440_v0 = vld [vmem:[%s4607_s1 + $0x2b0] ss:$8 sps:$4 sm:$0xff]  }
  0x7c   : > { %2427 = vmatpush1.bf16.msra.mxu0 %v3347_v1  ;;  %2216 = vmatprep.subr.bf16.mxu1 %v3354_v2  ;;  %v3443_v1 = vld [vmem:[%s4607_s1 + $0x6b0] ss:$8 sps:$4 sm:$0xff]   ;;  %v3448_v2 = vld [vmem:[%s4607_s1 + $0x2c4] ss:$8 sps:$4 sm:$0xff]  }
  0x7d   : > { %2428 = vmatprep.subr.bf16.mxu0 %v3359_v3  ;;  %v3451_v3 = vld [vmem:[%s4607_s1 + $0x6c4] ss:$8 sps:$4 sm:$0xff]  }
  0x7f   : > { %2217 = vmatpush1.bf16.msra.mxu1 %v3352_v4  ;;  %v3446_v4 = vld [vmem:[%s4607_s1 + $0x2c0] ss:$8 sps:$4 sm:$0xff]  }
  0x80   : > { %2429 = vmatpush1.bf16.msra.mxu0 %v3357_v5  ;;  %2218 = vmatprep.subr.bf16.mxu1 %v3364_v6  ;;  %v3449_v5 = vld [vmem:[%s4607_s1 + $0x6c0] ss:$8 sps:$4 sm:$0xff]   ;;  %v3454_v6 = vld [vmem:[%s4607_s1 + $0x2d4] ss:$8 sps:$4 sm:$0xff]  }
  0x81   : > { %2430 = vmatprep.subr.bf16.mxu0 %v3367_v7  ;;  %v3457_v7 = vld [vmem:[%s4607_s1 + $0x6d4] ss:$8 sps:$4 sm:$0xff]  }
  0x83   : > { %2219 = vmatpush1.bf16.msra.mxu1 %v3362_v8  ;;  %v3452_v8 = vld [vmem:[%s4607_s1 + $0x2d0] ss:$8 sps:$4 sm:$0xff]  }
  0x84   : > { %2431 = vmatpush1.bf16.msra.mxu0 %v3365_v9  ;;  %2241 = vmatprep.subr.bf16.mxu1 %v3373_v10  ;;  %v3455_v9 = vld [vmem:[%s4607_s1 + $0x6d0] ss:$8 sps:$4 sm:$0xff]   ;;  %v3462_v10 = vld [vmem:[%s4607_s1 + $0x2e4] ss:$8 sps:$4 sm:$0xff]  }
  0x85   : > { %2453 = vmatprep.subr.bf16.mxu0 %v3379_v11  ;;  %v3467_v11 = vld [vmem:[%s4607_s1 + $0x6e4] ss:$8 sps:$4 sm:$0xff]  }
  0x86   : > { %2221 = vmatmul.mubr.bf16.vlgmr.msra.gmra.mrb[0].mxu1 %v3368_v12  ;;  %v3460_v12 = vld [vmem:[%s4607_s1 + $0x2e0] ss:$8 sps:$4 sm:$0xff]  }
  0x87   : > { %2433 = vmatmul.mubr.bf16.vlgmr.msra.gmra.mrb[0].mxu0 %v3374_v14  ;;  %2242 = vmatpush1.bf16.msra.mxu1 %v3371_v13  ;;  %v3465_v13 = vld [vmem:[%s4607_s1 + $0x6e0] ss:$8 sps:$4 sm:$0xff]   ;;  %v3472_v14 = vld [vmem:[%s4607_s1 + $0x2f4] ss:$8 sps:$4 sm:$0xff]  }
  0x88   : > { %2454 = vmatpush1.bf16.msra.mxu0 %v3377_v15  ;;  %2243 = vmatprep.subr.bf16.mxu1 %v3382_v16  ;;  %v3475_v15 = vld [vmem:[%s4607_s1 + $0x6f4] ss:$8 sps:$4 sm:$0xff]   ;;  %v3470_v16 = vld [vmem:[%s4607_s1 + $0x2f0] ss:$8 sps:$4 sm:$0xff]  }
  0x89   : > { %2455 = vmatprep.subr.bf16.mxu0 %v3385_v17  ;;  %2230 = vmatprep.mubr.bf16.mxu1 %v3458_v20  ;;  %v3473_v17 = vld [vmem:[%s4607_s1 + $0x6f0] ss:$8 sps:$4 sm:$0xff]  }
  0x8a   : > { %2442 = vmatprep.mubr.bf16.mxu0 %v3463_v23  ;;  %v3476_v20 = vld [vmem:[%s3829_s13 + $0x10] ss:$72 sps:$4 sm:$0xff]   ;;  %v3485_v23 = vld [vmem:[%s4607_s1 + $0x700] ss:$8 sps:$4 sm:$0xff]  }
  0x8b   : > { %2244 = vmatpush1.bf16.msra.mxu1 %v3380_v18  ;;  %v3481_v18 = vld [vmem:[%s4607_s1 + $0x304] ss:$8 sps:$4 sm:$0xff]  }
  0x8c   : > { %2456 = vmatpush1.bf16.msra.mxu0 %v3383_v19  ;;  %2245 = vmatprep.subr.bf16.mxu1 %v3388_v21  ;;  %v3487_v19 = vld [vmem:[%s4607_s1 + $0x704] ss:$8 sps:$4 sm:$0xff]   ;;  %v3479_v21 = vld [vmem:[%s4607_s1 + $0x300] ss:$8 sps:$4 sm:$0xff]  }
  0x8d   : > { %2457 = vmatprep.subr.bf16.mxu0 %v3391_v22  ;;  %v3482_v22 = vld [vmem:[%s3829_s13 + $0x30] ss:$72 sps:$4 sm:$0xff]  }
  0x8e   : > { %2231 = vmatmul.mubr.bf16.gmra.mrb[4].mxu1 %v3468_v26  ;;  %v3566_v26 = vld [vmem:[%s3829_s13 + $0xa4] ss:$72 sps:$4 sm:$0xff]  }
  0x8f   : > { %2443 = vmatmul.mubr.bf16.gmra.mrb[4].mxu0 %v3469_v27  ;;  %2246 = vmatpush1.bf16.msra.mxu1 %v3386_v24  ;;  %v3490_v24 = vld [vmem:[%s4607_s1 + $0x314] ss:$8 sps:$4 sm:$0xff]   ;;  %v3568_v27 = vld [vmem:[%s3829_s13 + $0xc4] ss:$72 sps:$4 sm:$0xff]  }
  0x90   : > { %2458 = vmatpush1.bf16.msra.mxu0 %v3389_v25  ;;  %2247 = vmatprep.subr.bf16.mxu1 %v3394_v28  ;;  %v3493_v25 = vld [vmem:[%s4607_s1 + $0x714] ss:$8 sps:$4 sm:$0xff]   ;;  %v3488_v28 = vld [vmem:[%s4607_s1 + $0x310] ss:$8 sps:$4 sm:$0xff]  }
  0x91   : > { %2459 = vmatprep.subr.bf16.mxu0 %v3397_v29  ;;  %2273 = vmatprep.mubr.bf16.mxu1 %v3478_v32  ;;  %v3491_v29 = vld [vmem:[%s4607_s1 + $0x710] ss:$8 sps:$4 sm:$0xff]   ;;  %v3494_v32 = vld [vmem:[%s4607_s1 + $0x320] ss:$8 sps:$4 sm:$0xff]  }
  0x92   : > { %2485 = vmatprep.mubr.bf16.mxu0 %v3484_v35  ;;  %v3574_v35 = vld [vmem:[%s3829_s13 + $0xc0] ss:$72 sps:$4 sm:$0xff]  }
  0x93   : > { %2248 = vmatpush1.bf16.msra.mxu1 %v3392_v30  ;;  %v3496_v30 = vld [vmem:[%s4607_s1 + $0x324] ss:$8 sps:$4 sm:$0xff]  }
  0x94   : > { %2460 = vmatpush1.bf16.msra.mxu0 %v3395_v31  ;;  %2249 = vmatprep.subr.bf16.mxu1 %v3400_v33  ;;  %v3499_v31 = vld [vmem:[%s4607_s1 + $0x724] ss:$8 sps:$4 sm:$0xff]   ;;  %v3497_v33 = vld [vmem:[%s4607_s1 + $0x720] ss:$8 sps:$4 sm:$0xff]  }
  0x95   : > { %2461 = vmatprep.subr.bf16.mxu0 %v3403_v34  ;;  %v3570_v34 = vld [vmem:[%s3829_s13 + $0xa0] ss:$72 sps:$4 sm:$0xff]  }
  0x97   : > { %2250 = vmatpush1.bf16.msra.mxu1 %v3398_v36  ;;  %v3502_v36 = vld [vmem:[%s4607_s1 + $0x334] ss:$8 sps:$4 sm:$0xff]  }
  0x98   : > { %2462 = vmatpush1.bf16.msra.mxu0 %v3401_v37  ;;  %2251 = vmatprep.subr.bf16.mxu1 %v3406_v38  ;;  %v3505_v37 = vld [vmem:[%s4607_s1 + $0x734] ss:$8 sps:$4 sm:$0xff]  }
  0x99   : > { %2463 = vmatprep.subr.bf16.mxu0 %v3409_v39  ;;  %v3586_v38 = vld [vmem:[%s3829_s13 + $0x1c] ss:$72 sps:$4 sm:$0xff]  }
  0x9a   : > { %v3589_v39 = vld [vmem:[%s3829_s13 + $0x3c] ss:$72 sps:$4 sm:$0xff]  }
  0x9b   : > { %2252 = vmatpush1.bf16.msra.mxu1 %v3404_v40  ;;  %v3500_v40 = vld [vmem:[%s4607_s1 + $0x330] ss:$8 sps:$4 sm:$0xff]  }
  0x9c   : > { %2464 = vmatpush1.bf16.msra.mxu0 %v3407_v41  ;;  %2253 = vmatprep.subr.bf16.mxu1 %v3412_v42  ;;  %v3503_v41 = vld [vmem:[%s4607_s1 + $0x730] ss:$8 sps:$4 sm:$0xff]   ;;  %v3508_v42 = vld [vmem:[%s4607_s1 + $0x344] ss:$8 sps:$4 sm:$0xff]  }
  0x9d   : > { %2465 = vmatprep.subr.bf16.mxu0 %v3415_v43  ;;  %v3511_v43 = vld [vmem:[%s4607_s1 + $0x744] ss:$8 sps:$4 sm:$0xff]  }
  0x9f   : > { %2254 = vmatpush1.bf16.msra.mxu1 %v3410_v44  ;;  %v3506_v44 = vld [vmem:[%s4607_s1 + $0x340] ss:$8 sps:$4 sm:$0xff]  }
  0xa0   : > { %2466 = vmatpush1.bf16.msra.mxu0 %v3413_v45  ;;  %2255 = vmatprep.subr.bf16.mxu1 %v3418_v46  ;;  %v3509_v45 = vld [vmem:[%s4607_s1 + $0x740] ss:$8 sps:$4 sm:$0xff]   ;;  %v3514_v46 = vld [vmem:[%s4607_s1 + $0x354] ss:$8 sps:$4 sm:$0xff]  }
  0xa1   : > { %2467 = vmatprep.subr.bf16.mxu0 %v3421_v47  ;;  %v3517_v47 = vld [vmem:[%s4607_s1 + $0x754] ss:$8 sps:$4 sm:$0xff]  }
  0xa3   : > { %2256 = vmatpush1.bf16.msra.mxu1 %v3416_v48  ;;  %v3512_v48 = vld [vmem:[%s4607_s1 + $0x350] ss:$8 sps:$4 sm:$0xff]  }
  0xa4   : > { %2468 = vmatpush1.bf16.msra.mxu0 %v3419_v49  ;;  %2257 = vmatprep.subr.bf16.mxu1 %v3424_v50  ;;  %v3515_v49 = vld [vmem:[%s4607_s1 + $0x750] ss:$8 sps:$4 sm:$0xff]   ;;  %v3520_v50 = vld [vmem:[%s4607_s1 + $0x364] ss:$8 sps:$4 sm:$0xff]  }
  0xa5   : > { %2469 = vmatprep.subr.bf16.mxu0 %v3427_v51  ;;  %v3523_v51 = vld [vmem:[%s4607_s1 + $0x764] ss:$8 sps:$4 sm:$0xff]  }
  0xa7   : > { %2258 = vmatpush1.bf16.msra.mxu1 %v3422_v52  ;;  %v3518_v52 = vld [vmem:[%s4607_s1 + $0x360] ss:$8 sps:$4 sm:$0xff]  }
  0xa8   : > { %2470 = vmatpush1.bf16.msra.mxu0 %v3425_v53  ;;  %2259 = vmatprep.subr.bf16.mxu1 %v3430_v54  ;;  %v3521_v53 = vld [vmem:[%s4607_s1 + $0x760] ss:$8 sps:$4 sm:$0xff]   ;;  %v3526_v54 = vld [vmem:[%s4607_s1 + $0x374] ss:$8 sps:$4 sm:$0xff]  }
  0xa9   : > { %2471 = vmatprep.subr.bf16.mxu0 %v3433_v55  ;;  %v3529_v55 = vld [vmem:[%s4607_s1 + $0x774] ss:$8 sps:$4 sm:$0xff]  }
  0xab   : > { %2260 = vmatpush1.bf16.msra.mxu1 %v3428_v56  ;;  %v3524_v56 = vld [vmem:[%s4607_s1 + $0x370] ss:$8 sps:$4 sm:$0xff]  }
  0xac   : > { %2472 = vmatpush1.bf16.msra.mxu0 %v3431_v57  ;;  %2261 = vmatprep.subr.bf16.mxu1 %v3436_v58  ;;  %v3527_v57 = vld [vmem:[%s4607_s1 + $0x770] ss:$8 sps:$4 sm:$0xff]   ;;  %v3532_v58 = vld [vmem:[%s4607_s1 + $0x384] ss:$8 sps:$4 sm:$0xff]  }
  0xad   : > { %2473 = vmatprep.subr.bf16.mxu0 %v3439_v59  ;;  %v3535_v59 = vld [vmem:[%s4607_s1 + $0x784] ss:$8 sps:$4 sm:$0xff]  }
  0xaf   : > { %2262 = vmatpush1.bf16.msra.mxu1 %v3434_v60  ;;  %v3530_v60 = vld [vmem:[%s4607_s1 + $0x380] ss:$8 sps:$4 sm:$0xff]  }
  0xb0   : > { %2474 = vmatpush1.bf16.msra.mxu0 %v3437_v61  ;;  %2263 = vmatprep.subr.bf16.mxu1 %v3442_v62  ;;  %v3533_v61 = vld [vmem:[%s4607_s1 + $0x780] ss:$8 sps:$4 sm:$0xff]   ;;  %v3538_v62 = vld [vmem:[%s4607_s1 + $0x394] ss:$8 sps:$4 sm:$0xff]  }
  0xb1   : > { %2475 = vmatprep.subr.bf16.mxu0 %v3445_v63  ;;  %v3541_v63 = vld [vmem:[%s4607_s1 + $0x794] ss:$8 sps:$4 sm:$0xff]  }
  0xb3   : > { %2264 = vmatpush1.bf16.msra.mxu1 %v3440_v0  ;;  %v3536_v0 = vld [vmem:[%s4607_s1 + $0x390] ss:$8 sps:$4 sm:$0xff]  }
  0xb4   : > { %2476 = vmatpush1.bf16.msra.mxu0 %v3443_v1  ;;  %2265 = vmatprep.subr.bf16.mxu1 %v3448_v2  ;;  %v3539_v1 = vld [vmem:[%s4607_s1 + $0x790] ss:$8 sps:$4 sm:$0xff]   ;;  %v3544_v2 = vld [vmem:[%s4607_s1 + $0x3a4] ss:$8 sps:$4 sm:$0xff]  }
  0xb5   : > { %2477 = vmatprep.subr.bf16.mxu0 %v3451_v3  ;;  %v3547_v3 = vld [vmem:[%s4607_s1 + $0x7a4] ss:$8 sps:$4 sm:$0xff]  }
  0xb7   : > { %2266 = vmatpush1.bf16.msra.mxu1 %v3446_v4  ;;  %v3542_v4 = vld [vmem:[%s4607_s1 + $0x3a0] ss:$8 sps:$4 sm:$0xff]  }
  0xb8   : > { %2478 = vmatpush1.bf16.msra.mxu0 %v3449_v5  ;;  %2267 = vmatprep.subr.bf16.mxu1 %v3454_v6  ;;  %v3545_v5 = vld [vmem:[%s4607_s1 + $0x7a0] ss:$8 sps:$4 sm:$0xff]   ;;  %v3550_v6 = vld [vmem:[%s4607_s1 + $0x3b4] ss:$8 sps:$4 sm:$0xff]  }
  0xb9   : > { %2479 = vmatprep.subr.bf16.mxu0 %v3457_v7  ;;  %v3553_v7 = vld [vmem:[%s4607_s1 + $0x7b4] ss:$8 sps:$4 sm:$0xff]  }
  0xbb   : > { %2268 = vmatpush1.bf16.msra.mxu1 %v3452_v8  ;;  %v3548_v8 = vld [vmem:[%s4607_s1 + $0x3b0] ss:$8 sps:$4 sm:$0xff]  }
  0xbc   : > { %2480 = vmatpush1.bf16.msra.mxu0 %v3455_v9  ;;  %2269 = vmatprep.subr.bf16.mxu1 %v3462_v10  ;;  %v3551_v9 = vld [vmem:[%s4607_s1 + $0x7b0] ss:$8 sps:$4 sm:$0xff]   ;;  %v3556_v10 = vld [vmem:[%s4607_s1 + $0x3c4] ss:$8 sps:$4 sm:$0xff]  }
  0xbd   : > { %2481 = vmatprep.subr.bf16.mxu0 %v3467_v11  ;;  %v3559_v11 = vld [vmem:[%s4607_s1 + $0x7c4] ss:$8 sps:$4 sm:$0xff]  }
  0xbf   : > { %2270 = vmatpush1.bf16.msra.mxu1 %v3460_v12  ;;  %v3554_v12 = vld [vmem:[%s4607_s1 + $0x3c0] ss:$8 sps:$4 sm:$0xff]  }
  0xc0   : > { %2482 = vmatpush1.bf16.msra.mxu0 %v3465_v13  ;;  %2271 = vmatprep.subr.bf16.mxu1 %v3472_v14  ;;  %v3557_v13 = vld [vmem:[%s4607_s1 + $0x7c0] ss:$8 sps:$4 sm:$0xff]   ;;  %v3562_v14 = vld [vmem:[%s4607_s1 + $0x3d4] ss:$8 sps:$4 sm:$0xff]  }
  0xc1   : > { %2483 = vmatprep.subr.bf16.mxu0 %v3475_v15  ;;  %v3565_v15 = vld [vmem:[%s4607_s1 + $0x7d4] ss:$8 sps:$4 sm:$0xff]  }
  0xc3   : > { %2272 = vmatpush1.bf16.msra.mxu1 %v3470_v16  ;;  %v3560_v16 = vld [vmem:[%s4607_s1 + $0x3d0] ss:$8 sps:$4 sm:$0xff]  }
  0xc4   : > { %2484 = vmatpush1.bf16.msra.mxu0 %v3473_v17  ;;  %2294 = vmatprep.subr.bf16.mxu1 %v3481_v18  ;;  %v3563_v17 = vld [vmem:[%s4607_s1 + $0x7d0] ss:$8 sps:$4 sm:$0xff]   ;;  %v3573_v18 = vld [vmem:[%s4607_s1 + $0x3e4] ss:$8 sps:$4 sm:$0xff]  }
  0xc5   : > { %2506 = vmatprep.subr.bf16.mxu0 %v3487_v19  ;;  %v3577_v19 = vld [vmem:[%s4607_s1 + $0x7e4] ss:$8 sps:$4 sm:$0xff]  }
  0xc6   : > { %2274 = vmatmul.mubr.bf16.vlgmr.msra.gmra.mrb[0].mxu1 %v3476_v20  ;;  %v3571_v20 = vld [vmem:[%s4607_s1 + $0x3e0] ss:$8 sps:$4 sm:$0xff]  }
  0xc7   : > { %2486 = vmatmul.mubr.bf16.vlgmr.msra.gmra.mrb[0].mxu0 %v3482_v22  ;;  %2295 = vmatpush1.bf16.msra.mxu1 %v3479_v21  ;;  %v3575_v21 = vld [vmem:[%s4607_s1 + $0x7e0] ss:$8 sps:$4 sm:$0xff]   ;;  %v3580_v22 = vld [vmem:[%s4607_s1 + $0x3f4] ss:$8 sps:$4 sm:$0xff]  }
  0xc8   : > { %2507 = vmatpush1.bf16.msra.mxu0 %v3485_v23  ;;  %2296 = vmatprep.subr.bf16.mxu1 %v3490_v24  ;;  %v3583_v23 = vld [vmem:[%s4607_s1 + $0x7f4] ss:$8 sps:$4 sm:$0xff]   ;;  %v3578_v24 = vld [vmem:[%s4607_s1 + $0x3f0] ss:$8 sps:$4 sm:$0xff]  }
  0xc9   : > { %2508 = vmatprep.subr.bf16.mxu0 %v3493_v25  ;;  %2283 = vmatprep.mubr.bf16.mxu1 %v3566_v26  ;;  %v3581_v25 = vld [vmem:[%s4607_s1 + $0x7f0] ss:$8 sps:$4 sm:$0xff]   ;;  %v3592_v26 = vld [vmem:[%s4607_s1 + $0x804] ss:$8 sps:$4 sm:$0xff]  }
  0xca   : > { %2495 = vmatprep.mubr.bf16.mxu0 %v3568_v27  ;;  %v3584_v27 = vld [vmem:[%s3829_s13 + $0x18] ss:$72 sps:$4 sm:$0xff]  }
  0xcb   : > { %2297 = vmatpush1.bf16.msra.mxu1 %v3488_v28  ;;  %v3587_v28 = vld [vmem:[%s3829_s13 + $0x38] ss:$72 sps:$4 sm:$0xff]  }
  0xcc   : > { %2509 = vmatpush1.bf16.msra.mxu0 %v3491_v29  ;;  %2298 = vmatprep.subr.bf16.mxu1 %v3496_v30  ;;  %v3590_v29 = vld [vmem:[%s4607_s1 + $0x800] ss:$8 sps:$4 sm:$0xff]   ;;  %v3595_v30 = vld [vmem:[%s4607_s1 + $0x814] ss:$8 sps:$4 sm:$0xff]  }
  0xcd   : > { %2510 = vmatprep.subr.bf16.mxu0 %v3499_v31  ;;  %v3596_v31 = vld [vmem:[%s3829_s13 + $0xac] ss:$72 sps:$4 sm:$0xff]  }
  0xce   : > { %2284 = vmatmul.mubr.bf16.gmra.mrb[4].mxu1 %v3570_v34  ;;  %v3604_v34 = vld [vmem:[%s4607_s1 + $0x824] ss:$8 sps:$4 sm:$0xff]  }
  0xcf   : > { %2496 = vmatmul.mubr.bf16.gmra.mrb[4].mxu0 %v3574_v35  ;;  %2299 = vmatpush1.bf16.msra.mxu1 %v3494_v32  ;;  %v3598_v32 = vld [vmem:[%s3829_s13 + $0xcc] ss:$72 sps:$4 sm:$0xff]   ;;  %v3600_v35 = vld [vmem:[%s3829_s13 + $0xa8] ss:$72 sps:$4 sm:$0xff]  }
  0xd0   : > { %2511 = vmatpush1.bf16.msra.mxu0 %v3497_v33  ;;  %2300 = vmatprep.subr.bf16.mxu1 %v3502_v36  ;;  %v3593_v33 = vld [vmem:[%s4607_s1 + $0x810] ss:$8 sps:$4 sm:$0xff]  }
  0xd1   : > { %2512 = vmatprep.subr.bf16.mxu0 %v3505_v37  ;;  %2326 = vmatprep.mubr.bf16.mxu1 %v3586_v38  ;;  %v3601_v36 = vld [vmem:[%s3829_s13 + $0xc8] ss:$72 sps:$4 sm:$0xff]   ;;  %v3607_v38 = vld [vmem:[%s4607_s1 + $0x834] ss:$8 sps:$4 sm:$0xff]  }
  0xd2   : > { %2538 = vmatprep.mubr.bf16.mxu0 %v3589_v39  ;;  %v3602_v37 = vld [vmem:[%s4607_s1 + $0x820] ss:$8 sps:$4 sm:$0xff]   ;;  %v3646_v39 = vld [vmem:[%s3829_s13 + $0x44] ss:$72 sps:$4 sm:$0xff]  }
  0xd3   : > { %2301 = vmatpush1.bf16.msra.mxu1 %v3500_v40  ;;  %v3649_v40 = vld [vmem:[%s3829_s13 + $0xd4] ss:$72 sps:$4 sm:$0xff]  }
  0xd4   : > { %2513 = vmatpush1.bf16.msra.mxu0 %v3503_v41  ;;  %2302 = vmatprep.subr.bf16.mxu1 %v3508_v42  ;;  %v3605_v41 = vld [vmem:[%s4607_s1 + $0x830] ss:$8 sps:$4 sm:$0xff]   ;;  %v3610_v42 = vld [vmem:[%s4607_s1 + $0x844] ss:$8 sps:$4 sm:$0xff]  }
  0xd5   : > { %2514 = vmatprep.subr.bf16.mxu0 %v3511_v43  ;;  %v3608_v43 = vld [vmem:[%s4607_s1 + $0x840] ss:$8 sps:$4 sm:$0xff]  }
  0xd7   : > { %2303 = vmatpush1.bf16.msra.mxu1 %v3506_v44  ;;  %v3613_v44 = vld [vmem:[%s4607_s1 + $0x854] ss:$8 sps:$4 sm:$0xff]  }
  0xd8   : > { %2515 = vmatpush1.bf16.msra.mxu0 %v3509_v45  ;;  %2304 = vmatprep.subr.bf16.mxu1 %v3514_v46  ;;  %v3611_v45 = vld [vmem:[%s4607_s1 + $0x850] ss:$8 sps:$4 sm:$0xff]   ;;  %v3616_v46 = vld [vmem:[%s4607_s1 + $0x864] ss:$8 sps:$4 sm:$0xff]  }
  0xd9   : > { %2516 = vmatprep.subr.bf16.mxu0 %v3517_v47  ;;  %v3614_v47 = vld [vmem:[%s4607_s1 + $0x860] ss:$8 sps:$4 sm:$0xff]  }
  0xdb   : > { %2305 = vmatpush1.bf16.msra.mxu1 %v3512_v48  ;;  %v3619_v48 = vld [vmem:[%s4607_s1 + $0x874] ss:$8 sps:$4 sm:$0xff]  }
  0xdc   : > { %2517 = vmatpush1.bf16.msra.mxu0 %v3515_v49  ;;  %2306 = vmatprep.subr.bf16.mxu1 %v3520_v50  ;;  %v3617_v49 = vld [vmem:[%s4607_s1 + $0x870] ss:$8 sps:$4 sm:$0xff]   ;;  %v3622_v50 = vld [vmem:[%s4607_s1 + $0x884] ss:$8 sps:$4 sm:$0xff]  }
  0xdd   : > { %2518 = vmatprep.subr.bf16.mxu0 %v3523_v51  ;;  %v3620_v51 = vld [vmem:[%s4607_s1 + $0x880] ss:$8 sps:$4 sm:$0xff]  }
  0xdf   : > { %2307 = vmatpush1.bf16.msra.mxu1 %v3518_v52  ;;  %v3625_v52 = vld [vmem:[%s4607_s1 + $0x894] ss:$8 sps:$4 sm:$0xff]  }
  0xe0   : > { %2519 = vmatpush1.bf16.msra.mxu0 %v3521_v53  ;;  %2308 = vmatprep.subr.bf16.mxu1 %v3526_v54  ;;  %v3623_v53 = vld [vmem:[%s4607_s1 + $0x890] ss:$8 sps:$4 sm:$0xff]   ;;  %v3628_v54 = vld [vmem:[%s4607_s1 + $0x8a4] ss:$8 sps:$4 sm:$0xff]  }
  0xe1   : > { %2520 = vmatprep.subr.bf16.mxu0 %v3529_v55  ;;  %v3626_v55 = vld [vmem:[%s4607_s1 + $0x8a0] ss:$8 sps:$4 sm:$0xff]  }
  0xe3   : > { %2309 = vmatpush1.bf16.msra.mxu1 %v3524_v56  ;;  %v3631_v56 = vld [vmem:[%s4607_s1 + $0x8b4] ss:$8 sps:$4 sm:$0xff]  }
  0xe4   : > { %2521 = vmatpush1.bf16.msra.mxu0 %v3527_v57  ;;  %2310 = vmatprep.subr.bf16.mxu1 %v3532_v58  ;;  %v3629_v57 = vld [vmem:[%s4607_s1 + $0x8b0] ss:$8 sps:$4 sm:$0xff]   ;;  %v3634_v58 = vld [vmem:[%s4607_s1 + $0x8c4] ss:$8 sps:$4 sm:$0xff]  }
  0xe5   : > { %2522 = vmatprep.subr.bf16.mxu0 %v3535_v59  ;;  %v3632_v59 = vld [vmem:[%s4607_s1 + $0x8c0] ss:$8 sps:$4 sm:$0xff]  }
  0xe7   : > { %2311 = vmatpush1.bf16.msra.mxu1 %v3530_v60  ;;  %v3637_v60 = vld [vmem:[%s4607_s1 + $0x8d4] ss:$8 sps:$4 sm:$0xff]  }
  0xe8   : > { %2523 = vmatpush1.bf16.msra.mxu0 %v3533_v61  ;;  %2312 = vmatprep.subr.bf16.mxu1 %v3538_v62  ;;  %v3635_v61 = vld [vmem:[%s4607_s1 + $0x8d0] ss:$8 sps:$4 sm:$0xff]   ;;  %v3640_v62 = vld [vmem:[%s4607_s1 + $0x8e4] ss:$8 sps:$4 sm:$0xff]  }
  0xe9   : > { %2524 = vmatprep.subr.bf16.mxu0 %v3541_v63  ;;  %v3638_v63 = vld [vmem:[%s4607_s1 + $0x8e0] ss:$8 sps:$4 sm:$0xff]  }
  0xeb   : > { %2313 = vmatpush1.bf16.msra.mxu1 %v3536_v0  ;;  %v3643_v0 = vld [vmem:[%s4607_s1 + $0x8f4] ss:$8 sps:$4 sm:$0xff]  }
  0xec   : > { %2525 = vmatpush1.bf16.msra.mxu0 %v3539_v1  ;;  %2314 = vmatprep.subr.bf16.mxu1 %v3544_v2  ;;  %v3641_v1 = vld [vmem:[%s4607_s1 + $0x8f0] ss:$8 sps:$4 sm:$0xff]   ;;  %v3644_v2 = vld [vmem:[%s3829_s13 + $0x40] ss:$72 sps:$4 sm:$0xff]  }
  0xed   : > { %2526 = vmatprep.subr.bf16.mxu0 %v3547_v3  ;;  %v3647_v3 = vld [vmem:[%s3829_s13 + $0xd0] ss:$72 sps:$4 sm:$0xff]   ;;  %s3046_s13 = sshll.u32 %s4611_s24, 3 }
  0xee   : > { %s177_s18 = scalar_lea.vmem %s4609_s3, %s3046_s13 }
  0xef   : > { %2315 = vmatpush1.bf16.msra.mxu1 %v3542_v4  ;;  %v505_v4 = vlaneseq }
  0xf0   : > { %2527 = vmatpush1.bf16.msra.mxu0 %v3545_v5  ;;  %2316 = vmatprep.subr.bf16.mxu1 %v3550_v6 }
  0xf1   : > { %2528 = vmatprep.subr.bf16.mxu0 %v3553_v7  ;;  %v506_v5 = vshrl.u32 %v505_v4, 7 }
  0xf3   : > { %2317 = vmatpush1.bf16.msra.mxu1 %v3548_v8 }
  0xf4   : > { %2529 = vmatpush1.bf16.msra.mxu0 %v3551_v9  ;;  %2318 = vmatprep.subr.bf16.mxu1 %v3556_v10  ;;  %v507_v9 = vsub.s32 0, %v506_v5 }
  0xf5   : > { %2530 = vmatprep.subr.bf16.mxu0 %v3559_v11  ;;  %v503_v11 = vld [vmem:[%s4608_s2] sm:$0x3] }
  0xf7   : > { %2319 = vmatpush1.bf16.msra.mxu1 %v3554_v12  ;;  %v511_v12 = vsub.s32 1, %v506_v5 }
  0xf8   : > { %2531 = vmatpush1.bf16.msra.mxu0 %v3557_v13  ;;  %2320 = vmatprep.subr.bf16.mxu1 %v3562_v14  ;;  %v508_v13 = vrot.slane %v503_v11, %v507_v9 }
  0xf9   : > { %2532 = vmatprep.subr.bf16.mxu0 %v3565_v15  ;;  %v512_v14 = vrot.slane %v503_v11, %v511_v12 }
  0xfb   : > { %2321 = vmatpush1.bf16.msra.mxu1 %v3560_v16 }
  0xfc   : > { %2533 = vmatpush1.bf16.msra.mxu0 %v3563_v17  ;;  %2322 = vmatprep.subr.bf16.mxu1 %v3573_v18 }
  0xfd   : > { %2534 = vmatprep.subr.bf16.mxu0 %v3577_v19 }
  0xff   : > { %2323 = vmatpush1.bf16.msra.mxu1 %v3571_v20 }
 0x100   : > { %2535 = vmatpush1.bf16.msra.mxu0 %v3575_v21  ;;  %2324 = vmatprep.subr.bf16.mxu1 %v3580_v22 }
 0x101   : > { %2536 = vmatprep.subr.bf16.mxu0 %v3583_v23 }
 0x103   : > { %2325 = vmatpush1.bf16.msra.mxu1 %v3578_v24 }
 0x104   : > { %2537 = vmatpush1.bf16.msra.mxu0 %v3581_v25  ;;  %3051 = vmatprep.subr.bf16.mxu1 %v3592_v26 }
 0x105   : > { %2559 = vmatprep.subr.bf16.mxu0 %v3592_v26 }
 0x106   : > { %2327 = vmatmul.mubr.bf16.vlgmr.msra.gmra.mrb[0].mxu1 %v3584_v27 }
 0x107   : > { %2539 = vmatmul.mubr.bf16.vlgmr.msra.gmra.mrb[0].mxu0 %v3587_v28  ;;  %3067 = vmatpush1.bf16.msra.mxu1 %v3590_v29 }
 0x108   : > { %2560 = vmatpush1.bf16.msra.mxu0 %v3590_v29  ;;  %3052 = vmatprep.subr.bf16.mxu1 %v3595_v30 }
 0x109   : > { %2561 = vmatprep.subr.bf16.mxu0 %v3595_v30  ;;  %2336 = vmatprep.mubr.bf16.mxu1 %v3596_v31 }
 0x10a   : > { %2548 = vmatprep.mubr.bf16.mxu0 %v3598_v32 }
 0x10b   : > { %3068 = vmatpush1.bf16.msra.mxu1 %v3593_v33 }
 0x10c   : > { %2562 = vmatpush1.bf16.msra.mxu0 %v3593_v33  ;;  %3053 = vmatprep.subr.bf16.mxu1 %v3604_v34 }
 0x10d   : > { %2563 = vmatprep.subr.bf16.mxu0 %v3604_v34 }
 0x10e   : > { %2337 = vmatmul.mubr.bf16.gmra.mrb[4].mxu1 %v3600_v35 }
 0x10f   : > { %2549 = vmatmul.mubr.bf16.gmra.mrb[4].mxu0 %v3601_v36  ;;  %3069 = vmatpush1.bf16.msra.mxu1 %v3602_v37 }
 0x110   : > { %2564 = vmatpush1.bf16.msra.mxu0 %v3602_v37  ;;  %3054 = vmatprep.subr.bf16.mxu1 %v3607_v38 }
 0x111   : > { %2565 = vmatprep.subr.bf16.mxu0 %v3607_v38  ;;  %2591 = vmatprep.mubr.bf16.mxu0 %v3646_v39 }
 0x112   : > { %2601 = vmatprep.mubr.bf16.mxu1 %v3649_v40 }
 0x113   : > { %3070 = vmatpush1.bf16.msra.mxu1 %v3605_v41 }
 0x114   : > { %2566 = vmatpush1.bf16.msra.mxu0 %v3605_v41  ;;  %3055 = vmatprep.subr.bf16.mxu1 %v3610_v42 }
 0x115   : > { %2567 = vmatprep.subr.bf16.mxu0 %v3610_v42 }
 0x117   : > { %3071 = vmatpush1.bf16.msra.mxu1 %v3608_v43 }
 0x118   : > { %2568 = vmatpush1.bf16.msra.mxu0 %v3608_v43  ;;  %3056 = vmatprep.subr.bf16.mxu1 %v3613_v44 }
 0x119   : > { %2569 = vmatprep.subr.bf16.mxu0 %v3613_v44 }
 0x11b   : > { %3072 = vmatpush1.bf16.msra.mxu1 %v3611_v45 }
 0x11c   : > { %2570 = vmatpush1.bf16.msra.mxu0 %v3611_v45  ;;  %3057 = vmatprep.subr.bf16.mxu1 %v3616_v46 }
 0x11d   : > { %2571 = vmatprep.subr.bf16.mxu0 %v3616_v46 }
 0x11f   : > { %3073 = vmatpush1.bf16.msra.mxu1 %v3614_v47 }
 0x120   : > { %2572 = vmatpush1.bf16.msra.mxu0 %v3614_v47  ;;  %3058 = vmatprep.subr.bf16.mxu1 %v3619_v48 }
 0x121   : > { %2573 = vmatprep.subr.bf16.mxu0 %v3619_v48 }
 0x123   : > { %3074 = vmatpush1.bf16.msra.mxu1 %v3617_v49 }
 0x124   : > { %2574 = vmatpush1.bf16.msra.mxu0 %v3617_v49  ;;  %3059 = vmatprep.subr.bf16.mxu1 %v3622_v50 }
 0x125   : > { %2575 = vmatprep.subr.bf16.mxu0 %v3622_v50 }
 0x127   : > { %3075 = vmatpush1.bf16.msra.mxu1 %v3620_v51 }
 0x128   : > { %2576 = vmatpush1.bf16.msra.mxu0 %v3620_v51  ;;  %3060 = vmatprep.subr.bf16.mxu1 %v3625_v52 }
 0x129   : > { %2577 = vmatprep.subr.bf16.mxu0 %v3625_v52 }
 0x12b   : > { %3076 = vmatpush1.bf16.msra.mxu1 %v3623_v53 }
 0x12c   : > { %2578 = vmatpush1.bf16.msra.mxu0 %v3623_v53  ;;  %3061 = vmatprep.subr.bf16.mxu1 %v3628_v54 }
 0x12d   : > { %2579 = vmatprep.subr.bf16.mxu0 %v3628_v54 }
 0x12f   : > { %3077 = vmatpush1.bf16.msra.mxu1 %v3626_v55 }
 0x130   : > { %2580 = vmatpush1.bf16.msra.mxu0 %v3626_v55  ;;  %3062 = vmatprep.subr.bf16.mxu1 %v3631_v56 }
 0x131   : > { %2581 = vmatprep.subr.bf16.mxu0 %v3631_v56 }
 0x133   : > { %3078 = vmatpush1.bf16.msra.mxu1 %v3629_v57 }
 0x134   : > { %2582 = vmatpush1.bf16.msra.mxu0 %v3629_v57  ;;  %3063 = vmatprep.subr.bf16.mxu1 %v3634_v58 }
 0x135   : > { %2583 = vmatprep.subr.bf16.mxu0 %v3634_v58 }
 0x137   : > { %3079 = vmatpush1.bf16.msra.mxu1 %v3632_v59 }
 0x138   : > { %2584 = vmatpush1.bf16.msra.mxu0 %v3632_v59  ;;  %3064 = vmatprep.subr.bf16.mxu1 %v3637_v60 }
 0x139   : > { %2585 = vmatprep.subr.bf16.mxu0 %v3637_v60 }
 0x13b   : > { %3080 = vmatpush1.bf16.msra.mxu1 %v3635_v61 }
 0x13c   : > { %2586 = vmatpush1.bf16.msra.mxu0 %v3635_v61  ;;  %3065 = vmatprep.subr.bf16.mxu1 %v3640_v62 }
 0x13d   : > { %2587 = vmatprep.subr.bf16.mxu0 %v3640_v62 }
 0x13f   : > { %3081 = vmatpush1.bf16.msra.mxu1 %v3638_v63 }
 0x140   : > { %2588 = vmatpush1.bf16.msra.mxu0 %v3638_v63  ;;  %3066 = vmatprep.subr.bf16.mxu1 %v3643_v0 }
 0x141   : > { %2589 = vmatprep.subr.bf16.mxu0 %v3643_v0 }
 0x143   : > { %3082 = vmatpush1.bf16.msra.mxu1 %v3641_v1 }
 0x144   : > { %2590 = vmatpush1.bf16.msra.mxu0 %v3641_v1 }
 0x146   : > { %2602 = vmatmul.mubr.bf16.vlgmr.msra.gmra.mrb[8].mxu1 %v3647_v3 }
 0x147   : > { %2592 = vmatmul.mubr.bf16.vlgmr.msra.gmra.mrb[0].mxu0 %v3644_v2 }
 0x1d9   : > { %v2328_v6 = vpop.f32.mrb[0].mxu1 }
 0x1da   : > { %v2330_v7 = vpop.f32.mrb[1].mxu1  ;;  %v3083_v31 = vadd.f32 %v2328_v6, %v508_v13 }
 0x1db   : > { %v2332_v8 = vpop.f32.mrb[2].mxu1  ;;  %v3085_v32 = vadd.f32 %v2330_v7, %v512_v14 }
 0x1dc   : > { %v2334_v10 = vpop.f32.mrb[3].mxu1  ;;  %v3087_v35 = vadd.f32 %v2332_v8, %v508_v13 }
 0x1dd   : > { %v3089_v40 = vadd.f32 %v2334_v10, %v512_v14 }
 0x1e1   : > { %v2338_v15 = vpop.f32.mrb[4].mxu1 }
 0x1e2   : > { %v2550_v16 = vpop.f32.mrb[4].mxu0  ;;  %v3091_v17 = vadd.f32 %v2338_v15, %v508_v13  ;;  %v2340_v18 = vpop.f32.mrb[5].mxu1 }
 0x1e3   : > { %v2552_v19 = vpop.f32.mrb[5].mxu0  ;;  %v3094_v20 = vadd.f32 %v2340_v18, %v512_v14  ;;  %v2342_v21 = vpop.f32.mrb[6].mxu1 }
 0x1e4   : > { %v2554_v22 = vpop.f32.mrb[6].mxu0  ;;  %v3092_v23 = vadd.f32 %v3091_v17, %v2550_v16  ;;  %v3097_v24 = vadd.f32 %v2342_v21, %v508_v13  ;;  %v2344_v25 = vpop.f32.mrb[7].mxu1 }
 0x1e5   : > { %v2556_v26 = vpop.f32.mrb[7].mxu0  ;;  %v3095_v27 = vadd.f32 %v3094_v20, %v2552_v19  ;;  %v3100_v28 = vadd.f32 %v2344_v25, %v512_v14 }
 0x1e6   : > { %v3098_v29 = vadd.f32 %v3097_v24, %v2554_v22 }
 0x1e7   : > { %v3101_v30 = vadd.f32 %v3100_v28, %v2556_v26 }
 0x219   : > { %v2603_v34 = vpop.f32.mrb[8].mxu1 }
 0x21a   : > { %v2593_v33 = vpop.f32.mrb[0].mxu0  ;;  %v3093_v37 = vadd.f32 %v3092_v23, %v2603_v34  ;;  %v2605_v39 = vpop.f32.mrb[9].mxu1 }
 0x21b   : > { %v3084_v36 = vadd.f32 %v3083_v31, %v2593_v33  ;;  %v2595_v38 = vpop.f32.mrb[1].mxu0  ;;  %v3096_v42 = vadd.f32 %v3095_v27, %v2605_v39  ;;  %v2607_v44 = vpop.f32.mrb[10].mxu1 }
 0x21c   : > { %v3086_v41 = vadd.f32 %v3085_v32, %v2595_v38  ;;  %v2597_v43 = vpop.f32.mrb[2].mxu0  ;;  %v2616_v46 = vmax.f32 %v3093_v37, 0.0  ;;  %v3099_v48 = vadd.f32 %v3098_v29, %v2607_v44  ;;  %v2609_v50 = vpop.f32.mrb[11].mxu1 }
 0x21d   : > { %v2612_v45 = vmax.f32 %v3084_v36, 0.0  ;;  %v3088_v47 = vadd.f32 %v3087_v35, %v2597_v43  ;;  %v2599_v49 = vpop.f32.mrb[3].mxu0  ;;  %v2617_v52 = vmax.f32 %v3096_v42, 0.0  ;;  %v3102_v54 = vadd.f32 %v3101_v30, %v2609_v50 }
 0x21e   : > { %v2613_v51 = vmax.f32 %v3086_v41, 0.0  ;;  %v3090_v53 = vadd.f32 %v3089_v40, %v2599_v49  ;;  %v2618_v56 = vmax.f32 %v3099_v48, 0.0 }
 0x21f   : > { %v2614_v55 = vmax.f32 %v3088_v47, 0.0  ;;  %v3049_v58 = vpack.c.bf16 %v2617_v52, %v2616_v46  ;;  %v2619_v60 = vmax.f32 %v3102_v54, 0.0 }
 0x220   : > { %v3047_v57 = vpack.c.bf16 %v2613_v51, %v2612_v45  ;;  %v2615_v59 = vmax.f32 %v3090_v53, 0.0 }
 0x221   : > { %v3050_v62 = vpack.c.bf16 %v2619_v60, %v2618_v56  ;;  %2646 = vst [vmem:[%s177_s18 + $0x10] sm:$0xff] %v3049_v58 }
 0x222   : > { %2644 = vst [vmem:[%s177_s18] sm:$0xff] %v3047_v57  ;;  %v3048_v61 = vpack.c.bf16 %v2615_v59, %v2614_v55 }
 0x223   : > { %2647 = vst [vmem:[%s177_s18 + $0x18] sm:$0xff] %v3050_v62 }
 0x224   : > { %2645 = vst [vmem:[%s177_s18 + $0x8] sm:$0xff] %v3048_v61 }
 0x225 PF: > { %s13_s12 = sadd.s32 1, %s3656_s12  }
 0x226   : > { %p10_p4 = scmp.ge.s32.totalorder %s13_s12, 4  }
 0x228   :  { %12 = sbr.rel (!%p10_p4) target bundleno = 1 (0x1), region = 62 }

// kernel: perceptual_loss.21
= control target key start
LH: loop header
LB: loop body
LE: loop exit
PB: predicated region body
PF: predicated region fallthrough
CT: control target
= control target key end

     0   :  { %s449_s12 = smov 0   ;;  %s518_s0 = inlined_call_operand.vmem [shape: bf16[4,9,384], index: 0, kind: input, shape index: {}, may-alias: {0,1}]   ;;  %s519_s1 = inlined_call_operand.vmem [shape: bf16[4,9,384], index: 1, kind: input, shape index: {}, may-alias: {0,1}]   ;;  %s520_s2 = inlined_call_operand.vmem [shape: f32[1,384], index: 2, kind: input, shape index: {}]   ;;  %s521_s3 = inlined_call_operand.vmem [shape: f32[2,8,128], index: 3, kind: output, shape index: {}]  }
   0x1 LB: > { %s455_s13 = sadd.s32 4294967295, %s427_s12   ;;  %p395_p0 = scmp.ge.s32.totalorder %s427_s12, 1  ;;  %s427_s12 = sphi %s449_s12, %s13_s12  }
   0x2   : > { %p151_p1 = scmp.lt.s32.totalorder %s427_s12, 3 }
   0x4   : > { %p152_p2 = pnand %p395_p0, %p151_p1 }
   0x5   : > { %p180_p3 = scmp.lt.s32.totalorder (!%p152_p2), %s455_s13, 3  ;;  %s185_s14 = sadd.s32 (!%p152_p2), 2, %s455_s13  ;;  %vm226_vm0 = vcmask (!%p152_p2), 1040384   ;;  %v285_v52 = vlaneseq (!%p152_p2)  ;;  %v283_v58 = vld [vmem:[%s520_s2] sm:$0x7] (!%p152_p2) }
   0x6   : > { %155 = sbr.rel (%p152_p2) target bundleno = 411 (0x19b), region = 32  ;;  %p186_p4 = scmp.lt.s32.totalorder (!%p152_p2), %s185_s14, 3 }
   0x7   : > { %v286_v55 = vshrl.u32 (!%p152_p2), %v285_v52, 7  ;;  %p192_p5 = scmp.lt.s32.totalorder (!%p152_p2), %s455_s13, 1 }
   0x9   : > { %v287_v56 = vsub.s32 (!%p152_p2), 0, %v286_v55  ;;  %v291_v63 = vsub.s32 (!%p152_p2), 1, %v286_v55 }
   0xb   : > { %v288_v62 = vrot.slane (!%p152_p2), %v283_v58, %v287_v56 }
   0xd   : > { %s181_s15 = scalar_select %p180_p3, %s455_s13, 3 }
   0xe   : > { %s523_s14 = smov (!%p186_p4, %s185_s14), 3  ;;  %s525_s13 = smov (!%p192_p5, %s455_s13), 1 }
   0xf   : > { %s401_s16 = smul.u32 24, %s181_s15  ;;  %s398_s26 = sshll.u32 %s525_s13, 3 }
  0x10   : > { %s402_s17 = smul.u32 24, %s523_s14  ;;  %s195_s29 = scalar_lea.vmem %s521_s3, %s398_s26 }
  0x11   : > { %s184_s20 = scalar_lea.vmem %s518_s0, %s401_s16 }
  0x12   : > { %v196_v0 = vld [vmem:[%s184_s20] sm:$0xff]  ;;  %v197_v1 = vld [vmem:[%s184_s20 + $0x8] sm:$0xf]  ;;  %v198_v2 = vld [vmem:[%s184_s20 + $0xc] sm:$0x11]  ;;  %s190_s23 = scalar_lea.vmem %s519_s1, %s402_s17 }
  0x13   : > { %v468_v3 = vunpack.c.l.bf16 %v196_v0  ;;  %v470_v4 = vunpack.c.h.bf16 %v196_v0  ;;  %v472_v5 = vunpack.c.l.bf16 %v197_v1  ;;  %v199_v6 = vld [vmem:[%s184_s20 + $0x14] sm:$0x1]  ;;  %v474_v7 = vunpack.c.l.bf16 %v198_v2  ;;  %v206_v8 = vld [vmem:[%s190_s23] sm:$0xff]  ;;  %v207_v9 = vld [vmem:[%s190_s23 + $0x8] sm:$0xf] }
  0x14   : > { %v476_v10 = vunpack.c.h.bf16 %v198_v2  ;;  %v478_v11 = vunpack.c.l.bf16 %v199_v6  ;;  %v210_v12 = vunpack.c.l.bf16 %v206_v8  ;;  %v211_v13 = vunpack.c.h.bf16 %v206_v8  ;;  %v208_v14 = vld [vmem:[%s190_s23 + $0xc] sm:$0x11]  ;;  %v209_v23 = vld [vmem:[%s190_s23 + $0x14] sm:$0x1] }
  0x15   : > { %v216_v15 = vmul.f32 %v468_v3, %v468_v3  ;;  %v217_v16 = vmul.f32 %v470_v4, %v470_v4  ;;  %v218_v17 = vmul.f32 %v472_v5, %v472_v5  ;;  %v219_v18 = vmul.f32 %v474_v7, %v474_v7 }
  0x16   : > { %v220_v19 = vmul.f32 %v476_v10, %v476_v10  ;;  %v221_v20 = vmul.f32 %v478_v11, %v478_v11  ;;  %v212_v21 = vunpack.c.l.bf16 %v207_v9  ;;  %v238_v22 = vmul.f32 %v210_v12, %v210_v12 }
  0x17   : > { %v222_v24 = vadd.f32 %v217_v16, %v216_v15  ;;  %v227_v25 = vsel %vm226_vm0, %v219_v18, 0.0  ;;  %v239_v26 = vmul.f32 %v211_v13, %v211_v13  ;;  %v213_v27 = vunpack.c.l.bf16 %v208_v14 }
  0x18   : > { %v228_v28 = vsel %vm226_vm0, %v220_v19, 0.0  ;;  %v230_v29 = vsel %vm226_vm0, %v221_v20, 0.0  ;;  %v240_v30 = vmul.f32 %v212_v21, %v212_v21  ;;  %v214_v31 = vunpack.c.h.bf16 %v208_v14 }
  0x19   : > { %v223_v32 = vadd.f32 %v222_v24, %v218_v17  ;;  %v229_v33 = vadd.f32 %v228_v28, %v227_v25  ;;  %v244_v34 = vadd.f32 %v239_v26, %v238_v22  ;;  %v215_v35 = vunpack.c.l.bf16 %v209_v23 }
  0x1a   : > { %v241_v36 = vmul.f32 %v213_v27, %v213_v27  ;;  %v242_v37 = vmul.f32 %v214_v31, %v214_v31  ;;  %v295_v0 = vsub.s32 2, %v286_v55  ;;  %v292_v24 = vrot.slane %v283_v58, %v291_v63 }
  0x1b   : > { %224 = vadd.xlane.f32.xlu0 %v223_v32  ;;  %v231_v38 = vadd.f32 %v230_v29, %v229_v33  ;;  %v245_v39 = vadd.f32 %v244_v34, %v240_v30  ;;  %v243_v40 = vmul.f32 %v215_v35, %v215_v35 }
  0x1c   : > { %v248_v41 = vsel %vm226_vm0, %v241_v36, 0.0  ;;  %v249_v42 = vsel %vm226_vm0, %v242_v37, 0.0 }
  0x1d   : > { %232 = vadd.xlane.f32.xlu1 %v231_v38  ;;  %v250_v43 = vadd.f32 %v249_v42, %v248_v41  ;;  %v251_v44 = vsel %vm226_vm0, %v243_v40, 0.0 }
  0x1f   : > { %246 = vadd.xlane.f32.xlu0 %v245_v39  ;;  %v252_v45 = vadd.f32 %v251_v44, %v250_v43 }
  0x21   : > { %253 = vadd.xlane.f32.xlu1 %v252_v45 }
  0xa8   : > { %v225_v46 = vpop.xlane.xlu0 %224 }
  0xa9   : > { %v234_v47 = vadd.f32 1e-20, %v225_v46 }
  0xaa   : > { %v233_v48 = vpop.xlane.xlu1 %232 }
  0xab   : > { %v235_v49 = vadd.f32 1e-20, %v233_v48  ;;  %413 = vrsqrt.f32 %v234_v47 }
  0xac   : > { %v247_v50 = vpop.xlane.xlu0 %246 }
  0xad   : > { %v255_v51 = vadd.f32 1e-20, %v247_v50  ;;  %415 = vrsqrt.f32 %v235_v49 }
  0xae   : > { %v254_v53 = vpop.xlane.xlu1 %253 }
  0xaf   : > { %417 = vrsqrt.f32 %v255_v51  ;;  %v256_v54 = vadd.f32 1e-20, %v254_v53 }
  0xb1   : > { %419 = vrsqrt.f32 %v256_v54 }
  0xb5   : > { %v414_v57 = vpop.eup %413 }
  0xb6   : > { %v259_v61 = vmul.f32 %v414_v57, %v468_v3  ;;  %v260_v1 = vmul.f32 %v414_v57, %v470_v4  ;;  %v261_v14 = vmul.f32 %v414_v57, %v472_v5  ;;  %v296_v5 = vrot.slane %v283_v58, %v295_v0 }
  0xb7   : > { %v416_v59 = vpop.eup %415 }
  0xb8   : > { %v262_v15 = vmul.f32 %v416_v59, %v474_v7  ;;  %v263_v16 = vmul.f32 %v416_v59, %v476_v10  ;;  %v264_v17 = vmul.f32 %v416_v59, %v478_v11 }
  0xb9   : > { %v418_v60 = vpop.eup %417 }
  0xba   : > { %v265_v2 = vmul.f32 %v418_v60, %v210_v12  ;;  %v266_v6 = vmul.f32 %v418_v60, %v211_v13  ;;  %v267_v8 = vmul.f32 %v418_v60, %v212_v21 }
  0xbb   : > { %v420_v9 = vpop.eup %419 }
  0xbc   : > { %v268_v18 = vmul.f32 %v420_v9, %v213_v27  ;;  %v269_v19 = vmul.f32 %v420_v9, %v214_v31  ;;  %v270_v3 = vmul.f32 %v420_v9, %v215_v35  ;;  %v271_v20 = vsub.f32 %v259_v61, %v265_v2 }
  0xbd   : > { %v272_v22 = vsub.f32 %v260_v1, %v266_v6  ;;  %v273_v23 = vsub.f32 %v261_v14, %v267_v8 }
  0xbe   : > { %v274_v4 = vsub.f32 %v262_v15, %v268_v18  ;;  %v275_v12 = vsub.f32 %v263_v16, %v269_v19  ;;  %v276_v13 = vsub.f32 %v264_v17, %v270_v3  ;;  %v277_v21 = vmul.f32 %v271_v20, %v271_v20 }
  0xbf   : > { %v278_v25 = vmul.f32 %v272_v22, %v272_v22  ;;  %v279_v26 = vmul.f32 %v273_v23, %v273_v23 }
  0xc0   : > { %v280_v28 = vmul.f32 %v274_v4, %v274_v4  ;;  %v281_v7 = vmul.f32 %v275_v12, %v275_v12  ;;  %v300_v29 = vmul.f32 %v288_v62, %v277_v21  ;;  %v282_v30 = vmul.f32 %v276_v13, %v276_v13 }
  0xc1   : > { %v301_v10 = vmul.f32 %v292_v24, %v278_v25  ;;  %v302_v27 = vmul.f32 %v296_v5, %v279_v26 }
  0xc2   : > { %v303_v11 = vmul.f32 %v288_v62, %v280_v28  ;;  %v304_v32 = vmul.f32 %v292_v24, %v281_v7  ;;  %v305_v34 = vmul.f32 %v296_v5, %v282_v30 }
  0xc3   : > { %v306_v31 = vadd.f32 %v301_v10, %v300_v29 }
  0xc4   : > { %v308_v35 = vsel %vm226_vm0, %v303_v11, 0.0  ;;  %v310_v37 = vsel %vm226_vm0, %v304_v32, 0.0  ;;  %v312_v39 = vsel %vm226_vm0, %v305_v34, 0.0 }
  0xc5   : > { %v307_v33 = vadd.f32 %v306_v31, %v302_v27 }
  0xc7   : > { %v309_v36 = vadd.f32 %v308_v35, %v307_v33 }
  0xc9   : > { %v311_v38 = vadd.f32 %v310_v37, %v309_v36 }
  0xcb   : > { %v313_v40 = vadd.f32 %v312_v39, %v311_v38 }
  0xcd   : > { %314 = vadd.xlane.f32.xlu0 %v313_v40 }
 0x15a   : > { %v315_v41 = vpop.xlane.xlu0 %314 }
 0x15b   : > { %v316_v42 = vrot.slane %v315_v41, 4 }
 0x15d   : > { %v317_v43 = vadd.f32 %v316_v42, %v315_v41 }
 0x15f   : > { %v318_v44 = vrot.slane %v317_v43, 2 }
 0x161   : > { %v319_v45 = vadd.f32 %v318_v44, %v317_v43 }
 0x163   : > { %v320_v46 = vrot.slane %v319_v45, 1 }
 0x165   : > { %v321_v47 = vadd.f32 %v320_v46, %v319_v45 }
 0x167   : > { %403 = vpush %v321_v47 }
 0x198   : > { %s404_s30 = spop %403 }
 0x199   : > { %v323_v48 = vstv %s404_s30 }
 0x19a   : > { %325 = vst [vmem:[%s195_s29] sm:$0xff] %v323_v48 }
 0x19b PF: > { %s13_s12 = sadd.s32 1, %s427_s12  }
 0x19c   : > { %p10_p6 = scmp.ge.s32.totalorder %s13_s12, 4  }
 0x19e   :  { %12 = sbr.rel (!%p10_p6) target bundleno = 1 (0x1), region = 65 }

// kernel: perceptual_loss.20
= control target key start
LH: loop header
LB: loop body
LE: loop exit
PB: predicated region body
PF: predicated region fallthrough
CT: control target
= control target key end

     0   :  { %s613_s12 = smov 0   ;;  %s843_s0 = inlined_call_operand.vmem [shape: bf16[4,49,192], index: 0, kind: input, shape index: {}, may-alias: {0,1}]   ;;  %s844_s1 = inlined_call_operand.vmem [shape: bf16[4,49,192], index: 1, kind: input, shape index: {}, may-alias: {0,1}]   ;;  %s845_s2 = inlined_call_operand.vmem [shape: f32[1,192], index: 2, kind: input, shape index: {}]   ;;  %s846_s3 = inlined_call_operand.vmem [shape: f32[2,8,128], index: 3, kind: output, shape index: {}]  }
   0x1 LB: > { %s619_s13 = sadd.s32 4294967295, %s591_s12   ;;  %p539_p0 = scmp.ge.s32.totalorder %s591_s12, 1  ;;  %s591_s12 = sphi %s613_s12, %s13_s12  }
   0x2   : > { %p151_p1 = scmp.lt.s32.totalorder %s591_s12, 3 }
   0x4   : > { %p152_p2 = pnand %p539_p0, %p151_p1 }
   0x5   : > { %p180_p3 = scmp.lt.s32.totalorder (!%p152_p2), %s619_s13, 3  ;;  %s185_s14 = sadd.s32 (!%p152_p2), 2, %s619_s13  ;;  %vm252_vm0 = vcmask (!%p152_p2), 523264   ;;  %vm277_vm1 = vcmask (!%p152_p2), 1040384   ;;  %vm279_vm2 = vcmask (!%p152_p2), 516096  }
   0x6   : > { %155 = sbr.rel (%p152_p2) target bundleno = 428 (0x1ac), region = 32  ;;  %p186_p4 = scmp.lt.s32.totalorder (!%p152_p2), %s185_s14, 3 }
   0x7   : > { %p192_p5 = scmp.lt.s32.totalorder (!%p152_p2), %s619_s13, 1 }
   0xd   : > { %s181_s15 = scalar_select %p180_p3, %s619_s13, 3 }
   0xe   : > { %s848_s14 = smov (!%p186_p4, %s185_s14), 3  ;;  %s850_s13 = smov (!%p192_p5, %s619_s13), 1 }
   0xf   : > { %s545_s16 = smul.u32 56, %s181_s15  ;;  %s542_s26 = sshll.u32 %s850_s13, 3 }
  0x10   : > { %s546_s17 = smul.u32 56, %s848_s14  ;;  %s195_s29 = scalar_lea.vmem %s846_s3, %s542_s26 }
  0x11   : > { %s629_s20 = scalar_lea.vmem %s843_s0, %s545_s16 }
  0x12   : > { %v197_v0 = vld [vmem:[%s629_s20 + $0x8] sm:$0xff]  ;;  %v196_v1 = vld [vmem:[%s629_s20] sm:$0xff]  ;;  %s636_s23 = scalar_lea.vmem %s844_s1, %s546_s17  ;;  %v198_v25 = vld [vmem:[%s629_s20 + $0x10] sm:$0xff] }
  0x13   : > { %v638_v2 = vunpack.c.l.bf16 %v197_v0  ;;  %v640_v3 = vunpack.c.h.bf16 %v197_v0  ;;  %v642_v4 = vunpack.c.l.bf16 %v196_v1  ;;  %v644_v5 = vunpack.c.h.bf16 %v196_v1  ;;  %v218_v6 = vld [vmem:[%s636_s23 + $0x8] sm:$0xff]  ;;  %v217_v7 = vld [vmem:[%s636_s23] sm:$0xff]  ;;  %v219_v12 = vld [vmem:[%s636_s23 + $0x10] sm:$0xff] }
  0x14   : > { %v648_v8 = vunpack.c.l.bf16 %v218_v6  ;;  %v650_v9 = vunpack.c.h.bf16 %v218_v6  ;;  %v652_v10 = vunpack.c.l.bf16 %v217_v7  ;;  %v654_v11 = vunpack.c.h.bf16 %v217_v7  ;;  %v220_v26 = vld [vmem:[%s636_s23 + $0x18] sm:$0xff]  ;;  %v221_v36 = vld [vmem:[%s636_s23 + $0x20] sm:$0xff]  ;;  %v222_v57 = vld [vmem:[%s636_s23 + $0x28] sm:$0xff] }
  0x15   : > { %v240_v13 = vmul.f32 %v638_v2, %v638_v2  ;;  %v241_v14 = vmul.f32 %v640_v3, %v640_v3  ;;  %v238_v15 = vmul.f32 %v642_v4, %v642_v4  ;;  %v239_v16 = vmul.f32 %v644_v5, %v644_v5  ;;  %v199_v31 = vld [vmem:[%s629_s20 + $0x18] sm:$0xff]  ;;  %v200_v44 = vld [vmem:[%s629_s20 + $0x20] sm:$0xff]  ;;  %v201_v62 = vld [vmem:[%s629_s20 + $0x28] sm:$0xff] }
  0x16   : > { %v300_v17 = vmul.f32 %v648_v8, %v648_v8  ;;  %v301_v18 = vmul.f32 %v650_v9, %v650_v9  ;;  %v298_v19 = vmul.f32 %v652_v10, %v652_v10  ;;  %v299_v20 = vmul.f32 %v654_v11, %v654_v11  ;;  %v223_v63 = vld [vmem:[%s636_s23 + $0x30] sm:$0x11] }
  0x17   : > { %v257_v21 = vsel %vm252_vm0, %v241_v14, 0.0  ;;  %v253_v22 = vsel %vm252_vm0, %v239_v16, 0.0  ;;  %v675_v23 = vunpack.c.l.bf16 %v219_v12  ;;  %v677_v24 = vunpack.c.h.bf16 %v219_v12  ;;  %v202_v16 = vld [vmem:[%s629_s20 + $0x30] sm:$0x11] }
  0x18   : > { %v258_v27 = vadd.f32 %v257_v21, %v240_v13  ;;  %v254_v28 = vadd.f32 %v253_v22, %v238_v15  ;;  %v316_v29 = vsel %vm252_vm0, %v301_v18, 0.0  ;;  %v312_v30 = vsel %vm252_vm0, %v299_v20, 0.0 }
  0x19   : > { %v317_v32 = vadd.f32 %v316_v29, %v300_v17  ;;  %v313_v33 = vadd.f32 %v312_v30, %v298_v19  ;;  %v302_v34 = vmul.f32 %v675_v23, %v675_v23  ;;  %v303_v35 = vmul.f32 %v677_v24, %v677_v24 }
  0x1a   : > { %259 = vadd.xlane.f32.xlu1 %v258_v27  ;;  %255 = vadd.xlane.f32.xlu0 %v254_v28  ;;  %v689_v37 = vunpack.c.l.bf16 %v198_v25  ;;  %v691_v38 = vunpack.c.h.bf16 %v198_v25  ;;  %v693_v39 = vunpack.c.l.bf16 %v220_v26  ;;  %v695_v40 = vunpack.c.h.bf16 %v220_v26 }
  0x1b   : > { %v320_v41 = vsel %vm252_vm0, %v303_v35, 0.0  ;;  %v698_v42 = vunpack.c.l.bf16 %v199_v31  ;;  %v700_v43 = vunpack.c.h.bf16 %v199_v31  ;;  %v709_v48 = vunpack.c.l.bf16 %v221_v36 }
  0x1c   : > { %v242_v45 = vmul.f32 %v689_v37, %v689_v37  ;;  %v243_v46 = vmul.f32 %v691_v38, %v691_v38  ;;  %v304_v47 = vmul.f32 %v693_v39, %v693_v39  ;;  %v305_v49 = vmul.f32 %v695_v40, %v695_v40 }
  0x1d   : > { %v244_v50 = vmul.f32 %v698_v42, %v698_v42  ;;  %v245_v51 = vmul.f32 %v700_v43, %v700_v43  ;;  %v717_v52 = vunpack.c.h.bf16 %v221_v36  ;;  %v321_v53 = vadd.f32 %v320_v41, %v302_v34 }
  0x1e   : > { %318 = vadd.xlane.f32.xlu1 %v317_v32  ;;  %314 = vadd.xlane.f32.xlu0 %v313_v33  ;;  %v261_v54 = vsel %vm252_vm0, %v243_v46, 0.0  ;;  %v720_v55 = vunpack.c.l.bf16 %v200_v44  ;;  %v722_v56 = vunpack.c.h.bf16 %v200_v44  ;;  %v324_v59 = vsel %vm252_vm0, %v305_v49, 0.0 }
  0x1f   : > { %v262_v58 = vadd.f32 %v261_v54, %v242_v45  ;;  %v265_v60 = vsel %vm252_vm0, %v245_v51, 0.0  ;;  %v307_v61 = vmul.f32 %v717_v52, %v717_v52  ;;  %v325_v0 = vadd.f32 %v324_v59, %v304_v47 }
  0x20   : > { %v266_v1 = vadd.f32 %v265_v60, %v244_v50  ;;  %v306_v6 = vmul.f32 %v709_v48, %v709_v48  ;;  %v247_v7 = vmul.f32 %v722_v56, %v722_v56  ;;  %v246_v13 = vmul.f32 %v720_v55, %v720_v55 }
  0x21   : > { %v328_v12 = vsel %vm252_vm0, %v307_v61, 0.0  ;;  %v738_v14 = vunpack.c.l.bf16 %v222_v57  ;;  %v740_v15 = vunpack.c.h.bf16 %v222_v57  ;;  %v744_v18 = vunpack.c.l.bf16 %v201_v62 }
  0x22   : > { %322 = vadd.xlane.f32.xlu1 %v321_v53  ;;  %263 = vadd.xlane.f32.xlu0 %v262_v58  ;;  %v269_v17 = vsel %vm252_vm0, %v247_v7, 0.0  ;;  %v746_v19 = vunpack.c.h.bf16 %v201_v62  ;;  %v748_v20 = vunpack.c.l.bf16 %v223_v63  ;;  %v754_v25 = vunpack.c.h.bf16 %v223_v63 }
  0x23   : > { %v309_v21 = vmul.f32 %v740_v15, %v740_v15  ;;  %v756_v26 = vunpack.c.l.bf16 %v202_v16  ;;  %v329_v27 = vadd.f32 %v328_v12, %v306_v6  ;;  %v270_v28 = vadd.f32 %v269_v17, %v246_v13 }
  0x24   : > { %v249_v22 = vmul.f32 %v746_v19, %v746_v19  ;;  %v758_v29 = vunpack.c.h.bf16 %v202_v16  ;;  %v308_v30 = vmul.f32 %v738_v14, %v738_v14  ;;  %v248_v32 = vmul.f32 %v744_v18, %v744_v18 }
  0x25   : > { %v332_v31 = vsel %vm252_vm0, %v309_v21, 0.0  ;;  %v310_v33 = vmul.f32 %v748_v20, %v748_v20  ;;  %v311_v35 = vmul.f32 %v754_v25, %v754_v25  ;;  %v250_v36 = vmul.f32 %v756_v26, %v756_v26 }
  0x26   : > { %326 = vadd.xlane.f32.xlu1 %v325_v0  ;;  %267 = vadd.xlane.f32.xlu0 %v266_v1  ;;  %v273_v34 = vsel %vm252_vm0, %v249_v22, 0.0  ;;  %v251_v41 = vmul.f32 %v758_v29, %v758_v29  ;;  %v333_v44 = vadd.f32 %v332_v31, %v308_v30  ;;  %v413_v62 = vlaneseq  ;;  %v411_v30 = vld [vmem:[%s845_s2] sm:$0x3] }
  0x27   : > { %v274_v45 = vadd.f32 %v273_v34, %v248_v32  ;;  %v336_v46 = vsel %vm277_vm1, %v310_v33, 0.0  ;;  %v337_v47 = vsel %vm279_vm2, %v311_v35, 0.0  ;;  %v278_v49 = vsel %vm277_vm1, %v250_v36, 0.0 }
  0x28   : > { %v280_v50 = vsel %vm279_vm2, %v251_v41, 0.0  ;;  %v338_v51 = vadd.f32 %v337_v47, %v336_v46  ;;  %v414_v7 = vshrl.u32 %v413_v62, 7 }
  0x29   : > { %v281_v53 = vadd.f32 %v280_v50, %v278_v49 }
  0x2a   : > { %330 = vadd.xlane.f32.xlu1 %v329_v27  ;;  %271 = vadd.xlane.f32.xlu0 %v270_v28  ;;  %v415_v21 = vsub.s32 0, %v414_v7  ;;  %v419_v32 = vsub.s32 1, %v414_v7 }
  0x2c   : > { %v782_v41 = vrot.slane %v411_v30, %v415_v21 }
  0x2e   : > { %334 = vadd.xlane.f32.xlu1 %v333_v44  ;;  %275 = vadd.xlane.f32.xlu0 %v274_v45 }
  0x32   : > { %339 = vadd.xlane.f32.xlu1 %v338_v51  ;;  %282 = vadd.xlane.f32.xlu0 %v281_v53 }
  0xa7   : > { %v260_v54 = vpop.xlane.xlu1 %259  ;;  %v256_v57 = vpop.xlane.xlu0 %255 }
  0xa8   : > { %v285_v58 = vadd.f32 1e-20, %v260_v54  ;;  %v284_v59 = vadd.f32 1e-20, %v256_v57 }
  0xaa   : > { %557 = vrsqrt.f32 %v285_v58 }
  0xab   : > { %v319_v60 = vpop.xlane.xlu1 %318  ;;  %v315_v61 = vpop.xlane.xlu0 %314  ;;  %559 = vrsqrt.f32 %v284_v59 }
  0xac   : > { %v342_v63 = vadd.f32 1e-20, %v319_v60  ;;  %v341_v0 = vadd.f32 1e-20, %v315_v61 }
  0xae   : > { %561 = vrsqrt.f32 %v342_v63 }
  0xaf   : > { %563 = vrsqrt.f32 %v341_v0  ;;  %v323_v1 = vpop.xlane.xlu1 %322  ;;  %v264_v6 = vpop.xlane.xlu0 %263 }
  0xb0   : > { %v343_v12 = vadd.f32 1e-20, %v323_v1  ;;  %v286_v13 = vadd.f32 1e-20, %v264_v6 }
  0xb2   : > { %565 = vrsqrt.f32 %v343_v12 }
  0xb3   : > { %567 = vrsqrt.f32 %v286_v13  ;;  %v327_v16 = vpop.xlane.xlu1 %326  ;;  %v268_v17 = vpop.xlane.xlu0 %267 }
  0xb4   : > { %v344_v22 = vadd.f32 1e-20, %v327_v16  ;;  %v287_v27 = vadd.f32 1e-20, %v268_v17  ;;  %v558_v28 = vpop.eup %557 }
  0xb5   : > { %v560_v31 = vpop.eup %559  ;;  %v357_v36 = vmul.f32 %v558_v28, %v638_v2  ;;  %v358_v47 = vmul.f32 %v558_v28, %v640_v3  ;;  %v791_v2 = vrot.slane %v411_v30, %v419_v32 }
  0xb6   : > { %569 = vrsqrt.f32 %v344_v22  ;;  %v355_v49 = vmul.f32 %v560_v31, %v642_v4  ;;  %v356_v53 = vmul.f32 %v560_v31, %v644_v5 }
  0xb7   : > { %571 = vrsqrt.f32 %v287_v27  ;;  %v331_v33 = vpop.xlane.xlu1 %330  ;;  %v272_v34 = vpop.xlane.xlu0 %271 }
  0xb8   : > { %v562_v35 = vpop.eup %561  ;;  %v345_v44 = vadd.f32 1e-20, %v331_v33  ;;  %v288_v45 = vadd.f32 1e-20, %v272_v34 }
  0xb9   : > { %v564_v46 = vpop.eup %563  ;;  %v371_v50 = vmul.f32 %v562_v35, %v648_v8  ;;  %v372_v51 = vmul.f32 %v562_v35, %v650_v9 }
  0xba   : > { %v369_v54 = vmul.f32 %v564_v46, %v652_v10  ;;  %v370_v57 = vmul.f32 %v564_v46, %v654_v11  ;;  %573 = vrsqrt.f32 %v345_v44 }
  0xbb   : > { %v385_v58 = vsub.f32 %v357_v36, %v371_v50  ;;  %v386_v59 = vsub.f32 %v358_v47, %v372_v51  ;;  %575 = vrsqrt.f32 %v288_v45  ;;  %v335_v60 = vpop.xlane.xlu1 %334  ;;  %v276_v3 = vpop.xlane.xlu0 %275 }
  0xbc   : > { %v566_v61 = vpop.eup %565  ;;  %v383_v4 = vsub.f32 %v355_v49, %v369_v54  ;;  %v384_v62 = vsub.f32 %v356_v53, %v370_v57  ;;  %v346_v8 = vadd.f32 1e-20, %v335_v60  ;;  %v289_v63 = vadd.f32 1e-20, %v276_v3 }
  0xbd   : > { %v568_v9 = vpop.eup %567  ;;  %v399_v0 = vmul.f32 %v385_v58, %v385_v58  ;;  %v400_v5 = vmul.f32 %v386_v59, %v386_v59  ;;  %v373_v10 = vmul.f32 %v566_v61, %v675_v23  ;;  %v374_v11 = vmul.f32 %v566_v61, %v677_v24 }
  0xbe   : > { %v397_v1 = vmul.f32 %v383_v4, %v383_v4  ;;  %v398_v6 = vmul.f32 %v384_v62, %v384_v62  ;;  %v359_v7 = vmul.f32 %v568_v9, %v689_v37  ;;  %v360_v12 = vmul.f32 %v568_v9, %v691_v38 }
  0xbf   : > { %v426_v13 = vmul.f32 %v791_v2, %v400_v5  ;;  %577 = vrsqrt.f32 %v346_v8  ;;  %v340_v28 = vpop.xlane.xlu1 %339  ;;  %v283_v23 = vpop.xlane.xlu0 %282  ;;  %v425_v24 = vmul.f32 %v782_v41, %v399_v0 }
  0xc0   : > { %v570_v16 = vpop.eup %569  ;;  %v423_v17 = vmul.f32 %v782_v41, %v397_v1  ;;  %v424_v21 = vmul.f32 %v791_v2, %v398_v6  ;;  %v387_v22 = vsub.f32 %v359_v7, %v373_v10  ;;  %v388_v27 = vsub.f32 %v360_v12, %v374_v11 }
  0xc1   : > { %v572_v30 = vpop.eup %571  ;;  %v375_v31 = vmul.f32 %v570_v16, %v693_v39  ;;  %v376_v37 = vmul.f32 %v570_v16, %v695_v40  ;;  %579 = vrsqrt.f32 %v289_v63  ;;  %v347_v44 = vadd.f32 1e-20, %v340_v28 }
  0xc2   : > { %v437_v38 = vsel %vm252_vm0, %v424_v21, 0.0  ;;  %v401_v32 = vmul.f32 %v387_v22, %v387_v22  ;;  %v402_v33 = vmul.f32 %v388_v27, %v388_v27  ;;  %v361_v34 = vmul.f32 %v572_v30, %v698_v42 }
  0xc3   : > { %v438_v35 = vadd.f32 %v437_v38, %v423_v17  ;;  %v362_v36 = vmul.f32 %v572_v30, %v700_v43  ;;  %v290_v45 = vadd.f32 1e-20, %v283_v23  ;;  %v440_v47 = vsel %vm252_vm0, %v426_v13, 0.0 }
  0xc4   : > { %v574_v46 = vpop.eup %573  ;;  %v427_v49 = vmul.f32 %v782_v41, %v401_v32  ;;  %v428_v39 = vmul.f32 %v791_v2, %v402_v33  ;;  %v389_v40 = vsub.f32 %v361_v34, %v375_v31  ;;  %581 = vrsqrt.f32 %v347_v44 }
  0xc5   : > { %v576_v50 = vpop.eup %575  ;;  %v439_v51 = vadd.f32 %v438_v35, %v425_v24  ;;  %v390_v53 = vsub.f32 %v362_v36, %v376_v37  ;;  %v377_v54 = vmul.f32 %v574_v46, %v709_v48  ;;  %v378_v42 = vmul.f32 %v574_v46, %v717_v52 }
  0xc6   : > { %v403_v57 = vmul.f32 %v389_v40, %v389_v40  ;;  %v363_v43 = vmul.f32 %v576_v50, %v720_v55  ;;  %v364_v58 = vmul.f32 %v576_v50, %v722_v56  ;;  %583 = vrsqrt.f32 %v290_v45 }
  0xc7   : > { %v441_v59 = vadd.f32 %v440_v47, %v439_v51  ;;  %v404_v60 = vmul.f32 %v390_v53, %v390_v53  ;;  %v443_v48 = vsel %vm252_vm0, %v428_v39, 0.0 }
  0xc8   : > { %v391_v3 = vsub.f32 %v363_v43, %v377_v54  ;;  %v392_v61 = vsub.f32 %v364_v58, %v378_v42  ;;  %v429_v8 = vmul.f32 %v782_v41, %v403_v57 }
  0xc9   : > { %v578_v4 = vpop.eup %577  ;;  %v442_v62 = vadd.f32 %v441_v59, %v427_v49  ;;  %v430_v63 = vmul.f32 %v791_v2, %v404_v60 }
  0xca   : > { %v405_v52 = vmul.f32 %v391_v3, %v391_v3  ;;  %v379_v9 = vmul.f32 %v578_v4, %v738_v14  ;;  %v380_v55 = vmul.f32 %v578_v4, %v740_v15  ;;  %v406_v56 = vmul.f32 %v392_v61, %v392_v61 }
  0xcb   : > { %v580_v0 = vpop.eup %579  ;;  %v444_v5 = vadd.f32 %v443_v48, %v442_v62  ;;  %v446_v16 = vsel %vm252_vm0, %v430_v63, 0.0 }
  0xcc   : > { %v365_v10 = vmul.f32 %v580_v0, %v744_v18  ;;  %v366_v11 = vmul.f32 %v580_v0, %v746_v19  ;;  %v431_v1 = vmul.f32 %v782_v41, %v405_v52  ;;  %v432_v6 = vmul.f32 %v791_v2, %v406_v56 }
  0xcd   : > { %v445_v7 = vadd.f32 %v444_v5, %v429_v8 }
  0xce   : > { %v393_v12 = vsub.f32 %v365_v10, %v379_v9  ;;  %v394_v13 = vsub.f32 %v366_v11, %v380_v55  ;;  %v582_v14 = vpop.eup %581  ;;  %v449_v19 = vsel %vm252_vm0, %v432_v6, 0.0 }
  0xcf   : > { %v447_v17 = vadd.f32 %v446_v16, %v445_v7  ;;  %v381_v27 = vmul.f32 %v582_v14, %v748_v20  ;;  %v382_v18 = vmul.f32 %v582_v14, %v754_v25 }
  0xd0   : > { %v407_v21 = vmul.f32 %v393_v12, %v393_v12  ;;  %v408_v15 = vmul.f32 %v394_v13, %v394_v13  ;;  %v584_v22 = vpop.eup %583 }
  0xd1   : > { %v448_v28 = vadd.f32 %v447_v17, %v431_v1  ;;  %v367_v23 = vmul.f32 %v584_v22, %v756_v26  ;;  %v368_v30 = vmul.f32 %v584_v22, %v758_v29 }
  0xd2   : > { %v433_v24 = vmul.f32 %v782_v41, %v407_v21  ;;  %v434_v31 = vmul.f32 %v791_v2, %v408_v15 }
  0xd3   : > { %v450_v37 = vadd.f32 %v449_v19, %v448_v28  ;;  %v395_v38 = vsub.f32 %v367_v23, %v381_v27  ;;  %v396_v32 = vsub.f32 %v368_v30, %v382_v18 }
  0xd4   : > { %v452_v20 = vsel %vm252_vm0, %v434_v31, 0.0 }
  0xd5   : > { %v451_v33 = vadd.f32 %v450_v37, %v433_v24  ;;  %v409_v34 = vmul.f32 %v395_v38, %v395_v38  ;;  %v410_v35 = vmul.f32 %v396_v32, %v396_v32 }
  0xd7   : > { %v453_v25 = vadd.f32 %v452_v20, %v451_v33  ;;  %v435_v36 = vmul.f32 %v782_v41, %v409_v34  ;;  %v436_v26 = vmul.f32 %v791_v2, %v410_v35 }
  0xd9   : > { %v454_v29 = vsel %vm277_vm1, %v435_v36, 0.0  ;;  %v456_v45 = vsel %vm279_vm2, %v436_v26, 0.0 }
  0xda   : > { %v455_v44 = vadd.f32 %v454_v29, %v453_v25 }
  0xdc   : > { %v457_v46 = vadd.f32 %v456_v45, %v455_v44 }
  0xde   : > { %458 = vadd.xlane.f32.xlu0 %v457_v46 }
 0x16b   : > { %v459_v47 = vpop.xlane.xlu0 %458 }
 0x16c   : > { %v460_v49 = vrot.slane %v459_v47, 4 }
 0x16e   : > { %v461_v39 = vadd.f32 %v460_v49, %v459_v47 }
 0x170   : > { %v462_v40 = vrot.slane %v461_v39, 2 }
 0x172   : > { %v463_v50 = vadd.f32 %v462_v40, %v461_v39 }
 0x174   : > { %v464_v51 = vrot.slane %v463_v50, 1 }
 0x176   : > { %v465_v53 = vadd.f32 %v464_v51, %v463_v50 }
 0x178   : > { %547 = vpush %v465_v53 }
 0x1a9   : > { %s548_s30 = spop %547 }
 0x1aa   : > { %v467_v41 = vstv %s548_s30 }
 0x1ab   : > { %469 = vst [vmem:[%s195_s29] sm:$0xff] %v467_v41 }
 0x1ac PF: > { %s13_s12 = sadd.s32 1, %s591_s12  }
 0x1ad   : > { %p10_p6 = scmp.ge.s32.totalorder %s13_s12, 4  }
 0x1af   :  { %12 = sbr.rel (!%p10_p6) target bundleno = 1 (0x1), region = 65 }

// kernel: perceptual_loss.19
= control target key start
LH: loop header
LB: loop body
LE: loop exit
PB: predicated region body
PF: predicated region fallthrough
CT: control target
= control target key end

     0   :  { %s1253_s12 = smov 0   ;;  %s1725_s0 = inlined_call_operand.vmem [shape: bf16[4,225,64], index: 0, kind: input, shape index: {}, may-alias: {0,1}]   ;;  %s1726_s1 = inlined_call_operand.vmem [shape: bf16[4,225,64], index: 1, kind: input, shape index: {}, may-alias: {0,1}]   ;;  %s1727_s2 = inlined_call_operand.vmem [shape: f32[1,64], index: 2, kind: input, shape index: {}]   ;;  %s1728_s3 = inlined_call_operand.vmem [shape: f32[2,8,128], index: 3, kind: output, shape index: {}]  }
   0x1 LB: > { %s1259_s13 = sadd.s32 4294967295, %s1231_s12   ;;  %p952_p0 = scmp.ge.s32.totalorder %s1231_s12, 1  ;;  %s1231_s12 = sphi %s1253_s12, %s13_s12  }
   0x2   : > { %p151_p1 = scmp.lt.s32.totalorder %s1231_s12, 3 }
   0x4   : > { %p152_p2 = pnand %p952_p0, %p151_p1 }
   0x6   : > { %155 = sbr.rel (%p152_p2) target bundleno = 511 (0x1ff), region = 32 }
   0xd   : > { %s185_s14 = sadd.s32 2, %s1259_s13  ;;  %p180_p3 = scmp.lt.s32.totalorder %s1259_s13, 3  ;;  %vm341_vm0 = vcmask 523264   ;;  %vm426_vm1 = vcmask 516096  }
   0xe   : > { %p186_p4 = scmp.lt.s32.totalorder %s185_s14, 3  ;;  %p192_p5 = scmp.lt.s32.totalorder %s1259_s13, 1 }
   0xf   : > { %s181_s15 = scalar_select %p180_p3, %s1259_s13, 3 }
  0x10   : > { %s1796_s14 = smov (!%p186_p4, %s185_s14), 3  ;;  %s1798_s13 = smov (!%p192_p5, %s1259_s13), 1 }
  0x11   : > { %s1097_s16 = smul.u32 116, %s181_s15  ;;  %s955_s26 = sshll.u32 %s1798_s13, 3 }
  0x12   : > { %s1098_s17 = smul.u32 116, %s1796_s14  ;;  %s195_s29 = scalar_lea.vmem %s1728_s3, %s955_s26 }
  0x13   : > { %s1269_s20 = scalar_lea.vmem %s1725_s0, %s1097_s16 }
  0x14   : > { %s1274_s23 = scalar_lea.vmem %s1726_s1, %s1098_s17  ;;  %v960_v0 = vld [vmem:[%s1269_s20] sm:$0xff]   ;;  %v1071_v1 = vld [vmem:[%s1269_s20 + $0x8] sm:$0xff]   ;;  %v1072_v22 = vld [vmem:[%s1269_s20 + $0x10] sm:$0xff]  }
  0x15   : > { %v1016_v2 = vld [vmem:[%s1274_s23] sm:$0xff]   ;;  %v1279_v3 = vunpack.c.l.bf16 %v960_v0  ;;  %v1281_v4 = vunpack.c.h.bf16 %v960_v0  ;;  %v1084_v5 = vld [vmem:[%s1274_s23 + $0x8] sm:$0xff]   ;;  %v1292_v10 = vunpack.c.l.bf16 %v1071_v1  ;;  %v1305_v18 = vunpack.c.h.bf16 %v1071_v1  ;;  %v1085_v23 = vld [vmem:[%s1274_s23 + $0x10] sm:$0xff]  }
  0x16   : > { %v1284_v6 = vunpack.c.l.bf16 %v1016_v2  ;;  %v1286_v7 = vunpack.c.h.bf16 %v1016_v2  ;;  %v1298_v13 = vunpack.c.l.bf16 %v1084_v5  ;;  %v1310_v21 = vunpack.c.h.bf16 %v1084_v5  ;;  %v1073_v36 = vld [vmem:[%s1269_s20 + $0x18] sm:$0xff]   ;;  %v1074_v50 = vld [vmem:[%s1269_s20 + $0x20] sm:$0xff]   ;;  %v1075_v0 = vld [vmem:[%s1269_s20 + $0x28] sm:$0xff]  }
  0x17   : > { %v312_v8 = vmul.f32 %v1279_v3, %v1279_v3  ;;  %v313_v9 = vmul.f32 %v1281_v4, %v1281_v4  ;;  %v314_v17 = vmul.f32 %v1292_v10, %v1292_v10  ;;  %v315_v25 = vmul.f32 %v1305_v18, %v1305_v18  ;;  %v1086_v37 = vld [vmem:[%s1274_s23 + $0x18] sm:$0xff]   ;;  %v1087_v51 = vld [vmem:[%s1274_s23 + $0x20] sm:$0xff]   ;;  %v1088_v1 = vld [vmem:[%s1274_s23 + $0x28] sm:$0xff]  }
  0x18   : > { %v488_v11 = vmul.f32 %v1284_v6, %v1284_v6  ;;  %v489_v12 = vmul.f32 %v1286_v7, %v1286_v7  ;;  %v490_v20 = vmul.f32 %v1298_v13, %v1298_v13  ;;  %v1317_v26 = vunpack.c.l.bf16 %v1072_v22 }
  0x19   : > { %v342_v14 = vsel %vm341_vm0, %v312_v8, 0.0  ;;  %v345_v16 = vsel %vm341_vm0, %v313_v9, 0.0  ;;  %v348_v24 = vsel %vm341_vm0, %v314_v17, 0.0  ;;  %v491_v28 = vmul.f32 %v1310_v21, %v1310_v21 }
  0x1a   : > { %v517_v15 = vsel %vm341_vm0, %v488_v11, 0.0  ;;  %343 = vadd.xlane.f32.xlu0 %v342_v14  ;;  %v520_v19 = vsel %vm341_vm0, %v489_v12, 0.0  ;;  %v523_v27 = vsel %vm341_vm0, %v490_v20, 0.0  ;;  %v1322_v29 = vunpack.c.l.bf16 %v1085_v23 }
  0x1b   : > { %518 = vadd.xlane.f32.xlu1 %v517_v15  ;;  %v351_v30 = vsel %vm341_vm0, %v315_v25, 0.0  ;;  %v316_v31 = vmul.f32 %v1317_v26, %v1317_v26  ;;  %v1327_v32 = vunpack.c.h.bf16 %v1072_v22  ;;  %v526_v33 = vsel %vm341_vm0, %v491_v28, 0.0  ;;  %v1076_v22 = vld [vmem:[%s1269_s20 + $0x30] sm:$0xff]  }
  0x1c   : > { %v492_v34 = vmul.f32 %v1322_v29, %v1322_v29  ;;  %v1332_v35 = vunpack.c.h.bf16 %v1085_v23  ;;  %v1339_v40 = vunpack.c.l.bf16 %v1073_v36  ;;  %v1344_v43 = vunpack.c.l.bf16 %v1086_v37  ;;  %v1089_v23 = vld [vmem:[%s1274_s23 + $0x30] sm:$0xff]  }
  0x1d   : > { %v354_v38 = vsel %vm341_vm0, %v316_v31, 0.0  ;;  %v317_v39 = vmul.f32 %v1327_v32, %v1327_v32  ;;  %v1349_v46 = vunpack.c.h.bf16 %v1073_v36  ;;  %v1354_v49 = vunpack.c.h.bf16 %v1086_v37 }
  0x1e   : > { %346 = vadd.xlane.f32.xlu0 %v345_v16  ;;  %v529_v41 = vsel %vm341_vm0, %v492_v34, 0.0  ;;  %v493_v42 = vmul.f32 %v1332_v35, %v1332_v35  ;;  %v318_v45 = vmul.f32 %v1339_v40, %v1339_v40  ;;  %v494_v48 = vmul.f32 %v1344_v43, %v1344_v43 }
  0x1f   : > { %521 = vadd.xlane.f32.xlu1 %v520_v19  ;;  %v357_v44 = vsel %vm341_vm0, %v317_v39, 0.0  ;;  %v319_v53 = vmul.f32 %v1349_v46, %v1349_v46  ;;  %v1361_v54 = vunpack.c.l.bf16 %v1074_v50  ;;  %v495_v56 = vmul.f32 %v1354_v49, %v1354_v49 }
  0x20   : > { %v532_v47 = vsel %vm341_vm0, %v493_v42, 0.0  ;;  %v360_v52 = vsel %vm341_vm0, %v318_v45, 0.0  ;;  %v535_v55 = vsel %vm341_vm0, %v494_v48, 0.0  ;;  %v1366_v57 = vunpack.c.l.bf16 %v1087_v51  ;;  %v1090_v42 = vld [vmem:[%s1274_s23 + $0x38] sm:$0xff]  }
  0x21   : > { %v363_v58 = vsel %vm341_vm0, %v319_v53, 0.0  ;;  %v320_v59 = vmul.f32 %v1361_v54, %v1361_v54  ;;  %v1371_v60 = vunpack.c.h.bf16 %v1074_v50  ;;  %v538_v61 = vsel %vm341_vm0, %v495_v56, 0.0 }
  0x22   : > { %349 = vadd.xlane.f32.xlu0 %v348_v24  ;;  %v496_v62 = vmul.f32 %v1366_v57, %v1366_v57  ;;  %v1376_v63 = vunpack.c.h.bf16 %v1087_v51  ;;  %v1383_v8 = vunpack.c.l.bf16 %v1075_v0  ;;  %v1388_v12 = vunpack.c.l.bf16 %v1088_v1 }
  0x23   : > { %524 = vadd.xlane.f32.xlu1 %v523_v27  ;;  %v366_v2 = vsel %vm341_vm0, %v320_v59, 0.0  ;;  %v321_v5 = vmul.f32 %v1371_v60, %v1371_v60  ;;  %v1393_v16 = vunpack.c.h.bf16 %v1075_v0  ;;  %v1398_v20 = vunpack.c.h.bf16 %v1088_v1 }
  0x24   : > { %v541_v9 = vsel %vm341_vm0, %v496_v62, 0.0  ;;  %v497_v11 = vmul.f32 %v1376_v63, %v1376_v63  ;;  %v322_v15 = vmul.f32 %v1383_v8, %v1383_v8  ;;  %v498_v19 = vmul.f32 %v1388_v12, %v1388_v12  ;;  %v1091_v62 = vld [vmem:[%s1274_s23 + $0x40] sm:$0xff]  }
  0x25   : > { %v369_v14 = vsel %vm341_vm0, %v321_v5, 0.0  ;;  %v323_v25 = vmul.f32 %v1393_v16, %v1393_v16  ;;  %v1405_v27 = vunpack.c.l.bf16 %v1076_v22  ;;  %v1410_v31 = vunpack.c.l.bf16 %v1089_v23 }
  0x26   : > { %352 = vadd.xlane.f32.xlu0 %v351_v30  ;;  %v544_v17 = vsel %vm341_vm0, %v497_v11, 0.0  ;;  %v372_v24 = vsel %vm341_vm0, %v322_v15, 0.0  ;;  %v547_v28 = vsel %vm341_vm0, %v498_v19, 0.0  ;;  %v499_v30 = vmul.f32 %v1398_v20, %v1398_v20 }
  0x27   : > { %527 = vadd.xlane.f32.xlu1 %v526_v33  ;;  %v375_v33 = vsel %vm341_vm0, %v323_v25, 0.0  ;;  %v324_v34 = vmul.f32 %v1405_v27, %v1405_v27  ;;  %v1415_v36 = vunpack.c.h.bf16 %v1076_v22  ;;  %v1420_v39 = vunpack.c.h.bf16 %v1089_v23  ;;  %v1092_v25 = vld [vmem:[%s1274_s23 + $0x48] sm:$0xff]  }
  0x28   : > { %v550_v37 = vsel %vm341_vm0, %v499_v30, 0.0  ;;  %v1432_v51 = vunpack.c.l.bf16 %v1090_v42  ;;  %v1442_v59 = vunpack.c.h.bf16 %v1090_v42  ;;  %v1454_v11 = vunpack.c.l.bf16 %v1091_v62 }
  0x29   : > { %v325_v45 = vmul.f32 %v1415_v36, %v1415_v36  ;;  %v501_v50 = vmul.f32 %v1420_v39, %v1420_v39  ;;  %v1464_v23 = vunpack.c.h.bf16 %v1091_v62 }
  0x2a   : > { %355 = vadd.xlane.f32.xlu0 %v354_v38  ;;  %v500_v38 = vmul.f32 %v1410_v31, %v1410_v31  ;;  %v504_v22 = vmul.f32 %v1454_v11, %v1454_v11 }
  0x2b   : > { %530 = vadd.xlane.f32.xlu1 %v529_v41  ;;  %v1077_v41 = vld [vmem:[%s1269_s20 + $0x38] sm:$0xff]   ;;  %v556_v56 = vsel %vm341_vm0, %v501_v50, 0.0  ;;  %v1486_v50 = vunpack.c.h.bf16 %v1092_v25 }
  0x2c   : > { %v553_v48 = vsel %vm341_vm0, %v500_v38, 0.0  ;;  %v1476_v38 = vunpack.c.l.bf16 %v1092_v25  ;;  %v1094_v25 = vld [vmem:[%s1274_s23 + $0x58] sm:$0xff]  }
  0x2d   : > { %1754 = vst [vmem:[#allocation5_spill] sm:$0xff] %v1486_v50 }
  0x2e   : > { %358 = vadd.xlane.f32.xlu0 %v357_v44  ;;  %v378_v44 = vsel %vm341_vm0, %v324_v34, 0.0  ;;  %v565_v34 = vsel %vm341_vm0, %v504_v22, 0.0  ;;  %1752 = vst [vmem:[#allocation3_spill] sm:$0xff] %v1476_v38 }
  0x2f   : > { %533 = vadd.xlane.f32.xlu1 %v532_v47  ;;  %v1427_v47 = vunpack.c.l.bf16 %v1077_v41 }
  0x31   : > { %v326_v53 = vmul.f32 %v1427_v47, %v1427_v47 }
  0x32   : > { %361 = vadd.xlane.f32.xlu0 %v360_v52  ;;  %v381_v52 = vsel %vm341_vm0, %v325_v45, 0.0 }
  0x33   : > { %536 = vadd.xlane.f32.xlu1 %v535_v55  ;;  %v1437_v55 = vunpack.c.h.bf16 %v1077_v41  ;;  %v384_v0 = vsel %vm341_vm0, %v326_v53, 0.0  ;;  %v1093_v53 = vld [vmem:[%s1274_s23 + $0x50] sm:$0xff]  }
  0x34   : > { %v1508_v22 = vunpack.c.h.bf16 %v1093_v53 }
  0x35   : > { %v327_v1 = vmul.f32 %v1437_v55, %v1437_v55 }
  0x36   : > { %364 = vadd.xlane.f32.xlu0 %v363_v58  ;;  %v502_v58 = vmul.f32 %v1432_v51, %v1432_v51  ;;  %1758 = vst [vmem:[#allocation9_spill] sm:$0xff] %v1508_v22 }
  0x37   : > { %539 = vadd.xlane.f32.xlu1 %v538_v61  ;;  %v1078_v61 = vld [vmem:[%s1269_s20 + $0x40] sm:$0xff]  }
  0x38   : > { %v559_v5 = vsel %vm341_vm0, %v502_v58, 0.0 }
  0x3a   : > { %367 = vadd.xlane.f32.xlu0 %v366_v2  ;;  %v1449_v2 = vunpack.c.l.bf16 %v1078_v61 }
  0x3b   : > { %542 = vadd.xlane.f32.xlu1 %v541_v9  ;;  %v503_v9 = vmul.f32 %v1442_v59, %v1442_v59 }
  0x3c   : > { %v328_v15 = vmul.f32 %v1449_v2, %v1449_v2 }
  0x3d   : > { %v562_v19 = vsel %vm341_vm0, %v503_v9, 0.0 }
  0x3e   : > { %370 = vadd.xlane.f32.xlu0 %v369_v14  ;;  %v387_v14 = vsel %vm341_vm0, %v327_v1, 0.0  ;;  %v1498_v1 = vunpack.c.l.bf16 %v1093_v53 }
  0x3f   : > { %545 = vadd.xlane.f32.xlu1 %v544_v17  ;;  %v1459_v17 = vunpack.c.h.bf16 %v1078_v61 }
  0x40   : > { %1756 = vst [vmem:[#allocation7_spill] sm:$0xff] %v1498_v1 }
  0x41   : > { %v329_v30 = vmul.f32 %v1459_v17, %v1459_v17 }
  0x42   : > { %373 = vadd.xlane.f32.xlu0 %v372_v24  ;;  %v1079_v24 = vld [vmem:[%s1269_s20 + $0x48] sm:$0xff]  }
  0x43   : > { %548 = vadd.xlane.f32.xlu1 %v547_v28  ;;  %v390_v28 = vsel %vm341_vm0, %v328_v15, 0.0  ;;  %v393_v41 = vsel %vm341_vm0, %v329_v30, 0.0 }
  0x46   : > { %376 = vadd.xlane.f32.xlu0 %v375_v33  ;;  %v1471_v33 = vunpack.c.l.bf16 %v1079_v24 }
  0x47   : > { %551 = vadd.xlane.f32.xlu1 %v550_v37  ;;  %v505_v37 = vmul.f32 %v1464_v23, %v1464_v23 }
  0x48   : > { %1751 = vst [vmem:[#allocation2_spill] sm:$0xff] %v1471_v33  ;;  %v330_v42 = vmul.f32 %v1471_v33, %v1471_v33 }
  0x49   : > { %v568_v45 = vsel %vm341_vm0, %v505_v37, 0.0 }
  0x4a   : > { %379 = vadd.xlane.f32.xlu0 %v378_v44  ;;  %v1481_v44 = vunpack.c.h.bf16 %v1079_v24  ;;  %v1081_v24 = vld [vmem:[%s1269_s20 + $0x58] sm:$0xff]  }
  0x4b   : > { %554 = vadd.xlane.f32.xlu1 %v553_v48  ;;  %v506_v48 = vmul.f32 %v1476_v38, %v1476_v38 }
  0x4c   : > { %1753 = vst [vmem:[#allocation4_spill] sm:$0xff] %v1481_v44  ;;  %v331_v58 = vmul.f32 %v1481_v44, %v1481_v44 }
  0x4d   : > { %v571_v62 = vsel %vm341_vm0, %v506_v48, 0.0 }
  0x4e   : > { %382 = vadd.xlane.f32.xlu0 %v381_v52  ;;  %v1080_v52 = vld [vmem:[%s1269_s20 + $0x50] sm:$0xff]  }
  0x4f   : > { %557 = vadd.xlane.f32.xlu1 %v556_v56  ;;  %v396_v56 = vsel %vm341_vm0, %v330_v42, 0.0  ;;  %v1493_v61 = vunpack.c.l.bf16 %v1080_v52  ;;  %v1520_v42 = vunpack.c.l.bf16 %v1094_v25 }
  0x51   : > { %1755 = vst [vmem:[#allocation6_spill] sm:$0xff] %v1493_v61  ;;  %v332_v9 = vmul.f32 %v1493_v61, %v1493_v61  ;;  %1760 = vst [vmem:[#allocation11_spill] sm:$0xff] %v1520_v42 }
  0x52   : > { %385 = vadd.xlane.f32.xlu0 %v384_v0  ;;  %v507_v0 = vmul.f32 %v1486_v50, %v1486_v50 }
  0x53   : > { %560 = vadd.xlane.f32.xlu1 %v559_v5  ;;  %v399_v5 = vsel %vm341_vm0, %v331_v58, 0.0  ;;  %v1530_v58 = vunpack.c.h.bf16 %v1094_v25 }
  0x54   : > { %v574_v15 = vsel %vm341_vm0, %v507_v0, 0.0  ;;  %v1095_v0 = vld [vmem:[%s1274_s23 + $0x60] sm:$0xff]  }
  0x55   : > { %1762 = vst [vmem:[#allocation13_spill] sm:$0xff] %v1530_v58  ;;  %v1542_v25 = vunpack.c.l.bf16 %v1095_v0 }
  0x56   : > { %388 = vadd.xlane.f32.xlu0 %v387_v14  ;;  %v1503_v14 = vunpack.c.h.bf16 %v1080_v52  ;;  %v1525_v52 = vunpack.c.h.bf16 %v1081_v24 }
  0x57   : > { %563 = vadd.xlane.f32.xlu1 %v562_v19  ;;  %v508_v19 = vmul.f32 %v1498_v1, %v1498_v1  ;;  %1764 = vst [vmem:[#allocation15_spill] sm:$0xff] %v1542_v25 }
  0x58   : > { %1757 = vst [vmem:[#allocation8_spill] sm:$0xff] %v1503_v14  ;;  %v333_v30 = vmul.f32 %v1503_v14, %v1503_v14  ;;  %1761 = vst [vmem:[#allocation12_spill] sm:$0xff] %v1525_v52 }
  0x59   : > { %v577_v37 = vsel %vm341_vm0, %v508_v19, 0.0 }
  0x5a   : > { %391 = vadd.xlane.f32.xlu0 %v390_v28  ;;  %v402_v28 = vsel %vm341_vm0, %v332_v9, 0.0  ;;  %v335_v9 = vmul.f32 %v1525_v52, %v1525_v52 }
  0x5b   : > { %566 = vadd.xlane.f32.xlu1 %v565_v34  ;;  %v1515_v34 = vunpack.c.l.bf16 %v1081_v24  ;;  %v511_v24 = vmul.f32 %v1530_v58, %v1530_v58 }
  0x5d   : > { %1759 = vst [vmem:[#allocation10_spill] sm:$0xff] %v1515_v34  ;;  %v334_v48 = vmul.f32 %v1515_v34, %v1515_v34 }
  0x5e   : > { %394 = vadd.xlane.f32.xlu0 %v393_v41  ;;  %v509_v41 = vmul.f32 %v1508_v22, %v1508_v22 }
  0x5f   : > { %569 = vadd.xlane.f32.xlu1 %v568_v45  ;;  %v405_v45 = vsel %vm341_vm0, %v333_v30, 0.0 }
  0x60   : > { %v580_v53 = vsel %vm341_vm0, %v509_v41, 0.0  ;;  %v586_v41 = vsel %vm341_vm0, %v511_v24, 0.0 }
  0x62   : > { %397 = vadd.xlane.f32.xlu0 %v396_v56  ;;  %v510_v56 = vmul.f32 %v1520_v42, %v1520_v42 }
  0x63   : > { %572 = vadd.xlane.f32.xlu1 %v571_v62  ;;  %v1082_v62 = vld [vmem:[%s1269_s20 + $0x60] sm:$0xff]  }
  0x64   : > { %v583_v19 = vsel %vm341_vm0, %v510_v56, 0.0  ;;  %v1096_v56 = vld [vmem:[%s1274_s23 + $0x68] sm:$0xff]  }
  0x66   : > { %400 = vadd.xlane.f32.xlu0 %v399_v5  ;;  %v408_v5 = vsel %vm341_vm0, %v334_v48, 0.0  ;;  %v1552_v48 = vunpack.c.h.bf16 %v1095_v0  ;;  %v1564_v0 = vunpack.c.l.bf16 %v1096_v56 }
  0x67   : > { %575 = vadd.xlane.f32.xlu1 %v574_v15  ;;  %v1537_v15 = vunpack.c.l.bf16 %v1082_v62 }
  0x68   : > { %1766 = vst [vmem:[#allocation17_spill] sm:$0xff] %v1552_v48  ;;  %v513_v24 = vmul.f32 %v1552_v48, %v1552_v48  ;;  %1768 = vst [vmem:[#allocation19_spill] sm:$0xff] %v1564_v0  ;;  %v282_v48 = vld [vmem:[%s1274_s23 + $0x70] sm:$0x1] }
  0x69   : > { %1763 = vst [vmem:[#allocation14_spill] sm:$0xff] %v1537_v15  ;;  %v336_v30 = vmul.f32 %v1537_v15, %v1537_v15  ;;  %v224_v15 = vld [vmem:[%s1269_s20 + $0x70] sm:$0x1] }
  0x6a   : > { %403 = vadd.xlane.f32.xlu0 %v402_v28  ;;  %v411_v28 = vsel %vm341_vm0, %v335_v9, 0.0 }
  0x6b   : > { %578 = vadd.xlane.f32.xlu1 %v577_v37  ;;  %v1547_v37 = vunpack.c.h.bf16 %v1082_v62 }
  0x6d   : > { %1765 = vst [vmem:[#allocation16_spill] sm:$0xff] %v1547_v37  ;;  %v337_v9 = vmul.f32 %v1547_v37, %v1547_v37  ;;  %v592_v37 = vsel %vm341_vm0, %v513_v24, 0.0 }
  0x6e   : > { %406 = vadd.xlane.f32.xlu0 %v405_v45  ;;  %v512_v45 = vmul.f32 %v1542_v25, %v1542_v25  ;;  %v514_v25 = vmul.f32 %v1564_v0, %v1564_v0 }
  0x6f   : > { %581 = vadd.xlane.f32.xlu1 %v580_v53  ;;  %v1083_v53 = vld [vmem:[%s1269_s20 + $0x68] sm:$0xff]  }
  0x70   : > { %v1559_v62 = vunpack.c.l.bf16 %v1083_v53 }
  0x72   : > { %409 = vadd.xlane.f32.xlu0 %v408_v5  ;;  %v414_v5 = vsel %vm341_vm0, %v336_v30, 0.0  ;;  %1767 = vst [vmem:[#allocation18_spill] sm:$0xff] %v1559_v62  ;;  %v1569_v30 = vunpack.c.h.bf16 %v1083_v53  ;;  %v595_v53 = vsel %vm341_vm0, %v514_v25, 0.0 }
  0x73   : > { %584 = vadd.xlane.f32.xlu1 %v583_v19  ;;  %v589_v19 = vsel %vm341_vm0, %v512_v45, 0.0  ;;  %v1574_v45 = vunpack.c.h.bf16 %v1096_v56 }
  0x74   : > { %1769 = vst [vmem:[#allocation20_spill] sm:$0xff] %v1569_v30 }
  0x75   : > { %1770 = vst [vmem:[#allocation21_spill] sm:$0xff] %v1574_v45  ;;  %v515_v24 = vmul.f32 %v1574_v45, %v1574_v45 }
  0x76   : > { %412 = vadd.xlane.f32.xlu0 %v411_v28  ;;  %v417_v28 = vsel %vm341_vm0, %v337_v9, 0.0  ;;  %v339_v9 = vmul.f32 %v1569_v30, %v1569_v30 }
  0x77   : > { %587 = vadd.xlane.f32.xlu1 %v586_v41  ;;  %v338_v41 = vmul.f32 %v1559_v62, %v1559_v62  ;;  %v1586_v62 = vunpack.c.l.bf16 %v282_v48 }
  0x78   : > { %v423_v56 = vsel %vm341_vm0, %v339_v9, 0.0 }
  0x79   : > { %1772 = vst [vmem:[#allocation23_spill] sm:$0xff] %v1586_v62 }
  0x7a   : > { %415 = vadd.xlane.f32.xlu0 %v414_v5  ;;  %v420_v5 = vsel %vm341_vm0, %v338_v41, 0.0 }
  0x7b   : > { %590 = vadd.xlane.f32.xlu1 %v589_v19  ;;  %v1581_v19 = vunpack.c.l.bf16 %v224_v15  ;;  %v516_v15 = vmul.f32 %v1586_v62, %v1586_v62 }
  0x7d   : > { %1771 = vst [vmem:[#allocation22_spill] sm:$0xff] %v1581_v19  ;;  %v601_v48 = vsel %vm426_vm1, %v516_v15, 0.0 }
  0x7e   : > { %418 = vadd.xlane.f32.xlu0 %v417_v28  ;;  %v598_v28 = vsel %vm341_vm0, %v515_v24, 0.0 }
  0x7f   : > { %593 = vadd.xlane.f32.xlu1 %v592_v37  ;;  %v340_v37 = vmul.f32 %v1581_v19, %v1581_v19 }
  0x81   : > { %v427_v25 = vsel %vm426_vm1, %v340_v37, 0.0 }
  0x82   : > { %421 = vadd.xlane.f32.xlu0 %v420_v5 }
  0x83   : > { %596 = vadd.xlane.f32.xlu1 %v595_v53 }
  0x86   : > { %424 = vadd.xlane.f32.xlu0 %v423_v56 }
  0x87   : > { %599 = vadd.xlane.f32.xlu1 %v598_v28 }
  0x8a   : > { %428 = vadd.xlane.f32.xlu0 %v427_v25 }
  0x8b   : > { %602 = vadd.xlane.f32.xlu1 %v601_v48 }
  0xa7   : > { %v344_v41 = vpop.xlane.xlu0 %343 }
  0xa8   : > { %v519_v5 = vpop.xlane.xlu1 %518  ;;  %v430_v56 = vadd.f32 1e-20, %v344_v41 }
  0xa9   : > { %v604_v28 = vadd.f32 1e-20, %v519_v5 }
  0xaa   : > { %1109 = vrsqrt.f32 %v430_v56 }
  0xab   : > { %v347_v9 = vpop.xlane.xlu0 %346  ;;  %1111 = vrsqrt.f32 %v604_v28 }
  0xac   : > { %v522_v53 = vpop.xlane.xlu1 %521  ;;  %v431_v34 = vadd.f32 1e-20, %v347_v9 }
  0xad   : > { %v605_v42 = vadd.f32 1e-20, %v522_v53 }
  0xae   : > { %1113 = vrsqrt.f32 %v431_v34 }
  0xaf   : > { %v350_v45 = vpop.xlane.xlu0 %349  ;;  %1115 = vrsqrt.f32 %v605_v42 }
  0xb0   : > { %v525_v19 = vpop.xlane.xlu1 %524  ;;  %v432_v25 = vadd.f32 1e-20, %v350_v45 }
  0xb1   : > { %v606_v48 = vadd.f32 1e-20, %v525_v19 }
  0xb2   : > { %1117 = vrsqrt.f32 %v432_v25 }
  0xb3   : > { %v353_v30 = vpop.xlane.xlu0 %352  ;;  %1119 = vrsqrt.f32 %v606_v48 }
  0xb4   : > { %v528_v24 = vpop.xlane.xlu1 %527  ;;  %v433_v22 = vadd.f32 1e-20, %v353_v30  ;;  %v1110_v45 = vpop.eup %1109 }
  0xb5   : > { %v607_v1 = vadd.f32 1e-20, %v528_v24  ;;  %v1112_v56 = vpop.eup %1111 }
  0xb6   : > { %1121 = vrsqrt.f32 %v433_v22 }
  0xb7   : > { %v356_v0 = vpop.xlane.xlu0 %355  ;;  %1123 = vrsqrt.f32 %v607_v1 }
  0xb8   : > { %v531_v52 = vpop.xlane.xlu1 %530  ;;  %v434_v44 = vadd.f32 1e-20, %v356_v0  ;;  %v1114_v28 = vpop.eup %1113 }
  0xb9   : > { %v608_v50 = vadd.f32 1e-20, %v531_v52  ;;  %v1116_v24 = vpop.eup %1115  ;;  %v663_v48 = vmul.f32 %v1114_v28, %v1281_v4 }
  0xba   : > { %1125 = vrsqrt.f32 %v434_v44 }
  0xbb   : > { %v359_v58 = vpop.xlane.xlu0 %358  ;;  %1127 = vrsqrt.f32 %v608_v50  ;;  %v691_v50 = vmul.f32 %v1112_v56, %v1284_v6 }
  0xbc   : > { %v534_v62 = vpop.xlane.xlu1 %533  ;;  %v435_v9 = vadd.f32 1e-20, %v359_v58  ;;  %v1118_v0 = vpop.eup %1117 }
  0xbd   : > { %v609_v53 = vadd.f32 1e-20, %v534_v62  ;;  %v1120_v22 = vpop.eup %1119 }
  0xbe   : > { %1129 = vrsqrt.f32 %v435_v9  ;;  %v693_v9 = vmul.f32 %v1120_v22, %v1298_v13 }
  0xbf   : > { %v362_v37 = vpop.xlane.xlu0 %361  ;;  %1131 = vrsqrt.f32 %v609_v53  ;;  %v664_v53 = vmul.f32 %v1118_v0, %v1292_v10 }
  0xc0   : > { %v537_v15 = vpop.xlane.xlu1 %536  ;;  %v436_v19 = vadd.f32 1e-20, %v362_v37  ;;  %v1122_v62 = vpop.eup %1121  ;;  %v662_v37 = vmul.f32 %v1110_v45, %v1279_v3 }
  0xc1   : > { %v610_v42 = vadd.f32 1e-20, %v537_v15  ;;  %v1124_v25 = vpop.eup %1123  ;;  %v692_v15 = vmul.f32 %v1116_v24, %v1286_v7  ;;  %v722_v45 = vsub.f32 %v664_v53, %v693_v9  ;;  %v665_v7 = vmul.f32 %v1122_v62, %v1305_v18  ;;  %v1609_v18 = vld [vmem:[%s1727_s2] ss:$0 sm:$0xff] }
  0xc2   : > { %1133 = vrsqrt.f32 %v436_v19  ;;  %v720_v56 = vsub.f32 %v662_v37, %v691_v50  ;;  %v694_v13 = vmul.f32 %v1124_v25, %v1310_v21 }
  0xc3   : > { %v365_v14 = vpop.xlane.xlu0 %364  ;;  %1135 = vrsqrt.f32 %v610_v42  ;;  %v721_v3 = vsub.f32 %v663_v48, %v692_v15  ;;  %v751_v21 = vmul.f32 %v722_v45, %v722_v45 }
  0xc4   : > { %v540_v61 = vpop.xlane.xlu1 %539  ;;  %v437_v1 = vadd.f32 1e-20, %v365_v14  ;;  %v1126_v33 = vpop.eup %1125  ;;  %v723_v62 = vsub.f32 %v665_v7, %v694_v13 }
  0xc5   : > { %v611_v44 = vadd.f32 1e-20, %v540_v61  ;;  %v1128_v61 = vpop.eup %1127  ;;  %v666_v28 = vmul.f32 %v1126_v33, %v1317_v26  ;;  %v750_v50 = vmul.f32 %v721_v3, %v721_v3 }
  0xc6   : > { %1137 = vrsqrt.f32 %v437_v1  ;;  %v695_v10 = vmul.f32 %v1128_v61, %v1322_v29 }
  0xc7   : > { %v368_v41 = vpop.xlane.xlu0 %367  ;;  %1139 = vrsqrt.f32 %v611_v44  ;;  %v749_v44 = vmul.f32 %v720_v56, %v720_v56  ;;  %v786_v61 = vmul.f32 %v1609_v18, %v750_v50 }
  0xc8   : > { %v543_v5 = vpop.xlane.xlu1 %542  ;;  %v438_v14 = vadd.f32 1e-20, %v368_v41  ;;  %v1130_v6 = vpop.eup %1129  ;;  %v724_v29 = vsub.f32 %v666_v28, %v695_v10 }
  0xc9   : > { %v612_v38 = vadd.f32 1e-20, %v543_v5  ;;  %v1132_v4 = vpop.eup %1131  ;;  %v667_v26 = vmul.f32 %v1130_v6, %v1327_v32  ;;  %v785_v9 = vmul.f32 %v1609_v18, %v749_v44  ;;  %v787_v32 = vmul.f32 %v1609_v18, %v751_v21 }
  0xca   : > { %1141 = vrsqrt.f32 %v438_v14  ;;  %v696_v25 = vmul.f32 %v1132_v4, %v1332_v35  ;;  %v752_v6 = vmul.f32 %v723_v62, %v723_v62  ;;  %v753_v35 = vmul.f32 %v724_v29, %v724_v29 }
  0xcb   : > { %v371_v34 = vpop.xlane.xlu0 %370  ;;  %1143 = vrsqrt.f32 %v612_v38 }
  0xcc   : > { %v546_v30 = vpop.xlane.xlu1 %545  ;;  %v1134_v0 = vpop.eup %1133  ;;  %v439_v22 = vadd.f32 1e-20, %v371_v34  ;;  %v725_v3 = vsub.f32 %v667_v26, %v696_v25 }
  0xcd   : > { %v1136_v5 = vpop.eup %1135  ;;  %v613_v1 = vadd.f32 1e-20, %v546_v30  ;;  %v668_v34 = vmul.f32 %v1134_v0, %v1339_v40  ;;  %v815_v0 = vsel %vm341_vm0, %v786_v61, 0.0 }
  0xce   : > { %v697_v38 = vmul.f32 %v1136_v5, %v1344_v43  ;;  %1145 = vrsqrt.f32 %v439_v22  ;;  %v817_v22 = vsel %vm341_vm0, %v787_v32, 0.0  ;;  %v788_v5 = vmul.f32 %v1609_v18, %v752_v6 }
  0xcf   : > { %v374_v52 = vpop.xlane.xlu0 %373  ;;  %1147 = vrsqrt.f32 %v613_v1  ;;  %v754_v44 = vmul.f32 %v725_v3, %v725_v3 }
  0xd0   : > { %v549_v58 = vpop.xlane.xlu1 %548  ;;  %v1138_v30 = vpop.eup %1137  ;;  %v440_v15 = vadd.f32 1e-20, %v374_v52  ;;  %v726_v43 = vsub.f32 %v668_v34, %v697_v38 }
  0xd1   : > { %v1140_v48 = vpop.eup %1139  ;;  %v614_v53 = vadd.f32 1e-20, %v549_v58  ;;  %v669_v52 = vmul.f32 %v1138_v30, %v1349_v46  ;;  %v814_v58 = vsel %vm341_vm0, %v785_v9, 0.0  ;;  %v819_v30 = vsel %vm341_vm0, %v788_v5, 0.0 }
  0xd2   : > { %v698_v7 = vmul.f32 %v1140_v48, %v1354_v49  ;;  %1149 = vrsqrt.f32 %v440_v15  ;;  %v789_v49 = vmul.f32 %v1609_v18, %v753_v35  ;;  %v755_v46 = vmul.f32 %v726_v43, %v726_v43 }
  0xd3   : > { %v377_v19 = vpop.xlane.xlu0 %376  ;;  %1151 = vrsqrt.f32 %v614_v53  ;;  %v816_v62 = vadd.f32 %v815_v0, %v814_v58  ;;  %v790_v48 = vmul.f32 %v1609_v18, %v754_v44 }
  0xd4   : > { %v552_v42 = vpop.xlane.xlu1 %551  ;;  %v441_v45 = vadd.f32 1e-20, %v377_v19  ;;  %v1142_v40 = vpop.eup %1141  ;;  %v821_v15 = vsel %vm341_vm0, %v789_v49, 0.0 }
  0xd5   : > { %v615_v4 = vadd.f32 1e-20, %v552_v42  ;;  %v1144_v13 = vpop.eup %1143  ;;  %v727_v42 = vsub.f32 %v669_v52, %v698_v7  ;;  %v670_v21 = vmul.f32 %v1142_v40, %v1361_v54  ;;  %v818_v34 = vadd.f32 %v817_v22, %v816_v62 }
  0xd6   : > { %1153 = vrsqrt.f32 %v441_v45  ;;  %v699_v50 = vmul.f32 %v1144_v13, %v1366_v57  ;;  %v791_v57 = vmul.f32 %v1609_v18, %v755_v46  ;;  %v823_v40 = vsel %vm341_vm0, %v790_v48, 0.0 }
  0xd7   : > { %v380_v24 = vpop.xlane.xlu0 %379  ;;  %1155 = vrsqrt.f32 %v615_v4  ;;  %v756_v54 = vmul.f32 %v727_v42, %v727_v42  ;;  %v820_v35 = vadd.f32 %v819_v30, %v818_v34 }
  0xd8   : > { %v555_v41 = vpop.xlane.xlu1 %554  ;;  %v442_v10 = vadd.f32 1e-20, %v380_v24  ;;  %v1146_v24 = vpop.eup %1145  ;;  %v728_v9 = vsub.f32 %v670_v21, %v699_v50  ;;  %v825_v4 = vsel %vm341_vm0, %v791_v57, 0.0 }
  0xd9   : > { %v616_v19 = vadd.f32 1e-20, %v555_v41  ;;  %v1148_v25 = vpop.eup %1147  ;;  %v822_v52 = vadd.f32 %v821_v15, %v820_v35 }
  0xda   : > { %1157 = vrsqrt.f32 %v442_v10  ;;  %v700_v61 = vmul.f32 %v1148_v25, %v1376_v63  ;;  %v792_v63 = vmul.f32 %v1609_v18, %v756_v54 }
  0xdb   : > { %v383_v37 = vpop.xlane.xlu0 %382  ;;  %1159 = vrsqrt.f32 %v616_v19  ;;  %v824_v10 = vadd.f32 %v823_v40, %v822_v52 }
  0xdc   : > { %v558_v33 = vpop.xlane.xlu1 %557  ;;  %v443_v29 = vadd.f32 1e-20, %v383_v37  ;;  %v671_v37 = vmul.f32 %v1146_v24, %v1371_v60  ;;  %v1150_v6 = vpop.eup %1149  ;;  %v757_v60 = vmul.f32 %v728_v9, %v728_v9  ;;  %v827_v46 = vsel %vm341_vm0, %v792_v63, 0.0 }
  0xdd   : > { %v617_v41 = vadd.f32 1e-20, %v558_v33  ;;  %v1152_v45 = vpop.eup %1151  ;;  %v672_v0 = vmul.f32 %v1150_v6, %v1383_v8  ;;  %v826_v49 = vadd.f32 %v825_v4, %v824_v10 }
  0xde   : > { %1161 = vrsqrt.f32 %v443_v29  ;;  %v729_v13 = vsub.f32 %v671_v37, %v700_v61  ;;  %v793_v42 = vmul.f32 %v1609_v18, %v757_v60 }
  0xdf   : > { %v386_v14 = vpop.xlane.xlu0 %385  ;;  %1163 = vrsqrt.f32 %v617_v41  ;;  %v828_v15 = vadd.f32 %v827_v46, %v826_v49 }
  0xe0   : > { %v561_v56 = vpop.xlane.xlu1 %560  ;;  %v444_v53 = vadd.f32 1e-20, %v386_v14  ;;  %v1154_v14 = vpop.eup %1153  ;;  %v758_v50 = vmul.f32 %v729_v13, %v729_v13  ;;  %v829_v57 = vsel %vm341_vm0, %v793_v42, 0.0 }
  0xe1   : > { %v618_v32 = vadd.f32 1e-20, %v561_v56  ;;  %v1156_v58 = vpop.eup %1155  ;;  %v673_v8 = vmul.f32 %v1154_v14, %v1393_v16 }
  0xe2   : > { %1165 = vrsqrt.f32 %v444_v53  ;;  %v794_v54 = vmul.f32 %v1609_v18, %v758_v50 }
  0xe3   : > { %v389_v28 = vpop.xlane.xlu0 %388  ;;  %1167 = vrsqrt.f32 %v618_v32 }
  0xe4   : > { %v564_v1 = vpop.xlane.xlu1 %563  ;;  %v445_v3 = vadd.f32 1e-20, %v389_v28  ;;  %v701_v28 = vmul.f32 %v1152_v45, %v1388_v12  ;;  %v1158_v5 = vpop.eup %1157  ;;  %v702_v12 = vmul.f32 %v1156_v58, %v1398_v20  ;;  %v830_v45 = vadd.f32 %v829_v57, %v828_v15 }
  0xe5   : > { %v619_v7 = vadd.f32 1e-20, %v564_v1  ;;  %v1160_v1 = vpop.eup %1159  ;;  %v674_v34 = vmul.f32 %v1158_v5, %v1405_v27  ;;  %v831_v40 = vsel %vm341_vm0, %v794_v54, 0.0 }
  0xe6   : > { %1169 = vrsqrt.f32 %v445_v3  ;;  %v730_v62 = vsub.f32 %v672_v0, %v701_v28  ;;  %v731_v61 = vsub.f32 %v673_v8, %v702_v12 }
  0xe7   : > { %v392_v26 = vpop.xlane.xlu0 %391  ;;  %1171 = vrsqrt.f32 %v619_v7 }
  0xe8   : > { %v567_v38 = vpop.xlane.xlu1 %566  ;;  %v446_v19 = vadd.f32 1e-20, %v392_v26  ;;  %v1162_v41 = vpop.eup %1161  ;;  %v703_v26 = vmul.f32 %v1160_v1, %v1410_v31  ;;  %v759_v53 = vmul.f32 %v730_v62, %v730_v62  ;;  %v760_v14 = vmul.f32 %v731_v61, %v731_v61  ;;  %v1774_v61 = vld [vmem:[#allocation2_spill] sm:$0xff] }
  0xe9   : > { %v620_v44 = vadd.f32 1e-20, %v567_v38  ;;  %v1164_v30 = vpop.eup %1163  ;;  %v675_v6 = vmul.f32 %v1162_v41, %v1415_v36 }
  0xea   : > { %1173 = vrsqrt.f32 %v446_v19  ;;  %v732_v32 = vsub.f32 %v674_v34, %v703_v26  ;;  %v795_v4 = vmul.f32 %v1609_v18, %v759_v53  ;;  %v832_v19 = vadd.f32 %v831_v40, %v830_v45 }
  0xeb   : > { %v395_v33 = vpop.xlane.xlu0 %394  ;;  %1175 = vrsqrt.f32 %v620_v44  ;;  %v796_v1 = vmul.f32 %v1609_v18, %v760_v14 }
  0xec   : > { %v570_v43 = vpop.xlane.xlu1 %569  ;;  %v447_v21 = vadd.f32 1e-20, %v395_v33  ;;  %v1166_v9 = vpop.eup %1165  ;;  %v704_v33 = vmul.f32 %v1164_v30, %v1420_v39  ;;  %v761_v39 = vmul.f32 %v732_v32, %v732_v32 }
  0xed   : > { %v621_v29 = vadd.f32 1e-20, %v570_v43  ;;  %v1168_v27 = vpop.eup %1167  ;;  %v676_v36 = vmul.f32 %v1166_v9, %v1427_v47  ;;  %v833_v47 = vsel %vm341_vm0, %v795_v4, 0.0  ;;  %v835_v41 = vsel %vm341_vm0, %v796_v1, 0.0  ;;  %v1773_v9 = vld [vmem:[#allocation3_spill] sm:$0xff] }
  0xee   : > { %1177 = vrsqrt.f32 %v447_v21  ;;  %v733_v13 = vsub.f32 %v675_v6, %v704_v33  ;;  %v705_v58 = vmul.f32 %v1168_v27, %v1432_v51  ;;  %v797_v51 = vmul.f32 %v1609_v18, %v761_v39 }
  0xef   : > { %v398_v56 = vpop.xlane.xlu0 %397  ;;  %1179 = vrsqrt.f32 %v621_v29 }
  0xf0   : > { %v573_v22 = vpop.xlane.xlu1 %572  ;;  %v448_v38 = vadd.f32 1e-20, %v398_v56  ;;  %v1170_v35 = vpop.eup %1169  ;;  %v734_v50 = vsub.f32 %v676_v36, %v705_v58  ;;  %v837_v30 = vsel %vm341_vm0, %v797_v51, 0.0  ;;  %v1777_v58 = vld [vmem:[#allocation7_spill] sm:$0xff]  ;;  %v1779_v51 = vld [vmem:[#allocation9_spill] sm:$0xff] }
  0xf1   : > { %v622_v48 = vadd.f32 1e-20, %v573_v22  ;;  %v1172_v43 = vpop.eup %1171  ;;  %v677_v28 = vmul.f32 %v1170_v35, %v1437_v55  ;;  %v762_v55 = vmul.f32 %v733_v13, %v733_v13  ;;  %v1775_v35 = vld [vmem:[#allocation5_spill] sm:$0xff] }
  0xf2   : > { %1181 = vrsqrt.f32 %v448_v38  ;;  %v706_v10 = vmul.f32 %v1172_v43, %v1442_v59  ;;  %v1776_v43 = vld [vmem:[#allocation4_spill] sm:$0xff] }
  0xf3   : > { %v401_v24 = vpop.xlane.xlu0 %400  ;;  %1183 = vrsqrt.f32 %v622_v48 }
  0xf4   : > { %v576_v25 = vpop.xlane.xlu1 %575  ;;  %v449_v20 = vadd.f32 1e-20, %v401_v24  ;;  %v1174_v0 = vpop.eup %1173  ;;  %v735_v21 = vsub.f32 %v677_v28, %v706_v10  ;;  %v1778_v28 = vld [vmem:[#allocation6_spill] sm:$0xff] }
  0xf5   : > { %v623_v31 = vadd.f32 1e-20, %v576_v25  ;;  %v1176_v5 = vpop.eup %1175  ;;  %v678_v12 = vmul.f32 %v1174_v0, %v1449_v2  ;;  %v834_v25 = vadd.f32 %v833_v47, %v832_v19  ;;  %v763_v2 = vmul.f32 %v734_v50, %v734_v50 }
  0xf6   : > { %1185 = vrsqrt.f32 %v449_v20  ;;  %v707_v62 = vmul.f32 %v1176_v5, %v1454_v11  ;;  %v798_v11 = vmul.f32 %v1609_v18, %v762_v55  ;;  %v764_v20 = vmul.f32 %v735_v21, %v735_v21 }
  0xf7   : > { %v404_v16 = vpop.xlane.xlu0 %403  ;;  %1187 = vrsqrt.f32 %v623_v31  ;;  %v836_v32 = vadd.f32 %v835_v41, %v834_v25  ;;  %v799_v14 = vmul.f32 %v1609_v18, %v763_v2  ;;  %v1782_v41 = vld [vmem:[#allocation10_spill] sm:$0xff]  ;;  %v1783_v2 = vld [vmem:[#allocation13_spill] sm:$0xff] }
  0xf8   : > { %v579_v37 = vpop.xlane.xlu1 %578  ;;  %v450_v3 = vadd.f32 1e-20, %v404_v16  ;;  %v1178_v46 = vpop.eup %1177  ;;  %v736_v16 = vsub.f32 %v678_v12, %v707_v62  ;;  %v839_v4 = vsel %vm341_vm0, %v798_v11, 0.0 }
  0xf9   : > { %v624_v7 = vadd.f32 1e-20, %v579_v37  ;;  %v1180_v42 = vpop.eup %1179  ;;  %v679_v48 = vmul.f32 %v1178_v46, %v1459_v17  ;;  %v841_v47 = vsel %vm341_vm0, %v799_v14, 0.0 }
  0xfa   : > { %1189 = vrsqrt.f32 %v450_v3  ;;  %v708_v15 = vmul.f32 %v1180_v42, %v1464_v23  ;;  %v765_v39 = vmul.f32 %v736_v16, %v736_v16  ;;  %v1780_v42 = vld [vmem:[#allocation8_spill] sm:$0xff] }
  0xfb   : > { %v407_v52 = vpop.xlane.xlu0 %406  ;;  %1191 = vrsqrt.f32 %v624_v7  ;;  %v1784_v16 = vld [vmem:[#allocation12_spill] sm:$0xff] }
  0xfc   : > { %v582_v63 = vpop.xlane.xlu1 %581  ;;  %v451_v60 = vadd.f32 1e-20, %v407_v52  ;;  %v1182_v24 = vpop.eup %1181  ;;  %v737_v17 = vsub.f32 %v679_v48, %v708_v15  ;;  %v838_v52 = vadd.f32 %v837_v30, %v836_v32  ;;  %v801_v21 = vmul.f32 %v1609_v18, %v765_v39 }
  0xfd   : > { %v625_v56 = vadd.f32 1e-20, %v582_v63  ;;  %v1184_v29 = vpop.eup %1183  ;;  %v680_v31 = vmul.f32 %v1182_v24, %v1774_v61 }
  0xfe   : > { %1193 = vrsqrt.f32 %v451_v60  ;;  %v709_v53 = vmul.f32 %v1184_v29, %v1773_v9  ;;  %v800_v60 = vmul.f32 %v1609_v18, %v764_v20  ;;  %v840_v1 = vadd.f32 %v839_v4, %v838_v52  ;;  %v1781_v29 = vld [vmem:[#allocation11_spill] sm:$0xff] }
  0xff   : > { %v410_v22 = vpop.xlane.xlu0 %409  ;;  %1195 = vrsqrt.f32 %v625_v56  ;;  %v1786_v4 = vld [vmem:[#allocation15_spill] sm:$0xff] }
 0x100   : > { %v585_v49 = vpop.xlane.xlu1 %584  ;;  %v452_v44 = vadd.f32 1e-20, %v410_v22  ;;  %v1186_v38 = vpop.eup %1185  ;;  %v738_v13 = vsub.f32 %v680_v31, %v709_v53  ;;  %v843_v50 = vsel %vm341_vm0, %v800_v60, 0.0  ;;  %v842_v15 = vadd.f32 %v841_v47, %v840_v1  ;;  %v1788_v47 = vld [vmem:[#allocation17_spill] sm:$0xff] }
 0x101   : > { %v626_v59 = vadd.f32 1e-20, %v585_v49  ;;  %v1188_v54 = vpop.eup %1187  ;;  %v681_v45 = vmul.f32 %v1186_v38, %v1776_v43  ;;  %v766_v49 = vmul.f32 %v737_v17, %v737_v17  ;;  %v1785_v43 = vld [vmem:[#allocation14_spill] sm:$0xff] }
 0x102   : > { %1197 = vrsqrt.f32 %v452_v44  ;;  %v710_v3 = vmul.f32 %v1188_v54, %v1775_v35  ;;  %v767_v24 = vmul.f32 %v738_v13, %v738_v13  ;;  %v844_v53 = vadd.f32 %v843_v50, %v842_v15 }
 0x103   : > { %1199 = vrsqrt.f32 %v626_v59  ;;  %v413_v8 = vpop.xlane.xlu0 %412  ;;  %v802_v48 = vmul.f32 %v1609_v18, %v766_v49 }
 0x104   : > { %v588_v26 = vpop.xlane.xlu1 %587  ;;  %v453_v34 = vadd.f32 1e-20, %v413_v8  ;;  %v1190_v27 = vpop.eup %1189  ;;  %v739_v44 = vsub.f32 %v681_v45, %v710_v3  ;;  %v803_v61 = vmul.f32 %v1609_v18, %v767_v24 }
 0x105   : > { %v627_v57 = vadd.f32 1e-20, %v588_v26  ;;  %v1192_v6 = vpop.eup %1191  ;;  %v682_v0 = vmul.f32 %v1190_v27, %v1778_v28  ;;  %v845_v27 = vsel %vm341_vm0, %v801_v21, 0.0  ;;  %v847_v35 = vsel %vm341_vm0, %v802_v48, 0.0 }
 0x106   : > { %1201 = vrsqrt.f32 %v453_v34  ;;  %v711_v10 = vmul.f32 %v1192_v6, %v1777_v58  ;;  %v849_v60 = vsel %vm341_vm0, %v803_v61, 0.0 }
 0x107   : > { %1203 = vrsqrt.f32 %v627_v57  ;;  %v416_v37 = vpop.xlane.xlu0 %415  ;;  %v768_v57 = vmul.f32 %v739_v44, %v739_v44 }
 0x108   : > { %v591_v33 = vpop.xlane.xlu1 %590  ;;  %v454_v23 = vadd.f32 1e-20, %v416_v37  ;;  %v1194_v7 = vpop.eup %1193  ;;  %v740_v8 = vsub.f32 %v682_v0, %v711_v10 }
 0x109   : > { %v628_v40 = vadd.f32 1e-20, %v591_v33  ;;  %v1196_v63 = vpop.eup %1195  ;;  %v683_v55 = vmul.f32 %v1194_v7, %v1780_v42  ;;  %v804_v3 = vmul.f32 %v1609_v18, %v768_v57 }
 0x10a   : > { %1205 = vrsqrt.f32 %v454_v23  ;;  %v712_v59 = vmul.f32 %v1196_v63, %v1779_v51  ;;  %v769_v32 = vmul.f32 %v740_v8, %v740_v8  ;;  %v846_v63 = vadd.f32 %v845_v27, %v844_v53 }
 0x10b   : > { %1207 = vrsqrt.f32 %v628_v40  ;;  %v419_v36 = vpop.xlane.xlu0 %418 }
 0x10c   : > { %v1198_v56 = vpop.eup %1197  ;;  %v594_v22 = vpop.xlane.xlu1 %593  ;;  %v455_v5 = vadd.f32 1e-20, %v419_v36  ;;  %v741_v11 = vsub.f32 %v683_v55, %v712_v59  ;;  %v805_v36 = vmul.f32 %v1609_v18, %v769_v32 }
 0x10d   : > { %v1200_v19 = vpop.eup %1199  ;;  %v629_v46 = vadd.f32 1e-20, %v594_v22  ;;  %v684_v26 = vmul.f32 %v1198_v56, %v1782_v41  ;;  %v848_v22 = vadd.f32 %v847_v35, %v846_v63  ;;  %v1793_v35 = vld [vmem:[#allocation22_spill] sm:$0xff] }
 0x10e   : > { %1209 = vrsqrt.f32 %v455_v5  ;;  %v713_v25 = vmul.f32 %v1200_v19, %v1781_v29  ;;  %v770_v7 = vmul.f32 %v741_v11, %v741_v11  ;;  %v851_v5 = vsel %vm341_vm0, %v804_v3, 0.0  ;;  %v1787_v19 = vld [vmem:[#allocation16_spill] sm:$0xff] }
 0x10f   : > { %1211 = vrsqrt.f32 %v629_v46  ;;  %v422_v62 = vpop.xlane.xlu0 %421  ;;  %v850_v59 = vadd.f32 %v849_v60, %v848_v22  ;;  %v853_v24 = vsel %vm341_vm0, %v805_v36, 0.0 }
 0x110   : > { %v1202_v12 = vpop.eup %1201  ;;  %v597_v34 = vpop.xlane.xlu1 %596  ;;  %v456_v38 = vadd.f32 1e-20, %v422_v62  ;;  %v742_v33 = vsub.f32 %v684_v26, %v713_v25  ;;  %v806_v44 = vmul.f32 %v1609_v18, %v770_v7  ;;  %v1790_v25 = vld [vmem:[#allocation19_spill] sm:$0xff] }
 0x111   : > { %v1204_v30 = vpop.eup %1203  ;;  %v630_v54 = vadd.f32 1e-20, %v597_v34  ;;  %v685_v9 = vmul.f32 %v1202_v12, %v1784_v16  ;;  %v1789_v12 = vld [vmem:[#allocation18_spill] sm:$0xff]  ;;  %v852_v29 = vadd.f32 %v851_v5, %v850_v59 }
 0x112   : > { %v714_v20 = vmul.f32 %v1204_v30, %v1783_v2  ;;  %1213 = vrsqrt.f32 %v456_v38  ;;  %v771_v56 = vmul.f32 %v742_v33, %v742_v33  ;;  %v855_v38 = vsel %vm341_vm0, %v806_v44, 0.0  ;;  %v1791_v2 = vld [vmem:[#allocation20_spill] sm:$0xff] }
 0x113   : > { %1215 = vrsqrt.f32 %v630_v54  ;;  %v425_v31 = vpop.xlane.xlu0 %424  ;;  %v854_v30 = vadd.f32 %v853_v24, %v852_v29 }
 0x114   : > { %v1206_v37 = vpop.eup %1205  ;;  %v600_v23 = vpop.xlane.xlu1 %599  ;;  %v457_v6 = vadd.f32 1e-20, %v425_v31  ;;  %v743_v52 = vsub.f32 %v685_v9, %v714_v20  ;;  %v807_v21 = vmul.f32 %v1609_v18, %v771_v56  ;;  %v1792_v9 = vld [vmem:[#allocation21_spill] sm:$0xff] }
 0x115   : > { %v1208_v17 = vpop.eup %1207  ;;  %v686_v45 = vmul.f32 %v1206_v37, %v1785_v43  ;;  %v631_v40 = vadd.f32 1e-20, %v600_v23  ;;  %v856_v16 = vadd.f32 %v855_v38, %v854_v30 }
 0x116   : > { %v715_v14 = vmul.f32 %v1208_v17, %v1786_v4  ;;  %1217 = vrsqrt.f32 %v457_v6  ;;  %v772_v46 = vmul.f32 %v743_v52, %v743_v52  ;;  %v857_v54 = vsel %vm341_vm0, %v807_v21, 0.0 }
 0x117   : > { %1219 = vrsqrt.f32 %v631_v40  ;;  %v429_v39 = vpop.xlane.xlu0 %428  ;;  %v858_v27 = vadd.f32 %v857_v54, %v856_v16 }
 0x118   : > { %v1210_v13 = vpop.eup %1209  ;;  %v744_v58 = vsub.f32 %v686_v45, %v715_v14  ;;  %v603_v10 = vpop.xlane.xlu1 %602  ;;  %v458_v28 = vadd.f32 1e-20, %v429_v39  ;;  %v808_v34 = vmul.f32 %v1609_v18, %v772_v46  ;;  %v1794_v45 = vld [vmem:[#allocation23_spill] sm:$0xff] }
 0x119   : > { %v1212_v0 = vpop.eup %1211  ;;  %v687_v1 = vmul.f32 %v1210_v13, %v1787_v19  ;;  %v632_v49 = vadd.f32 1e-20, %v603_v10 }
 0x11a   : > { %v716_v51 = vmul.f32 %v1212_v0, %v1788_v47  ;;  %1221 = vrsqrt.f32 %v458_v28  ;;  %v773_v50 = vmul.f32 %v744_v58, %v744_v58  ;;  %v859_v37 = vsel %vm341_vm0, %v808_v34, 0.0 }
 0x11b   : > { %1223 = vrsqrt.f32 %v632_v49  ;;  %v860_v43 = vadd.f32 %v859_v37, %v858_v27 }
 0x11c   : > { %v1214_v42 = vpop.eup %1213  ;;  %v745_v55 = vsub.f32 %v687_v1, %v716_v51  ;;  %v809_v57 = vmul.f32 %v1609_v18, %v773_v50 }
 0x11d   : > { %v1216_v62 = vpop.eup %1215  ;;  %v688_v8 = vmul.f32 %v1214_v42, %v1789_v12 }
 0x11e   : > { %v717_v41 = vmul.f32 %v1216_v62, %v1790_v25  ;;  %v774_v26 = vmul.f32 %v745_v55, %v745_v55  ;;  %v861_v6 = vsel %vm341_vm0, %v809_v57, 0.0 }
 0x11f   : > { %v862_v4 = vadd.f32 %v861_v6, %v860_v43 }
 0x120   : > { %v1218_v15 = vpop.eup %1217  ;;  %v746_v48 = vsub.f32 %v688_v8, %v717_v41  ;;  %v810_v31 = vmul.f32 %v1609_v18, %v774_v26 }
 0x121   : > { %v1220_v11 = vpop.eup %1219  ;;  %v689_v20 = vmul.f32 %v1218_v15, %v1791_v2 }
 0x122   : > { %v718_v53 = vmul.f32 %v1220_v11, %v1792_v9  ;;  %v775_v61 = vmul.f32 %v746_v48, %v746_v48  ;;  %v863_v52 = vsel %vm341_vm0, %v810_v31, 0.0 }
 0x123   : > { %v864_v39 = vadd.f32 %v863_v52, %v862_v4 }
 0x124   : > { %v1222_v32 = vpop.eup %1221  ;;  %v747_v33 = vsub.f32 %v689_v20, %v718_v53  ;;  %v811_v23 = vmul.f32 %v1609_v18, %v775_v61 }
 0x125   : > { %v1224_v17 = vpop.eup %1223  ;;  %v690_v3 = vmul.f32 %v1222_v32, %v1793_v35 }
 0x126   : > { %v719_v40 = vmul.f32 %v1224_v17, %v1794_v45  ;;  %v776_v7 = vmul.f32 %v747_v33, %v747_v33  ;;  %v865_v60 = vsel %vm341_vm0, %v811_v23, 0.0 }
 0x127   : > { %v866_v56 = vadd.f32 %v865_v60, %v864_v39 }
 0x128   : > { %v748_v14 = vsub.f32 %v690_v3, %v719_v40  ;;  %v812_v63 = vmul.f32 %v1609_v18, %v776_v7 }
 0x12a   : > { %v777_v13 = vmul.f32 %v748_v14, %v748_v14  ;;  %v867_v36 = vsel %vm341_vm0, %v812_v63, 0.0 }
 0x12b   : > { %v868_v10 = vadd.f32 %v867_v36, %v866_v56 }
 0x12c   : > { %v813_v58 = vmul.f32 %v1609_v18, %v777_v13 }
 0x12e   : > { %v869_v28 = vsel %vm426_vm1, %v813_v58, 0.0 }
 0x12f   : > { %v870_v0 = vadd.f32 %v869_v28, %v868_v10 }
 0x131   : > { %871 = vadd.xlane.f32.xlu0 %v870_v0 }
 0x1be   : > { %v872_v22 = vpop.xlane.xlu0 %871 }
 0x1bf   : > { %v873_v5 = vrot.slane %v872_v22, 4 }
 0x1c1   : > { %v874_v19 = vadd.f32 %v873_v5, %v872_v22 }
 0x1c3   : > { %v875_v1 = vrot.slane %v874_v19, 2 }
 0x1c5   : > { %v876_v49 = vadd.f32 %v875_v1, %v874_v19 }
 0x1c7   : > { %v877_v44 = vrot.slane %v876_v49, 1 }
 0x1c9   : > { %v878_v46 = vadd.f32 %v877_v44, %v876_v49 }
 0x1cb   : > { %1099 = vpush %v878_v46 }
 0x1fc   : > { %s1100_s30 = spop %1099 }
 0x1fd   : > { %v880_v18 = vstv %s1100_s30 }
 0x1fe   : > { %882 = vst [vmem:[%s195_s29] sm:$0xff] %v880_v18 }
 0x1ff PF: > { %s13_s12 = sadd.s32 1, %s1231_s12  }
 0x200   : > { %p10_p6 = scmp.ge.s32.totalorder %s13_s12, 4  }
 0x202   :  { %12 = sbr.rel (!%p10_p6) target bundleno = 1 (0x1), region = 65 }

</bundles_post_ra>
